<compile_context>
chip_gen: v7x
topology: tpu7x:2x2x1
jax: 0.10.0
libtpu: 0.0.40
codegen_flags: <defaults>
</compile_context>

<pallas_src>
import jax
import jax.numpy as jnp
from jax.experimental import pallas as pl
from jax.experimental.pallas import tpu as pltpu

EPS = 1e-5       # torch.nn.BatchNorm2d default eps
LANE = 128       # keep every channel dim a multiple of the lane width


# ---------------------------------------------------------------------------
# Small helpers
# ---------------------------------------------------------------------------
def _round_up(n, m):
    return ((n + m - 1) // m) * m


def _row_tile(m, target=2048):
    """Largest multiple-of-8 divisor of m that is <= target (rows per M tile)."""
    # TODO(synk): for awkward m (no multiple-of-8 divisor) this falls back to a
    #             single whole-array tile; padding M + masked stats would be the
    #             general fix.
    t = min(target, m)
    while t > 8 and (m % t != 0 or t % 8 != 0):
        t -= 8
    return t if (t > 0 and m % t == 0) else m


def _vmem_limit_bytes():
    """Per-generation VMEM budget (~3/4 of physical, capped)."""
    try:
        cap = getattr(pltpu.get_tpu_info(), "vmem_capacity_bytes", None)
    except Exception:
        cap = None
    if not cap:
        cap = 64 << 20            # conservative default (v7x-sized)
    return int(min(3 * cap // 4, 96 << 20))


def _compiler_params():
    return pltpu.CompilerParams(dimension_semantics=("parallel",),
                                vmem_limit_bytes=_vmem_limit_bytes())


def _tile_stats(z):
    """(sum, centered sum-of-squares) over rows of an f32 (rows, C) tile."""
    rows = z.shape[0]
    s = jnp.sum(z, axis=0, keepdims=True)
    mu = s * (1.0 / rows)
    d = z - mu
    ss = jnp.sum(d * d, axis=0, keepdims=True)
    return jnp.concatenate([s, ss], axis=0)          # (2, C)


# ---------------------------------------------------------------------------
# Kernels
# ---------------------------------------------------------------------------
def _conv1x1_stats_kernel(x_ref, w_ref, z_ref, st_ref):
    """z = x @ w (bf16 MXU, f32 accum); bf16 writeback; per-tile BN partials."""
    z = jnp.dot(x_ref[...], w_ref[...], preferred_element_type=jnp.float32)
    z_ref[...] = z.astype(z_ref.dtype)
    st_ref[0] = _tile_stats(z)


def _bn_relu_conv1x1_stats_kernel(zin_ref, s_ref, b_ref, w_ref, z_ref, st_ref):
    """y = relu(zin*scale + bias) (f32), z = y @ w (bf16 MXU), bf16 writeback."""
    y = jnp.maximum(zin_ref[...].astype(jnp.float32) * s_ref[...] + b_ref[...], 0.0)
    z = jnp.dot(y.astype(jnp.bfloat16), w_ref[...],
                preferred_element_type=jnp.float32)
    z_ref[...] = z.astype(z_ref.dtype)
    st_ref[0] = _tile_stats(z)


def _bn_relu_conv3x3_stats_kernel(zin_ref, s_ref, b_ref, w_ref, z_ref, st_ref,
                                  pad_ref, acc_ref):
    """Per-image 3x3 conv, stride=1, pad=1, on a flat padded bf16 activation.

    pad_ref is a flat (PADM, C) bf16 buffer holding the zero-padded activation
    with a row stride Wp (multiple of 8).  Each tap (kh, kw) is then just a
    contiguous row-slice of pad_ref starting at kh*Wp + kw, so no per-tap
    strided slice+reshape copies are needed.  The extra Wp-W "wide" output
    columns per image row are junk and dropped before stats / writeback.
    """
    _, H, W, C = zin_ref.shape
    HWp = acc_ref.shape[0]
    Wp = HWp // H                       # padded/aligned row width (multiple of 8)
    PADM = pad_ref.shape[0]

    # Re-zero only the halo: top padded row and bottom padded row(+overflow).
    # (Left/right zero columns are rewritten below as part of the full-row store,
    #  so every row that the taps read is written each grid step -> safe with
    #  "parallel" grid semantics.)
    pad_ref[0:Wp, :] = jnp.zeros((Wp, C), pad_ref.dtype)
    pad_ref[(H + 1) * Wp:PADM, :] = jnp.zeros((PADM - (H + 1) * Wp, C), pad_ref.dtype)

    # bn1 + relu prologue in f32, single cast to bf16, one aligned contiguous
    # store of full padded rows (zero columns included).
    y = jnp.maximum(zin_ref[0].astype(jnp.float32) * s_ref[...] + b_ref[...], 0.0)
    yb = y.astype(jnp.bfloat16)
    ypad = jnp.concatenate(
        [jnp.zeros((H, 1, C), yb.dtype), yb, jnp.zeros((H, Wp - 1 - W, C), yb.dtype)],
        axis=1)                                            # (H, Wp, C)
    pad_ref[Wp:Wp + H * Wp, :] = ypad.reshape(H * Wp, C)

    # 9-tap accumulation: shifted contiguous views of the flat padded buffer.
    # First tap assigns (no accumulator zeroing pass).
    first = True
    for kh in range(3):
        for kw in range(3):
            start = kh * Wp + kw
            patch = pad_ref[start:start + H * Wp, :]       # (H*Wp, C) bf16 view
            contrib = jnp.dot(patch, w_ref[kh * 3 + kw],
                              preferred_element_type=jnp.float32)
            if first:
                acc_ref[...] = contrib
                first = False
            else:
                acc_ref[...] += contrib

    # Drop the junk wide columns, take stats on valid pixels only, write bf16.
    z = acc_ref[...]
    zc = z.reshape(H, Wp, C)[:, :W, :].reshape(H * W, C)
    z_ref[0] = zc.astype(z_ref.dtype)
    st_ref[0] = _tile_stats(zc)


def _bn_res_relu_kernel(z_ref, s_ref, b_ref, r_ref, o_ref):
    """out = relu(z*scale + bias + residual)."""
    o_ref[...] = jnp.maximum(
        z_ref[...].astype(jnp.float32) * s_ref[...] + b_ref[...]
        + r_ref[...].astype(jnp.float32), 0.0)


# ---------------------------------------------------------------------------
# pallas_call wrappers
# ---------------------------------------------------------------------------
def _conv1x1_stats(x2d, w, tm):
    m, cin = x2d.shape
    cout = w.shape[1]
    nt = m // tm
    return pl.pallas_call(
        _conv1x1_stats_kernel,
        grid=(nt,),
        in_specs=[pl.BlockSpec((tm, cin), lambda i: (i, 0)),
                  pl.BlockSpec((cin, cout), lambda i: (0, 0))],
        out_specs=(pl.BlockSpec((tm, cout), lambda i: (i, 0)),
                   pl.BlockSpec((1, 2, cout), lambda i: (i, 0, 0))),
        out_shape=(jax.ShapeDtypeStruct((m, cout), jnp.bfloat16),
                   jax.ShapeDtypeStruct((nt, 2, cout), jnp.float32)),
        compiler_params=_compiler_params(),
        cost_estimate=pl.CostEstimate(
            flops=2 * m * cin * cout, transcendentals=0,
            bytes_accessed=2 * m * (cin + cout) + 2 * cin * cout),
    )(x2d, w)


def _bn_relu_conv1x1_stats(z_in, scale, bias, w, tm):
    m, cin = z_in.shape
    cout = w.shape[1]
    nt = m // tm
    return pl.pallas_call(
        _bn_relu_conv1x1_stats_kernel,
        grid=(nt,),
        in_specs=[pl.BlockSpec((tm, cin), lambda i: (i, 0)),
                  pl.BlockSpec((1, cin), lambda i: (0, 0)),
                  pl.BlockSpec((1, cin), lambda i: (0, 0)),
                  pl.BlockSpec((cin, cout), lambda i: (0, 0))],
        out_specs=(pl.BlockSpec((tm, cout), lambda i: (i, 0)),
                   pl.BlockSpec((1, 2, cout), lambda i: (i, 0, 0))),
        out_shape=(jax.ShapeDtypeStruct((m, cout), jnp.bfloat16),
                   jax.ShapeDtypeStruct((nt, 2, cout), jnp.float32)),
        compiler_params=_compiler_params(),
        cost_estimate=pl.CostEstimate(
            flops=2 * m * cin * cout + 3 * m * cin, transcendentals=0,
            bytes_accessed=2 * m * (cin + cout) + 2 * cin * cout),
    )(z_in, scale, bias, w)


def _bn_relu_conv3x3_stats(z_img, scale, bias, w9):
    n, h, w, c = z_img.shape
    wp = _round_up(w + 2, 8)                        # aligned padded row width
    padm = _round_up((h + 2) * wp + 2, 8)           # flat padded buffer rows
    hw = h * w
    # TODO(synk): for v7x megacore / very large images, tile K2 over row-bands
    #             (grid=(n, H//HB) with a halo) instead of whole images.
    return pl.pallas_call(
        _bn_relu_conv3x3_stats_kernel,
        grid=(n,),
        in_specs=[pl.BlockSpec((1, h, w, c), lambda i: (i, 0, 0, 0)),
                  pl.BlockSpec((1, c), lambda i: (0, 0)),
                  pl.BlockSpec((1, c), lambda i: (0, 0)),
                  pl.BlockSpec((9, c, c), lambda i: (0, 0, 0))],
        out_specs=(pl.BlockSpec((1, hw, c), lambda i: (i, 0, 0)),
                   pl.BlockSpec((1, 2, c), lambda i: (i, 0, 0))),
        out_shape=(jax.ShapeDtypeStruct((n, hw, c), jnp.bfloat16),
                   jax.ShapeDtypeStruct((n, 2, c), jnp.float32)),
        scratch_shapes=[pltpu.VMEM((padm, c), jnp.bfloat16),   # flat padded activation
                        pltpu.VMEM((h * wp, c), jnp.float32)], # f32 wide accumulator
        compiler_params=_compiler_params(),
        cost_estimate=pl.CostEstimate(
            flops=2 * 9 * n * h * wp * c * c, transcendentals=0,
            bytes_accessed=4 * n * hw * c + 2 * 9 * c * c),
    )(z_img, scale, bias, w9)


def _bn_res_relu(z, scale, bias, res, tm):
    m, c = z.shape
    return pl.pallas_call(
        _bn_res_relu_kernel,
        grid=(m // tm,),
        in_specs=[pl.BlockSpec((tm, c), lambda i: (i, 0)),
                  pl.BlockSpec((1, c), lambda i: (0, 0)),
                  pl.BlockSpec((1, c), lambda i: (0, 0)),
                  pl.BlockSpec((tm, c), lambda i: (i, 0))],
        out_specs=pl.BlockSpec((tm, c), lambda i: (i, 0)),
        out_shape=jax.ShapeDtypeStruct((m, c), jnp.float32),
        compiler_params=_compiler_params(),
        cost_estimate=pl.CostEstimate(
            flops=3 * m * c, transcendentals=0, bytes_accessed=8 * m * c),
    )(z, scale, bias, res)


# ---------------------------------------------------------------------------
# JAX glue
# ---------------------------------------------------------------------------
def _fold_bn(stats, gamma, beta, rows_per_tile, total_rows):
    """Combine per-tile (sum, centered sumsq) partials into fused BN scale/bias.

    Uses the parallel-variance combine (stable; no E[x^2]-E[x]^2 cancellation).
    All tiles have `rows_per_tile` rows; total_rows = n_tiles * rows_per_tile,
    i.e. batch statistics over all N*H*W rows with biased variance (matches
    torch.nn.BatchNorm2d forward in training mode)."""
    sums = stats[:, 0, :]                              # (nt, C)
    ssq = stats[:, 1, :]                               # (nt, C) centered per tile
    means = sums / rows_per_tile                       # (nt, C)
    mean = jnp.mean(means, axis=0)                     # (C,)
    var = (jnp.sum(ssq, axis=0)
           + rows_per_tile * jnp.sum(jnp.square(means - mean), axis=0)) / total_rows
    var = jnp.maximum(var, 0.0)
    scale = gamma * jax.lax.rsqrt(var + EPS)
    bias = beta - mean * scale
    return scale.reshape(1, -1), bias.reshape(1, -1)


@jax.jit
def bottleneck_forward(x_nchw, params):
    """Bottleneck forward (stride=1, downsample=None).  NCHW in/out, NHWC inside."""
    # TODO(synk): training-mode BN running_mean/running_var updates are not reproduced.
    # TODO(synk): only stride=1 / downsample=None (identity residual) is implemented.
    # TODO(synk): in a full ResNet the NCHW<->NHWC transposes below should be hoisted
    #             to the network boundary so consecutive blocks stay NHWC.
    n, cin, h, w = x_nchw.shape
    cmid = params["w1"].shape[1]
    cout = params["w3"].shape[1]
    assert cout == cin, "identity residual requires in_channels == out_channels * 4"

    cin_p, cmid_p, cout_p = (_round_up(c, LANE) for c in (cin, cmid, cout))
    m = n * h * w
    tm = _row_tile(m)

    x_nhwc = jnp.transpose(x_nchw, (0, 2, 3, 1))
    # bf16 activations on the HBM side (MXU consumes bf16 anyway).
    x2d = jnp.pad(x_nhwc.reshape(m, cin).astype(jnp.bfloat16),
                  ((0, 0), (0, cin_p - cin)))

    # Lane-dense (zero padded to 128 lanes) weights, bf16 for the MXU.
    w1 = jnp.pad(params["w1"], ((0, cin_p - cin), (0, cmid_p - cmid))).astype(jnp.bfloat16)
    w2 = jnp.pad(params["w2"],
                 ((0, 0), (0, 0), (0, cmid_p - cmid), (0, cmid_p - cmid))
                 ).reshape(9, cmid_p, cmid_p).astype(jnp.bfloat16)
    w3 = jnp.pad(params["w3"], ((0, cmid_p - cmid), (0, cout_p - cout))).astype(jnp.bfloat16)
    g1 = jnp.pad(params["g1"], (0, cmid_p - cmid)); b1 = jnp.pad(params["b1"], (0, cmid_p - cmid))
    g2 = jnp.pad(params["g2"], (0, cmid_p - cmid)); b2 = jnp.pad(params["b2"], (0, cmid_p - cmid))
    g3 = jnp.pad(params["g3"], (0, cout_p - cout)); b3 = jnp.pad(params["b3"], (0, cout_p - cout))

    # conv1 (1x1): tiled bf16 matmul + BN partials.
    z1, st1 = _conv1x1_stats(x2d, w1, tm)
    s1, o1 = _fold_bn(st1, g1, b1, tm, m)

    # conv2 (3x3, stride=1, pad=1): bn1+relu prologue fused in, padding + 9 taps in VMEM.
    z2, st2 = _bn_relu_conv3x3_stats(z1.reshape(n, h, w, cmid_p), s1, o1, w2)
    s2, o2 = _fold_bn(st2, g2, b2, h * w, m)

    # conv3 (1x1): bn2+relu prologue fused in.
    z3, st3 = _bn_relu_conv1x1_stats(z2.reshape(m, cmid_p), s2, o2, w3, tm)
    s3, o3 = _fold_bn(st3, g3, b3, tm, m)

    # bn3 + identity residual + relu.
    y = _bn_res_relu(z3, s3, o3, x2d, tm)

    y = y.reshape(n, h, w, cout_p)[..., :cout]
    return jnp.transpose(y, (0, 3, 1, 2))


# ---------------------------------------------------------------------------
# Pure-JAX reference (same bf16 matmul + bf16 inter-stage storage precision
# as the kernels; BN statistics are taken from the f32 conv outputs, exactly
# like the kernels do).
# ---------------------------------------------------------------------------
def bottleneck_reference(x_nchw, params):
    def mm(a, wt):
        return jnp.dot(a.astype(jnp.bfloat16), wt.astype(jnp.bfloat16),
                       preferred_element_type=jnp.float32)

    def rnd(z):  # mirror the kernels' bf16 inter-stage HBM storage
        return z.astype(jnp.bfloat16).astype(jnp.float32)

    def bn(z, g, b):
        mean = jnp.mean(z, axis=(0, 1, 2))
        var = jnp.mean(jnp.square(z - mean), axis=(0, 1, 2))
        return (rnd(z) - mean) * jax.lax.rsqrt(var + EPS) * g + b

    x = jnp.transpose(x_nchw, (0, 2, 3, 1)).astype(jnp.float32)
    n, h, w, cin = x.shape
    cmid = params["w1"].shape[1]

    y = mm(x.reshape(-1, cin), params["w1"]).reshape(n, h, w, cmid)
    y = jnp.maximum(bn(y, params["g1"], params["b1"]), 0.0)

    yp = jnp.pad(y, ((0, 0), (1, 1), (1, 1), (0, 0)))
    z = jnp.zeros((n, h, w, cmid), jnp.float32)
    for kh in range(3):
        for kw in range(3):
            z = z + mm(yp[:, kh:kh + h, kw:kw + w, :].reshape(-1, cmid),
                       params["w2"][kh, kw]).reshape(n, h, w, cmid)
    z = jnp.maximum(bn(z, params["g2"], params["b2"]), 0.0)

    z = mm(z.reshape(-1, cmid), params["w3"]).reshape(n, h, w, -1)
    z = jnp.maximum(bn(z, params["g3"], params["b3"]) + rnd(x), 0.0)
    return jnp.transpose(z, (0, 3, 1, 2))


# ---------------------------------------------------------------------------
if __name__ == "__main__":
    # in_channels == out_channels * expansion so the identity residual is valid.
    N, CIN, H, W = 4, 16, 16, 16
    CMID = 4                     # `out_channels`; expansion=4 -> conv3 emits CIN channels

    key = jax.random.PRNGKey(0)
    kx, k1, k2, k3 = jax.random.split(key, 4)
    x = jax.random.normal(kx, (N, CIN, H, W), dtype=jnp.float32)

    params = {
        # torch conv1.weight [CMID, CIN, 1, 1]  -> [CIN, CMID]
        "w1": jax.random.normal(k1, (CIN, CMID), jnp.float32) * 0.1,
        "g1": jnp.ones((CMID,), jnp.float32),
        "b1": jnp.zeros((CMID,), jnp.float32),
        # torch conv2.weight [CMID, CMID, 3, 3] -> [3, 3, CMID, CMID]  (kh, kw, cin, cout)
        "w2": jax.random.normal(k2, (3, 3, CMID, CMID), jnp.float32) * 0.1,
        "g2": jnp.ones((CMID,), jnp.float32),
        "b2": jnp.zeros((CMID,), jnp.float32),
        # torch conv3.weight [CIN, CMID, 1, 1]  -> [CMID, CIN]
        "w3": jax.random.normal(k3, (CMID, 4 * CMID), jnp.float32) * 0.1,
        "g3": jnp.ones((4 * CMID,), jnp.float32),
        "b3": jnp.zeros((4 * CMID,), jnp.float32),
    }

    out = bottleneck_forward(x, params)
    jax.block_until_ready(out)

    ref = bottleneck_reference(x, params)
    err = float(jnp.max(jnp.abs(out - ref)))

    assert out.shape == (N, CIN, H, W)
    assert bool(jnp.all(jnp.isfinite(out)))
    assert bool(jnp.all(out >= 0.0))          # final ReLU
    assert err < 5e-2, f"mismatch vs reference: max abs err = {err}"
    print("KERNEL_OK")
</pallas_src>

<mosaic_0001>
module attributes {stable_mosaic.version = 11 : i64} {
  func.func @_conv1x1_stats_kernel(%arg0: i32, %arg1: memref<1024x128xbf16, #tpu.memory_space<vmem>>, %arg2: memref<128x128xbf16, #tpu.memory_space<vmem>>, %arg3: memref<1024x128xbf16, #tpu.memory_space<vmem>>, %arg4: memref<1x2x128xf32, #tpu.memory_space<vmem>>) attributes {dimension_semantics = [#tpu.dimension_semantics<parallel>], iteration_bounds = array<i64: 1>, scalar_prefetch = 0 : i64, scratch_operands = 0 : i64, tpu.core_type = #tpu.core_type<tc>, window_params = [{transform_indices = @transform_0, window_bounds = array<i64: 1024, 128>}, {pipeline_mode = #tpu.pipeline_mode<synchronous>, transform_indices = @transform_1, window_bounds = array<i64: 128, 128>}, {transform_indices = @transform_2, window_bounds = array<i64: 1024, 128>}, {transform_indices = @transform_3, window_bounds = array<i64: 1, 2, 128>}]} {
    %c0 = arith.constant 0 : index
    %c0_0 = arith.constant 0 : index
    %0 = vector.load %arg1[%c0, %c0_0] : memref<1024x128xbf16, #tpu.memory_space<vmem>>, vector<1024x128xbf16>
    %c0_1 = arith.constant 0 : index
    %c0_2 = arith.constant 0 : index
    %1 = vector.load %arg2[%c0_1, %c0_2] : memref<128x128xbf16, #tpu.memory_space<vmem>>, vector<128x128xbf16>
    %cst = arith.constant dense<0.000000e+00> : vector<1024x128xf32>
    %2 = tpu.matmul %0, %1, %cst {dimension_numbers = #tpu.dot_dimension_numbers<[1], [0], [0], [1], [0, 0, 1, 1], [], []>} : vector<1024x128xbf16>, vector<128x128xbf16>, vector<1024x128xf32> -> vector<1024x128xf32>
    %3 = arith.truncf %2 : vector<1024x128xf32> to vector<1024x128xbf16>
    %c0_3 = arith.constant 0 : index
    %c0_4 = arith.constant 0 : index
    %4 = vector.load %arg3[%c0_3, %c0_4] : memref<1024x128xbf16, #tpu.memory_space<vmem>>, vector<1024x128xbf16>
    tpu.vector_store %arg3[%c0_3, %c0_4], %3 {strides = array<i32>} : memref<1024x128xbf16, #tpu.memory_space<vmem>>, vector<1024x128xbf16>,
    %cst_5 = arith.constant dense<0.000000e+00> : vector<128xf32>
    %5 = vector.multi_reduction <add>, %2, %cst_5 [0] : vector<1024x128xf32> to vector<128xf32>
    %6 = vector.shape_cast %5 : vector<128xf32> to vector<1x128xf32>
    %cst_6 = arith.constant 9.765625E-4 : f32
    %7 = vector.broadcast %cst_6 : f32 to vector<1x128xf32>
    %8 = arith.mulf %6, %7 : vector<1x128xf32>
    %9 = vector.broadcast %8 : vector<1x128xf32> to vector<1024x128xf32>
    %10 = arith.subf %2, %9 : vector<1024x128xf32>
    %11 = arith.mulf %10, %10 : vector<1024x128xf32>
    %cst_7 = arith.constant dense<0.000000e+00> : vector<128xf32>
    %12 = vector.multi_reduction <add>, %11, %cst_7 [0] : vector<1024x128xf32> to vector<128xf32>
    %13 = vector.shape_cast %12 : vector<128xf32> to vector<1x128xf32>
    %14 = tpu.concatenate %6, %13 in 0 : vector<1x128xf32>, vector<1x128xf32> -> vector<2x128xf32>
    %c0_8 = arith.constant 0 : index
    %c0_9 = arith.constant 0 : index
    %c0_10 = arith.constant 0 : index
    %15 = vector.load %arg4[%c0_8, %c0_9, %c0_10] : memref<1x2x128xf32, #tpu.memory_space<vmem>>, vector<1x2x128xf32>
    %16 = vector.shape_cast %15 : vector<1x2x128xf32> to vector<2x128xf32>
    %17 = vector.shape_cast %14 : vector<2x128xf32> to vector<1x2x128xf32>
    tpu.vector_store %arg4[%c0_8, %c0_9, %c0_10], %17 {strides = array<i32>} : memref<1x2x128xf32, #tpu.memory_space<vmem>>, vector<1x2x128xf32>,
    return
  }
  func.func @transform_0(%arg0: i32) -> (i32, i32) {
    %c0_i32 = arith.constant 0 : i32
    %c0_i32_0 = arith.constant 0 : i32
    return %arg0, %c0_i32 : i32, i32
  }
  func.func @transform_1(%arg0: i32) -> (i32, i32) {
    %c0_i32 = arith.constant 0 : i32
    %c0_i32_0 = arith.constant 0 : i32
    %c0_i32_1 = arith.constant 0 : i32
    return %c0_i32, %c0_i32_0 : i32, i32
  }
  func.func @transform_2(%arg0: i32) -> (i32, i32) {
    %c0_i32 = arith.constant 0 : i32
    %c0_i32_0 = arith.constant 0 : i32
    return %arg0, %c0_i32 : i32, i32
  }
  func.func @transform_3(%arg0: i32) -> (i32, i32, i32) {
    %c0_i32 = arith.constant 0 : i32
    %c0_i32_0 = arith.constant 0 : i32
    %c0_i32_1 = arith.constant 0 : i32
    return %arg0, %c0_i32, %c0_i32_0 : i32, i32, i32
  }
}

module attributes {stable_mosaic.version = 11 : i64} {
  func.func @_bn_relu_conv3x3_stats_kernel(%arg0: i32, %arg1: memref<1x16x16x128xbf16, #tpu.memory_space<vmem>>, %arg2: memref<1x128xf32, #tpu.memory_space<vmem>>, %arg3: memref<1x128xf32, #tpu.memory_space<vmem>>, %arg4: memref<9x128x128xbf16, #tpu.memory_space<vmem>>, %arg5: memref<1x256x128xbf16, #tpu.memory_space<vmem>>, %arg6: memref<1x2x128xf32, #tpu.memory_space<vmem>>, %arg7: memref<440x128xbf16, #tpu.memory_space<vmem>>, %arg8: memref<384x128xf32, #tpu.memory_space<vmem>>) attributes {dimension_semantics = [#tpu.dimension_semantics<parallel>], iteration_bounds = array<i64: 4>, scalar_prefetch = 0 : i64, scratch_operands = 2 : i64, tpu.core_type = #tpu.core_type<tc>, window_params = [{transform_indices = @transform_0, window_bounds = array<i64: 1, 16, 16, 128>}, {pipeline_mode = #tpu.pipeline_mode<synchronous>, transform_indices = @transform_1, window_bounds = array<i64: 1, 128>}, {pipeline_mode = #tpu.pipeline_mode<synchronous>, transform_indices = @transform_2, window_bounds = array<i64: 1, 128>}, {pipeline_mode = #tpu.pipeline_mode<synchronous>, transform_indices = @transform_3, window_bounds = array<i64: 9, 128, 128>}, {transform_indices = @transform_4, window_bounds = array<i64: 1, 256, 128>}, {transform_indices = @transform_5, window_bounds = array<i64: 1, 2, 128>}]} {
    %cst = arith.constant 0.000000e+00 : bf16
    %0 = vector.broadcast %cst : bf16 to vector<24x128xbf16>
    %c0 = arith.constant 0 : index
    %c0_0 = arith.constant 0 : index
    %1 = vector.load %arg7[%c0, %c0_0] : memref<440x128xbf16, #tpu.memory_space<vmem>>, vector<24x128xbf16>
    tpu.vector_store %arg7[%c0, %c0_0], %0 {strides = array<i32>} : memref<440x128xbf16, #tpu.memory_space<vmem>>, vector<24x128xbf16>,
    %cst_1 = arith.constant 0.000000e+00 : bf16
    %2 = vector.broadcast %cst_1 : bf16 to vector<32x128xbf16>
    %c408 = arith.constant 408 : index
    %c0_2 = arith.constant 0 : index
    %3 = vector.load %arg7[%c408, %c0_2] : memref<440x128xbf16, #tpu.memory_space<vmem>>, vector<32x128xbf16>
    tpu.vector_store %arg7[%c408, %c0_2], %2 {strides = array<i32>} : memref<440x128xbf16, #tpu.memory_space<vmem>>, vector<32x128xbf16>,
    %c0_3 = arith.constant 0 : index
    %c0_4 = arith.constant 0 : index
    %c0_5 = arith.constant 0 : index
    %c0_6 = arith.constant 0 : index
    %4 = vector.load %arg1[%c0_3, %c0_4, %c0_5, %c0_6] : memref<1x16x16x128xbf16, #tpu.memory_space<vmem>>, vector<1x16x16x128xbf16>
    %5 = vector.shape_cast %4 : vector<1x16x16x128xbf16> to vector<16x16x128xbf16>
    %6 = arith.extf %5 : vector<16x16x128xbf16> to vector<16x16x128xf32>
    %c0_7 = arith.constant 0 : index
    %c0_8 = arith.constant 0 : index
    %7 = vector.load %arg2[%c0_7, %c0_8] : memref<1x128xf32, #tpu.memory_space<vmem>>, vector<1x128xf32>
    %8 = vector.shape_cast %7 : vector<1x128xf32> to vector<1x1x128xf32>
    %9 = vector.broadcast %8 : vector<1x1x128xf32> to vector<16x16x128xf32>
    %10 = arith.mulf %6, %9 : vector<16x16x128xf32>
    %c0_9 = arith.constant 0 : index
    %c0_10 = arith.constant 0 : index
    %11 = vector.load %arg3[%c0_9, %c0_10] : memref<1x128xf32, #tpu.memory_space<vmem>>, vector<1x128xf32>
    %12 = vector.shape_cast %11 : vector<1x128xf32> to vector<1x1x128xf32>
    %13 = vector.broadcast %12 : vector<1x1x128xf32> to vector<16x16x128xf32>
    %14 = arith.addf %10, %13 : vector<16x16x128xf32>
    %cst_11 = arith.constant 0.000000e+00 : f32
    %15 = vector.broadcast %cst_11 : f32 to vector<16x16x128xf32>
    %16 = arith.maximumf %14, %15 : vector<16x16x128xf32>
    %17 = arith.truncf %16 : vector<16x16x128xf32> to vector<16x16x128xbf16>
    %cst_12 = arith.constant 0.000000e+00 : bf16
    %18 = vector.broadcast %cst_12 : bf16 to vector<16x1x128xbf16>
    %cst_13 = arith.constant 0.000000e+00 : bf16
    %19 = vector.broadcast %cst_13 : bf16 to vector<16x7x128xbf16>
    %20 = tpu.concatenate %18, %17, %19 in 1 : vector<16x1x128xbf16>, vector<16x16x128xbf16>, vector<16x7x128xbf16> -> vector<16x24x128xbf16>
    %21 = vector.shape_cast %20 : vector<16x24x128xbf16> to vector<384x128xbf16>
    %c24 = arith.constant 24 : index
    %c0_14 = arith.constant 0 : index
    %22 = vector.load %arg7[%c24, %c0_14] : memref<440x128xbf16, #tpu.memory_space<vmem>>, vector<384x128xbf16>
    tpu.vector_store %arg7[%c24, %c0_14], %21 {strides = array<i32>} : memref<440x128xbf16, #tpu.memory_space<vmem>>, vector<384x128xbf16>,
    %c0_15 = arith.constant 0 : index
    %c0_16 = arith.constant 0 : index
    %23 = vector.load %arg7[%c0_15, %c0_16] : memref<440x128xbf16, #tpu.memory_space<vmem>>, vector<384x128xbf16>
    %c0_17 = arith.constant 0 : index
    %c0_18 = arith.constant 0 : index
    %c0_19 = arith.constant 0 : index
    %24 = vector.load %arg4[%c0_17, %c0_18, %c0_19] : memref<9x128x128xbf16, #tpu.memory_space<vmem>>, vector<1x128x128xbf16>
    %25 = vector.shape_cast %24 : vector<1x128x128xbf16> to vector<128x128xbf16>
    %cst_20 = arith.constant dense<0.000000e+00> : vector<384x128xf32>
    %26 = tpu.matmul %23, %25, %cst_20 {dimension_numbers = #tpu.dot_dimension_numbers<[1], [0], [0], [1], [0, 0, 1, 1], [], []>} : vector<384x128xbf16>, vector<128x128xbf16>, vector<384x128xf32> -> vector<384x128xf32>
    %c0_21 = arith.constant 0 : index
    %c0_22 = arith.constant 0 : index
    %27 = vector.load %arg8[%c0_21, %c0_22] : memref<384x128xf32, #tpu.memory_space<vmem>>, vector<384x128xf32>
    tpu.vector_store %arg8[%c0_21, %c0_22], %26 {strides = array<i32>} : memref<384x128xf32, #tpu.memory_space<vmem>>, vector<384x128xf32>,
    %c1 = arith.constant 1 : index
    %c0_23 = arith.constant 0 : index
    %28 = vector.load %arg7[%c1, %c0_23] : memref<440x128xbf16, #tpu.memory_space<vmem>>, vector<384x128xbf16>
    %c1_24 = arith.constant 1 : index
    %c0_25 = arith.constant 0 : index
    %c0_26 = arith.constant 0 : index
    %29 = vector.load %arg4[%c1_24, %c0_25, %c0_26] : memref<9x128x128xbf16, #tpu.memory_space<vmem>>, vector<1x128x128xbf16>
    %30 = vector.shape_cast %29 : vector<1x128x128xbf16> to vector<128x128xbf16>
    %cst_27 = arith.constant dense<0.000000e+00> : vector<384x128xf32>
    %31 = tpu.matmul %28, %30, %cst_27 {dimension_numbers = #tpu.dot_dimension_numbers<[1], [0], [0], [1], [0, 0, 1, 1], [], []>} : vector<384x128xbf16>, vector<128x128xbf16>, vector<384x128xf32> -> vector<384x128xf32>
    %c0_28 = arith.constant 0 : index
    %c0_29 = arith.constant 0 : index
    %32 = vector.load %arg8[%c0_28, %c0_29] : memref<384x128xf32, #tpu.memory_space<vmem>>, vector<384x128xf32>
    %33 = arith.addf %32, %31 : vector<384x128xf32>
    %c0_30 = arith.constant 0 : index
    %c0_31 = arith.constant 0 : index
    %34 = vector.load %arg8[%c0_30, %c0_31] : memref<384x128xf32, #tpu.memory_space<vmem>>, vector<384x128xf32>
    tpu.vector_store %arg8[%c0_30, %c0_31], %33 {strides = array<i32>} : memref<384x128xf32, #tpu.memory_space<vmem>>, vector<384x128xf32>,
    %c2 = arith.constant 2 : index
    %c0_32 = arith.constant 0 : index
    %35 = vector.load %arg7[%c2, %c0_32] : memref<440x128xbf16, #tpu.memory_space<vmem>>, vector<384x128xbf16>
    %c2_33 = arith.constant 2 : index
    %c0_34 = arith.constant 0 : index
    %c0_35 = arith.constant 0 : index
    %36 = vector.load %arg4[%c2_33, %c0_34, %c0_35] : memref<9x128x128xbf16, #tpu.memory_space<vmem>>, vector<1x128x128xbf16>
    %37 = vector.shape_cast %36 : vector<1x128x128xbf16> to vector<128x128xbf16>
    %cst_36 = arith.constant dense<0.000000e+00> : vector<384x128xf32>
    %38 = tpu.matmul %35, %37, %cst_36 {dimension_numbers = #tpu.dot_dimension_numbers<[1], [0], [0], [1], [0, 0, 1, 1], [], []>} : vector<384x128xbf16>, vector<128x128xbf16>, vector<384x128xf32> -> vector<384x128xf32>
    %c0_37 = arith.constant 0 : index
    %c0_38 = arith.constant 0 : index
    %39 = vector.load %arg8[%c0_37, %c0_38] : memref<384x128xf32, #tpu.memory_space<vmem>>, vector<384x128xf32>
    %40 = arith.addf %39, %38 : vector<384x128xf32>
    %c0_39 = arith.constant 0 : index
    %c0_40 = arith.constant 0 : index
    %41 = vector.load %arg8[%c0_39, %c0_40] : memref<384x128xf32, #tpu.memory_space<vmem>>, vector<384x128xf32>
    tpu.vector_store %arg8[%c0_39, %c0_40], %40 {strides = array<i32>} : memref<384x128xf32, #tpu.memory_space<vmem>>, vector<384x128xf32>,
    %c24_41 = arith.constant 24 : index
    %c0_42 = arith.constant 0 : index
    %42 = vector.load %arg7[%c24_41, %c0_42] : memref<440x128xbf16, #tpu.memory_space<vmem>>, vector<384x128xbf16>
    %c3 = arith.constant 3 : index
    %c0_43 = arith.constant 0 : index
    %c0_44 = arith.constant 0 : index
    %43 = vector.load %arg4[%c3, %c0_43, %c0_44] : memref<9x128x128xbf16, #tpu.memory_space<vmem>>, vector<1x128x128xbf16>
    %44 = vector.shape_cast %43 : vector<1x128x128xbf16> to vector<128x128xbf16>
    %cst_45 = arith.constant dense<0.000000e+00> : vector<384x128xf32>
    %45 = tpu.matmul %42, %44, %cst_45 {dimension_numbers = #tpu.dot_dimension_numbers<[1], [0], [0], [1], [0, 0, 1, 1], [], []>} : vector<384x128xbf16>, vector<128x128xbf16>, vector<384x128xf32> -> vector<384x128xf32>
    %c0_46 = arith.constant 0 : index
    %c0_47 = arith.constant 0 : index
    %46 = vector.load %arg8[%c0_46, %c0_47] : memref<384x128xf32, #tpu.memory_space<vmem>>, vector<384x128xf32>
    %47 = arith.addf %46, %45 : vector<384x128xf32>
    %c0_48 = arith.constant 0 : index
    %c0_49 = arith.constant 0 : index
    %48 = vector.load %arg8[%c0_48, %c0_49] : memref<384x128xf32, #tpu.memory_space<vmem>>, vector<384x128xf32>
    tpu.vector_store %arg8[%c0_48, %c0_49], %47 {strides = array<i32>} : memref<384x128xf32, #tpu.memory_space<vmem>>, vector<384x128xf32>,
    %c25 = arith.constant 25 : index
    %c0_50 = arith.constant 0 : index
    %49 = vector.load %arg7[%c25, %c0_50] : memref<440x128xbf16, #tpu.memory_space<vmem>>, vector<384x128xbf16>
    %c4 = arith.constant 4 : index
    %c0_51 = arith.constant 0 : index
    %c0_52 = arith.constant 0 : index
    %50 = vector.load %arg4[%c4, %c0_51, %c0_52] : memref<9x128x128xbf16, #tpu.memory_space<vmem>>, vector<1x128x128xbf16>
    %51 = vector.shape_cast %50 : vector<1x128x128xbf16> to vector<128x128xbf16>
    %cst_53 = arith.constant dense<0.000000e+00> : vector<384x128xf32>
    %52 = tpu.matmul %49, %51, %cst_53 {dimension_numbers = #tpu.dot_dimension_numbers<[1], [0], [0], [1], [0, 0, 1, 1], [], []>} : vector<384x128xbf16>, vector<128x128xbf16>, vector<384x128xf32> -> vector<384x128xf32>
    %c0_54 = arith.constant 0 : index
    %c0_55 = arith.constant 0 : index
    %53 = vector.load %arg8[%c0_54, %c0_55] : memref<384x128xf32, #tpu.memory_space<vmem>>, vector<384x128xf32>
    %54 = arith.addf %53, %52 : vector<384x128xf32>
    %c0_56 = arith.constant 0 : index
    %c0_57 = arith.constant 0 : index
    %55 = vector.load %arg8[%c0_56, %c0_57] : memref<384x128xf32, #tpu.memory_space<vmem>>, vector<384x128xf32>
    tpu.vector_store %arg8[%c0_56, %c0_57], %54 {strides = array<i32>} : memref<384x128xf32, #tpu.memory_space<vmem>>, vector<384x128xf32>,
    %c26 = arith.constant 26 : index
    %c0_58 = arith.constant 0 : index
    %56 = vector.load %arg7[%c26, %c0_58] : memref<440x128xbf16, #tpu.memory_space<vmem>>, vector<384x128xbf16>
    %c5 = arith.constant 5 : index
    %c0_59 = arith.constant 0 : index
    %c0_60 = arith.constant 0 : index
    %57 = vector.load %arg4[%c5, %c0_59, %c0_60] : memref<9x128x128xbf16, #tpu.memory_space<vmem>>, vector<1x128x128xbf16>
    %58 = vector.shape_cast %57 : vector<1x128x128xbf16> to vector<128x128xbf16>
    %cst_61 = arith.constant dense<0.000000e+00> : vector<384x128xf32>
    %59 = tpu.matmul %56, %58, %cst_61 {dimension_numbers = #tpu.dot_dimension_numbers<[1], [0], [0], [1], [0, 0, 1, 1], [], []>} : vector<384x128xbf16>, vector<128x128xbf16>, vector<384x128xf32> -> vector<384x128xf32>
    %c0_62 = arith.constant 0 : index
    %c0_63 = arith.constant 0 : index
    %60 = vector.load %arg8[%c0_62, %c0_63] : memref<384x128xf32, #tpu.memory_space<vmem>>, vector<384x128xf32>
    %61 = arith.addf %60, %59 : vector<384x128xf32>
    %c0_64 = arith.constant 0 : index
    %c0_65 = arith.constant 0 : index
    %62 = vector.load %arg8[%c0_64, %c0_65] : memref<384x128xf32, #tpu.memory_space<vmem>>, vector<384x128xf32>
    tpu.vector_store %arg8[%c0_64, %c0_65], %61 {strides = array<i32>} : memref<384x128xf32, #tpu.memory_space<vmem>>, vector<384x128xf32>,
    %c48 = arith.constant 48 : index
    %c0_66 = arith.constant 0 : index
    %63 = vector.load %arg7[%c48, %c0_66] : memref<440x128xbf16, #tpu.memory_space<vmem>>, vector<384x128xbf16>
    %c6 = arith.constant 6 : index
    %c0_67 = arith.constant 0 : index
    %c0_68 = arith.constant 0 : index
    %64 = vector.load %arg4[%c6, %c0_67, %c0_68] : memref<9x128x128xbf16, #tpu.memory_space<vmem>>, vector<1x128x128xbf16>
    %65 = vector.shape_cast %64 : vector<1x128x128xbf16> to vector<128x128xbf16>
    %cst_69 = arith.constant dense<0.000000e+00> : vector<384x128xf32>
    %66 = tpu.matmul %63, %65, %cst_69 {dimension_numbers = #tpu.dot_dimension_numbers<[1], [0], [0], [1], [0, 0, 1, 1], [], []>} : vector<384x128xbf16>, vector<128x128xbf16>, vector<384x128xf32> -> vector<384x128xf32>
    %c0_70 = arith.constant 0 : index
    %c0_71 = arith.constant 0 : index
    %67 = vector.load %arg8[%c0_70, %c0_71] : memref<384x128xf32, #tpu.memory_space<vmem>>, vector<384x128xf32>
    %68 = arith.addf %67, %66 : vector<384x128xf32>
    %c0_72 = arith.constant 0 : index
    %c0_73 = arith.constant 0 : index
    %69 = vector.load %arg8[%c0_72, %c0_73] : memref<384x128xf32, #tpu.memory_space<vmem>>, vector<384x128xf32>
    tpu.vector_store %arg8[%c0_72, %c0_73], %68 {strides = array<i32>} : memref<384x128xf32, #tpu.memory_space<vmem>>, vector<384x128xf32>,
    %c49 = arith.constant 49 : index
    %c0_74 = arith.constant 0 : index
    %70 = vector.load %arg7[%c49, %c0_74] : memref<440x128xbf16, #tpu.memory_space<vmem>>, vector<384x128xbf16>
    %c7 = arith.constant 7 : index
    %c0_75 = arith.constant 0 : index
    %c0_76 = arith.constant 0 : index
    %71 = vector.load %arg4[%c7, %c0_75, %c0_76] : memref<9x128x128xbf16, #tpu.memory_space<vmem>>, vector<1x128x128xbf16>
    %72 = vector.shape_cast %71 : vector<1x128x128xbf16> to vector<128x128xbf16>
    %cst_77 = arith.constant dense<0.000000e+00> : vector<384x128xf32>
    %73 = tpu.matmul %70, %72, %cst_77 {dimension_numbers = #tpu.dot_dimension_numbers<[1], [0], [0], [1], [0, 0, 1, 1], [], []>} : vector<384x128xbf16>, vector<128x128xbf16>, vector<384x128xf32> -> vector<384x128xf32>
    %c0_78 = arith.constant 0 : index
    %c0_79 = arith.constant 0 : index
    %74 = vector.load %arg8[%c0_78, %c0_79] : memref<384x128xf32, #tpu.memory_space<vmem>>, vector<384x128xf32>
    %75 = arith.addf %74, %73 : vector<384x128xf32>
    %c0_80 = arith.constant 0 : index
    %c0_81 = arith.constant 0 : index
    %76 = vector.load %arg8[%c0_80, %c0_81] : memref<384x128xf32, #tpu.memory_space<vmem>>, vector<384x128xf32>
    tpu.vector_store %arg8[%c0_80, %c0_81], %75 {strides = array<i32>} : memref<384x128xf32, #tpu.memory_space<vmem>>, vector<384x128xf32>,
    %c50 = arith.constant 50 : index
    %c0_82 = arith.constant 0 : index
    %77 = vector.load %arg7[%c50, %c0_82] : memref<440x128xbf16, #tpu.memory_space<vmem>>, vector<384x128xbf16>
    %c8 = arith.constant 8 : index
    %c0_83 = arith.constant 0 : index
    %c0_84 = arith.constant 0 : index
    %78 = vector.load %arg4[%c8, %c0_83, %c0_84] : memref<9x128x128xbf16, #tpu.memory_space<vmem>>, vector<1x128x128xbf16>
    %79 = vector.shape_cast %78 : vector<1x128x128xbf16> to vector<128x128xbf16>
    %cst_85 = arith.constant dense<0.000000e+00> : vector<384x128xf32>
    %80 = tpu.matmul %77, %79, %cst_85 {dimension_numbers = #tpu.dot_dimension_numbers<[1], [0], [0], [1], [0, 0, 1, 1], [], []>} : vector<384x128xbf16>, vector<128x128xbf16>, vector<384x128xf32> -> vector<384x128xf32>
    %c0_86 = arith.constant 0 : index
    %c0_87 = arith.constant 0 : index
    %81 = vector.load %arg8[%c0_86, %c0_87] : memref<384x128xf32, #tpu.memory_space<vmem>>, vector<384x128xf32>
    %82 = arith.addf %81, %80 : vector<384x128xf32>
    %c0_88 = arith.constant 0 : index
    %c0_89 = arith.constant 0 : index
    %83 = vector.load %arg8[%c0_88, %c0_89] : memref<384x128xf32, #tpu.memory_space<vmem>>, vector<384x128xf32>
    tpu.vector_store %arg8[%c0_88, %c0_89], %82 {strides = array<i32>} : memref<384x128xf32, #tpu.memory_space<vmem>>, vector<384x128xf32>,
    %c0_90 = arith.constant 0 : index
    %c0_91 = arith.constant 0 : index
    %84 = vector.load %arg8[%c0_90, %c0_91] : memref<384x128xf32, #tpu.memory_space<vmem>>, vector<384x128xf32>
    %85 = vector.shape_cast %84 : vector<384x128xf32> to vector<16x24x128xf32>
    %86 = vector.extract_strided_slice %85 {offsets = [0, 0, 0], sizes = [16, 16, 128], strides = [1, 1, 1]} : vector<16x24x128xf32> to vector<16x16x128xf32>
    %87 = vector.shape_cast %86 : vector<16x16x128xf32> to vector<256x128xf32>
    %88 = arith.truncf %87 : vector<256x128xf32> to vector<256x128xbf16>
    %c0_92 = arith.constant 0 : index
    %c0_93 = arith.constant 0 : index
    %c0_94 = arith.constant 0 : index
    %89 = vector.load %arg5[%c0_92, %c0_93, %c0_94] : memref<1x256x128xbf16, #tpu.memory_space<vmem>>, vector<1x256x128xbf16>
    %90 = vector.shape_cast %89 : vector<1x256x128xbf16> to vector<256x128xbf16>
    %91 = vector.shape_cast %88 : vector<256x128xbf16> to vector<1x256x128xbf16>
    tpu.vector_store %arg5[%c0_92, %c0_93, %c0_94], %91 {strides = array<i32>} : memref<1x256x128xbf16, #tpu.memory_space<vmem>>, vector<1x256x128xbf16>,
    %cst_95 = arith.constant dense<0.000000e+00> : vector<128xf32>
    %92 = vector.multi_reduction <add>, %87, %cst_95 [0] : vector<256x128xf32> to vector<128xf32>
    %93 = vector.shape_cast %92 : vector<128xf32> to vector<1x128xf32>
    %cst_96 = arith.constant 3.906250e-03 : f32
    %94 = vector.broadcast %cst_96 : f32 to vector<1x128xf32>
    %95 = arith.mulf %93, %94 : vector<1x128xf32>
    %96 = vector.broadcast %95 : vector<1x128xf32> to vector<256x128xf32>
    %97 = arith.subf %87, %96 : vector<256x128xf32>
    %98 = arith.mulf %97, %97 : vector<256x128xf32>
    %cst_97 = arith.constant dense<0.000000e+00> : vector<128xf32>
    %99 = vector.multi_reduction <add>, %98, %cst_97 [0] : vector<256x128xf32> to vector<128xf32>
    %100 = vector.shape_cast %99 : vector<128xf32> to vector<1x128xf32>
    %101 = tpu.concatenate %93, %100 in 0 : vector<1x128xf32>, vector<1x128xf32> -> vector<2x128xf32>
    %c0_98 = arith.constant 0 : index
    %c0_99 = arith.constant 0 : index
    %c0_100 = arith.constant 0 : index
    %102 = vector.load %arg6[%c0_98, %c0_99, %c0_100] : memref<1x2x128xf32, #tpu.memory_space<vmem>>, vector<1x2x128xf32>
    %103 = vector.shape_cast %102 : vector<1x2x128xf32> to vector<2x128xf32>
    %104 = vector.shape_cast %101 : vector<2x128xf32> to vector<1x2x128xf32>
    tpu.vector_store %arg6[%c0_98, %c0_99, %c0_100], %104 {strides = array<i32>} : memref<1x2x128xf32, #tpu.memory_space<vmem>>, vector<1x2x128xf32>,
    return
  }
  func.func @transform_0(%arg0: i32) -> (i32, i32, i32, i32) {
    %c0_i32 = arith.constant 0 : i32
    %c0_i32_0 = arith.constant 0 : i32
    %c0_i32_1 = arith.constant 0 : i32
    %c0_i32_2 = arith.constant 0 : i32
    return %arg0, %c0_i32, %c0_i32_0, %c0_i32_1 : i32, i32, i32, i32
  }
  func.func @transform_1(%arg0: i32) -> (i32, i32) {
    %c0_i32 = arith.constant 0 : i32
    %c0_i32_0 = arith.constant 0 : i32
    %c0_i32_1 = arith.constant 0 : i32
    return %c0_i32, %c0_i32_0 : i32, i32
  }
  func.func @transform_2(%arg0: i32) -> (i32, i32) {
    %c0_i32 = arith.constant 0 : i32
    %c0_i32_0 = arith.constant 0 : i32
    %c0_i32_1 = arith.constant 0 : i32
    return %c0_i32, %c0_i32_0 : i32, i32
  }
  func.func @transform_3(%arg0: i32) -> (i32, i32, i32) {
    %c0_i32 = arith.constant 0 : i32
    %c0_i32_0 = arith.constant 0 : i32
    %c0_i32_1 = arith.constant 0 : i32
    %c0_i32_2 = arith.constant 0 : i32
    return %c0_i32, %c0_i32_0, %c0_i32_1 : i32, i32, i32
  }
  func.func @transform_4(%arg0: i32) -> (i32, i32, i32) {
    %c0_i32 = arith.constant 0 : i32
    %c0_i32_0 = arith.constant 0 : i32
    %c0_i32_1 = arith.constant 0 : i32
    return %arg0, %c0_i32, %c0_i32_0 : i32, i32, i32
  }
  func.func @transform_5(%arg0: i32) -> (i32, i32, i32) {
    %c0_i32 = arith.constant 0 : i32
    %c0_i32_0 = arith.constant 0 : i32
    %c0_i32_1 = arith.constant 0 : i32
    return %arg0, %c0_i32, %c0_i32_0 : i32, i32, i32
  }
}

module attributes {stable_mosaic.version = 11 : i64} {
  func.func @_bn_relu_conv1x1_stats_kernel(%arg0: i32, %arg1: memref<1024x128xbf16, #tpu.memory_space<vmem>>, %arg2: memref<1x128xf32, #tpu.memory_space<vmem>>, %arg3: memref<1x128xf32, #tpu.memory_space<vmem>>, %arg4: memref<128x128xbf16, #tpu.memory_space<vmem>>, %arg5: memref<1024x128xbf16, #tpu.memory_space<vmem>>, %arg6: memref<1x2x128xf32, #tpu.memory_space<vmem>>) attributes {dimension_semantics = [#tpu.dimension_semantics<parallel>], iteration_bounds = array<i64: 1>, scalar_prefetch = 0 : i64, scratch_operands = 0 : i64, tpu.core_type = #tpu.core_type<tc>, window_params = [{transform_indices = @transform_0, window_bounds = array<i64: 1024, 128>}, {pipeline_mode = #tpu.pipeline_mode<synchronous>, transform_indices = @transform_1, window_bounds = array<i64: 1, 128>}, {pipeline_mode = #tpu.pipeline_mode<synchronous>, transform_indices = @transform_2, window_bounds = array<i64: 1, 128>}, {pipeline_mode = #tpu.pipeline_mode<synchronous>, transform_indices = @transform_3, window_bounds = array<i64: 128, 128>}, {transform_indices = @transform_4, window_bounds = array<i64: 1024, 128>}, {transform_indices = @transform_5, window_bounds = array<i64: 1, 2, 128>}]} {
    %c0 = arith.constant 0 : index
    %c0_0 = arith.constant 0 : index
    %0 = vector.load %arg1[%c0, %c0_0] : memref<1024x128xbf16, #tpu.memory_space<vmem>>, vector<1024x128xbf16>
    %1 = arith.extf %0 : vector<1024x128xbf16> to vector<1024x128xf32>
    %c0_1 = arith.constant 0 : index
    %c0_2 = arith.constant 0 : index
    %2 = vector.load %arg2[%c0_1, %c0_2] : memref<1x128xf32, #tpu.memory_space<vmem>>, vector<1x128xf32>
    %3 = vector.broadcast %2 : vector<1x128xf32> to vector<1024x128xf32>
    %4 = arith.mulf %1, %3 : vector<1024x128xf32>
    %c0_3 = arith.constant 0 : index
    %c0_4 = arith.constant 0 : index
    %5 = vector.load %arg3[%c0_3, %c0_4] : memref<1x128xf32, #tpu.memory_space<vmem>>, vector<1x128xf32>
    %6 = vector.broadcast %5 : vector<1x128xf32> to vector<1024x128xf32>
    %7 = arith.addf %4, %6 : vector<1024x128xf32>
    %cst = arith.constant 0.000000e+00 : f32
    %8 = vector.broadcast %cst : f32 to vector<1024x128xf32>
    %9 = arith.maximumf %7, %8 : vector<1024x128xf32>
    %10 = arith.truncf %9 : vector<1024x128xf32> to vector<1024x128xbf16>
    %c0_5 = arith.constant 0 : index
    %c0_6 = arith.constant 0 : index
    %11 = vector.load %arg4[%c0_5, %c0_6] : memref<128x128xbf16, #tpu.memory_space<vmem>>, vector<128x128xbf16>
    %cst_7 = arith.constant dense<0.000000e+00> : vector<1024x128xf32>
    %12 = tpu.matmul %10, %11, %cst_7 {dimension_numbers = #tpu.dot_dimension_numbers<[1], [0], [0], [1], [0, 0, 1, 1], [], []>} : vector<1024x128xbf16>, vector<128x128xbf16>, vector<1024x128xf32> -> vector<1024x128xf32>
    %13 = arith.truncf %12 : vector<1024x128xf32> to vector<1024x128xbf16>
    %c0_8 = arith.constant 0 : index
    %c0_9 = arith.constant 0 : index
    %14 = vector.load %arg5[%c0_8, %c0_9] : memref<1024x128xbf16, #tpu.memory_space<vmem>>, vector<1024x128xbf16>
    tpu.vector_store %arg5[%c0_8, %c0_9], %13 {strides = array<i32>} : memref<1024x128xbf16, #tpu.memory_space<vmem>>, vector<1024x128xbf16>,
    %cst_10 = arith.constant dense<0.000000e+00> : vector<128xf32>
    %15 = vector.multi_reduction <add>, %12, %cst_10 [0] : vector<1024x128xf32> to vector<128xf32>
    %16 = vector.shape_cast %15 : vector<128xf32> to vector<1x128xf32>
    %cst_11 = arith.constant 9.765625E-4 : f32
    %17 = vector.broadcast %cst_11 : f32 to vector<1x128xf32>
    %18 = arith.mulf %16, %17 : vector<1x128xf32>
    %19 = vector.broadcast %18 : vector<1x128xf32> to vector<1024x128xf32>
    %20 = arith.subf %12, %19 : vector<1024x128xf32>
    %21 = arith.mulf %20, %20 : vector<1024x128xf32>
    %cst_12 = arith.constant dense<0.000000e+00> : vector<128xf32>
    %22 = vector.multi_reduction <add>, %21, %cst_12 [0] : vector<1024x128xf32> to vector<128xf32>
    %23 = vector.shape_cast %22 : vector<128xf32> to vector<1x128xf32>
    %24 = tpu.concatenate %16, %23 in 0 : vector<1x128xf32>, vector<1x128xf32> -> vector<2x128xf32>
    %c0_13 = arith.constant 0 : index
    %c0_14 = arith.constant 0 : index
    %c0_15 = arith.constant 0 : index
    %25 = vector.load %arg6[%c0_13, %c0_14, %c0_15] : memref<1x2x128xf32, #tpu.memory_space<vmem>>, vector<1x2x128xf32>
    %26 = vector.shape_cast %25 : vector<1x2x128xf32> to vector<2x128xf32>
    %27 = vector.shape_cast %24 : vector<2x128xf32> to vector<1x2x128xf32>
    tpu.vector_store %arg6[%c0_13, %c0_14, %c0_15], %27 {strides = array<i32>} : memref<1x2x128xf32, #tpu.memory_space<vmem>>, vector<1x2x128xf32>,
    return
  }
  func.func @transform_0(%arg0: i32) -> (i32, i32) {
    %c0_i32 = arith.constant 0 : i32
    %c0_i32_0 = arith.constant 0 : i32
    return %arg0, %c0_i32 : i32, i32
  }
  func.func @transform_1(%arg0: i32) -> (i32, i32) {
    %c0_i32 = arith.constant 0 : i32
    %c0_i32_0 = arith.constant 0 : i32
    %c0_i32_1 = arith.constant 0 : i32
    return %c0_i32, %c0_i32_0 : i32, i32
  }
  func.func @transform_2(%arg0: i32) -> (i32, i32) {
    %c0_i32 = arith.constant 0 : i32
    %c0_i32_0 = arith.constant 0 : i32
    %c0_i32_1 = arith.constant 0 : i32
    return %c0_i32, %c0_i32_0 : i32, i32
  }
  func.func @transform_3(%arg0: i32) -> (i32, i32) {
    %c0_i32 = arith.constant 0 : i32
    %c0_i32_0 = arith.constant 0 : i32
    %c0_i32_1 = arith.constant 0 : i32
    return %c0_i32, %c0_i32_0 : i32, i32
  }
  func.func @transform_4(%arg0: i32) -> (i32, i32) {
    %c0_i32 = arith.constant 0 : i32
    %c0_i32_0 = arith.constant 0 : i32
    return %arg0, %c0_i32 : i32, i32
  }
  func.func @transform_5(%arg0: i32) -> (i32, i32, i32) {
    %c0_i32 = arith.constant 0 : i32
    %c0_i32_0 = arith.constant 0 : i32
    %c0_i32_1 = arith.constant 0 : i32
    return %arg0, %c0_i32, %c0_i32_0 : i32, i32, i32
  }
}

module attributes {stable_mosaic.version = 11 : i64} {
  func.func @_bn_res_relu_kernel(%arg0: i32, %arg1: memref<1024x128xbf16, #tpu.memory_space<vmem>>, %arg2: memref<1x128xf32, #tpu.memory_space<vmem>>, %arg3: memref<1x128xf32, #tpu.memory_space<vmem>>, %arg4: memref<1024x128xbf16, #tpu.memory_space<vmem>>, %arg5: memref<1024x128xf32, #tpu.memory_space<vmem>>) attributes {dimension_semantics = [#tpu.dimension_semantics<parallel>], iteration_bounds = array<i64: 1>, scalar_prefetch = 0 : i64, scratch_operands = 0 : i64, tpu.core_type = #tpu.core_type<tc>, window_params = [{transform_indices = @transform_0, window_bounds = array<i64: 1024, 128>}, {pipeline_mode = #tpu.pipeline_mode<synchronous>, transform_indices = @transform_1, window_bounds = array<i64: 1, 128>}, {pipeline_mode = #tpu.pipeline_mode<synchronous>, transform_indices = @transform_2, window_bounds = array<i64: 1, 128>}, {transform_indices = @transform_3, window_bounds = array<i64: 1024, 128>}, {transform_indices = @transform_4, window_bounds = array<i64: 1024, 128>}]} {
    %c0 = arith.constant 0 : index
    %c0_0 = arith.constant 0 : index
    %0 = vector.load %arg1[%c0, %c0_0] : memref<1024x128xbf16, #tpu.memory_space<vmem>>, vector<1024x128xbf16>
    %1 = arith.extf %0 : vector<1024x128xbf16> to vector<1024x128xf32>
    %c0_1 = arith.constant 0 : index
    %c0_2 = arith.constant 0 : index
    %2 = vector.load %arg2[%c0_1, %c0_2] : memref<1x128xf32, #tpu.memory_space<vmem>>, vector<1x128xf32>
    %3 = vector.broadcast %2 : vector<1x128xf32> to vector<1024x128xf32>
    %4 = arith.mulf %1, %3 : vector<1024x128xf32>
    %c0_3 = arith.constant 0 : index
    %c0_4 = arith.constant 0 : index
    %5 = vector.load %arg3[%c0_3, %c0_4] : memref<1x128xf32, #tpu.memory_space<vmem>>, vector<1x128xf32>
    %6 = vector.broadcast %5 : vector<1x128xf32> to vector<1024x128xf32>
    %7 = arith.addf %4, %6 : vector<1024x128xf32>
    %c0_5 = arith.constant 0 : index
    %c0_6 = arith.constant 0 : index
    %8 = vector.load %arg4[%c0_5, %c0_6] : memref<1024x128xbf16, #tpu.memory_space<vmem>>, vector<1024x128xbf16>
    %9 = arith.extf %8 : vector<1024x128xbf16> to vector<1024x128xf32>
    %10 = arith.addf %7, %9 : vector<1024x128xf32>
    %cst = arith.constant 0.000000e+00 : f32
    %11 = vector.broadcast %cst : f32 to vector<1024x128xf32>
    %12 = arith.maximumf %10, %11 : vector<1024x128xf32>
    %c0_7 = arith.constant 0 : index
    %c0_8 = arith.constant 0 : index
    %13 = vector.load %arg5[%c0_7, %c0_8] : memref<1024x128xf32, #tpu.memory_space<vmem>>, vector<1024x128xf32>
    tpu.vector_store %arg5[%c0_7, %c0_8], %12 {strides = array<i32>} : memref<1024x128xf32, #tpu.memory_space<vmem>>, vector<1024x128xf32>,
    return
  }
  func.func @transform_0(%arg0: i32) -> (i32, i32) {
    %c0_i32 = arith.constant 0 : i32
    %c0_i32_0 = arith.constant 0 : i32
    return %arg0, %c0_i32 : i32, i32
  }
  func.func @transform_1(%arg0: i32) -> (i32, i32) {
    %c0_i32 = arith.constant 0 : i32
    %c0_i32_0 = arith.constant 0 : i32
    %c0_i32_1 = arith.constant 0 : i32
    return %c0_i32, %c0_i32_0 : i32, i32
  }
  func.func @transform_2(%arg0: i32) -> (i32, i32) {
    %c0_i32 = arith.constant 0 : i32
    %c0_i32_0 = arith.constant 0 : i32
    %c0_i32_1 = arith.constant 0 : i32
    return %c0_i32, %c0_i32_0 : i32, i32
  }
  func.func @transform_3(%arg0: i32) -> (i32, i32) {
    %c0_i32 = arith.constant 0 : i32
    %c0_i32_0 = arith.constant 0 : i32
    return %arg0, %c0_i32 : i32, i32
  }
  func.func @transform_4(%arg0: i32) -> (i32, i32) {
    %c0_i32 = arith.constant 0 : i32
    %c0_i32_0 = arith.constant 0 : i32
    return %arg0, %c0_i32 : i32, i32
  }
}

</mosaic_0001>

<bundles_post_ra>
// kernel: bottleneck_forward.4
= control target key start
LH: loop header
LB: loop body
LE: loop exit
PB: predicated region body
PF: predicated region fallthrough
CT: control target
= control target key end

     0   :  { %vm2298_vm0 = vcmask 1040384   ;;  %s4909_s1 = inlined_call_operand.vmem [shape: bf16[128,128], index: 1, kind: input, shape index: {}]   ;;  %s4910_s0 = inlined_call_operand.vmem [shape: bf16[1024,128], index: 0, kind: input, shape index: {}]   ;;  %s4911_s2 = inlined_call_operand.vmem [shape: bf16[1024,128], index: 2, kind: output, shape index: {0}]   ;;  %s4912_s3 = inlined_call_operand.vmem [shape: f32[1,2,128], index: 3, kind: output, shape index: {1}]  }
   0x1   :  { %v3252_v0 = vld [vmem:[%s4909_s1] sm:$0xff]   ;;  %v3253_v1 = vld [vmem:[%s4909_s1 + $0x8] sm:$0xff]   ;;  %v3254_v2 = vld [vmem:[%s4909_s1 + $0x10] sm:$0xff]  }
   0x2   :  { %3092 = vmatprep.subr.bf16.mxu0 %v3252_v0  ;;  %3236 = vmatprep.subr.bf16.mxu1 %v3252_v0  ;;  %v3255_v3 = vld [vmem:[%s4909_s1 + $0x18] sm:$0xff]   ;;  %v3260_v4 = vld [vmem:[%s4910_s0] sm:$0xff]   ;;  %v3257_v6 = vld [vmem:[%s4909_s1 + $0x28] sm:$0xff]  }
   0x3   :  { %3093 = vmatpush3.bf16.msra.mxu0 %v3252_v0  ;;  %3244 = vmatpush3.bf16.msra.mxu1 %v3252_v0  ;;  %v3256_v5 = vld [vmem:[%s4909_s1 + $0x20] sm:$0xff]   ;;  %v3258_v7 = vld [vmem:[%s4909_s1 + $0x30] sm:$0xff]   ;;  %v3259_v8 = vld [vmem:[%s4909_s1 + $0x38] sm:$0xff]  }
   0x4   :  { %3094 = vmatprep.subr.bf16.mxu0 %v3253_v1  ;;  %3237 = vmatprep.subr.bf16.mxu1 %v3253_v1  ;;  %v3261_v9 = vld [vmem:[%s4910_s0 + $0x8] sm:$0xff]   ;;  %v3262_v10 = vld [vmem:[%s4910_s0 + $0x10] sm:$0xff]   ;;  %v3263_v11 = vld [vmem:[%s4910_s0 + $0x18] sm:$0xff]  }
   0x5   :  { %3108 = vmatprep.mubr.bf16.mxu0 %v3260_v4  ;;  %v3264_v12 = vld [vmem:[%s4910_s0 + $0x20] sm:$0xff]   ;;  %v3293_v14 = vld [vmem:[%s4910_s0 + $0x108] sm:$0xff]   ;;  %v3294_v15 = vld [vmem:[%s4910_s0 + $0x110] sm:$0xff]  }
   0x6   :  { %v3292_v13 = vld [vmem:[%s4910_s0 + $0x100] sm:$0xff]   ;;  %v3265_v16 = vld [vmem:[%s4910_s0 + $0x28] sm:$0xff]   ;;  %v3266_v17 = vld [vmem:[%s4910_s0 + $0x30] sm:$0xff]  }
   0x7   :  { %3095 = vmatpush3.bf16.msra.mxu0 %v3253_v1  ;;  %3245 = vmatpush3.bf16.msra.mxu1 %v3253_v1  ;;  %v3295_v18 = vld [vmem:[%s4910_s0 + $0x118] sm:$0xff]   ;;  %v3296_v19 = vld [vmem:[%s4910_s0 + $0x120] sm:$0xff]   ;;  %v3297_v22 = vld [vmem:[%s4910_s0 + $0x128] sm:$0xff]  }
   0x8   :  { %3096 = vmatprep.subr.bf16.mxu0 %v3254_v2  ;;  %3238 = vmatprep.subr.bf16.mxu1 %v3254_v2  ;;  %v3267_v20 = vld [vmem:[%s4910_s0 + $0x38] sm:$0xff]   ;;  %v3268_v21 = vld [vmem:[%s4910_s0 + $0x40] sm:$0xff]   ;;  %v3298_v23 = vld [vmem:[%s4910_s0 + $0x130] sm:$0xff]  }
   0x9   :  { %3172 = vmatprep.mubr.bf16.mxu1 %v3292_v13  ;;  %v3269_v24 = vld [vmem:[%s4910_s0 + $0x48] sm:$0xff]   ;;  %v3270_v25 = vld [vmem:[%s4910_s0 + $0x50] sm:$0xff]   ;;  %v3299_v26 = vld [vmem:[%s4910_s0 + $0x138] sm:$0xff]  }
   0xa   :  { %v3300_v27 = vld [vmem:[%s4910_s0 + $0x140] sm:$0xff]   ;;  %v3271_v28 = vld [vmem:[%s4910_s0 + $0x58] sm:$0xff]   ;;  %v3301_v30 = vld [vmem:[%s4910_s0 + $0x148] sm:$0xff]  }
   0xb   :  { %3097 = vmatpush3.bf16.msra.mxu0 %v3254_v2  ;;  %3246 = vmatpush3.bf16.msra.mxu1 %v3254_v2  ;;  %v3272_v29 = vld [vmem:[%s4910_s0 + $0x60] sm:$0xff]   ;;  %v3302_v31 = vld [vmem:[%s4910_s0 + $0x150] sm:$0xff]   ;;  %v3273_v32 = vld [vmem:[%s4910_s0 + $0x68] sm:$0xff]  }
   0xc   :  { %3098 = vmatprep.subr.bf16.mxu0 %v3255_v3  ;;  %3239 = vmatprep.subr.bf16.mxu1 %v3255_v3  ;;  %v3274_v33 = vld [vmem:[%s4910_s0 + $0x70] sm:$0xff]   ;;  %v3303_v34 = vld [vmem:[%s4910_s0 + $0x158] sm:$0xff]   ;;  %v3304_v35 = vld [vmem:[%s4910_s0 + $0x160] sm:$0xff]  }
   0xd   :  { %v3275_v36 = vld [vmem:[%s4910_s0 + $0x78] sm:$0xff]   ;;  %v3276_v37 = vld [vmem:[%s4910_s0 + $0x80] sm:$0xff]   ;;  %v3305_v38 = vld [vmem:[%s4910_s0 + $0x168] sm:$0xff]  }
   0xe   :  { %v3306_v39 = vld [vmem:[%s4910_s0 + $0x170] sm:$0xff]   ;;  %v3277_v40 = vld [vmem:[%s4910_s0 + $0x88] sm:$0xff]   ;;  %v3307_v42 = vld [vmem:[%s4910_s0 + $0x178] sm:$0xff]  }
   0xf   :  { %3099 = vmatpush3.bf16.msra.mxu0 %v3255_v3  ;;  %3247 = vmatpush3.bf16.msra.mxu1 %v3255_v3  ;;  %v3278_v41 = vld [vmem:[%s4910_s0 + $0x90] sm:$0xff]   ;;  %v3308_v43 = vld [vmem:[%s4910_s0 + $0x180] sm:$0xff]   ;;  %v3279_v44 = vld [vmem:[%s4910_s0 + $0x98] sm:$0xff]  }
  0x10   :  { %3100 = vmatprep.subr.bf16.mxu0 %v3256_v5  ;;  %3240 = vmatprep.subr.bf16.mxu1 %v3256_v5  ;;  %v3280_v45 = vld [vmem:[%s4910_s0 + $0xa0] sm:$0xff]   ;;  %v3309_v46 = vld [vmem:[%s4910_s0 + $0x188] sm:$0xff]   ;;  %v3310_v47 = vld [vmem:[%s4910_s0 + $0x190] sm:$0xff]  }
  0x11   :  { %v3281_v48 = vld [vmem:[%s4910_s0 + $0xa8] sm:$0xff]   ;;  %v3282_v49 = vld [vmem:[%s4910_s0 + $0xb0] sm:$0xff]   ;;  %v3311_v50 = vld [vmem:[%s4910_s0 + $0x198] sm:$0xff]  }
  0x12   :  { %v3312_v51 = vld [vmem:[%s4910_s0 + $0x1a0] sm:$0xff]   ;;  %v3283_v52 = vld [vmem:[%s4910_s0 + $0xb8] sm:$0xff]   ;;  %v3313_v54 = vld [vmem:[%s4910_s0 + $0x1a8] sm:$0xff]  }
  0x13   :  { %3101 = vmatpush3.bf16.msra.mxu0 %v3256_v5  ;;  %3248 = vmatpush3.bf16.msra.mxu1 %v3256_v5  ;;  %v3284_v53 = vld [vmem:[%s4910_s0 + $0xc0] sm:$0xff]   ;;  %v3314_v55 = vld [vmem:[%s4910_s0 + $0x1b0] sm:$0xff]   ;;  %v3285_v56 = vld [vmem:[%s4910_s0 + $0xc8] sm:$0xff]  }
  0x14   :  { %3102 = vmatprep.subr.bf16.mxu0 %v3257_v6  ;;  %3241 = vmatprep.subr.bf16.mxu1 %v3257_v6  ;;  %v3286_v57 = vld [vmem:[%s4910_s0 + $0xd0] sm:$0xff]   ;;  %v3315_v58 = vld [vmem:[%s4910_s0 + $0x1b8] sm:$0xff]   ;;  %v3316_v59 = vld [vmem:[%s4910_s0 + $0x1c0] sm:$0xff]  }
  0x15   :  { %v3287_v60 = vld [vmem:[%s4910_s0 + $0xd8] sm:$0xff]   ;;  %v3288_v61 = vld [vmem:[%s4910_s0 + $0xe0] sm:$0xff]   ;;  %v3317_v62 = vld [vmem:[%s4910_s0 + $0x1c8] sm:$0xff]  }
  0x16   :  { %v3318_v63 = vld [vmem:[%s4910_s0 + $0x1d0] sm:$0xff]   ;;  %v3289_v0 = vld [vmem:[%s4910_s0 + $0xe8] sm:$0xff]   ;;  %v3319_v2 = vld [vmem:[%s4910_s0 + $0x1d8] sm:$0xff]  }
  0x17   :  { %3103 = vmatpush3.bf16.msra.mxu0 %v3257_v6  ;;  %3249 = vmatpush3.bf16.msra.mxu1 %v3257_v6  ;;  %v3290_v1 = vld [vmem:[%s4910_s0 + $0xf0] sm:$0xff]   ;;  %v3320_v3 = vld [vmem:[%s4910_s0 + $0x1e0] sm:$0xff]   ;;  %v3291_v4 = vld [vmem:[%s4910_s0 + $0xf8] sm:$0xff]  }
  0x18   :  { %3104 = vmatprep.subr.bf16.mxu0 %v3258_v7  ;;  %3242 = vmatprep.subr.bf16.mxu1 %v3258_v7  ;;  %v3321_v5 = vld [vmem:[%s4910_s0 + $0x1e8] sm:$0xff]   ;;  %v3322_v6 = vld [vmem:[%s4910_s0 + $0x1f0] sm:$0xff]  }
  0x1b   :  { %3105 = vmatpush3.bf16.msra.mxu0 %v3258_v7  ;;  %3250 = vmatpush3.bf16.msra.mxu1 %v3258_v7  ;;  %v3323_v7 = vld [vmem:[%s4910_s0 + $0x1f8] sm:$0xff]  }
  0x1c   :  { %3106 = vmatprep.subr.bf16.mxu0 %v3259_v8  ;;  %3243 = vmatprep.subr.bf16.mxu1 %v3259_v8 }
  0x1f   :  { %3107 = vmatpush3.bf16.msra.mxu0 %v3259_v8  ;;  %3251 = vmatpush3.bf16.msra.mxu1 %v3259_v8 }
  0x22   :  { %3109 = vmatmul.mubr.bf16.vlgmr.msra.gmra.mrb[0].mxu0 %v3261_v9  ;;  %3173 = vmatmul.mubr.bf16.vlgmr.msra.gmra.mrb[0].mxu1 %v3293_v14 }
  0x23   :  { %3112 = vmatprep.mubr.bf16.mxu0 %v3262_v10  ;;  %3176 = vmatprep.mubr.bf16.mxu1 %v3294_v15 }
  0x2a   :  { %3113 = vmatmul.mubr.bf16.gmra.mrb[4].mxu0 %v3263_v11  ;;  %3177 = vmatmul.mubr.bf16.gmra.mrb[4].mxu1 %v3295_v18 }
  0x2b   :  { %3116 = vmatprep.mubr.bf16.mxu0 %v3264_v12  ;;  %3180 = vmatprep.mubr.bf16.mxu1 %v3296_v19 }
  0x32   :  { %3117 = vmatmul.mubr.bf16.gmra.mrb[8].mxu0 %v3265_v16  ;;  %3181 = vmatmul.mubr.bf16.gmra.mrb[8].mxu1 %v3297_v22 }
  0x33   :  { %3120 = vmatprep.mubr.bf16.mxu0 %v3266_v17  ;;  %3184 = vmatprep.mubr.bf16.mxu1 %v3298_v23 }
  0x3a   :  { %3121 = vmatmul.mubr.bf16.gmra.mrb[12].mxu0 %v3267_v20  ;;  %3185 = vmatmul.mubr.bf16.gmra.mrb[12].mxu1 %v3299_v26 }
  0x3b   :  { %3124 = vmatprep.mubr.bf16.mxu0 %v3268_v21  ;;  %3188 = vmatprep.mubr.bf16.mxu1 %v3300_v27 }
  0x42   :  { %3125 = vmatmul.mubr.bf16.gmra.mrb[16].mxu0 %v3269_v24  ;;  %3189 = vmatmul.mubr.bf16.gmra.mrb[16].mxu1 %v3301_v30 }
  0x43   :  { %3128 = vmatprep.mubr.bf16.mxu0 %v3270_v25  ;;  %3192 = vmatprep.mubr.bf16.mxu1 %v3302_v31 }
  0x4a   :  { %3129 = vmatmul.mubr.bf16.gmra.mrb[20].mxu0 %v3271_v28  ;;  %3193 = vmatmul.mubr.bf16.gmra.mrb[20].mxu1 %v3303_v34 }
  0x4b   :  { %3132 = vmatprep.mubr.bf16.mxu0 %v3272_v29  ;;  %3196 = vmatprep.mubr.bf16.mxu1 %v3304_v35 }
  0x52   :  { %3133 = vmatmul.mubr.bf16.gmra.mrb[24].mxu0 %v3273_v32  ;;  %3197 = vmatmul.mubr.bf16.gmra.mrb[24].mxu1 %v3305_v38 }
  0x53   :  { %3136 = vmatprep.mubr.bf16.mxu0 %v3274_v33  ;;  %3200 = vmatprep.mubr.bf16.mxu1 %v3306_v39 }
  0x5a   :  { %3137 = vmatmul.mubr.bf16.gmra.mrb[28].mxu0 %v3275_v36  ;;  %3201 = vmatmul.mubr.bf16.gmra.mrb[28].mxu1 %v3307_v42 }
  0x5b   :  { %3140 = vmatprep.mubr.bf16.mxu0 %v3276_v37  ;;  %3204 = vmatprep.mubr.bf16.mxu1 %v3308_v43 }
  0x62   :  { %3141 = vmatmul.mubr.bf16.gmra.mrb[32].mxu0 %v3277_v40  ;;  %3205 = vmatmul.mubr.bf16.gmra.mrb[32].mxu1 %v3309_v46 }
  0x63   :  { %3144 = vmatprep.mubr.bf16.mxu0 %v3278_v41  ;;  %3208 = vmatprep.mubr.bf16.mxu1 %v3310_v47 }
  0x6a   :  { %3145 = vmatmul.mubr.bf16.gmra.mrb[36].mxu0 %v3279_v44  ;;  %3209 = vmatmul.mubr.bf16.gmra.mrb[36].mxu1 %v3311_v50 }
  0x6b   :  { %3148 = vmatprep.mubr.bf16.mxu0 %v3280_v45  ;;  %3212 = vmatprep.mubr.bf16.mxu1 %v3312_v51 }
  0x72   :  { %3149 = vmatmul.mubr.bf16.gmra.mrb[40].mxu0 %v3281_v48  ;;  %3213 = vmatmul.mubr.bf16.gmra.mrb[40].mxu1 %v3313_v54 }
  0x73   :  { %3152 = vmatprep.mubr.bf16.mxu0 %v3282_v49  ;;  %3216 = vmatprep.mubr.bf16.mxu1 %v3314_v55 }
  0x7a   :  { %3153 = vmatmul.mubr.bf16.gmra.mrb[44].mxu0 %v3283_v52  ;;  %3217 = vmatmul.mubr.bf16.gmra.mrb[44].mxu1 %v3315_v58 }
  0x7b   :  { %3156 = vmatprep.mubr.bf16.mxu0 %v3284_v53  ;;  %3220 = vmatprep.mubr.bf16.mxu1 %v3316_v59 }
  0x82   :  { %3157 = vmatmul.mubr.bf16.gmra.mrb[48].mxu0 %v3285_v56  ;;  %3221 = vmatmul.mubr.bf16.gmra.mrb[48].mxu1 %v3317_v62 }
  0x83   :  { %3160 = vmatprep.mubr.bf16.mxu0 %v3286_v57  ;;  %3224 = vmatprep.mubr.bf16.mxu1 %v3318_v63 }
  0x8a   :  { %3161 = vmatmul.mubr.bf16.gmra.mrb[52].mxu0 %v3287_v60  ;;  %3225 = vmatmul.mubr.bf16.gmra.mrb[52].mxu1 %v3319_v2 }
  0x8b   :  { %3164 = vmatprep.mubr.bf16.mxu0 %v3288_v61  ;;  %3228 = vmatprep.mubr.bf16.mxu1 %v3320_v3 }
  0x92   :  { %3165 = vmatmul.mubr.bf16.gmra.mrb[56].mxu0 %v3289_v0  ;;  %3229 = vmatmul.mubr.bf16.gmra.mrb[56].mxu1 %v3321_v5 }
  0x93   :  { %3168 = vmatprep.mubr.bf16.mxu0 %v3290_v1  ;;  %3232 = vmatprep.mubr.bf16.mxu1 %v3322_v6 }
  0x9a   :  { %3169 = vmatmul.mubr.bf16.gmra.mrb[60].mxu0 %v3291_v4  ;;  %3233 = vmatmul.mubr.bf16.gmra.mrb[60].mxu1 %v3323_v7 }
  0xf5   :  { %v3560_v8 = vpop.f32.mrb[0].mxu0  ;;  %v3586_v19 = vpop.f32.mrb[0].mxu1 }
  0xf6   :  { %5005 = vst [vmem:[#allocation2_spill] sm:$0xff] %v3560_v8  ;;  %v3562_v9 = vpop.f32.mrb[1].mxu0  ;;  %5011 = vst [vmem:[#allocation8_spill] sm:$0xff] %v3586_v19  ;;  %v3591_v22 = vpop.f32.mrb[1].mxu1 }
  0xf7   :  { %5006 = vst [vmem:[#allocation3_spill] sm:$0xff] %v3562_v9  ;;  %v3564_v10 = vpop.f32.mrb[2].mxu0  ;;  %5013 = vst [vmem:[#allocation10_spill] sm:$0xff] %v3591_v22  ;;  %v3597_v25 = vpop.f32.mrb[2].mxu1 }
  0xf8   :  { %5007 = vst [vmem:[#allocation4_spill] sm:$0xff] %v3564_v10  ;;  %v2645_v11 = vpack.c.bf16 %v3564_v10, %v3560_v8  ;;  %v3568_v12 = vpop.f32.mrb[3].mxu0  ;;  %v2805_v28 = vpack.c.bf16 %v3597_v25, %v3586_v19  ;;  %v3604_v29 = vpop.f32.mrb[3].mxu1 }
  0xf9   :  { %5008 = vst [vmem:[#allocation5_spill] sm:$0xff] %v3568_v12  ;;  %v2640_v13 = vpack.c.bf16 %v3568_v12, %v3562_v9  ;;  %v1775_v14 = vadd.f32 %v3568_v12, %v3562_v9  ;;  %5015 = vst [vmem:[#allocation12_spill] sm:$0xff] %v3604_v29  ;;  %v2800_v30 = vpack.c.bf16 %v3604_v29, %v3591_v22 }
  0xfa   :  { %2957 = vst [vmem:[%s4911_s2 + $0x8] sm:$0xff] %v2645_v11   ;;  %2989 = vst [vmem:[%s4911_s2 + $0x108] sm:$0xff] %v2805_v28  }
  0xfb   :  { %2641 = vst [vmem:[%s4911_s2] sm:$0xff] %v2640_v13   ;;  %v1776_v15 = vadd.f32 %v3560_v8, %v1775_v14  ;;  %2988 = vst [vmem:[%s4911_s2 + $0x100] sm:$0xff] %v2800_v30  }
  0xfd   :  { %v1777_v16 = vadd.f32 %v3564_v10, %v1776_v15  ;;  %v3582_v17 = vpop.f32.mrb[4].mxu0  ;;  %v3626_v35 = vpop.f32.mrb[4].mxu1 }
  0xfe   :  { %5009 = vst [vmem:[#allocation6_spill] sm:$0xff] %v3582_v17  ;;  %v3584_v18 = vpop.f32.mrb[5].mxu0  ;;  %v3631_v38 = vpop.f32.mrb[5].mxu1 }
  0xff   :  { %5010 = vst [vmem:[#allocation7_spill] sm:$0xff] %v3584_v18  ;;  %v1778_v20 = vadd.f32 %v1777_v16, %v3584_v18  ;;  %v3589_v21 = vpop.f32.mrb[6].mxu0  ;;  %v3637_v41 = vpop.f32.mrb[6].mxu1 }
 0x100   :  { %5012 = vst [vmem:[#allocation9_spill] sm:$0xff] %v3589_v21  ;;  %v2655_v23 = vpack.c.bf16 %v3589_v21, %v3582_v17  ;;  %v3595_v24 = vpop.f32.mrb[7].mxu0  ;;  %v2815_v44 = vpack.c.bf16 %v3637_v41, %v3626_v35  ;;  %v3644_v45 = vpop.f32.mrb[7].mxu1 }
 0x101   :  { %5014 = vst [vmem:[#allocation11_spill] sm:$0xff] %v3595_v24  ;;  %v2650_v26 = vpack.c.bf16 %v3595_v24, %v3584_v18  ;;  %v1779_v27 = vadd.f32 %v1778_v20, %v3595_v24  ;;  %v2810_v46 = vpack.c.bf16 %v3644_v45, %v3631_v38 }
 0x102   :  { %2959 = vst [vmem:[%s4911_s2 + $0x18] sm:$0xff] %v2655_v23   ;;  %2991 = vst [vmem:[%s4911_s2 + $0x118] sm:$0xff] %v2815_v44  }
 0x103   :  { %2958 = vst [vmem:[%s4911_s2 + $0x10] sm:$0xff] %v2650_v26   ;;  %v1780_v31 = vadd.f32 %v3582_v17, %v1779_v27  ;;  %2990 = vst [vmem:[%s4911_s2 + $0x110] sm:$0xff] %v2810_v46  }
 0x105   :  { %v3621_v32 = vpop.f32.mrb[8].mxu0  ;;  %v1781_v33 = vadd.f32 %v3589_v21, %v1780_v31  ;;  %v3666_v51 = vpop.f32.mrb[8].mxu1 }
 0x106   :  { %5016 = vst [vmem:[#allocation13_spill] sm:$0xff] %v3621_v32  ;;  %v3624_v34 = vpop.f32.mrb[9].mxu0  ;;  %v3671_v54 = vpop.f32.mrb[9].mxu1 }
 0x107   :  { %5017 = vst [vmem:[#allocation14_spill] sm:$0xff] %v3624_v34  ;;  %v1782_v36 = vadd.f32 %v1781_v33, %v3624_v34  ;;  %v3629_v37 = vpop.f32.mrb[10].mxu0  ;;  %v3677_v57 = vpop.f32.mrb[10].mxu1 }
 0x108   :  { %5018 = vst [vmem:[#allocation15_spill] sm:$0xff] %v3629_v37  ;;  %v2665_v39 = vpack.c.bf16 %v3629_v37, %v3621_v32  ;;  %v3635_v40 = vpop.f32.mrb[11].mxu0  ;;  %v2825_v60 = vpack.c.bf16 %v3677_v57, %v3666_v51  ;;  %v3684_v61 = vpop.f32.mrb[11].mxu1 }
 0x109   :  { %5019 = vst [vmem:[#allocation16_spill] sm:$0xff] %v3635_v40  ;;  %v2660_v42 = vpack.c.bf16 %v3635_v40, %v3624_v34  ;;  %v1783_v43 = vadd.f32 %v1782_v36, %v3635_v40  ;;  %v2820_v62 = vpack.c.bf16 %v3684_v61, %v3671_v54 }
 0x10a   :  { %2961 = vst [vmem:[%s4911_s2 + $0x28] sm:$0xff] %v2665_v39   ;;  %2993 = vst [vmem:[%s4911_s2 + $0x128] sm:$0xff] %v2825_v60  }
 0x10b   :  { %2960 = vst [vmem:[%s4911_s2 + $0x20] sm:$0xff] %v2660_v42   ;;  %v1784_v47 = vadd.f32 %v3621_v32, %v1783_v43  ;;  %2992 = vst [vmem:[%s4911_s2 + $0x120] sm:$0xff] %v2820_v62  }
 0x10d   :  { %v3661_v48 = vpop.f32.mrb[12].mxu0  ;;  %v1785_v49 = vadd.f32 %v3629_v37, %v1784_v47  ;;  %v3706_v3 = vpop.f32.mrb[12].mxu1 }
 0x10e   :  { %5020 = vst [vmem:[#allocation17_spill] sm:$0xff] %v3661_v48  ;;  %v3664_v50 = vpop.f32.mrb[13].mxu0  ;;  %v3711_v6 = vpop.f32.mrb[13].mxu1 }
 0x10f   :  { %5021 = vst [vmem:[#allocation18_spill] sm:$0xff] %v3664_v50  ;;  %v1786_v52 = vadd.f32 %v1785_v49, %v3664_v50  ;;  %v3669_v53 = vpop.f32.mrb[14].mxu0  ;;  %v3717_v13 = vpop.f32.mrb[14].mxu1 }
 0x110   :  { %5022 = vst [vmem:[#allocation19_spill] sm:$0xff] %v3669_v53  ;;  %v2675_v55 = vpack.c.bf16 %v3669_v53, %v3661_v48  ;;  %v3675_v56 = vpop.f32.mrb[15].mxu0  ;;  %v2835_v16 = vpack.c.bf16 %v3717_v13, %v3706_v3  ;;  %v3724_v20 = vpop.f32.mrb[15].mxu1 }
 0x111   :  { %5023 = vst [vmem:[#allocation20_spill] sm:$0xff] %v3675_v56  ;;  %v2670_v58 = vpack.c.bf16 %v3675_v56, %v3664_v50  ;;  %v1787_v59 = vadd.f32 %v1786_v52, %v3675_v56  ;;  %v2830_v23 = vpack.c.bf16 %v3724_v20, %v3711_v6 }
 0x112   :  { %2963 = vst [vmem:[%s4911_s2 + $0x38] sm:$0xff] %v2675_v55   ;;  %2995 = vst [vmem:[%s4911_s2 + $0x138] sm:$0xff] %v2835_v16  }
 0x113   :  { %2962 = vst [vmem:[%s4911_s2 + $0x30] sm:$0xff] %v2670_v58   ;;  %v1788_v63 = vadd.f32 %v3661_v48, %v1787_v59  ;;  %2994 = vst [vmem:[%s4911_s2 + $0x130] sm:$0xff] %v2830_v23  }
 0x115   :  { %v3701_v0 = vpop.f32.mrb[16].mxu0  ;;  %v1789_v1 = vadd.f32 %v3669_v53, %v1788_v63  ;;  %v3746_v31 = vpop.f32.mrb[16].mxu1 }
 0x116   :  { %5024 = vst [vmem:[#allocation21_spill] sm:$0xff] %v3701_v0  ;;  %v3704_v2 = vpop.f32.mrb[17].mxu0  ;;  %v3751_v39 = vpop.f32.mrb[17].mxu1 }
 0x117   :  { %5025 = vst [vmem:[#allocation22_spill] sm:$0xff] %v3704_v2  ;;  %v1790_v4 = vadd.f32 %v1789_v1, %v3704_v2  ;;  %v3709_v5 = vpop.f32.mrb[18].mxu0  ;;  %v3757_v44 = vpop.f32.mrb[18].mxu1 }
 0x118   :  { %5026 = vst [vmem:[#allocation23_spill] sm:$0xff] %v3709_v5  ;;  %v2685_v7 = vpack.c.bf16 %v3709_v5, %v3701_v0  ;;  %v3715_v11 = vpop.f32.mrb[19].mxu0  ;;  %v2845_v49 = vpack.c.bf16 %v3757_v44, %v3746_v31  ;;  %v3764_v52 = vpop.f32.mrb[19].mxu1 }
 0x119   :  { %5027 = vst [vmem:[#allocation24_spill] sm:$0xff] %v3715_v11  ;;  %v2680_v14 = vpack.c.bf16 %v3715_v11, %v3704_v2  ;;  %v1791_v15 = vadd.f32 %v1790_v4, %v3715_v11  ;;  %v2840_v55 = vpack.c.bf16 %v3764_v52, %v3751_v39 }
 0x11a   :  { %2965 = vst [vmem:[%s4911_s2 + $0x48] sm:$0xff] %v2685_v7   ;;  %2997 = vst [vmem:[%s4911_s2 + $0x148] sm:$0xff] %v2845_v49  }
 0x11b   :  { %2964 = vst [vmem:[%s4911_s2 + $0x40] sm:$0xff] %v2680_v14   ;;  %v1792_v26 = vadd.f32 %v3701_v0, %v1791_v15  ;;  %2996 = vst [vmem:[%s4911_s2 + $0x140] sm:$0xff] %v2840_v55  }
 0x11d   :  { %v3741_v27 = vpop.f32.mrb[20].mxu0  ;;  %v1793_v28 = vadd.f32 %v3709_v5, %v1792_v26  ;;  %v3786_v63 = vpop.f32.mrb[20].mxu1 }
 0x11e   :  { %5028 = vst [vmem:[#allocation25_spill] sm:$0xff] %v3741_v27  ;;  %v3744_v30 = vpop.f32.mrb[21].mxu0  ;;  %v3791_v7 = vpop.f32.mrb[21].mxu1 }
 0x11f   :  { %5029 = vst [vmem:[#allocation26_spill] sm:$0xff] %v3744_v30  ;;  %v1794_v33 = vadd.f32 %v1793_v28, %v3744_v30  ;;  %v3749_v36 = vpop.f32.mrb[22].mxu0  ;;  %v3797_v16 = vpop.f32.mrb[22].mxu1 }
 0x120   :  { %5030 = vst [vmem:[#allocation27_spill] sm:$0xff] %v3749_v36  ;;  %v2695_v42 = vpack.c.bf16 %v3749_v36, %v3741_v27  ;;  %v3755_v43 = vpop.f32.mrb[23].mxu0  ;;  %v2855_v28 = vpack.c.bf16 %v3797_v16, %v3786_v63 }
 0x121   :  { %5031 = vst [vmem:[#allocation28_spill] sm:$0xff] %v3755_v43  ;;  %v2690_v46 = vpack.c.bf16 %v3755_v43, %v3744_v30  ;;  %v1795_v47 = vadd.f32 %v1794_v33, %v3755_v43  ;;  %v3804_v33 = vpop.f32.mrb[23].mxu1 }
 0x122   :  { %2967 = vst [vmem:[%s4911_s2 + $0x58] sm:$0xff] %v2695_v42   ;;  %v2850_v42 = vpack.c.bf16 %v3804_v33, %v3791_v7  ;;  %2999 = vst [vmem:[%s4911_s2 + $0x158] sm:$0xff] %v2855_v28  }
 0x123   :  { %2966 = vst [vmem:[%s4911_s2 + $0x50] sm:$0xff] %v2690_v46   ;;  %v1796_v58 = vadd.f32 %v3741_v27, %v1795_v47 }
 0x124   :  { %2998 = vst [vmem:[%s4911_s2 + $0x150] sm:$0xff] %v2850_v42  }
 0x125   :  { %v3781_v59 = vpop.f32.mrb[24].mxu0  ;;  %v1797_v60 = vadd.f32 %v3749_v36, %v1796_v58  ;;  %v3826_v58 = vpop.f32.mrb[24].mxu1 }
 0x126   :  { %5032 = vst [vmem:[#allocation29_spill] sm:$0xff] %v3781_v59  ;;  %v3784_v62 = vpop.f32.mrb[25].mxu0 }
 0x127   :  { %5033 = vst [vmem:[#allocation30_spill] sm:$0xff] %v3784_v62  ;;  %v1798_v1 = vadd.f32 %v1797_v60, %v3784_v62  ;;  %v3789_v4 = vpop.f32.mrb[26].mxu0 }
 0x128   :  { %5034 = vst [vmem:[#allocation31_spill] sm:$0xff] %v3789_v4  ;;  %v2705_v14 = vpack.c.bf16 %v3789_v4, %v3781_v59  ;;  %v3795_v15 = vpop.f32.mrb[27].mxu0 }
 0x129   :  { %5035 = vst [vmem:[#allocation32_spill] sm:$0xff] %v3795_v15  ;;  %v2700_v23 = vpack.c.bf16 %v3795_v15, %v3784_v62  ;;  %v1799_v26 = vadd.f32 %v1798_v1, %v3795_v15 }
 0x12a   :  { %2969 = vst [vmem:[%s4911_s2 + $0x68] sm:$0xff] %v2705_v14   ;;  %v3831_v14 = vpop.f32.mrb[25].mxu1 }
 0x12b   :  { %2968 = vst [vmem:[%s4911_s2 + $0x60] sm:$0xff] %v2700_v23   ;;  %v1800_v46 = vadd.f32 %v3781_v59, %v1799_v26  ;;  %v3837_v28 = vpop.f32.mrb[26].mxu1 }
 0x12d   :  { %v3821_v47 = vpop.f32.mrb[28].mxu0  ;;  %v1801_v49 = vadd.f32 %v3789_v4, %v1800_v46  ;;  %v2865_v4 = vpack.c.bf16 %v3837_v28, %v3826_v58 }
 0x12e   :  { %5036 = vst [vmem:[#allocation33_spill] sm:$0xff] %v3821_v47  ;;  %v3824_v55 = vpop.f32.mrb[29].mxu0 }
 0x12f   :  { %5037 = vst [vmem:[#allocation34_spill] sm:$0xff] %v3824_v55  ;;  %v1802_v60 = vadd.f32 %v1801_v49, %v3824_v55  ;;  %v3829_v1 = vpop.f32.mrb[30].mxu0  ;;  %v3844_v49 = vpop.f32.mrb[27].mxu1  ;;  %3001 = vst [vmem:[%s4911_s2 + $0x168] sm:$0xff] %v2865_v4  }
 0x130   :  { %5038 = vst [vmem:[#allocation35_spill] sm:$0xff] %v3829_v1  ;;  %v2715_v23 = vpack.c.bf16 %v3829_v1, %v3821_v47  ;;  %v3835_v26 = vpop.f32.mrb[31].mxu0  ;;  %v2860_v59 = vpack.c.bf16 %v3844_v49, %v3831_v14  ;;  %v3866_v15 = vpop.f32.mrb[28].mxu1 }
 0x131   :  { %5039 = vst [vmem:[#allocation36_spill] sm:$0xff] %v3835_v26  ;;  %v2710_v42 = vpack.c.bf16 %v3835_v26, %v3824_v55  ;;  %v1803_v46 = vadd.f32 %v1802_v60, %v3835_v26 }
 0x132   :  { %2971 = vst [vmem:[%s4911_s2 + $0x78] sm:$0xff] %v2715_v23   ;;  %3000 = vst [vmem:[%s4911_s2 + $0x160] sm:$0xff] %v2860_v59  }
 0x133   :  { %2970 = vst [vmem:[%s4911_s2 + $0x70] sm:$0xff] %v2710_v42   ;;  %v1804_v55 = vadd.f32 %v3821_v47, %v1803_v46  ;;  %v3871_v46 = vpop.f32.mrb[29].mxu1 }
 0x134   :  { %v3877_v59 = vpop.f32.mrb[30].mxu1 }
 0x135   :  { %v3861_v60 = vpop.f32.mrb[32].mxu0  ;;  %v1805_v23 = vadd.f32 %v3829_v1, %v1804_v55  ;;  %v2875_v36 = vpack.c.bf16 %v3877_v59, %v3866_v15 }
 0x136   :  { %5040 = vst [vmem:[#allocation37_spill] sm:$0xff] %v3861_v60  ;;  %v3864_v26 = vpop.f32.mrb[33].mxu0 }
 0x137   :  { %5041 = vst [vmem:[#allocation38_spill] sm:$0xff] %v3864_v26  ;;  %v1806_v42 = vadd.f32 %v1805_v23, %v3864_v26  ;;  %v3869_v62 = vpop.f32.mrb[34].mxu0  ;;  %v3884_v23 = vpop.f32.mrb[31].mxu1  ;;  %3003 = vst [vmem:[%s4911_s2 + $0x178] sm:$0xff] %v2875_v36  }
 0x138   :  { %5042 = vst [vmem:[#allocation39_spill] sm:$0xff] %v3869_v62  ;;  %v2725_v4 = vpack.c.bf16 %v3869_v62, %v3861_v60  ;;  %v3875_v47 = vpop.f32.mrb[35].mxu0  ;;  %v2870_v27 = vpack.c.bf16 %v3884_v23, %v3871_v46  ;;  %v3906_v30 = vpop.f32.mrb[32].mxu1 }
 0x139   :  { %5043 = vst [vmem:[#allocation40_spill] sm:$0xff] %v3875_v47  ;;  %v2720_v55 = vpack.c.bf16 %v3875_v47, %v3864_v26  ;;  %v1807_v1 = vadd.f32 %v1806_v42, %v3875_v47 }
 0x13a   :  { %2973 = vst [vmem:[%s4911_s2 + $0x88] sm:$0xff] %v2725_v4   ;;  %3002 = vst [vmem:[%s4911_s2 + $0x170] sm:$0xff] %v2870_v27  }
 0x13b   :  { %2972 = vst [vmem:[%s4911_s2 + $0x80] sm:$0xff] %v2720_v55   ;;  %v1808_v26 = vadd.f32 %v3861_v60, %v1807_v1  ;;  %v3911_v1 = vpop.f32.mrb[33].mxu1 }
 0x13c   :  { %v3917_v27 = vpop.f32.mrb[34].mxu1 }
 0x13d   :  { %v3901_v42 = vpop.f32.mrb[36].mxu0  ;;  %v1809_v4 = vadd.f32 %v3869_v62, %v1808_v26  ;;  %v2885_v2 = vpack.c.bf16 %v3917_v27, %v3906_v30 }
 0x13e   :  { %5044 = vst [vmem:[#allocation41_spill] sm:$0xff] %v3901_v42  ;;  %v3904_v43 = vpop.f32.mrb[37].mxu0 }
 0x13f   :  { %5045 = vst [vmem:[#allocation42_spill] sm:$0xff] %v3904_v43  ;;  %v1810_v55 = vadd.f32 %v1809_v4, %v3904_v43  ;;  %v3909_v5 = vpop.f32.mrb[38].mxu0  ;;  %v3924_v4 = vpop.f32.mrb[35].mxu1  ;;  %3005 = vst [vmem:[%s4911_s2 + $0x188] sm:$0xff] %v2885_v2  }
 0x140   :  { %5046 = vst [vmem:[#allocation43_spill] sm:$0xff] %v3909_v5  ;;  %v2735_v36 = vpack.c.bf16 %v3909_v5, %v3901_v42  ;;  %v3915_v0 = vpop.f32.mrb[39].mxu0  ;;  %v2880_v53 = vpack.c.bf16 %v3924_v4, %v3911_v1  ;;  %v3946_v50 = vpop.f32.mrb[36].mxu1 }
 0x141   :  { %5047 = vst [vmem:[#allocation44_spill] sm:$0xff] %v3915_v0  ;;  %v2730_v26 = vpack.c.bf16 %v3915_v0, %v3904_v43  ;;  %v1811_v11 = vadd.f32 %v1810_v55, %v3915_v0 }
 0x142   :  { %2975 = vst [vmem:[%s4911_s2 + $0x98] sm:$0xff] %v2735_v36   ;;  %3004 = vst [vmem:[%s4911_s2 + $0x180] sm:$0xff] %v2880_v53  }
 0x143   :  { %2974 = vst [vmem:[%s4911_s2 + $0x90] sm:$0xff] %v2730_v26   ;;  %v1812_v48 = vadd.f32 %v3901_v42, %v1811_v11  ;;  %v3951_v11 = vpop.f32.mrb[37].mxu1 }
 0x144   :  { %v3957_v53 = vpop.f32.mrb[38].mxu1 }
 0x145   :  { %v3941_v55 = vpop.f32.mrb[40].mxu0  ;;  %v1813_v36 = vadd.f32 %v3909_v5, %v1812_v48  ;;  %5052 = vst [vmem:[#allocation49_spill] sm:$0xff] %v3957_v53  ;;  %v2895_v34 = vpack.c.bf16 %v3957_v53, %v3946_v50 }
 0x146   :  { %5048 = vst [vmem:[#allocation45_spill] sm:$0xff] %v3941_v55  ;;  %v3944_v56 = vpop.f32.mrb[41].mxu0 }
 0x147   :  { %5049 = vst [vmem:[#allocation46_spill] sm:$0xff] %v3944_v56  ;;  %v1814_v26 = vadd.f32 %v1813_v36, %v3944_v56  ;;  %v3949_v37 = vpop.f32.mrb[42].mxu0  ;;  %v3964_v36 = vpop.f32.mrb[39].mxu1  ;;  %3007 = vst [vmem:[%s4911_s2 + $0x198] sm:$0xff] %v2895_v34  }
 0x148   :  { %5050 = vst [vmem:[#allocation47_spill] sm:$0xff] %v3949_v37  ;;  %v2745_v2 = vpack.c.bf16 %v3949_v37, %v3941_v55  ;;  %v3955_v32 = vpop.f32.mrb[43].mxu0  ;;  %v2890_v21 = vpack.c.bf16 %v3964_v36, %v3951_v11  ;;  %v3986_v18 = vpop.f32.mrb[40].mxu1 }
 0x149   :  { %5051 = vst [vmem:[#allocation48_spill] sm:$0xff] %v3955_v32  ;;  %v2740_v48 = vpack.c.bf16 %v3955_v32, %v3944_v56  ;;  %v1815_v40 = vadd.f32 %v1814_v26, %v3955_v32  ;;  %5055 = vst [vmem:[#allocation52_spill] sm:$0xff] %v3986_v18 }
 0x14a   :  { %2977 = vst [vmem:[%s4911_s2 + $0xa8] sm:$0xff] %v2745_v2   ;;  %3006 = vst [vmem:[%s4911_s2 + $0x190] sm:$0xff] %v2890_v21  }
 0x14b   :  { %2976 = vst [vmem:[%s4911_s2 + $0xa0] sm:$0xff] %v2740_v48   ;;  %v1816_v17 = vadd.f32 %v3941_v55, %v1815_v40  ;;  %v3991_v40 = vpop.f32.mrb[41].mxu1 }
 0x14c   :  { %5057 = vst [vmem:[#allocation54_spill] sm:$0xff] %v3991_v40  ;;  %v3997_v21 = vpop.f32.mrb[42].mxu1 }
 0x14d   :  { %v3981_v26 = vpop.f32.mrb[44].mxu0  ;;  %v1817_v2 = vadd.f32 %v3949_v37, %v1816_v17  ;;  %5059 = vst [vmem:[#allocation56_spill] sm:$0xff] %v3997_v21  ;;  %v2905_v9 = vpack.c.bf16 %v3997_v21, %v3986_v18 }
 0x14e   :  { %5053 = vst [vmem:[#allocation50_spill] sm:$0xff] %v3981_v26  ;;  %v3984_v24 = vpop.f32.mrb[45].mxu0 }
 0x14f   :  { %5054 = vst [vmem:[#allocation51_spill] sm:$0xff] %v3984_v24  ;;  %v1818_v48 = vadd.f32 %v1817_v2, %v3984_v24  ;;  %v3989_v10 = vpop.f32.mrb[46].mxu0  ;;  %v4004_v2 = vpop.f32.mrb[43].mxu1  ;;  %3009 = vst [vmem:[%s4911_s2 + $0x1a8] sm:$0xff] %v2905_v9  }
 0x150   :  { %5056 = vst [vmem:[#allocation53_spill] sm:$0xff] %v3989_v10  ;;  %v2755_v34 = vpack.c.bf16 %v3989_v10, %v3981_v26  ;;  %v3995_v8 = vpop.f32.mrb[47].mxu0  ;;  %5060 = vst [vmem:[#allocation57_spill] sm:$0xff] %v4004_v2  ;;  %v2900_v37 = vpack.c.bf16 %v4004_v2, %v3991_v40  ;;  %v4026_v55 = vpop.f32.mrb[44].mxu1 }
 0x151   :  { %5058 = vst [vmem:[#allocation55_spill] sm:$0xff] %v3995_v8  ;;  %v2750_v17 = vpack.c.bf16 %v3995_v8, %v3984_v24  ;;  %v1819_v12 = vadd.f32 %v1818_v48, %v3995_v8 }
 0x152   :  { %2979 = vst [vmem:[%s4911_s2 + $0xb8] sm:$0xff] %v2755_v34   ;;  %3008 = vst [vmem:[%s4911_s2 + $0x1a0] sm:$0xff] %v2900_v37  }
 0x153   :  { %2978 = vst [vmem:[%s4911_s2 + $0xb0] sm:$0xff] %v2750_v17   ;;  %v1820_v24 = vadd.f32 %v3981_v26, %v1819_v12  ;;  %v4031_v12 = vpop.f32.mrb[45].mxu1 }
 0x154   :  { %5064 = vst [vmem:[#allocation61_spill] sm:$0xff] %v4031_v12  ;;  %v4037_v37 = vpop.f32.mrb[46].mxu1 }
 0x155   :  { %v4021_v48 = vpop.f32.mrb[48].mxu0  ;;  %v1821_v34 = vadd.f32 %v3989_v10, %v1820_v24  ;;  %5066 = vst [vmem:[#allocation63_spill] sm:$0xff] %v4037_v37  ;;  %v2915_v56 = vpack.c.bf16 %v4037_v37, %v4026_v55 }
 0x156   :  { %5061 = vst [vmem:[#allocation58_spill] sm:$0xff] %v4021_v48  ;;  %v4024_v8 = vpop.f32.mrb[49].mxu0 }
 0x157   :  { %5062 = vst [vmem:[#allocation59_spill] sm:$0xff] %v4024_v8  ;;  %v1822_v17 = vadd.f32 %v1821_v34, %v4024_v8  ;;  %v4029_v32 = vpop.f32.mrb[50].mxu0  ;;  %v4044_v34 = vpop.f32.mrb[47].mxu1  ;;  %3011 = vst [vmem:[%s4911_s2 + $0x1b8] sm:$0xff] %v2915_v56  }
 0x158   :  { %5063 = vst [vmem:[#allocation60_spill] sm:$0xff] %v4029_v32  ;;  %v2765_v9 = vpack.c.bf16 %v4029_v32, %v4021_v48  ;;  %v4035_v26 = vpop.f32.mrb[51].mxu0  ;;  %v2910_v5 = vpack.c.bf16 %v4044_v34, %v4031_v12  ;;  %v4066_v42 = vpop.f32.mrb[48].mxu1 }
 0x159   :  { %5065 = vst [vmem:[#allocation62_spill] sm:$0xff] %v4035_v26  ;;  %v2760_v24 = vpack.c.bf16 %v4035_v26, %v4024_v8  ;;  %v1823_v10 = vadd.f32 %v1822_v17, %v4035_v26  ;;  %5069 = vst [vmem:[#allocation66_spill] sm:$0xff] %v4066_v42 }
 0x15a   :  { %2981 = vst [vmem:[%s4911_s2 + $0xc8] sm:$0xff] %v2765_v9   ;;  %3010 = vst [vmem:[%s4911_s2 + $0x1b0] sm:$0xff] %v2910_v5  }
 0x15b   :  { %2980 = vst [vmem:[%s4911_s2 + $0xc0] sm:$0xff] %v2760_v24   ;;  %v1824_v8 = vadd.f32 %v4021_v48, %v1823_v10  ;;  %v4071_v10 = vpop.f32.mrb[49].mxu1 }
 0x15c   :  { %5071 = vst [vmem:[#allocation68_spill] sm:$0xff] %v4071_v10  ;;  %v4077_v5 = vpop.f32.mrb[50].mxu1 }
 0x15d   :  { %v4061_v17 = vpop.f32.mrb[52].mxu0  ;;  %v1825_v9 = vadd.f32 %v4029_v32, %v1824_v8  ;;  %5073 = vst [vmem:[#allocation70_spill] sm:$0xff] %v4077_v5  ;;  %v2925_v43 = vpack.c.bf16 %v4077_v5, %v4066_v42 }
 0x15e   :  { %5067 = vst [vmem:[#allocation64_spill] sm:$0xff] %v4061_v17  ;;  %v4064_v26 = vpop.f32.mrb[53].mxu0 }
 0x15f   :  { %5068 = vst [vmem:[#allocation65_spill] sm:$0xff] %v4064_v26  ;;  %v1826_v24 = vadd.f32 %v1825_v9, %v4064_v26  ;;  %v4069_v0 = vpop.f32.mrb[54].mxu0  ;;  %v4084_v9 = vpop.f32.mrb[51].mxu1  ;;  %3013 = vst [vmem:[%s4911_s2 + $0x1c8] sm:$0xff] %v2925_v43  }
 0x160   :  { %5070 = vst [vmem:[#allocation67_spill] sm:$0xff] %v4069_v0  ;;  %v2775_v56 = vpack.c.bf16 %v4069_v0, %v4061_v17  ;;  %v4075_v48 = vpop.f32.mrb[55].mxu0  ;;  %v2920_v62 = vpack.c.bf16 %v4084_v9, %v4071_v10  ;;  %v4106_v60 = vpop.f32.mrb[52].mxu1 }
 0x161   :  { %5072 = vst [vmem:[#allocation69_spill] sm:$0xff] %v4075_v48  ;;  %v2770_v8 = vpack.c.bf16 %v4075_v48, %v4064_v26  ;;  %v1827_v32 = vadd.f32 %v1826_v24, %v4075_v48  ;;  %5076 = vst [vmem:[#allocation73_spill] sm:$0xff] %v4106_v60 }
 0x162   :  { %2983 = vst [vmem:[%s4911_s2 + $0xd8] sm:$0xff] %v2775_v56   ;;  %3012 = vst [vmem:[%s4911_s2 + $0x1c0] sm:$0xff] %v2920_v62  }
 0x163   :  { %2982 = vst [vmem:[%s4911_s2 + $0xd0] sm:$0xff] %v2770_v8   ;;  %v1828_v26 = vadd.f32 %v4061_v17, %v1827_v32  ;;  %v4111_v32 = vpop.f32.mrb[53].mxu1 }
 0x164   :  { %5078 = vst [vmem:[#allocation75_spill] sm:$0xff] %v4111_v32  ;;  %v4117_v62 = vpop.f32.mrb[54].mxu1 }
 0x165   :  { %v4101_v24 = vpop.f32.mrb[56].mxu0  ;;  %v1829_v56 = vadd.f32 %v4069_v0, %v1828_v26  ;;  %5080 = vst [vmem:[#allocation77_spill] sm:$0xff] %v4117_v62  ;;  %v2935_v5 = vpack.c.bf16 %v4117_v62, %v4106_v60 }
 0x166   :  { %5074 = vst [vmem:[#allocation71_spill] sm:$0xff] %v4101_v24  ;;  %v4104_v48 = vpop.f32.mrb[57].mxu0 }
 0x167   :  { %5075 = vst [vmem:[#allocation72_spill] sm:$0xff] %v4104_v48  ;;  %v1830_v8 = vadd.f32 %v1829_v56, %v4104_v48  ;;  %v4109_v47 = vpop.f32.mrb[58].mxu0  ;;  %v4124_v56 = vpop.f32.mrb[55].mxu1  ;;  %3015 = vst [vmem:[%s4911_s2 + $0x1d8] sm:$0xff] %v2935_v5  }
 0x168   :  { %5077 = vst [vmem:[#allocation74_spill] sm:$0xff] %v4109_v47  ;;  %v2785_v43 = vpack.c.bf16 %v4109_v47, %v4101_v24  ;;  %v4115_v17 = vpop.f32.mrb[59].mxu0  ;;  %5081 = vst [vmem:[#allocation78_spill] sm:$0xff] %v4124_v56  ;;  %v2930_v42 = vpack.c.bf16 %v4124_v56, %v4111_v32  ;;  %v4146_v62 = vpop.f32.mrb[56].mxu1 }
 0x169   :  { %5079 = vst [vmem:[#allocation76_spill] sm:$0xff] %v4115_v17  ;;  %v2780_v26 = vpack.c.bf16 %v4115_v17, %v4104_v48  ;;  %v1831_v0 = vadd.f32 %v1830_v8, %v4115_v17  ;;  %5084 = vst [vmem:[#allocation81_spill] sm:$0xff] %v4146_v62 }
 0x16a   :  { %2985 = vst [vmem:[%s4911_s2 + $0xe8] sm:$0xff] %v2785_v43   ;;  %3014 = vst [vmem:[%s4911_s2 + $0x1d0] sm:$0xff] %v2930_v42  }
 0x16b   :  { %2984 = vst [vmem:[%s4911_s2 + $0xe0] sm:$0xff] %v2780_v26   ;;  %v1832_v48 = vadd.f32 %v4101_v24, %v1831_v0  ;;  %v4151_v0 = vpop.f32.mrb[57].mxu1 }
 0x16c   :  { %v4157_v42 = vpop.f32.mrb[58].mxu1 }
 0x16d   :  { %v4141_v8 = vpop.f32.mrb[60].mxu0  ;;  %v1833_v43 = vadd.f32 %v4109_v47, %v1832_v48  ;;  %5087 = vst [vmem:[#allocation84_spill] sm:$0xff] %v4157_v42  ;;  %v2945_v56 = vpack.c.bf16 %v4157_v42, %v4146_v62 }
 0x16e   :  { %5082 = vst [vmem:[#allocation79_spill] sm:$0xff] %v4141_v8  ;;  %v4144_v17 = vpop.f32.mrb[61].mxu0 }
 0x16f   :  { %5083 = vst [vmem:[#allocation80_spill] sm:$0xff] %v4144_v17  ;;  %v1834_v26 = vadd.f32 %v1833_v43, %v4144_v17  ;;  %v4149_v60 = vpop.f32.mrb[62].mxu0  ;;  %v4164_v43 = vpop.f32.mrb[59].mxu1  ;;  %3017 = vst [vmem:[%s4911_s2 + $0x1e8] sm:$0xff] %v2945_v56  }
 0x170   :  { %5085 = vst [vmem:[#allocation82_spill] sm:$0xff] %v4149_v60  ;;  %v2795_v5 = vpack.c.bf16 %v4149_v60, %v4141_v8  ;;  %v4155_v24 = vpop.f32.mrb[63].mxu0  ;;  %v2940_v32 = vpack.c.bf16 %v4164_v43, %v4151_v0 }
 0x171   :  { %5086 = vst [vmem:[#allocation83_spill] sm:$0xff] %v4155_v24  ;;  %v2790_v48 = vpack.c.bf16 %v4155_v24, %v4144_v17  ;;  %v1835_v47 = vadd.f32 %v1834_v26, %v4155_v24 }
 0x172   :  { %2987 = vst [vmem:[%s4911_s2 + $0xf8] sm:$0xff] %v2795_v5   ;;  %3016 = vst [vmem:[%s4911_s2 + $0x1e0] sm:$0xff] %v2940_v32   ;;  %v4182_v5 = vpop.f32.mrb[60].mxu1 }
 0x173   :  { %2986 = vst [vmem:[%s4911_s2 + $0xf0] sm:$0xff] %v2790_v48   ;;  %v1836_v17 = vadd.f32 %v4141_v8, %v1835_v47  ;;  %v4185_v42 = vpop.f32.mrb[61].mxu1 }
 0x174   :  { %v4187_v62 = vpop.f32.mrb[62].mxu1 }
 0x175   :  { %v1837_v26 = vadd.f32 %v4149_v60, %v1836_v17  ;;  %v2955_v48 = vpack.c.bf16 %v4187_v62, %v4182_v5  ;;  %v4192_v56 = vpop.f32.mrb[63].mxu1 }
 0x176   :  { %v2950_v32 = vpack.c.bf16 %v4192_v56, %v4185_v42 }
 0x177   :  { %v1838_v24 = vadd.f32 %v1837_v26, %v3591_v22  ;;  %3019 = vst [vmem:[%s4911_s2 + $0x1f8] sm:$0xff] %v2955_v48  }
 0x178   :  { %3018 = vst [vmem:[%s4911_s2 + $0x1f0] sm:$0xff] %v2950_v32  }
 0x179   :  { %v1839_v47 = vadd.f32 %v1838_v24, %v3604_v29 }
 0x17b   :  { %v1840_v17 = vadd.f32 %v3586_v19, %v1839_v47 }
 0x17d   :  { %v1841_v24 = vadd.f32 %v3597_v25, %v1840_v17 }
 0x17f   :  { %v1842_v26 = vadd.f32 %v1841_v24, %v3631_v38 }
 0x181   :  { %v1843_v29 = vadd.f32 %v1842_v26, %v3644_v45 }
 0x183   :  { %v1844_v22 = vadd.f32 %v3626_v35, %v1843_v29 }
 0x185   :  { %v1845_v60 = vadd.f32 %v3637_v41, %v1844_v22 }
 0x187   :  { %v1846_v47 = vadd.f32 %v1845_v60, %v3671_v54 }
 0x189   :  { %v1847_v19 = vadd.f32 %v1846_v47, %v3684_v61 }
 0x18b   :  { %v1848_v48 = vadd.f32 %v3666_v51, %v1847_v19 }
 0x18d   :  { %v1849_v8 = vadd.f32 %v3677_v57, %v1848_v48 }
 0x18f   :  { %v1850_v32 = vadd.f32 %v1849_v8, %v3711_v6 }
 0x191   :  { %v1851_v17 = vadd.f32 %v1850_v32, %v3724_v20 }
 0x193   :  { %v1852_v24 = vadd.f32 %v3706_v3, %v1851_v17 }
 0x195   :  { %v1853_v26 = vadd.f32 %v3717_v13, %v1852_v24 }
 0x197   :  { %v1854_v29 = vadd.f32 %v1853_v26, %v3751_v39 }
 0x199   :  { %v1855_v22 = vadd.f32 %v1854_v29, %v3764_v52 }
 0x19b   :  { %v1856_v60 = vadd.f32 %v3746_v31, %v1855_v22 }
 0x19d   :  { %v1857_v47 = vadd.f32 %v3757_v44, %v1856_v60 }
 0x19f   :  { %v1858_v19 = vadd.f32 %v1857_v47, %v3791_v7 }
 0x1a1   :  { %v1859_v48 = vadd.f32 %v1858_v19, %v3804_v33 }
 0x1a3   :  { %v1860_v8 = vadd.f32 %v3786_v63, %v1859_v48 }
 0x1a5   :  { %v1861_v32 = vadd.f32 %v3797_v16, %v1860_v8 }
 0x1a7   :  { %v1862_v17 = vadd.f32 %v1861_v32, %v3831_v14 }
 0x1a9   :  { %v1863_v24 = vadd.f32 %v1862_v17, %v3844_v49 }
 0x1ab   :  { %v1864_v26 = vadd.f32 %v3826_v58, %v1863_v24 }
 0x1ad   :  { %v1865_v29 = vadd.f32 %v3837_v28, %v1864_v26 }
 0x1af   :  { %v1866_v22 = vadd.f32 %v1865_v29, %v3871_v46 }
 0x1b1   :  { %v1867_v60 = vadd.f32 %v1866_v22, %v3884_v23 }
 0x1b3   :  { %v1868_v47 = vadd.f32 %v3866_v15, %v1867_v60 }
 0x1b5   :  { %v1869_v19 = vadd.f32 %v3877_v59, %v1868_v47 }
 0x1b7   :  { %v1870_v48 = vadd.f32 %v1869_v19, %v3911_v1 }
 0x1b9   :  { %v1871_v8 = vadd.f32 %v1870_v48, %v3924_v4 }
 0x1bb   :  { %v1872_v32 = vadd.f32 %v3906_v30, %v1871_v8 }
 0x1bd   :  { %v1873_v17 = vadd.f32 %v3917_v27, %v1872_v32 }
 0x1bf   :  { %v1874_v24 = vadd.f32 %v1873_v17, %v3951_v11 }
 0x1c1   :  { %v1875_v26 = vadd.f32 %v1874_v24, %v3964_v36 }
 0x1c3   :  { %v1876_v29 = vadd.f32 %v3946_v50, %v1875_v26 }
 0x1c5   :  { %v1877_v22 = vadd.f32 %v3957_v53, %v1876_v29  ;;  %v5088_v53 = vld [vmem:[#allocation66_spill] sm:$0xff] }
 0x1c7   :  { %v1878_v60 = vadd.f32 %v1877_v22, %v3991_v40  ;;  %v5089_v40 = vld [vmem:[#allocation70_spill] sm:$0xff] }
 0x1c9   :  { %v1879_v47 = vadd.f32 %v1878_v60, %v4004_v2  ;;  %v5090_v2 = vld [vmem:[#allocation75_spill] sm:$0xff] }
 0x1cb   :  { %v1880_v19 = vadd.f32 %v3986_v18, %v1879_v47  ;;  %v5091_v18 = vld [vmem:[#allocation78_spill] sm:$0xff] }
 0x1cd   :  { %v1881_v48 = vadd.f32 %v3997_v21, %v1880_v19  ;;  %v5092_v21 = vld [vmem:[#allocation73_spill] sm:$0xff] }
 0x1cf   :  { %v1882_v8 = vadd.f32 %v1881_v48, %v4031_v12  ;;  %v5093_v12 = vld [vmem:[#allocation77_spill] sm:$0xff] }
 0x1d1   :  { %v1883_v32 = vadd.f32 %v1882_v8, %v4044_v34 }
 0x1d3   :  { %v1884_v17 = vadd.f32 %v4026_v55, %v1883_v32 }
 0x1d5   :  { %v1885_v24 = vadd.f32 %v4037_v37, %v1884_v17  ;;  %v5094_v37 = vld [vmem:[#allocation81_spill] sm:$0xff] }
 0x1d7   :  { %v1886_v26 = vadd.f32 %v1885_v24, %v4071_v10  ;;  %v5095_v10 = vld [vmem:[#allocation84_spill] sm:$0xff] }
 0x1d9   :  { %v1887_v29 = vadd.f32 %v1886_v26, %v4084_v9 }
 0x1db   :  { %v1888_v22 = vadd.f32 %v5088_v53, %v1887_v29 }
 0x1dd   :  { %v1889_v60 = vadd.f32 %v5089_v40, %v1888_v22 }
 0x1df   :  { %v1890_v47 = vadd.f32 %v1889_v60, %v5090_v2 }
 0x1e1   :  { %v1891_v19 = vadd.f32 %v1890_v47, %v5091_v18 }
 0x1e3   :  { %v1892_v48 = vadd.f32 %v5092_v21, %v1891_v19 }
 0x1e5   :  { %v1893_v8 = vadd.f32 %v5093_v12, %v1892_v48 }
 0x1e7   :  { %v1894_v32 = vadd.f32 %v1893_v8, %v4151_v0 }
 0x1e9   :  { %v1895_v17 = vadd.f32 %v1894_v32, %v4164_v43 }
 0x1eb   :  { %v1896_v24 = vadd.f32 %v5094_v37, %v1895_v17  ;;  %v5097_v17 = vld [vmem:[#allocation40_spill] sm:$0xff] }
 0x1ed   :  { %v1897_v26 = vadd.f32 %v5095_v10, %v1896_v24 }
 0x1ef   :  { %v1898_v29 = vadd.f32 %v1897_v26, %v4185_v42  ;;  %v5098_v26 = vld [vmem:[#allocation37_spill] sm:$0xff] }
 0x1f1   :  { %v1899_v22 = vadd.f32 %v1898_v29, %v4192_v56 }
 0x1f3   :  { %v1900_v60 = vadd.f32 %v4182_v5, %v1899_v22  ;;  %v5099_v22 = vld [vmem:[#allocation39_spill] sm:$0xff] }
 0x1f5   :  { %v1901_v47 = vadd.f32 %v4187_v62, %v1900_v60 }
 0x1f7   :  { %v1902_v18 = vrot.slane %v1901_v47, 4 }
 0x1f9   :  { %v1903_v19 = vadd.f32 %v1902_v18, %v1901_v47  ;;  %v5101_v18 = vld [vmem:[#allocation42_spill] sm:$0xff] }
 0x1fb   :  { %v1904_v21 = vrot.slane %v1903_v19, 2 }
 0x1fd   :  { %v1905_v48 = vadd.f32 %v1904_v21, %v1903_v19  ;;  %v5105_v19 = vld [vmem:[#allocation41_spill] sm:$0xff] }
 0x1ff   :  { %v1906_v12 = vrot.slane %v1905_v48, 1 }
 0x201   :  { %v4264_v8 = vadd.f32 %v1906_v12, %v1905_v48  ;;  %v5103_v12 = vld [vmem:[#allocation44_spill] sm:$0xff] }
 0x203   :  { %5096 = vst [vmem:[#allocation66_spill] sm:$0xff] %v4264_v8  ;;  %v4267_v32 = vmul.f32 0.0009765625, %v4264_v8  ;;  %v5109_v8 = vld [vmem:[#allocation46_spill] sm:$0xff] }
 0x205   :  { %v4271_v24 = vsub.f32 %v5097_v17, %v4267_v32  ;;  %v4275_v29 = vsub.f32 %v5098_v26, %v4267_v32  ;;  %v4279_v60 = vsub.f32 %v5099_v22, %v4267_v32  ;;  %v4283_v21 = vsub.f32 %v5101_v18, %v4267_v32  ;;  %v5107_v17 = vld [vmem:[#allocation43_spill] sm:$0xff] }
 0x206   :  { %v4287_v47 = vsub.f32 %v5103_v12, %v4267_v32  ;;  %v4291_v48 = vsub.f32 %v5105_v19, %v4267_v32  ;;  %v4295_v26 = vsub.f32 %v5107_v17, %v4267_v32  ;;  %v4299_v22 = vsub.f32 %v5109_v8, %v4267_v32 }
 0x207   :  { %5100 = vst [vmem:[#allocation70_spill] sm:$0xff] %v4279_v60  ;;  %5102 = vst [vmem:[#allocation75_spill] sm:$0xff] %v4283_v21  ;;  %v5111_v60 = vld [vmem:[#allocation48_spill] sm:$0xff]  ;;  %v5113_v21 = vld [vmem:[#allocation45_spill] sm:$0xff] }
 0x208   :  { %5104 = vst [vmem:[#allocation81_spill] sm:$0xff] %v4287_v47  ;;  %5106 = vst [vmem:[#allocation84_spill] sm:$0xff] %v4291_v48  ;;  %v4303_v18 = vsub.f32 %v5111_v60, %v4267_v32  ;;  %v4307_v12 = vsub.f32 %v5113_v21, %v4267_v32  ;;  %v5115_v47 = vld [vmem:[#allocation47_spill] sm:$0xff] }
 0x209   :  { %5108 = vst [vmem:[#allocation40_spill] sm:$0xff] %v4295_v26  ;;  %5110 = vst [vmem:[#allocation37_spill] sm:$0xff] %v4299_v22  ;;  %v4311_v19 = vsub.f32 %v5115_v47, %v4267_v32  ;;  %v5117_v48 = vld [vmem:[#allocation51_spill] sm:$0xff]  ;;  %v5121_v22 = vld [vmem:[#allocation50_spill] sm:$0xff] }
 0x20a   :  { %5112 = vst [vmem:[#allocation39_spill] sm:$0xff] %v4303_v18  ;;  %5114 = vst [vmem:[#allocation42_spill] sm:$0xff] %v4307_v12  ;;  %v4315_v17 = vsub.f32 %v5117_v48, %v4267_v32  ;;  %v5119_v26 = vld [vmem:[#allocation55_spill] sm:$0xff]  ;;  %v4323_v60 = vsub.f32 %v5121_v22, %v4267_v32  ;;  %v5123_v18 = vld [vmem:[#allocation53_spill] sm:$0xff] }
 0x20b   :  { %5116 = vst [vmem:[#allocation44_spill] sm:$0xff] %v4311_v19  ;;  %v4319_v8 = vsub.f32 %v5119_v26, %v4267_v32  ;;  %v4327_v21 = vsub.f32 %v5123_v18, %v4267_v32  ;;  %v5125_v12 = vld [vmem:[#allocation59_spill] sm:$0xff]  ;;  %v5127_v19 = vld [vmem:[#allocation62_spill] sm:$0xff] }
 0x20c   :  { %5118 = vst [vmem:[#allocation41_spill] sm:$0xff] %v4315_v17  ;;  %5122 = vst [vmem:[#allocation46_spill] sm:$0xff] %v4323_v60  ;;  %v4331_v47 = vsub.f32 %v5125_v12, %v4267_v32  ;;  %v4335_v48 = vsub.f32 %v5127_v19, %v4267_v32  ;;  %v5129_v17 = vld [vmem:[#allocation58_spill] sm:$0xff]  ;;  %v5133_v60 = vld [vmem:[#allocation65_spill] sm:$0xff] }
 0x20d   :  { %5120 = vst [vmem:[#allocation43_spill] sm:$0xff] %v4319_v8  ;;  %5124 = vst [vmem:[#allocation48_spill] sm:$0xff] %v4327_v21  ;;  %v4339_v26 = vsub.f32 %v5129_v17, %v4267_v32  ;;  %v5131_v8 = vld [vmem:[#allocation60_spill] sm:$0xff]  ;;  %v4347_v18 = vsub.f32 %v5133_v60, %v4267_v32  ;;  %v5135_v21 = vld [vmem:[#allocation69_spill] sm:$0xff] }
 0x20e   :  { %5126 = vst [vmem:[#allocation45_spill] sm:$0xff] %v4331_v47  ;;  %5128 = vst [vmem:[#allocation47_spill] sm:$0xff] %v4335_v48  ;;  %v4343_v22 = vsub.f32 %v5131_v8, %v4267_v32  ;;  %v4351_v12 = vsub.f32 %v5135_v21, %v4267_v32  ;;  %v5137_v47 = vld [vmem:[#allocation64_spill] sm:$0xff]  ;;  %v5139_v48 = vld [vmem:[#allocation67_spill] sm:$0xff] }
 0x20f   :  { %5130 = vst [vmem:[#allocation51_spill] sm:$0xff] %v4339_v26  ;;  %5134 = vst [vmem:[#allocation50_spill] sm:$0xff] %v4347_v18  ;;  %v4355_v19 = vsub.f32 %v5137_v47, %v4267_v32  ;;  %v4359_v17 = vsub.f32 %v5139_v48, %v4267_v32  ;;  %v5141_v26 = vld [vmem:[#allocation72_spill] sm:$0xff]  ;;  %v5145_v18 = vld [vmem:[#allocation71_spill] sm:$0xff] }
 0x210   :  { %5132 = vst [vmem:[#allocation55_spill] sm:$0xff] %v4343_v22  ;;  %5136 = vst [vmem:[#allocation53_spill] sm:$0xff] %v4351_v12  ;;  %v4363_v8 = vsub.f32 %v5141_v26, %v4267_v32  ;;  %v5143_v22 = vld [vmem:[#allocation76_spill] sm:$0xff]  ;;  %v4371_v21 = vsub.f32 %v5145_v18, %v4267_v32  ;;  %v5147_v12 = vld [vmem:[#allocation74_spill] sm:$0xff] }
 0x211   :  { %5138 = vst [vmem:[#allocation59_spill] sm:$0xff] %v4355_v19  ;;  %5140 = vst [vmem:[#allocation62_spill] sm:$0xff] %v4359_v17  ;;  %v4367_v60 = vsub.f32 %v5143_v22, %v4267_v32  ;;  %v4375_v47 = vsub.f32 %v5147_v12, %v4267_v32  ;;  %v5149_v19 = vld [vmem:[#allocation80_spill] sm:$0xff]  ;;  %v5151_v17 = vld [vmem:[#allocation83_spill] sm:$0xff] }
 0x212   :  { %5142 = vst [vmem:[#allocation58_spill] sm:$0xff] %v4363_v8  ;;  %5146 = vst [vmem:[#allocation65_spill] sm:$0xff] %v4371_v21  ;;  %v4379_v48 = vsub.f32 %v5149_v19, %v4267_v32  ;;  %v4383_v26 = vsub.f32 %v5151_v17, %v4267_v32  ;;  %v5152_v8 = vld [vmem:[#allocation79_spill] sm:$0xff]  ;;  %v5154_v21 = vld [vmem:[#allocation10_spill] sm:$0xff] }
 0x213   :  { %5144 = vst [vmem:[#allocation60_spill] sm:$0xff] %v4367_v60  ;;  %5148 = vst [vmem:[#allocation69_spill] sm:$0xff] %v4375_v47  ;;  %v4387_v22 = vsub.f32 %v5152_v8, %v4267_v32  ;;  %v5153_v60 = vld [vmem:[#allocation82_spill] sm:$0xff]  ;;  %v4395_v12 = vsub.f32 %v5154_v21, %v4267_v32  ;;  %v5155_v47 = vld [vmem:[#allocation12_spill] sm:$0xff]  ;;  %v4407_v8 = vsub.f32 %v3597_v25, %v4267_v32 }
 0x214   :  { %5150 = vst [vmem:[#allocation64_spill] sm:$0xff] %v4379_v48  ;;  %v4391_v18 = vsub.f32 %v5153_v60, %v4267_v32  ;;  %v4399_v19 = vsub.f32 %v5155_v47, %v4267_v32  ;;  %v5156_v48 = vld [vmem:[#allocation8_spill] sm:$0xff]  ;;  %v4411_v60 = vsub.f32 %v3631_v38, %v4267_v32  ;;  %v4415_v21 = vsub.f32 %v3644_v45, %v4267_v32 }
 0x215   :  { %v4403_v17 = vsub.f32 %v5156_v48, %v4267_v32  ;;  %v4419_v47 = vsub.f32 %v3626_v35, %v4267_v32  ;;  %v4423_v48 = vsub.f32 %v3637_v41, %v4267_v32  ;;  %v4427_v25 = vsub.f32 %v3671_v54, %v4267_v32 }
 0x216   :  { %v4431_v38 = vsub.f32 %v3684_v61, %v4267_v32  ;;  %v4435_v45 = vsub.f32 %v3666_v51, %v4267_v32  ;;  %v4439_v35 = vsub.f32 %v3677_v57, %v4267_v32  ;;  %v4443_v41 = vsub.f32 %v3711_v6, %v4267_v32 }
 0x217   :  { %v4447_v54 = vsub.f32 %v3724_v20, %v4267_v32  ;;  %v4451_v61 = vsub.f32 %v3706_v3, %v4267_v32  ;;  %v4455_v51 = vsub.f32 %v3717_v13, %v4267_v32  ;;  %v4459_v57 = vsub.f32 %v3751_v39, %v4267_v32 }
 0x218   :  { %v4463_v6 = vsub.f32 %v3764_v52, %v4267_v32  ;;  %v4467_v20 = vsub.f32 %v3746_v31, %v4267_v32  ;;  %v4471_v3 = vsub.f32 %v3757_v44, %v4267_v32  ;;  %v4475_v13 = vsub.f32 %v3791_v7, %v4267_v32 }
 0x219   :  { %v4479_v39 = vsub.f32 %v3804_v33, %v4267_v32  ;;  %v4483_v52 = vsub.f32 %v3786_v63, %v4267_v32  ;;  %v4487_v31 = vsub.f32 %v3797_v16, %v4267_v32  ;;  %v4491_v44 = vsub.f32 %v3831_v14, %v4267_v32 }
 0x21a   :  { %v4495_v7 = vsub.f32 %v3844_v49, %v4267_v32  ;;  %v4499_v33 = vsub.f32 %v3826_v58, %v4267_v32  ;;  %v4503_v63 = vsub.f32 %v3837_v28, %v4267_v32  ;;  %v4507_v16 = vsub.f32 %v3871_v46, %v4267_v32 }
 0x21b   :  { %v4511_v14 = vsub.f32 %v3884_v23, %v4267_v32  ;;  %v4515_v49 = vsub.f32 %v3866_v15, %v4267_v32  ;;  %v4519_v58 = vsub.f32 %v3877_v59, %v4267_v32  ;;  %v4523_v28 = vsub.f32 %v3911_v1, %v4267_v32 }
 0x21c   :  { %v4527_v46 = vsub.f32 %v3924_v4, %v4267_v32  ;;  %v4531_v23 = vsub.f32 %v3906_v30, %v4267_v32  ;;  %v4535_v15 = vsub.f32 %v3917_v27, %v4267_v32  ;;  %v4539_v59 = vsub.f32 %v3951_v11, %v4267_v32 }
 0x21d   :  { %v4543_v1 = vsub.f32 %v3964_v36, %v4267_v32  ;;  %v4547_v4 = vsub.f32 %v3946_v50, %v4267_v32 }
 0x21e   :  { %5157 = vst [vmem:[#allocation67_spill] sm:$0xff] %v4527_v46  ;;  %5158 = vst [vmem:[#allocation72_spill] sm:$0xff] %v4531_v23  ;;  %v5163_v46 = vld [vmem:[#allocation49_spill] sm:$0xff]  ;;  %v5164_v23 = vld [vmem:[#allocation54_spill] sm:$0xff] }
 0x21f   :  { %5159 = vst [vmem:[#allocation76_spill] sm:$0xff] %v4535_v15  ;;  %5160 = vst [vmem:[#allocation71_spill] sm:$0xff] %v4539_v59  ;;  %v4551_v30 = vsub.f32 %v5163_v46, %v4267_v32  ;;  %v4555_v27 = vsub.f32 %v5164_v23, %v4267_v32  ;;  %v5165_v15 = vld [vmem:[#allocation57_spill] sm:$0xff]  ;;  %v5167_v59 = vld [vmem:[#allocation52_spill] sm:$0xff]  ;;  %v4575_v23 = vsub.f32 %v4044_v34, %v4267_v32 }
 0x220   :  { %5161 = vst [vmem:[#allocation74_spill] sm:$0xff] %v4543_v1  ;;  %5162 = vst [vmem:[#allocation80_spill] sm:$0xff] %v4547_v4  ;;  %v4559_v11 = vsub.f32 %v5165_v15, %v4267_v32  ;;  %v4563_v36 = vsub.f32 %v5167_v59, %v4267_v32  ;;  %v5169_v1 = vld [vmem:[#allocation56_spill] sm:$0xff]  ;;  %v5170_v4 = vld [vmem:[#allocation61_spill] sm:$0xff]  ;;  %v4579_v15 = vsub.f32 %v4026_v55, %v4267_v32 }
 0x221   :  { %v4567_v50 = vsub.f32 %v5169_v1, %v4267_v32  ;;  %v4571_v46 = vsub.f32 %v5170_v4, %v4267_v32  ;;  %5172 = vst [vmem:[#allocation10_spill] sm:$0xff] %v4575_v23  ;;  %v4591_v4 = vsub.f32 %v4084_v9, %v4267_v32  ;;  %v4595_v34 = vsub.f32 %v5088_v53, %v4267_v32  ;;  %v5204_v23 = vld [vmem:[#allocation14_spill] sm:$0xff] }
 0x222   :  { %5166 = vst [vmem:[#allocation83_spill] sm:$0xff] %v4559_v11  ;;  %5168 = vst [vmem:[#allocation79_spill] sm:$0xff] %v4563_v36  ;;  %v5174_v11 = vld [vmem:[#allocation63_spill] sm:$0xff]  ;;  %v5176_v36 = vld [vmem:[#allocation68_spill] sm:$0xff]  ;;  %v4599_v55 = vsub.f32 %v5089_v40, %v4267_v32  ;;  %v4619_v40 = vsub.f32 %v4151_v0, %v4267_v32  ;;  %v4639_v0 = vsub.f32 %v4192_v56, %v4267_v32 }
 0x223   :  { %5171 = vst [vmem:[#allocation82_spill] sm:$0xff] %v4571_v46  ;;  %5173 = vst [vmem:[#allocation12_spill] sm:$0xff] %v4579_v15  ;;  %v4583_v59 = vsub.f32 %v5174_v11, %v4267_v32  ;;  %v4587_v1 = vsub.f32 %v5176_v36, %v4267_v32  ;;  %v4603_v11 = vsub.f32 %v5090_v2, %v4267_v32 }
 0x224   :  { %5178 = vst [vmem:[#allocation54_spill] sm:$0xff] %v4591_v4  ;;  %5179 = vst [vmem:[#allocation57_spill] sm:$0xff] %v4595_v34  ;;  %v5186_v4 = vld [vmem:[#allocation77_spill] sm:$0xff]  ;;  %v4623_v2 = vsub.f32 %v4164_v43, %v4267_v32  ;;  %v4643_v43 = vsub.f32 %v4182_v5, %v4267_v32  ;;  %v5200_v5 = vld [vmem:[#allocation7_spill] sm:$0xff] }
 0x225   :  { %5175 = vst [vmem:[#allocation8_spill] sm:$0xff] %v4583_v59  ;;  %5177 = vst [vmem:[#allocation49_spill] sm:$0xff] %v4587_v1  ;;  %v5182_v59 = vld [vmem:[#allocation78_spill] sm:$0xff]  ;;  %v5184_v1 = vld [vmem:[#allocation73_spill] sm:$0xff]  ;;  %v4615_v53 = vsub.f32 %v5186_v4, %v4267_v32  ;;  %v4635_v4 = vsub.f32 %v4185_v42, %v4267_v32 }
 0x226   :  { %5180 = vst [vmem:[#allocation52_spill] sm:$0xff] %v4599_v55  ;;  %5181 = vst [vmem:[#allocation56_spill] sm:$0xff] %v4603_v11  ;;  %v4607_v36 = vsub.f32 %v5182_v59, %v4267_v32  ;;  %v4611_v9 = vsub.f32 %v5184_v1, %v4267_v32  ;;  %v4627_v59 = vsub.f32 %v5094_v37, %v4267_v32  ;;  %v5198_v42 = vld [vmem:[#allocation2_spill] sm:$0xff] }
 0x227   :  { %5187 = vst [vmem:[#allocation68_spill] sm:$0xff] %v4615_v53  ;;  %5188 = vst [vmem:[#allocation78_spill] sm:$0xff] %v4619_v40  ;;  %v4631_v1 = vsub.f32 %v5095_v10, %v4267_v32  ;;  %v4647_v37 = vsub.f32 %v4187_v62, %v4267_v32 }
 0x228   :  { %5183 = vst [vmem:[#allocation61_spill] sm:$0xff] %v4607_v36  ;;  %5185 = vst [vmem:[#allocation63_spill] sm:$0xff] %v4611_v9 }
 0x229   :  { %5189 = vst [vmem:[#allocation73_spill] sm:$0xff] %v4623_v2  ;;  %5190 = vst [vmem:[#allocation77_spill] sm:$0xff] %v4627_v59  ;;  %v5196_v59 = vld [vmem:[#allocation3_spill] sm:$0xff] }
 0x22a   :  { %5191 = vst [vmem:[#allocation85_spill] sm:$0xff] %v4631_v1  ;;  %5192 = vst [vmem:[#allocation86_spill] sm:$0xff] %v4635_v4  ;;  %v1909_v10 = vsub.f32 %v5196_v59, %v4267_v32  ;;  %v5197_v1 = vld [vmem:[#allocation5_spill] sm:$0xff]  ;;  %v1911_v4 = vsub.f32 %v5198_v42, %v4267_v32 }
 0x22b   :  { %5193 = vst [vmem:[#allocation87_spill] sm:$0xff] %v4639_v0  ;;  %5194 = vst [vmem:[#allocation88_spill] sm:$0xff] %v4643_v43  ;;  %v1910_v2 = vsub.f32 %v5197_v1, %v4267_v32  ;;  %v5199_v0 = vld [vmem:[#allocation4_spill] sm:$0xff]  ;;  %v1913_v43 = vsub.f32 %v5200_v5, %v4267_v32  ;;  %v5202_v1 = vld [vmem:[#allocation6_spill] sm:$0xff]  ;;  %v1917_v5 = vsub.f32 %v5204_v23, %v4267_v32 }
 0x22c   :  { %5195 = vst [vmem:[#allocation89_spill] sm:$0xff] %v4647_v37  ;;  %v2037_v40 = vmul.f32 %v1909_v10, %v1909_v10  ;;  %v1912_v53 = vsub.f32 %v5199_v0, %v4267_v32  ;;  %v2039_v9 = vmul.f32 %v1911_v4, %v1911_v4  ;;  %v5201_v37 = vld [vmem:[#allocation11_spill] sm:$0xff]  ;;  %v1915_v55 = vsub.f32 %v5202_v1, %v4267_v32 }
 0x22d   :  { %v2038_v56 = vmul.f32 %v1910_v2, %v1910_v2  ;;  %v1914_v36 = vsub.f32 %v5201_v37, %v4267_v32  ;;  %v2041_v34 = vmul.f32 %v1913_v43, %v1913_v43  ;;  %v5203_v2 = vld [vmem:[#allocation9_spill] sm:$0xff]  ;;  %v2045_v43 = vmul.f32 %v1917_v5, %v1917_v5 }
 0x22e   :  { %v2040_v59 = vmul.f32 %v1912_v53, %v1912_v53  ;;  %v1916_v10 = vsub.f32 %v5203_v2, %v4267_v32  ;;  %v2043_v4 = vmul.f32 %v1915_v55, %v1915_v55 }
 0x22f   :  { %v2165_v62 = vadd.f32 %v2038_v56, %v2037_v40  ;;  %v2042_v15 = vmul.f32 %v1914_v36, %v1914_v36  ;;  %v5205_v56 = vld [vmem:[#allocation16_spill] sm:$0xff] }
 0x230   :  { %v1918_v37 = vsub.f32 %v5205_v56, %v4267_v32  ;;  %v2044_v53 = vmul.f32 %v1916_v10, %v1916_v10 }
 0x231   :  { %v2166_v11 = vadd.f32 %v2165_v62, %v2039_v9  ;;  %v5206_v62 = vld [vmem:[#allocation13_spill] sm:$0xff] }
 0x232   :  { %v1919_v1 = vsub.f32 %v5206_v62, %v4267_v32  ;;  %v2046_v36 = vmul.f32 %v1918_v37, %v1918_v37 }
 0x233   :  { %v2167_v42 = vadd.f32 %v2166_v11, %v2040_v59  ;;  %v5207_v59 = vld [vmem:[#allocation15_spill] sm:$0xff] }
 0x234   :  { %v1920_v2 = vsub.f32 %v5207_v59, %v4267_v32  ;;  %v2047_v55 = vmul.f32 %v1919_v1, %v1919_v1 }
 0x235   :  { %v2168_v0 = vadd.f32 %v2167_v42, %v2041_v34  ;;  %v5208_v42 = vld [vmem:[#allocation18_spill] sm:$0xff] }
 0x236   :  { %v1921_v23 = vsub.f32 %v5208_v42, %v4267_v32  ;;  %v2048_v10 = vmul.f32 %v1920_v2, %v1920_v2 }
 0x237   :  { %v2169_v40 = vadd.f32 %v2168_v0, %v2042_v15  ;;  %v5209_v0 = vld [vmem:[#allocation20_spill] sm:$0xff] }
 0x238   :  { %v1922_v56 = vsub.f32 %v5209_v0, %v4267_v32  ;;  %v2049_v5 = vmul.f32 %v1921_v23, %v1921_v23 }
 0x239   :  { %v2170_v9 = vadd.f32 %v2169_v40, %v2043_v4  ;;  %v5210_v40 = vld [vmem:[#allocation17_spill] sm:$0xff] }
 0x23a   :  { %v1923_v62 = vsub.f32 %v5210_v40, %v4267_v32  ;;  %v2050_v37 = vmul.f32 %v1922_v56, %v1922_v56 }
 0x23b   :  { %v2171_v11 = vadd.f32 %v2170_v9, %v2044_v53  ;;  %v5211_v9 = vld [vmem:[#allocation19_spill] sm:$0xff] }
 0x23c   :  { %v1924_v59 = vsub.f32 %v5211_v9, %v4267_v32  ;;  %v2051_v1 = vmul.f32 %v1923_v62, %v1923_v62 }
 0x23d   :  { %v2172_v34 = vadd.f32 %v2171_v11, %v2045_v43  ;;  %v5212_v11 = vld [vmem:[#allocation22_spill] sm:$0xff] }
 0x23e   :  { %v1925_v42 = vsub.f32 %v5212_v11, %v4267_v32  ;;  %v2052_v2 = vmul.f32 %v1924_v59, %v1924_v59 }
 0x23f   :  { %v2173_v15 = vadd.f32 %v2172_v34, %v2046_v36  ;;  %v5213_v34 = vld [vmem:[#allocation24_spill] sm:$0xff] }
 0x240   :  { %v1926_v0 = vsub.f32 %v5213_v34, %v4267_v32  ;;  %v2053_v23 = vmul.f32 %v1925_v42, %v1925_v42 }
 0x241   :  { %v2174_v4 = vadd.f32 %v2173_v15, %v2047_v55  ;;  %v5214_v15 = vld [vmem:[#allocation21_spill] sm:$0xff] }
 0x242   :  { %v1927_v40 = vsub.f32 %v5214_v15, %v4267_v32  ;;  %v2054_v56 = vmul.f32 %v1926_v0, %v1926_v0 }
 0x243   :  { %v2175_v53 = vadd.f32 %v2174_v4, %v2048_v10  ;;  %v5215_v4 = vld [vmem:[#allocation23_spill] sm:$0xff] }
 0x244   :  { %v1928_v9 = vsub.f32 %v5215_v4, %v4267_v32  ;;  %v2055_v62 = vmul.f32 %v1927_v40, %v1927_v40 }
 0x245   :  { %v2176_v43 = vadd.f32 %v2175_v53, %v2049_v5  ;;  %v5216_v53 = vld [vmem:[#allocation26_spill] sm:$0xff] }
 0x246   :  { %v1929_v11 = vsub.f32 %v5216_v53, %v4267_v32  ;;  %v2056_v59 = vmul.f32 %v1928_v9, %v1928_v9 }
 0x247   :  { %v2177_v36 = vadd.f32 %v2176_v43, %v2050_v37  ;;  %v5217_v43 = vld [vmem:[#allocation28_spill] sm:$0xff] }
 0x248   :  { %v1930_v34 = vsub.f32 %v5217_v43, %v4267_v32  ;;  %v2057_v42 = vmul.f32 %v1929_v11, %v1929_v11 }
 0x249   :  { %v2178_v55 = vadd.f32 %v2177_v36, %v2051_v1  ;;  %v5218_v36 = vld [vmem:[#allocation25_spill] sm:$0xff] }
 0x24a   :  { %v1931_v15 = vsub.f32 %v5218_v36, %v4267_v32  ;;  %v2058_v0 = vmul.f32 %v1930_v34, %v1930_v34 }
 0x24b   :  { %v2179_v10 = vadd.f32 %v2178_v55, %v2052_v2  ;;  %v5219_v55 = vld [vmem:[#allocation27_spill] sm:$0xff] }
 0x24c   :  { %v1932_v4 = vsub.f32 %v5219_v55, %v4267_v32  ;;  %v2059_v40 = vmul.f32 %v1931_v15, %v1931_v15 }
 0x24d   :  { %v2180_v5 = vadd.f32 %v2179_v10, %v2053_v23  ;;  %v5220_v10 = vld [vmem:[#allocation30_spill] sm:$0xff] }
 0x24e   :  { %v1933_v53 = vsub.f32 %v5220_v10, %v4267_v32  ;;  %v2060_v9 = vmul.f32 %v1932_v4, %v1932_v4 }
 0x24f   :  { %v2181_v37 = vadd.f32 %v2180_v5, %v2054_v56  ;;  %v5221_v5 = vld [vmem:[#allocation32_spill] sm:$0xff] }
 0x250   :  { %v1934_v43 = vsub.f32 %v5221_v5, %v4267_v32  ;;  %v2061_v11 = vmul.f32 %v1933_v53, %v1933_v53 }
 0x251   :  { %v2182_v1 = vadd.f32 %v2181_v37, %v2055_v62  ;;  %v5222_v37 = vld [vmem:[#allocation29_spill] sm:$0xff] }
 0x252   :  { %v1935_v36 = vsub.f32 %v5222_v37, %v4267_v32  ;;  %v2062_v34 = vmul.f32 %v1934_v43, %v1934_v43 }
 0x253   :  { %v2183_v2 = vadd.f32 %v2182_v1, %v2056_v59  ;;  %v5223_v1 = vld [vmem:[#allocation31_spill] sm:$0xff] }
 0x254   :  { %v1936_v55 = vsub.f32 %v5223_v1, %v4267_v32  ;;  %v2063_v15 = vmul.f32 %v1935_v36, %v1935_v36 }
 0x255   :  { %v2184_v23 = vadd.f32 %v2183_v2, %v2057_v42  ;;  %v5224_v2 = vld [vmem:[#allocation34_spill] sm:$0xff] }
 0x256   :  { %v1937_v10 = vsub.f32 %v5224_v2, %v4267_v32  ;;  %v2064_v4 = vmul.f32 %v1936_v55, %v1936_v55 }
 0x257   :  { %v2185_v56 = vadd.f32 %v2184_v23, %v2058_v0  ;;  %v5225_v23 = vld [vmem:[#allocation36_spill] sm:$0xff] }
 0x258   :  { %v1938_v5 = vsub.f32 %v5225_v23, %v4267_v32  ;;  %v2065_v53 = vmul.f32 %v1937_v10, %v1937_v10  ;;  %v2071_v10 = vmul.f32 %v4275_v29, %v4275_v29 }
 0x259   :  { %v2186_v62 = vadd.f32 %v2185_v56, %v2059_v40  ;;  %v5226_v56 = vld [vmem:[#allocation33_spill] sm:$0xff] }
 0x25a   :  { %v1939_v37 = vsub.f32 %v5226_v56, %v4267_v32  ;;  %v2066_v43 = vmul.f32 %v1938_v5, %v1938_v5 }
 0x25b   :  { %v2187_v59 = vadd.f32 %v2186_v62, %v2060_v9  ;;  %v5227_v62 = vld [vmem:[#allocation35_spill] sm:$0xff] }
 0x25c   :  { %v1940_v1 = vsub.f32 %v5227_v62, %v4267_v32  ;;  %v2067_v36 = vmul.f32 %v1939_v37, %v1939_v37 }
 0x25d   :  { %v2188_v42 = vadd.f32 %v2187_v59, %v2061_v11  ;;  %v5228_v59 = vld [vmem:[#allocation38_spill] sm:$0xff] }
 0x25e   :  { %v1941_v2 = vsub.f32 %v5228_v59, %v4267_v32 }
 0x25f   :  { %v2189_v0 = vadd.f32 %v2188_v42, %v2062_v34  ;;  %v2068_v42 = vmul.f32 %v1940_v1, %v1940_v1  ;;  %v5232_v1 = vld [vmem:[#allocation84_spill] sm:$0xff] }
 0x260   :  { %v2069_v23 = vmul.f32 %v1941_v2, %v1941_v2  ;;  %v5234_v2 = vld [vmem:[#allocation37_spill] sm:$0xff] }
 0x261   :  { %v2190_v40 = vadd.f32 %v2189_v0, %v2063_v15  ;;  %v2070_v15 = vmul.f32 %v4271_v24, %v4271_v24  ;;  %v2075_v24 = vmul.f32 %v5232_v1, %v5232_v1 }
 0x263   :  { %v2191_v9 = vadd.f32 %v2190_v40, %v2064_v4  ;;  %v5229_v40 = vld [vmem:[#allocation70_spill] sm:$0xff] }
 0x264   :  { %v2072_v5 = vmul.f32 %v5229_v40, %v5229_v40 }
 0x265   :  { %v2192_v11 = vadd.f32 %v2191_v9, %v2065_v53  ;;  %v5230_v53 = vld [vmem:[#allocation75_spill] sm:$0xff]  ;;  %v5231_v9 = vld [vmem:[#allocation81_spill] sm:$0xff] }
 0x266   :  { %v2073_v32 = vmul.f32 %v5230_v53, %v5230_v53  ;;  %v2074_v62 = vmul.f32 %v5231_v9, %v5231_v9 }
 0x267   :  { %v2193_v34 = vadd.f32 %v2192_v11, %v2066_v43  ;;  %v5233_v11 = vld [vmem:[#allocation40_spill] sm:$0xff] }
 0x268   :  { %v2076_v29 = vmul.f32 %v5233_v11, %v5233_v11 }
 0x269   :  { %v2194_v46 = vadd.f32 %v2193_v34, %v2067_v36  ;;  %v2077_v36 = vmul.f32 %v5234_v2, %v5234_v2 }
 0x26b   :  { %v2195_v55 = vadd.f32 %v2194_v46, %v2068_v42  ;;  %v5235_v42 = vld [vmem:[#allocation39_spill] sm:$0xff] }
 0x26d   :  { %v2196_v0 = vadd.f32 %v2195_v55, %v2069_v23  ;;  %v2078_v23 = vmul.f32 %v5235_v42, %v5235_v42 }
 0x26f   :  { %v2197_v4 = vadd.f32 %v2196_v0, %v2070_v15  ;;  %v5236_v15 = vld [vmem:[#allocation42_spill] sm:$0xff] }
 0x270   :  { %v2079_v0 = vmul.f32 %v5236_v15, %v5236_v15 }
 0x271   :  { %v2198_v56 = vadd.f32 %v2197_v4, %v2071_v10  ;;  %v5237_v4 = vld [vmem:[#allocation44_spill] sm:$0xff] }
 0x272   :  { %v2080_v40 = vmul.f32 %v5237_v4, %v5237_v4 }
 0x273   :  { %v2199_v37 = vadd.f32 %v2198_v56, %v2072_v5  ;;  %v5238_v56 = vld [vmem:[#allocation41_spill] sm:$0xff] }
 0x274   :  { %v2081_v53 = vmul.f32 %v5238_v56, %v5238_v56 }
 0x275   :  { %v2200_v46 = vadd.f32 %v2199_v37, %v2073_v32  ;;  %v5239_v37 = vld [vmem:[#allocation43_spill] sm:$0xff] }
 0x276   :  { %v2082_v9 = vmul.f32 %v5239_v37, %v5239_v37 }
 0x277   :  { %v2201_v43 = vadd.f32 %v2200_v46, %v2074_v62  ;;  %v5240_v46 = vld [vmem:[#allocation46_spill] sm:$0xff] }
 0x278   :  { %v2083_v1 = vmul.f32 %v5240_v46, %v5240_v46 }
 0x279   :  { %v2202_v59 = vadd.f32 %v2201_v43, %v2075_v24  ;;  %v5241_v43 = vld [vmem:[#allocation48_spill] sm:$0xff] }
 0x27a   :  { %v2084_v11 = vmul.f32 %v5241_v43, %v5241_v43 }
 0x27b   :  { %v2203_v34 = vadd.f32 %v2202_v59, %v2076_v29  ;;  %v5242_v59 = vld [vmem:[#allocation45_spill] sm:$0xff] }
 0x27c   :  { %v2085_v2 = vmul.f32 %v5242_v59, %v5242_v59 }
 0x27d   :  { %v2204_v55 = vadd.f32 %v2203_v34, %v2077_v36  ;;  %v5243_v34 = vld [vmem:[#allocation47_spill] sm:$0xff] }
 0x27e   :  { %v2086_v42 = vmul.f32 %v5243_v34, %v5243_v34 }
 0x27f   :  { %v2205_v10 = vadd.f32 %v2204_v55, %v2078_v23  ;;  %v5244_v55 = vld [vmem:[#allocation51_spill] sm:$0xff] }
 0x280   :  { %v2087_v15 = vmul.f32 %v5244_v55, %v5244_v55 }
 0x281   :  { %v2206_v5 = vadd.f32 %v2205_v10, %v2079_v0  ;;  %v5245_v10 = vld [vmem:[#allocation55_spill] sm:$0xff] }
 0x282   :  { %v2088_v4 = vmul.f32 %v5245_v10, %v5245_v10 }
 0x283   :  { %v2207_v32 = vadd.f32 %v2206_v5, %v2080_v40  ;;  %v5246_v5 = vld [vmem:[#allocation50_spill] sm:$0xff] }
 0x284   :  { %v2089_v56 = vmul.f32 %v5246_v5, %v5246_v5 }
 0x285   :  { %v2208_v62 = vadd.f32 %v2207_v32, %v2081_v53  ;;  %v5247_v32 = vld [vmem:[#allocation53_spill] sm:$0xff] }
 0x286   :  { %v2090_v37 = vmul.f32 %v5247_v32, %v5247_v32 }
 0x287   :  { %v2209_v24 = vadd.f32 %v2208_v62, %v2082_v9  ;;  %v5248_v62 = vld [vmem:[#allocation59_spill] sm:$0xff] }
 0x288   :  { %v2091_v46 = vmul.f32 %v5248_v62, %v5248_v62  ;;  %v2100_v62 = vmul.f32 %v4391_v18, %v4391_v18  ;;  %v2105_v18 = vmul.f32 %v4411_v60, %v4411_v60  ;;  %v2110_v60 = vmul.f32 %v4431_v38, %v4431_v38 }
 0x289   :  { %v2210_v29 = vadd.f32 %v2209_v24, %v2083_v1  ;;  %v5249_v24 = vld [vmem:[#allocation62_spill] sm:$0xff]  ;;  %v2115_v38 = vmul.f32 %v4451_v61, %v4451_v61  ;;  %v2120_v61 = vmul.f32 %v4471_v3, %v4471_v3  ;;  %v2125_v3 = vmul.f32 %v4491_v44, %v4491_v44 }
 0x28a   :  { %v2092_v43 = vmul.f32 %v5249_v24, %v5249_v24  ;;  %v2130_v44 = vmul.f32 %v4511_v14, %v4511_v14 }
 0x28b   :  { %v2211_v36 = vadd.f32 %v2210_v29, %v2084_v11  ;;  %v5250_v29 = vld [vmem:[#allocation58_spill] sm:$0xff] }
 0x28c   :  { %v2093_v59 = vmul.f32 %v5250_v29, %v5250_v29 }
 0x28d   :  { %v2212_v23 = vadd.f32 %v2211_v36, %v2085_v2  ;;  %v5251_v36 = vld [vmem:[#allocation60_spill] sm:$0xff] }
 0x28e   :  { %v2094_v34 = vmul.f32 %v5251_v36, %v5251_v36 }
 0x28f   :  { %v2213_v0 = vadd.f32 %v2212_v23, %v2086_v42  ;;  %v5252_v23 = vld [vmem:[#allocation65_spill] sm:$0xff] }
 0x290   :  { %v2095_v55 = vmul.f32 %v5252_v23, %v5252_v23 }
 0x291   :  { %v2214_v40 = vadd.f32 %v2213_v0, %v2087_v15  ;;  %v5253_v0 = vld [vmem:[#allocation69_spill] sm:$0xff] }
 0x292   :  { %v2096_v10 = vmul.f32 %v5253_v0, %v5253_v0 }
 0x293   :  { %v2215_v53 = vadd.f32 %v2214_v40, %v2088_v4  ;;  %v5254_v40 = vld [vmem:[#allocation64_spill] sm:$0xff] }
 0x294   :  { %v2097_v5 = vmul.f32 %v5254_v40, %v5254_v40 }
 0x295   :  { %v2216_v9 = vadd.f32 %v2215_v53, %v2089_v56  ;;  %v2098_v53 = vmul.f32 %v4383_v26, %v4383_v26  ;;  %v2103_v26 = vmul.f32 %v4403_v17, %v4403_v17  ;;  %v2108_v17 = vmul.f32 %v4423_v48, %v4423_v48 }
 0x296   :  { %v2113_v48 = vmul.f32 %v4443_v41, %v4443_v41  ;;  %v2118_v41 = vmul.f32 %v4463_v6, %v4463_v6  ;;  %v2123_v6 = vmul.f32 %v4483_v52, %v4483_v52  ;;  %v2128_v52 = vmul.f32 %v4503_v63, %v4503_v63 }
 0x297   :  { %v2217_v1 = vadd.f32 %v2216_v9, %v2090_v37  ;;  %v2099_v37 = vmul.f32 %v4387_v22, %v4387_v22  ;;  %v2104_v22 = vmul.f32 %v4407_v8, %v4407_v8  ;;  %v2109_v8 = vmul.f32 %v4427_v25, %v4427_v25 }
 0x298   :  { %v2114_v25 = vmul.f32 %v4447_v54, %v4447_v54  ;;  %v2119_v54 = vmul.f32 %v4467_v20, %v4467_v20  ;;  %v2124_v20 = vmul.f32 %v4487_v31, %v4487_v31  ;;  %v2129_v31 = vmul.f32 %v4507_v16, %v4507_v16 }
 0x299   :  { %v2218_v11 = vadd.f32 %v2217_v1, %v2091_v46  ;;  %v2101_v1 = vmul.f32 %v4395_v12, %v4395_v12  ;;  %v2106_v12 = vmul.f32 %v4415_v21, %v4415_v21  ;;  %v2111_v21 = vmul.f32 %v4435_v45, %v4435_v45 }
 0x29a   :  { %v2116_v45 = vmul.f32 %v4455_v51, %v4455_v51  ;;  %v2121_v51 = vmul.f32 %v4475_v13, %v4475_v13  ;;  %v2126_v13 = vmul.f32 %v4495_v7, %v4495_v7  ;;  %v2131_v7 = vmul.f32 %v4515_v49, %v4515_v49 }
 0x29b   :  { %v2219_v2 = vadd.f32 %v2218_v11, %v2092_v43  ;;  %v2102_v43 = vmul.f32 %v4399_v19, %v4399_v19  ;;  %v2107_v19 = vmul.f32 %v4419_v47, %v4419_v47  ;;  %v2112_v47 = vmul.f32 %v4439_v35, %v4439_v35 }
 0x29c   :  { %v2117_v35 = vmul.f32 %v4459_v57, %v4459_v57  ;;  %v2122_v57 = vmul.f32 %v4479_v39, %v4479_v39  ;;  %v2127_v39 = vmul.f32 %v4499_v33, %v4499_v33  ;;  %v2132_v33 = vmul.f32 %v4519_v58, %v4519_v58 }
 0x29d   :  { %v2220_v42 = vadd.f32 %v2219_v2, %v2093_v59  ;;  %v2133_v63 = vmul.f32 %v4523_v28, %v4523_v28 }
 0x29f   :  { %v2221_v15 = vadd.f32 %v2220_v42, %v2094_v34 }
 0x2a1   :  { %v2222_v4 = vadd.f32 %v2221_v15, %v2095_v55 }
 0x2a3   :  { %v2223_v56 = vadd.f32 %v2222_v4, %v2096_v10 }
 0x2a5   :  { %v2224_v32 = vadd.f32 %v2223_v56, %v2097_v5 }
 0x2a7   :  { %v2225_v9 = vadd.f32 %v2224_v32, %v2098_v53 }
 0x2a9   :  { %v2226_v46 = vadd.f32 %v2225_v9, %v2099_v37 }
 0x2ab   :  { %v2227_v24 = vadd.f32 %v2226_v46, %v2100_v62 }
 0x2ad   :  { %v2228_v11 = vadd.f32 %v2227_v24, %v2101_v1 }
 0x2af   :  { %v2229_v29 = vadd.f32 %v2228_v11, %v2102_v43 }
 0x2b1   :  { %v2230_v59 = vadd.f32 %v2229_v29, %v2103_v26 }
 0x2b3   :  { %v2231_v2 = vadd.f32 %v2230_v59, %v2104_v22 }
 0x2b5   :  { %v2232_v36 = vadd.f32 %v2231_v2, %v2105_v18 }
 0x2b7   :  { %v2233_v34 = vadd.f32 %v2232_v36, %v2106_v12  ;;  %v5255_v12 = vld [vmem:[#allocation67_spill] sm:$0xff] }
 0x2b8   :  { %v2134_v16 = vmul.f32 %v5255_v12, %v5255_v12 }
 0x2b9   :  { %v2234_v42 = vadd.f32 %v2233_v34, %v2107_v19  ;;  %v5256_v19 = vld [vmem:[#allocation72_spill] sm:$0xff] }
 0x2ba   :  { %v2135_v14 = vmul.f32 %v5256_v19, %v5256_v19 }
 0x2bb   :  { %v2235_v23 = vadd.f32 %v2234_v42, %v2108_v17  ;;  %v5257_v17 = vld [vmem:[#allocation76_spill] sm:$0xff] }
 0x2bc   :  { %v2136_v49 = vmul.f32 %v5257_v17, %v5257_v17 }
 0x2bd   :  { %v2236_v55 = vadd.f32 %v2235_v23, %v2109_v8  ;;  %v5258_v8 = vld [vmem:[#allocation71_spill] sm:$0xff] }
 0x2be   :  { %v2137_v58 = vmul.f32 %v5258_v8, %v5258_v8 }
 0x2bf   :  { %v2237_v15 = vadd.f32 %v2236_v55, %v2110_v60  ;;  %v5259_v60 = vld [vmem:[#allocation74_spill] sm:$0xff] }
 0x2c0   :  { %v2138_v28 = vmul.f32 %v5259_v60, %v5259_v60 }
 0x2c1   :  { %v2238_v0 = vadd.f32 %v2237_v15, %v2111_v21  ;;  %v5260_v21 = vld [vmem:[#allocation80_spill] sm:$0xff] }
 0x2c2   :  { %v2139_v15 = vmul.f32 %v5260_v21, %v5260_v21 }
 0x2c3   :  { %v2239_v10 = vadd.f32 %v2238_v0, %v2112_v47  ;;  %v2140_v0 = vmul.f32 %v4551_v30, %v4551_v30 }
 0x2c5   :  { %v2240_v4 = vadd.f32 %v2239_v10, %v2113_v48  ;;  %v2141_v10 = vmul.f32 %v4555_v27, %v4555_v27 }
 0x2c7   :  { %v2241_v40 = vadd.f32 %v2240_v4, %v2114_v25  ;;  %v5261_v4 = vld [vmem:[#allocation83_spill] sm:$0xff] }
 0x2c9   :  { %v2242_v5 = vadd.f32 %v2241_v40, %v2115_v38  ;;  %v2142_v38 = vmul.f32 %v5261_v4, %v5261_v4 }
 0x2cb   :  { %v2243_v56 = vadd.f32 %v2242_v5, %v2116_v45  ;;  %v5262_v45 = vld [vmem:[#allocation79_spill] sm:$0xff] }
 0x2cc   :  { %v2143_v5 = vmul.f32 %v5262_v45, %v5262_v45 }
 0x2cd   :  { %v2244_v53 = vadd.f32 %v2243_v56, %v2117_v35  ;;  %v2144_v56 = vmul.f32 %v4567_v50, %v4567_v50 }
 0x2cf   :  { %v2245_v32 = vadd.f32 %v2244_v53, %v2118_v41  ;;  %v5263_v53 = vld [vmem:[#allocation82_spill] sm:$0xff] }
 0x2d0   :  { %v2145_v30 = vmul.f32 %v5263_v53, %v5263_v53 }
 0x2d1   :  { %v2246_v37 = vadd.f32 %v2245_v32, %v2119_v54  ;;  %v5264_v32 = vld [vmem:[#allocation10_spill] sm:$0xff] }
 0x2d2   :  { %v2146_v27 = vmul.f32 %v5264_v32, %v5264_v32  ;;  %v5283_v32 = vld [vmem:[#allocation66_spill] sm:$0xff] }
 0x2d3   :  { %v2247_v9 = vadd.f32 %v2246_v37, %v2120_v61  ;;  %v5265_v37 = vld [vmem:[#allocation12_spill] sm:$0xff] }
 0x2d5   :  { %v2248_v62 = vadd.f32 %v2247_v9, %v2121_v51  ;;  %v2147_v51 = vmul.f32 %v5265_v37, %v5265_v37 }
 0x2d7   :  { %v2249_v46 = vadd.f32 %v2248_v62, %v2122_v57  ;;  %v5266_v57 = vld [vmem:[#allocation8_spill] sm:$0xff] }
 0x2d8   :  { %v2148_v62 = vmul.f32 %v5266_v57, %v5266_v57 }
 0x2d9   :  { %v2250_v1 = vadd.f32 %v2249_v46, %v2123_v6  ;;  %v5267_v46 = vld [vmem:[#allocation49_spill] sm:$0xff] }
 0x2da   :  { %v2149_v50 = vmul.f32 %v5267_v46, %v5267_v46 }
 0x2db   :  { %v2251_v24 = vadd.f32 %v2250_v1, %v2124_v20  ;;  %v5268_v1 = vld [vmem:[#allocation54_spill] sm:$0xff] }
 0x2dd   :  { %v2252_v43 = vadd.f32 %v2251_v24, %v2125_v3  ;;  %v2150_v3 = vmul.f32 %v5268_v1, %v5268_v1 }
 0x2df   :  { %v2253_v11 = vadd.f32 %v2252_v43, %v2126_v13  ;;  %v5269_v13 = vld [vmem:[#allocation57_spill] sm:$0xff] }
 0x2e0   :  { %v2151_v43 = vmul.f32 %v5269_v13, %v5269_v13 }
 0x2e1   :  { %v2254_v26 = vadd.f32 %v2253_v11, %v2127_v39  ;;  %v5270_v11 = vld [vmem:[#allocation52_spill] sm:$0xff] }
 0x2e3   :  { %v2255_v29 = vadd.f32 %v2254_v26, %v2128_v52  ;;  %v2152_v52 = vmul.f32 %v5270_v11, %v5270_v11 }
 0x2e5   :  { %v2256_v22 = vadd.f32 %v2255_v29, %v2129_v31  ;;  %v5271_v31 = vld [vmem:[#allocation56_spill] sm:$0xff] }
 0x2e6   :  { %v2153_v29 = vmul.f32 %v5271_v31, %v5271_v31 }
 0x2e7   :  { %v2257_v59 = vadd.f32 %v2256_v22, %v2130_v44  ;;  %v5272_v22 = vld [vmem:[#allocation61_spill] sm:$0xff] }
 0x2e9   :  { %v2258_v18 = vadd.f32 %v2257_v59, %v2131_v7  ;;  %v2154_v7 = vmul.f32 %v5272_v22, %v5272_v22 }
 0x2eb   :  { %v2259_v2 = vadd.f32 %v2258_v18, %v2132_v33  ;;  %v5273_v33 = vld [vmem:[#allocation63_spill] sm:$0xff] }
 0x2ec   :  { %v2155_v18 = vmul.f32 %v5273_v33, %v5273_v33 }
 0x2ed   :  { %v2260_v36 = vadd.f32 %v2259_v2, %v2133_v63  ;;  %v5274_v2 = vld [vmem:[#allocation68_spill] sm:$0xff] }
 0x2ee   :  { %v2156_v12 = vmul.f32 %v5274_v2, %v5274_v2 }
 0x2ef   :  { %v2261_v34 = vadd.f32 %v2260_v36, %v2134_v16  ;;  %v5275_v36 = vld [vmem:[#allocation78_spill] sm:$0xff] }
 0x2f0   :  { %v2157_v19 = vmul.f32 %v5275_v36, %v5275_v36 }
 0x2f1   :  { %v2262_v42 = vadd.f32 %v2261_v34, %v2135_v14  ;;  %v5276_v34 = vld [vmem:[#allocation73_spill] sm:$0xff] }
 0x2f2   :  { %v2158_v17 = vmul.f32 %v5276_v34, %v5276_v34 }
 0x2f3   :  { %v2263_v23 = vadd.f32 %v2262_v42, %v2136_v49  ;;  %v5277_v42 = vld [vmem:[#allocation77_spill] sm:$0xff] }
 0x2f4   :  { %v2159_v8 = vmul.f32 %v5277_v42, %v5277_v42 }
 0x2f5   :  { %v2264_v55 = vadd.f32 %v2263_v23, %v2137_v58  ;;  %v5278_v23 = vld [vmem:[#allocation85_spill] sm:$0xff] }
 0x2f6   :  { %v2160_v60 = vmul.f32 %v5278_v23, %v5278_v23 }
 0x2f7   :  { %v2265_v47 = vadd.f32 %v2264_v55, %v2138_v28  ;;  %v5279_v55 = vld [vmem:[#allocation86_spill] sm:$0xff] }
 0x2f8   :  { %v2161_v21 = vmul.f32 %v5279_v55, %v5279_v55 }
 0x2f9   :  { %v2266_v48 = vadd.f32 %v2265_v47, %v2139_v15  ;;  %v5280_v47 = vld [vmem:[#allocation87_spill] sm:$0xff] }
 0x2fb   :  { %v2267_v25 = vadd.f32 %v2266_v48, %v2140_v0  ;;  %v2162_v0 = vmul.f32 %v5280_v47, %v5280_v47 }
 0x2fd   :  { %v2268_v40 = vadd.f32 %v2267_v25, %v2141_v10  ;;  %v5281_v10 = vld [vmem:[#allocation88_spill] sm:$0xff] }
 0x2fe   :  { %v2163_v25 = vmul.f32 %v5281_v10, %v5281_v10 }
 0x2ff   :  { %v2269_v35 = vadd.f32 %v2268_v40, %v2142_v38  ;;  %v5282_v38 = vld [vmem:[#allocation89_spill] sm:$0xff] }
 0x300   :  { %v2164_v40 = vmul.f32 %v5282_v38, %v5282_v38 }
 0x301   :  { %v2270_v41 = vadd.f32 %v2269_v35, %v2143_v5 }
 0x303   :  { %v2271_v54 = vadd.f32 %v2270_v41, %v2144_v56 }
 0x305   :  { %v2272_v61 = vadd.f32 %v2271_v54, %v2145_v30 }
 0x307   :  { %v2273_v9 = vadd.f32 %v2272_v61, %v2146_v27 }
 0x309   :  { %v2274_v6 = vadd.f32 %v2273_v9, %v2147_v51 }
 0x30b   :  { %v2275_v20 = vadd.f32 %v2274_v6, %v2148_v62 }
 0x30d   :  { %v2276_v24 = vadd.f32 %v2275_v20, %v2149_v50 }
 0x30f   :  { %v2277_v39 = vadd.f32 %v2276_v24, %v2150_v3 }
 0x311   :  { %v2278_v26 = vadd.f32 %v2277_v39, %v2151_v43 }
 0x313   :  { %v2279_v44 = vadd.f32 %v2278_v26, %v2152_v52 }
 0x315   :  { %v2280_v59 = vadd.f32 %v2279_v44, %v2153_v29 }
 0x317   :  { %v2281_v63 = vadd.f32 %v2280_v59, %v2154_v7 }
 0x319   :  { %v2282_v16 = vadd.f32 %v2281_v63, %v2155_v18 }
 0x31b   :  { %v2283_v14 = vadd.f32 %v2282_v16, %v2156_v12 }
 0x31d   :  { %v2284_v49 = vadd.f32 %v2283_v14, %v2157_v19 }
 0x31f   :  { %v2285_v58 = vadd.f32 %v2284_v49, %v2158_v17 }
 0x321   :  { %v2286_v28 = vadd.f32 %v2285_v58, %v2159_v8 }
 0x323   :  { %v2287_v15 = vadd.f32 %v2286_v28, %v2160_v60 }
 0x325   :  { %v2288_v48 = vadd.f32 %v2287_v15, %v2161_v21 }
 0x327   :  { %v2289_v4 = vadd.f32 %v2288_v48, %v2162_v0 }
 0x329   :  { %v2290_v45 = vadd.f32 %v2289_v4, %v2163_v25 }
 0x32b   :  { %v2291_v5 = vadd.f32 %v2290_v45, %v2164_v40 }
 0x32d   :  { %v2292_v35 = vrot.slane %v2291_v5, 4 }
 0x32f   :  { %v2293_v56 = vadd.f32 %v2292_v35, %v2291_v5 }
 0x331   :  { %v2294_v41 = vrot.slane %v2293_v56, 2 }
 0x333   :  { %v2295_v53 = vadd.f32 %v2294_v41, %v2293_v56 }
 0x335   :  { %v2296_v30 = vrot.slane %v2295_v53, 1 }
 0x337   :  { %v2297_v54 = vadd.f32 %v2296_v30, %v2295_v53 }
 0x339   :  { %v2299_v27 = vsel %vm2298_vm0, %v5283_v32, %v2297_v54 }
 0x33a   :  { %2300 = vst [vmem:[%s4912_s3] sm:$0x3] %v2299_v27 }

// kernel: bottleneck_forward.6
= control target key start
LH: loop header
LB: loop body
LE: loop exit
PB: predicated region body
PF: predicated region fallthrough
CT: control target
= control target key end

     0   :  { %vm2510_vm0 = vcmask 1040384   ;;  %s5650_s3 = inlined_call_operand.vmem [shape: bf16[128,128], index: 3, kind: input, shape index: {}]   ;;  %s5651_s0 = inlined_call_operand.vmem [shape: bf16[1024,128], index: 0, kind: input, shape index: {}]   ;;  %s5652_s1 = inlined_call_operand.vmem [shape: f32[1,128], index: 1, kind: input, shape index: {}]   ;;  %s5653_s2 = inlined_call_operand.vmem [shape: f32[1,128], index: 2, kind: input, shape index: {}]   ;;  %s5654_s4 = inlined_call_operand.vmem [shape: bf16[1024,128], index: 4, kind: output, shape index: {0}]   ;;  %s5655_s5 = inlined_call_operand.vmem [shape: f32[1,2,128], index: 5, kind: output, shape index: {1}]  }
   0x1   :  { %v3721_v0 = vld [vmem:[%s5650_s3] sm:$0xff]   ;;  %v3722_v1 = vld [vmem:[%s5650_s3 + $0x8] sm:$0xff]   ;;  %v3723_v2 = vld [vmem:[%s5650_s3 + $0x10] sm:$0xff]  }
   0x2   :  { %3561 = vmatprep.subr.bf16.mxu0 %v3721_v0  ;;  %3705 = vmatprep.subr.bf16.mxu1 %v3721_v0  ;;  %v3724_v3 = vld [vmem:[%s5650_s3 + $0x18] sm:$0xff]   ;;  %v2788_v4 = vld [vmem:[%s5651_s0] sm:$0xff]   ;;  %v3363_v11 = vld [vmem:[%s5651_s0 + $0x8] sm:$0xff]  }
   0x3   :  { %3562 = vmatpush3.bf16.msra.mxu0 %v3721_v0  ;;  %3713 = vmatpush3.bf16.msra.mxu1 %v3721_v0  ;;  %v3779_v5 = vld [vmem:[%s5652_s1] ss:$0 sm:$0xff]  ;;  %v2789_v6 = vunpack.c.l.bf16 %v2788_v4  ;;  %v2790_v7 = vunpack.c.h.bf16 %v2788_v4  ;;  %v3364_v13 = vld [vmem:[%s5651_s0 + $0x10] sm:$0xff]   ;;  %v2793_v16 = vunpack.c.l.bf16 %v3363_v11  ;;  %v2794_v17 = vunpack.c.h.bf16 %v3363_v11  ;;  %v3726_v22 = vld [vmem:[%s5650_s3 + $0x28] sm:$0xff]  }
   0x4   :  { %3563 = vmatprep.subr.bf16.mxu0 %v3722_v1  ;;  %3706 = vmatprep.subr.bf16.mxu1 %v3722_v1  ;;  %v3784_v8 = vld [vmem:[%s5653_s2] ss:$0 sm:$0xff]  ;;  %v2797_v20 = vunpack.c.l.bf16 %v3364_v13  ;;  %v2798_v21 = vunpack.c.h.bf16 %v3364_v13  ;;  %v3365_v26 = vld [vmem:[%s5651_s0 + $0x18] sm:$0xff]   ;;  %v3727_v29 = vld [vmem:[%s5650_s3 + $0x30] sm:$0xff]  }
   0x5   :  { %v283_v9 = vmul.f32 %v2789_v6, %v3779_v5  ;;  %v284_v10 = vmul.f32 %v2790_v7, %v3779_v5  ;;  %v3725_v12 = vld [vmem:[%s5650_s3 + $0x20] sm:$0xff]   ;;  %v285_v24 = vmul.f32 %v2793_v16, %v3779_v5  ;;  %v286_v25 = vmul.f32 %v2794_v17, %v3779_v5  ;;  %v3728_v39 = vld [vmem:[%s5650_s3 + $0x38] sm:$0xff]   ;;  %v3367_v48 = vld [vmem:[%s5651_s0 + $0x28] sm:$0xff]  }
   0x6   :  { %v287_v27 = vmul.f32 %v2797_v20, %v3779_v5  ;;  %v288_v28 = vmul.f32 %v2798_v21, %v3779_v5  ;;  %v3366_v30 = vld [vmem:[%s5651_s0 + $0x20] sm:$0xff]   ;;  %v2801_v31 = vunpack.c.l.bf16 %v3365_v26  ;;  %v2802_v32 = vunpack.c.h.bf16 %v3365_v26  ;;  %v3368_v49 = vld [vmem:[%s5651_s0 + $0x30] sm:$0xff]   ;;  %v3373_v26 = vld [vmem:[%s5651_s0 + $0x58] sm:$0xff]  }
   0x7   :  { %3564 = vmatpush3.bf16.msra.mxu0 %v3722_v1  ;;  %3714 = vmatpush3.bf16.msra.mxu1 %v3722_v1  ;;  %v418_v14 = vadd.f32 %v3784_v8, %v283_v9  ;;  %v419_v15 = vadd.f32 %v3784_v8, %v284_v10  ;;  %v420_v33 = vadd.f32 %v3784_v8, %v285_v24  ;;  %v2805_v37 = vunpack.c.l.bf16 %v3366_v30  ;;  %v3369_v1 = vld [vmem:[%s5651_s0 + $0x38] sm:$0xff]   ;;  %v3370_v6 = vld [vmem:[%s5651_s0 + $0x40] sm:$0xff]   ;;  %v3372_v21 = vld [vmem:[%s5651_s0 + $0x50] sm:$0xff]  }
   0x8   :  { %3565 = vmatprep.subr.bf16.mxu0 %v3723_v2  ;;  %3707 = vmatprep.subr.bf16.mxu1 %v3723_v2  ;;  %v421_v34 = vadd.f32 %v3784_v8, %v286_v25  ;;  %v422_v35 = vadd.f32 %v3784_v8, %v287_v27  ;;  %v423_v36 = vadd.f32 %v3784_v8, %v288_v28  ;;  %v2806_v38 = vunpack.c.h.bf16 %v3366_v30 }
   0x9   :  { %v546_v18 = vmax.f32 %v418_v14, 0.0  ;;  %v547_v19 = vmax.f32 %v419_v15, 0.0  ;;  %v289_v40 = vmul.f32 %v2801_v31, %v3779_v5  ;;  %v290_v41 = vmul.f32 %v2802_v32, %v3779_v5 }
   0xa   :  { %v548_v42 = vmax.f32 %v420_v33, 0.0  ;;  %v549_v43 = vmax.f32 %v421_v34, 0.0  ;;  %v550_v44 = vmax.f32 %v422_v35, 0.0  ;;  %v551_v45 = vmax.f32 %v423_v36, 0.0 }
   0xb   :  { %3566 = vmatpush3.bf16.msra.mxu0 %v3723_v2  ;;  %3715 = vmatpush3.bf16.msra.mxu1 %v3723_v2  ;;  %v674_v23 = vpack.c.bf16 %v547_v19, %v546_v18  ;;  %v291_v46 = vmul.f32 %v2805_v37, %v3779_v5  ;;  %v292_v47 = vmul.f32 %v2806_v38, %v3779_v5  ;;  %v2809_v53 = vunpack.c.l.bf16 %v3367_v48  ;;  %v3371_v18 = vld [vmem:[%s5651_s0 + $0x48] sm:$0xff]  }
   0xc   :  { %3567 = vmatprep.subr.bf16.mxu0 %v3724_v3  ;;  %3708 = vmatprep.subr.bf16.mxu1 %v3724_v3  ;;  %v424_v50 = vadd.f32 %v3784_v8, %v289_v40  ;;  %v425_v51 = vadd.f32 %v3784_v8, %v290_v41  ;;  %v675_v52 = vpack.c.bf16 %v549_v43, %v548_v42  ;;  %v2810_v54 = vunpack.c.h.bf16 %v3367_v48 }
   0xd   :  { %3577 = vmatprep.mubr.bf16.mxu0 %v674_v23  ;;  %v2813_v55 = vunpack.c.l.bf16 %v3368_v49  ;;  %v676_v56 = vpack.c.bf16 %v551_v45, %v550_v44  ;;  %v426_v57 = vadd.f32 %v3784_v8, %v291_v46  ;;  %v427_v58 = vadd.f32 %v3784_v8, %v292_v47  ;;  %v3374_v45 = vld [vmem:[%s5651_s0 + $0x60] sm:$0xff]  }
   0xe   :  { %v2814_v59 = vunpack.c.h.bf16 %v3368_v49  ;;  %v552_v60 = vmax.f32 %v424_v50, 0.0  ;;  %v553_v61 = vmax.f32 %v425_v51, 0.0  ;;  %v293_v62 = vmul.f32 %v2809_v53, %v3779_v5 }
   0xf   :  { %3568 = vmatpush3.bf16.msra.mxu0 %v3724_v3  ;;  %3716 = vmatpush3.bf16.msra.mxu1 %v3724_v3  ;;  %v294_v63 = vmul.f32 %v2810_v54, %v3779_v5  ;;  %v295_v0 = vmul.f32 %v2813_v55, %v3779_v5  ;;  %v554_v2 = vmax.f32 %v426_v57, 0.0  ;;  %v555_v3 = vmax.f32 %v427_v58, 0.0  ;;  %v3375_v57 = vld [vmem:[%s5651_s0 + $0x68] sm:$0xff]  }
  0x10   :  { %3569 = vmatprep.subr.bf16.mxu0 %v3725_v12  ;;  %3709 = vmatprep.subr.bf16.mxu1 %v3725_v12  ;;  %v296_v4 = vmul.f32 %v2814_v59, %v3779_v5  ;;  %v2817_v7 = vunpack.c.l.bf16 %v3369_v1  ;;  %v2818_v9 = vunpack.c.h.bf16 %v3369_v1  ;;  %v677_v10 = vpack.c.bf16 %v553_v61, %v552_v60 }
  0x11   :  { %v428_v11 = vadd.f32 %v3784_v8, %v293_v62  ;;  %v430_v13 = vadd.f32 %v3784_v8, %v295_v0  ;;  %v678_v14 = vpack.c.bf16 %v555_v3, %v554_v2  ;;  %v2821_v16 = vunpack.c.l.bf16 %v3370_v6 }
  0x12   :  { %v431_v15 = vadd.f32 %v3784_v8, %v296_v4  ;;  %v2822_v17 = vunpack.c.h.bf16 %v3370_v6  ;;  %v297_v19 = vmul.f32 %v2817_v7, %v3779_v5  ;;  %v298_v20 = vmul.f32 %v2818_v9, %v3779_v5 }
  0x13   :  { %3570 = vmatpush3.bf16.msra.mxu0 %v3725_v12  ;;  %3717 = vmatpush3.bf16.msra.mxu1 %v3725_v12  ;;  %v429_v12 = vadd.f32 %v3784_v8, %v294_v63  ;;  %v558_v24 = vmax.f32 %v430_v13, 0.0  ;;  %v2825_v25 = vunpack.c.l.bf16 %v3371_v18  ;;  %v299_v28 = vmul.f32 %v2821_v16, %v3779_v5  ;;  %v3378_v16 = vld [vmem:[%s5651_s0 + $0x80] sm:$0xff]  }
  0x14   :  { %3571 = vmatprep.subr.bf16.mxu0 %v3726_v22  ;;  %3710 = vmatprep.subr.bf16.mxu1 %v3726_v22  ;;  %v559_v27 = vmax.f32 %v431_v15, 0.0  ;;  %v2826_v30 = vunpack.c.h.bf16 %v3371_v18  ;;  %v2829_v31 = vunpack.c.l.bf16 %v3372_v21  ;;  %v2830_v32 = vunpack.c.h.bf16 %v3372_v21 }
  0x15   :  { %v557_v23 = vmax.f32 %v429_v12, 0.0  ;;  %v2833_v33 = vunpack.c.l.bf16 %v3373_v26  ;;  %v2834_v34 = vunpack.c.h.bf16 %v3373_v26  ;;  %v432_v36 = vadd.f32 %v3784_v8, %v297_v19  ;;  %v3377_v12 = vld [vmem:[%s5651_s0 + $0x78] sm:$0xff]  }
  0x16   :  { %v433_v37 = vadd.f32 %v3784_v8, %v298_v20  ;;  %v301_v38 = vmul.f32 %v2825_v25, %v3779_v5  ;;  %v434_v40 = vadd.f32 %v3784_v8, %v299_v28  ;;  %v302_v42 = vmul.f32 %v2826_v30, %v3779_v5 }
  0x17   :  { %3572 = vmatpush3.bf16.msra.mxu0 %v3726_v22  ;;  %3718 = vmatpush3.bf16.msra.mxu1 %v3726_v22  ;;  %v556_v22 = vmax.f32 %v428_v11, 0.0  ;;  %v303_v43 = vmul.f32 %v2829_v31, %v3779_v5  ;;  %v304_v44 = vmul.f32 %v2830_v32, %v3779_v5  ;;  %v305_v46 = vmul.f32 %v2833_v33, %v3779_v5  ;;  %v3376_v11 = vld [vmem:[%s5651_s0 + $0x70] sm:$0xff]  }
  0x18   :  { %3573 = vmatprep.subr.bf16.mxu0 %v3727_v29  ;;  %3711 = vmatprep.subr.bf16.mxu1 %v3727_v29  ;;  %v306_v47 = vmul.f32 %v2834_v34, %v3779_v5  ;;  %v560_v48 = vmax.f32 %v432_v36, 0.0  ;;  %v561_v49 = vmax.f32 %v433_v37, 0.0  ;;  %v436_v50 = vadd.f32 %v3784_v8, %v301_v38 }
  0x19   :  { %v679_v35 = vpack.c.bf16 %v557_v23, %v556_v22  ;;  %v562_v51 = vmax.f32 %v434_v40, 0.0  ;;  %v437_v53 = vadd.f32 %v3784_v8, %v302_v42  ;;  %v2837_v54 = vunpack.c.l.bf16 %v3374_v45  ;;  %v3380_v22 = vld [vmem:[%s5651_s0 + $0x90] sm:$0xff]   ;;  %v3382_v40 = vld [vmem:[%s5651_s0 + $0xa0] sm:$0xff]  }
  0x1a   :  { %v438_v55 = vadd.f32 %v3784_v8, %v303_v43  ;;  %v440_v58 = vadd.f32 %v3784_v8, %v305_v46  ;;  %v441_v59 = vadd.f32 %v3784_v8, %v306_v47  ;;  %v2838_v60 = vunpack.c.h.bf16 %v3374_v45 }
  0x1b   :  { %3574 = vmatpush3.bf16.msra.mxu0 %v3727_v29  ;;  %3719 = vmatpush3.bf16.msra.mxu1 %v3727_v29  ;;  %v300_v29 = vmul.f32 %v2822_v17, %v3779_v5  ;;  %v681_v61 = vpack.c.bf16 %v561_v49, %v560_v48  ;;  %v564_v62 = vmax.f32 %v436_v50, 0.0  ;;  %v565_v0 = vmax.f32 %v437_v53, 0.0  ;;  %v3379_v17 = vld [vmem:[%s5651_s0 + $0x88] sm:$0xff]  }
  0x1c   :  { %3575 = vmatprep.subr.bf16.mxu0 %v3728_v39  ;;  %3712 = vmatprep.subr.bf16.mxu1 %v3728_v39  ;;  %v307_v1 = vmul.f32 %v2837_v54, %v3779_v5  ;;  %v2841_v2 = vunpack.c.l.bf16 %v3375_v57  ;;  %v566_v3 = vmax.f32 %v438_v55, 0.0  ;;  %v2842_v6 = vunpack.c.h.bf16 %v3375_v57 }
  0x1d   :  { %v435_v41 = vadd.f32 %v3784_v8, %v300_v29  ;;  %v568_v7 = vmax.f32 %v440_v58, 0.0  ;;  %v569_v9 = vmax.f32 %v441_v59, 0.0  ;;  %v683_v13 = vpack.c.bf16 %v565_v0, %v564_v62 }
  0x1e   :  { %v309_v15 = vmul.f32 %v2841_v2, %v3779_v5  ;;  %v310_v19 = vmul.f32 %v2842_v6, %v3779_v5  ;;  %v2845_v20 = vunpack.c.l.bf16 %v3376_v11  ;;  %v2846_v21 = vunpack.c.h.bf16 %v3376_v11 }
  0x1f   :  { %3576 = vmatpush3.bf16.msra.mxu0 %v3728_v39  ;;  %3720 = vmatpush3.bf16.msra.mxu1 %v3728_v39  ;;  %v680_v39 = vpack.c.bf16 %v559_v27, %v558_v24  ;;  %v685_v23 = vpack.c.bf16 %v569_v9, %v568_v7  ;;  %v2849_v25 = vunpack.c.l.bf16 %v3377_v12  ;;  %v2850_v26 = vunpack.c.h.bf16 %v3377_v12  ;;  %v3381_v27 = vld [vmem:[%s5651_s0 + $0x98] sm:$0xff]  }
  0x20   :  { %v2853_v28 = vunpack.c.l.bf16 %v3378_v16  ;;  %v2854_v29 = vunpack.c.h.bf16 %v3378_v16  ;;  %v2857_v30 = vunpack.c.l.bf16 %v3379_v17  ;;  %v2858_v31 = vunpack.c.h.bf16 %v3379_v17 }
  0x21   :  { %v444_v33 = vadd.f32 %v3784_v8, %v309_v15  ;;  %v2861_v34 = vunpack.c.l.bf16 %v3380_v22  ;;  %v445_v36 = vadd.f32 %v3784_v8, %v310_v19  ;;  %v311_v37 = vmul.f32 %v2845_v20, %v3779_v5  ;;  %v3384_v20 = vld [vmem:[%s5651_s0 + $0xb0] sm:$0xff]  }
  0x22   :  { %3578 = vmatmul.mubr.bf16.vlgmr.msra.gmra.mrb[0].mxu0 %v675_v52  ;;  %v563_v52 = vmax.f32 %v435_v41, 0.0  ;;  %v2865_v38 = vunpack.c.l.bf16 %v3381_v27  ;;  %v312_v42 = vmul.f32 %v2846_v21, %v3779_v5  ;;  %v313_v43 = vmul.f32 %v2849_v25, %v3779_v5 }
  0x23   :  { %3581 = vmatprep.mubr.bf16.mxu0 %v676_v56  ;;  %v439_v56 = vadd.f32 %v3784_v8, %v304_v44  ;;  %v314_v44 = vmul.f32 %v2850_v26, %v3779_v5  ;;  %v315_v45 = vmul.f32 %v2853_v28, %v3779_v5  ;;  %v316_v46 = vmul.f32 %v2854_v29, %v3779_v5 }
  0x24   :  { %v682_v63 = vpack.c.bf16 %v563_v52, %v562_v51  ;;  %v317_v47 = vmul.f32 %v2857_v30, %v3779_v5  ;;  %v318_v48 = vmul.f32 %v2858_v31, %v3779_v5  ;;  %v572_v49 = vmax.f32 %v444_v33, 0.0 }
  0x25   :  { %v567_v4 = vmax.f32 %v439_v56, 0.0  ;;  %v319_v50 = vmul.f32 %v2861_v34, %v3779_v5  ;;  %v2869_v52 = vunpack.c.l.bf16 %v3382_v40  ;;  %v573_v53 = vmax.f32 %v445_v36, 0.0  ;;  %v3957_v34 = vld [vmem:[%s5651_s0 + $0xb8] sm:$0xff]  }
  0x26   :  { %v446_v54 = vadd.f32 %v3784_v8, %v311_v37  ;;  %v321_v55 = vmul.f32 %v2865_v38, %v3779_v5  ;;  %v447_v58 = vadd.f32 %v3784_v8, %v312_v42  ;;  %v448_v59 = vadd.f32 %v3784_v8, %v313_v43 }
  0x27   :  { %v684_v18 = vpack.c.bf16 %v567_v4, %v566_v3  ;;  %v450_v62 = vadd.f32 %v3784_v8, %v315_v45  ;;  %v452_v0 = vadd.f32 %v3784_v8, %v317_v47  ;;  %v454_v2 = vadd.f32 %v3784_v8, %v319_v50 }
  0x28   :  { %v2870_v4 = vunpack.c.h.bf16 %v3382_v40  ;;  %v323_v6 = vmul.f32 %v2869_v52, %v3779_v5  ;;  %v574_v7 = vmax.f32 %v446_v54, 0.0  ;;  %v456_v9 = vadd.f32 %v3784_v8, %v321_v55 }
  0x29   :  { %v575_v12 = vmax.f32 %v447_v58, 0.0  ;;  %v578_v16 = vmax.f32 %v450_v62, 0.0  ;;  %v582_v21 = vmax.f32 %v454_v2, 0.0  ;;  %v687_v26 = vpack.c.bf16 %v573_v53, %v572_v49  ;;  %v3397_v53 = vld [vmem:[%s5651_s0 + $0x118] sm:$0xff]   ;;  %v3398_v2 = vld [vmem:[%s5651_s0 + $0x120] sm:$0xff]  }
  0x2a   :  { %3582 = vmatmul.mubr.bf16.gmra.mrb[4].mxu0 %v677_v10  ;;  %v308_v10 = vmul.f32 %v2838_v60, %v3779_v5  ;;  %v449_v60 = vadd.f32 %v3784_v8, %v314_v44  ;;  %v3947_v25 = vadd.f32 %v3784_v8, %v323_v6  ;;  %v2877_v33 = vunpack.c.l.bf16 %v3384_v20  ;;  %v3396_v44 = vld [vmem:[%s5651_s0 + $0x110] sm:$0xff]  }
  0x2b   :  { %3585 = vmatprep.mubr.bf16.mxu0 %v678_v14  ;;  %v442_v14 = vadd.f32 %v3784_v8, %v307_v1  ;;  %v453_v1 = vadd.f32 %v3784_v8, %v318_v48  ;;  %v688_v30 = vpack.c.bf16 %v575_v12, %v574_v7  ;;  %v2878_v37 = vunpack.c.h.bf16 %v3384_v20 }
  0x2c   :  { %v443_v24 = vadd.f32 %v3784_v8, %v308_v10  ;;  %v586_v42 = vmax.f32 %v3947_v25, 0.0  ;;  %v2881_v47 = vunpack.c.l.bf16 %v3957_v34  ;;  %v3984_v50 = vmul.f32 %v2877_v33, %v3779_v5 }
  0x2d   :  { %v570_v32 = vmax.f32 %v442_v14, 0.0  ;;  %v577_v14 = vmax.f32 %v449_v60, 0.0  ;;  %v581_v19 = vmax.f32 %v453_v1, 0.0  ;;  %v3991_v54 = vmul.f32 %v2878_v37, %v3779_v5 }
  0x2e   :  { %v571_v41 = vmax.f32 %v443_v24, 0.0  ;;  %v324_v24 = vmul.f32 %v2870_v4, %v3779_v5  ;;  %v2929_v1 = vunpack.c.l.bf16 %v3397_v53 }
  0x30   :  { %v686_v57 = vpack.c.bf16 %v571_v41, %v570_v32  ;;  %v3967_v41 = vadd.f32 %v3784_v8, %v324_v24  ;;  %v353_v12 = vmul.f32 %v2929_v1, %v3779_v5  ;;  %v2934_v24 = vunpack.c.h.bf16 %v3398_v2 }
  0x32   :  { %3586 = vmatmul.mubr.bf16.gmra.mrb[8].mxu0 %v679_v35  ;;  %v2862_v35 = vunpack.c.h.bf16 %v3380_v22  ;;  %v587_v58 = vmax.f32 %v3967_v41, 0.0  ;;  %v356_v37 = vmul.f32 %v2934_v24, %v3779_v5 }
  0x33   :  { %3589 = vmatprep.mubr.bf16.mxu0 %v680_v39  ;;  %v2866_v39 = vunpack.c.h.bf16 %v3381_v27  ;;  %v584_v27 = vmax.f32 %v456_v9, 0.0 }
  0x34   :  { %v320_v51 = vmul.f32 %v2862_v35, %v3779_v5 }
  0x35   :  { %v322_v56 = vmul.f32 %v2866_v39, %v3779_v5  ;;  %v3395_v39 = vld [vmem:[%s5651_s0 + $0x108] sm:$0xff]  }
  0x36   :  { %v455_v3 = vadd.f32 %v3784_v8, %v320_v51  ;;  %v2921_v52 = vunpack.c.l.bf16 %v3395_v39 }
  0x37   :  { %v457_v10 = vadd.f32 %v3784_v8, %v322_v56  ;;  %v2922_v56 = vunpack.c.h.bf16 %v3395_v39 }
  0x38   :  { %v583_v22 = vmax.f32 %v455_v3, 0.0  ;;  %v349_v60 = vmul.f32 %v2921_v52, %v3779_v5  ;;  %v2882_v52 = vunpack.c.h.bf16 %v3957_v34 }
  0x39   :  { %v585_v28 = vmax.f32 %v457_v10, 0.0 }
  0x3a   :  { %3590 = vmatmul.mubr.bf16.gmra.mrb[12].mxu0 %v681_v61  ;;  %v3383_v61 = vld [vmem:[%s5651_s0 + $0xa8] sm:$0xff]   ;;  %v3964_v40 = vpack.c.bf16 %v583_v22, %v582_v21  ;;  %v484_v6 = vadd.f32 %v3784_v8, %v349_v60  ;;  %v488_v21 = vadd.f32 %v3784_v8, %v353_v12 }
  0x3b   :  { %3593 = vmatprep.mubr.bf16.mxu0 %v682_v63  ;;  %v451_v63 = vadd.f32 %v3784_v8, %v316_v46  ;;  %v2873_v11 = vunpack.c.l.bf16 %v3383_v61  ;;  %v2874_v15 = vunpack.c.h.bf16 %v3383_v61  ;;  %v3973_v45 = vpack.c.bf16 %v585_v28, %v584_v27  ;;  %v3400_v27 = vld [vmem:[%s5651_s0 + $0x130] sm:$0xff]  }
  0x3c   :  { %v2926_v61 = vunpack.c.h.bf16 %v3396_v44 }
  0x3d   :  { %v579_v17 = vmax.f32 %v451_v63, 0.0  ;;  %v325_v29 = vmul.f32 %v2873_v11, %v3779_v5  ;;  %v326_v32 = vmul.f32 %v2874_v15, %v3779_v5  ;;  %v350_v63 = vmul.f32 %v2922_v56, %v3779_v5 }
  0x3e   :  { %v352_v7 = vmul.f32 %v2926_v61, %v3779_v5  ;;  %v2930_v11 = vunpack.c.h.bf16 %v3397_v53  ;;  %v612_v15 = vmax.f32 %v484_v6, 0.0  ;;  %v329_v53 = vmul.f32 %v2881_v47, %v3779_v5 }
  0x3f   :  { %v690_v35 = vpack.c.bf16 %v579_v17, %v578_v16  ;;  %v3976_v46 = vadd.f32 %v3784_v8, %v325_v29  ;;  %v3981_v49 = vadd.f32 %v3784_v8, %v326_v32  ;;  %v485_v9 = vadd.f32 %v3784_v8, %v350_v63 }
  0x40   :  { %v487_v16 = vadd.f32 %v3784_v8, %v352_v7  ;;  %v2933_v17 = vunpack.c.l.bf16 %v3398_v2  ;;  %v354_v20 = vmul.f32 %v2930_v11, %v3779_v5  ;;  %v330_v11 = vmul.f32 %v2882_v52, %v3779_v5 }
  0x41   :  { %v588_v3 = vmax.f32 %v3976_v46, 0.0  ;;  %v4051_v12 = vadd.f32 %v3784_v8, %v329_v53  ;;  %v3403_v46 = vld [vmem:[%s5651_s0 + $0x148] sm:$0xff]  }
  0x42   :  { %3594 = vmatmul.mubr.bf16.gmra.mrb[16].mxu0 %v683_v13  ;;  %v576_v13 = vmax.f32 %v448_v59, 0.0  ;;  %v615_v22 = vmax.f32 %v487_v16, 0.0  ;;  %v489_v29 = vadd.f32 %v3784_v8, %v354_v20 }
  0x43   :  { %3597 = vmatprep.mubr.bf16.mxu0 %v684_v18  ;;  %v580_v18 = vmax.f32 %v452_v0, 0.0 }
  0x44   :  { %v689_v31 = vpack.c.bf16 %v577_v14, %v576_v13  ;;  %v3399_v13 = vld [vmem:[%s5651_s0 + $0x128] sm:$0xff]  }
  0x45   :  { %v3959_v36 = vpack.c.bf16 %v581_v19, %v580_v18  ;;  %v613_v18 = vmax.f32 %v485_v9, 0.0  ;;  %v2938_v32 = vunpack.c.h.bf16 %v3399_v13 }
  0x47   :  { %v707_v28 = vpack.c.bf16 %v613_v18, %v612_v15 }
  0x4a   :  { %3598 = vmatmul.mubr.bf16.gmra.mrb[20].mxu0 %v685_v23  ;;  %v3394_v23 = vld [vmem:[%s5651_s0 + $0x100] sm:$0xff]  }
  0x4b   :  { %3601 = vmatprep.mubr.bf16.mxu0 %v686_v57  ;;  %v2917_v38 = vunpack.c.l.bf16 %v3394_v23  ;;  %v2918_v43 = vunpack.c.h.bf16 %v3394_v23  ;;  %v2925_v57 = vunpack.c.l.bf16 %v3396_v44  ;;  %v355_v23 = vmul.f32 %v2933_v17, %v3779_v5 }
  0x4c   :  { %v617_v44 = vmax.f32 %v489_v29, 0.0 }
  0x4d   :  { %v347_v48 = vmul.f32 %v2917_v38, %v3779_v5  ;;  %v348_v51 = vmul.f32 %v2918_v43, %v3779_v5  ;;  %v351_v0 = vmul.f32 %v2925_v57, %v3779_v5  ;;  %v490_v38 = vadd.f32 %v3784_v8, %v355_v23  ;;  %v3386_v43 = vld [vmem:[%s5651_s0 + $0xc0] sm:$0xff]  }
  0x4e   :  { %v589_v57 = vmax.f32 %v3981_v49, 0.0  ;;  %v2885_v63 = vunpack.c.l.bf16 %v3386_v43 }
  0x4f   :  { %v482_v55 = vadd.f32 %v3784_v8, %v347_v48  ;;  %v483_v59 = vadd.f32 %v3784_v8, %v348_v51  ;;  %v486_v10 = vadd.f32 %v3784_v8, %v351_v0  ;;  %v2941_v48 = vunpack.c.l.bf16 %v3400_v27 }
  0x50   :  { %v2942_v51 = vunpack.c.h.bf16 %v3400_v27  ;;  %v618_v56 = vmax.f32 %v490_v38, 0.0  ;;  %v331_v15 = vmul.f32 %v2885_v63, %v3779_v5  ;;  %v3388_v27 = vld [vmem:[%s5651_s0 + $0xd0] sm:$0xff]  }
  0x51   :  { %v610_v62 = vmax.f32 %v482_v55, 0.0  ;;  %v611_v4 = vmax.f32 %v483_v59, 0.0  ;;  %v614_v19 = vmax.f32 %v486_v10, 0.0  ;;  %v491_v55 = vadd.f32 %v3784_v8, %v356_v37 }
  0x52   :  { %3602 = vmatmul.mubr.bf16.gmra.mrb[24].mxu0 %v687_v26  ;;  %v2937_v26 = vunpack.c.l.bf16 %v3399_v13  ;;  %v462_v59 = vadd.f32 %v3784_v8, %v3984_v50  ;;  %v359_v60 = vmul.f32 %v2941_v48, %v3779_v5  ;;  %v360_v61 = vmul.f32 %v2942_v51, %v3779_v5 }
  0x53   :  { %3605 = vmatprep.mubr.bf16.mxu0 %v688_v30  ;;  %v706_v14 = vpack.c.bf16 %v611_v4, %v610_v62  ;;  %v616_v30 = vmax.f32 %v488_v21, 0.0  ;;  %v708_v33 = vpack.c.bf16 %v615_v22, %v614_v19  ;;  %v3402_v62 = vld [vmem:[%s5651_s0 + $0x140] sm:$0xff]   ;;  %v619_v34 = vmax.f32 %v491_v55, 0.0  ;;  %v3389_v55 = vld [vmem:[%s5651_s0 + $0xd8] sm:$0xff]  }
  0x54   :  { %v357_v39 = vmul.f32 %v2937_v26, %v3779_v5  ;;  %v494_v4 = vadd.f32 %v3784_v8, %v359_v60  ;;  %v495_v6 = vadd.f32 %v3784_v8, %v360_v61  ;;  %v2949_v7 = vunpack.c.l.bf16 %v3402_v62 }
  0x55   :  { %3641 = vmatprep.mubr.bf16.mxu1 %v706_v14  ;;  %v709_v1 = vpack.c.bf16 %v617_v44, %v616_v30  ;;  %v710_v50 = vpack.c.bf16 %v619_v34, %v618_v56  ;;  %v2950_v9 = vunpack.c.h.bf16 %v3402_v62  ;;  %v463_v10 = vadd.f32 %v3784_v8, %v3991_v54  ;;  %v3405_v62 = vld [vmem:[%s5651_s0 + $0x158] sm:$0xff]  }
  0x56   :  { %3642 = vmatmul.mubr.bf16.vlgmr.msra.gmra.mrb[0].mxu1 %v707_v28  ;;  %v492_v2 = vadd.f32 %v3784_v8, %v357_v39  ;;  %v2886_v13 = vunpack.c.h.bf16 %v3386_v43  ;;  %v694_v14 = vpack.c.bf16 %v587_v58, %v586_v42  ;;  %v4063_v54 = vpack.c.bf16 %v589_v57, %v588_v3  ;;  %v3404_v3 = vld [vmem:[%s5651_s0 + $0x150] sm:$0xff]  }
  0x57   :  { %3645 = vmatprep.mubr.bf16.mxu1 %v708_v33  ;;  %v590_v17 = vmax.f32 %v462_v59, 0.0  ;;  %v622_v41 = vmax.f32 %v494_v4, 0.0  ;;  %v623_v42 = vmax.f32 %v495_v6, 0.0  ;;  %v363_v58 = vmul.f32 %v2949_v7, %v3779_v5 }
  0x58   :  { %v620_v25 = vmax.f32 %v492_v2, 0.0  ;;  %v364_v19 = vmul.f32 %v2950_v9, %v3779_v5  ;;  %v591_v20 = vmax.f32 %v463_v10, 0.0  ;;  %v465_v21 = vadd.f32 %v3784_v8, %v330_v11 }
  0x59   :  { %v592_v22 = vmax.f32 %v4051_v12, 0.0  ;;  %v332_v24 = vmul.f32 %v2886_v13, %v3779_v5  ;;  %v466_v23 = vadd.f32 %v3784_v8, %v331_v15  ;;  %v2954_v33 = vunpack.c.h.bf16 %v3403_v46 }
  0x5a   :  { %3606 = vmatmul.mubr.bf16.gmra.mrb[28].mxu0 %v689_v31  ;;  %v358_v31 = vmul.f32 %v2938_v32, %v3779_v5  ;;  %v2953_v32 = vunpack.c.l.bf16 %v3403_v46  ;;  %v2957_v37 = vunpack.c.l.bf16 %v3404_v3  ;;  %v712_v38 = vpack.c.bf16 %v623_v42, %v622_v41  ;;  %v3390_v46 = vld [vmem:[%s5651_s0 + $0xe0] sm:$0xff]  }
  0x5b   :  { %3609 = vmatprep.mubr.bf16.mxu0 %v690_v35  ;;  %v3401_v35 = vld [vmem:[%s5651_s0 + $0x138] sm:$0xff]   ;;  %v498_v39 = vadd.f32 %v3784_v8, %v363_v58  ;;  %v499_v43 = vadd.f32 %v3784_v8, %v364_v19  ;;  %v2958_v44 = vunpack.c.h.bf16 %v3404_v3  ;;  %v467_v48 = vadd.f32 %v3784_v8, %v332_v24  ;;  %v3407_v24 = vld [vmem:[%s5651_s0 + $0x168] sm:$0xff]  }
  0x5c   :  { %v2945_v47 = vunpack.c.l.bf16 %v3401_v35  ;;  %v2946_v0 = vunpack.c.h.bf16 %v3401_v35  ;;  %v493_v49 = vadd.f32 %v3784_v8, %v358_v31  ;;  %v696_v31 = vpack.c.bf16 %v591_v20, %v590_v17 }
  0x5d   :  { %v2893_v35 = vunpack.c.l.bf16 %v3388_v27  ;;  %v2894_v53 = vunpack.c.h.bf16 %v3388_v27  ;;  %v593_v59 = vmax.f32 %v465_v21, 0.0  ;;  %v365_v60 = vmul.f32 %v2953_v32, %v3779_v5 }
  0x5e   :  { %v362_v16 = vmul.f32 %v2946_v0, %v3779_v5  ;;  %3646 = vmatmul.mubr.bf16.gmra.mrb[4].mxu1 %v709_v1  ;;  %v621_v18 = vmax.f32 %v493_v49, 0.0  ;;  %v367_v61 = vmul.f32 %v2957_v37, %v3779_v5  ;;  %v594_v63 = vmax.f32 %v466_v23, 0.0 }
  0x5f   :  { %3649 = vmatprep.mubr.bf16.mxu1 %v710_v50  ;;  %v626_v34 = vmax.f32 %v498_v39, 0.0  ;;  %v368_v0 = vmul.f32 %v2958_v44, %v3779_v5  ;;  %v595_v1 = vmax.f32 %v467_v48, 0.0  ;;  %v335_v49 = vmul.f32 %v2893_v35, %v3779_v5  ;;  %v3406_v50 = vld [vmem:[%s5651_s0 + $0x160] sm:$0xff]  }
  0x60   :  { %v497_v29 = vadd.f32 %v3784_v8, %v362_v16  ;;  %v711_v30 = vpack.c.bf16 %v621_v18, %v620_v25  ;;  %v2897_v4 = vunpack.c.l.bf16 %v3389_v55  ;;  %v336_v7 = vmul.f32 %v2894_v53, %v3779_v5 }
  0x61   :  { %v2961_v10 = vunpack.c.l.bf16 %v3405_v62  ;;  %v500_v11 = vadd.f32 %v3784_v8, %v365_v60  ;;  %v502_v13 = vadd.f32 %v3784_v8, %v367_v61  ;;  %v2965_v16 = vunpack.c.l.bf16 %v3406_v50 }
  0x62   :  { %3610 = vmatmul.mubr.bf16.gmra.mrb[32].mxu0 %v3959_v36  ;;  %v361_v36 = vmul.f32 %v2945_v47, %v3779_v5  ;;  %v625_v57 = vmax.f32 %v497_v29, 0.0  ;;  %v627_v47 = vmax.f32 %v499_v43, 0.0  ;;  %v2966_v17 = vunpack.c.h.bf16 %v3406_v50  ;;  %v3408_v29 = vld [vmem:[%s5651_s0 + $0x170] sm:$0xff]   ;;  %v3391_v43 = vld [vmem:[%s5651_s0 + $0xe8] sm:$0xff]   ;;  %v3409_v50 = vld [vmem:[%s5651_s0 + $0x178] sm:$0xff]  }
  0x63   :  { %3613 = vmatprep.mubr.bf16.mxu0 %v3964_v40  ;;  %v3387_v40 = vld [vmem:[%s5651_s0 + $0xc8] sm:$0xff]   ;;  %v470_v18 = vadd.f32 %v3784_v8, %v335_v49  ;;  %v2898_v41 = vunpack.c.h.bf16 %v3389_v55  ;;  %v698_v42 = vpack.c.bf16 %v595_v1, %v594_v63  ;;  %v337_v19 = vmul.f32 %v2897_v4, %v3779_v5 }
  0x64   :  { %v2889_v26 = vunpack.c.l.bf16 %v3387_v40  ;;  %v496_v28 = vadd.f32 %v3784_v8, %v361_v36  ;;  %v2890_v51 = vunpack.c.h.bf16 %v3387_v40  ;;  %v714_v15 = vpack.c.bf16 %v627_v47, %v626_v34  ;;  %v3392_v47 = vld [vmem:[%s5651_s0 + $0xf0] sm:$0xff]  }
  0x65   :  { %v503_v36 = vadd.f32 %v3784_v8, %v368_v0  ;;  %v697_v40 = vpack.c.bf16 %v593_v59, %v592_v22  ;;  %v369_v3 = vmul.f32 %v2961_v10, %v3779_v5  ;;  %v471_v20 = vadd.f32 %v3784_v8, %v336_v7 }
  0x66   :  { %v333_v52 = vmul.f32 %v2889_v26, %v3779_v5  ;;  %v624_v56 = vmax.f32 %v496_v28, 0.0  ;;  %3650 = vmatmul.mubr.bf16.gmra.mrb[8].mxu1 %v711_v30  ;;  %v334_v2 = vmul.f32 %v2890_v51, %v3779_v5  ;;  %v630_v23 = vmax.f32 %v502_v13, 0.0 }
  0x67   :  { %3653 = vmatprep.mubr.bf16.mxu1 %v712_v38  ;;  %v631_v26 = vmax.f32 %v503_v36, 0.0  ;;  %v371_v27 = vmul.f32 %v2965_v16, %v3779_v5  ;;  %v372_v28 = vmul.f32 %v2966_v17, %v3779_v5  ;;  %v598_v32 = vmax.f32 %v470_v18, 0.0 }
  0x68   :  { %v468_v6 = vadd.f32 %v3784_v8, %v333_v52  ;;  %v713_v9 = vpack.c.bf16 %v625_v57, %v624_v56  ;;  %v469_v25 = vadd.f32 %v3784_v8, %v334_v2  ;;  %v2901_v37 = vunpack.c.l.bf16 %v3390_v46 }
  0x69   :  { %v4131_v38 = vadd.f32 %v3784_v8, %v337_v19  ;;  %v2902_v39 = vunpack.c.h.bf16 %v3390_v46  ;;  %v504_v44 = vadd.f32 %v3784_v8, %v369_v3  ;;  %v2970_v35 = vunpack.c.h.bf16 %v3407_v24 }
  0x6a   :  { %3614 = vmatmul.mubr.bf16.gmra.mrb[36].mxu0 %v3973_v45  ;;  %v366_v45 = vmul.f32 %v2954_v33, %v3779_v5  ;;  %v596_v58 = vmax.f32 %v468_v6, 0.0  ;;  %v597_v30 = vmax.f32 %v469_v25, 0.0  ;;  %v338_v33 = vmul.f32 %v2898_v41, %v3779_v5 }
  0x6b   :  { %3617 = vmatprep.mubr.bf16.mxu0 %v694_v14  ;;  %v2962_v14 = vunpack.c.h.bf16 %v3405_v62  ;;  %v2973_v52 = vunpack.c.l.bf16 %v3408_v29  ;;  %v716_v53 = vpack.c.bf16 %v631_v26, %v630_v23  ;;  %v506_v55 = vadd.f32 %v3784_v8, %v371_v27  ;;  %v4172_v26 = vld [vmem:[%s5652_s1] ss:$0 sm:$0xff] }
  0x6c   :  { %v501_v12 = vadd.f32 %v3784_v8, %v366_v45  ;;  %v507_v56 = vadd.f32 %v3784_v8, %v372_v28  ;;  %v2974_v57 = vunpack.c.h.bf16 %v3408_v29  ;;  %v699_v59 = vpack.c.bf16 %v597_v30, %v596_v58  ;;  %v3393_v58 = vld [vmem:[%s5651_s0 + $0xf8] sm:$0xff]   ;;  %v4180_v29 = vld [vmem:[%s5653_s2] ss:$0 sm:$0xff] }
  0x6d   :  { %v370_v22 = vmul.f32 %v2962_v14, %v3779_v5  ;;  %v599_v60 = vmax.f32 %v471_v20, 0.0  ;;  %v339_v45 = vmul.f32 %v2901_v37, %v3779_v5  ;;  %v2905_v61 = vunpack.c.l.bf16 %v3391_v43 }
  0x6e   :  { %3654 = vmatmul.mubr.bf16.gmra.mrb[12].mxu1 %v713_v9  ;;  %v629_v21 = vmax.f32 %v501_v12, 0.0  ;;  %v473_v62 = vadd.f32 %v3784_v8, %v338_v33  ;;  %v600_v63 = vmax.f32 %v4131_v38, 0.0  ;;  %v340_v34 = vmul.f32 %v2902_v39, %v3779_v5 }
  0x6f   :  { %3657 = vmatprep.mubr.bf16.mxu1 %v714_v15  ;;  %v505_v51 = vadd.f32 %v3784_v8, %v370_v22  ;;  %v632_v0 = vmax.f32 %v504_v44, 0.0  ;;  %v374_v49 = vmul.f32 %v2970_v35, %v3779_v5  ;;  %v375_v4 = vmul.f32 %v2973_v52, %v3779_v5  ;;  %v3410_v15 = vld [vmem:[%s5651_s0 + $0x180] sm:$0xff]   ;;  %v3411_v44 = vld [vmem:[%s5651_s0 + $0x188] sm:$0xff]  }
  0x70   :  { %v2906_v6 = vunpack.c.h.bf16 %v3391_v43  ;;  %v634_v7 = vmax.f32 %v506_v55, 0.0  ;;  %v635_v9 = vmax.f32 %v507_v56, 0.0  ;;  %v376_v10 = vmul.f32 %v2974_v57, %v3779_v5 }
  0x71   :  { %v633_v1 = vmax.f32 %v505_v51, 0.0  ;;  %v474_v12 = vadd.f32 %v3784_v8, %v339_v45  ;;  %v341_v13 = vmul.f32 %v2905_v61, %v3779_v5  ;;  %v2909_v14 = vunpack.c.l.bf16 %v3392_v47 }
  0x72   :  { %3618 = vmatmul.mubr.bf16.gmra.mrb[40].mxu0 %v4063_v54  ;;  %v628_v54 = vmax.f32 %v500_v11, 0.0  ;;  %v700_v11 = vpack.c.bf16 %v599_v60, %v598_v32  ;;  %v475_v36 = vadd.f32 %v3784_v8, %v340_v34  ;;  %v2910_v16 = vunpack.c.h.bf16 %v3392_v47 }
  0x73   :  { %3621 = vmatprep.mubr.bf16.mxu0 %v696_v31  ;;  %v2969_v31 = vunpack.c.l.bf16 %v3407_v24  ;;  %v2977_v17 = vunpack.c.l.bf16 %v3409_v50  ;;  %v717_v25 = vpack.c.bf16 %v633_v1, %v632_v0  ;;  %v509_v41 = vadd.f32 %v3784_v8, %v374_v49 }
  0x74   :  { %v715_v48 = vpack.c.bf16 %v629_v21, %v628_v54  ;;  %v718_v19 = vpack.c.bf16 %v635_v9, %v634_v7  ;;  %v511_v46 = vadd.f32 %v3784_v8, %v376_v10  ;;  %v2981_v3 = vunpack.c.l.bf16 %v3410_v15 }
  0x75   :  { %v373_v2 = vmul.f32 %v2969_v31, %v3779_v5  ;;  %v2982_v20 = vunpack.c.h.bf16 %v3410_v15  ;;  %v601_v54 = vmax.f32 %v473_v62, 0.0  ;;  %v602_v21 = vmax.f32 %v474_v12, 0.0  ;;  %v3412_v31 = vld [vmem:[%s5651_s0 + $0x190] sm:$0xff]   ;;  %v3413_v12 = vld [vmem:[%s5651_s0 + $0x198] sm:$0xff]  }
  0x76   :  { %3658 = vmatmul.mubr.bf16.gmra.mrb[16].mxu1 %v715_v48  ;;  %v342_v22 = vmul.f32 %v2906_v6, %v3779_v5  ;;  %v343_v24 = vmul.f32 %v2909_v14, %v3779_v5  ;;  %v603_v23 = vmax.f32 %v475_v36, 0.0  ;;  %v344_v27 = vmul.f32 %v4172_v26, %v2910_v16 }
  0x77   :  { %3661 = vmatprep.mubr.bf16.mxu1 %v716_v53  ;;  %v508_v18 = vadd.f32 %v3784_v8, %v373_v2  ;;  %v476_v5 = vadd.f32 %v4180_v29, %v341_v13  ;;  %v2913_v30 = vunpack.c.l.bf16 %v3393_v58  ;;  %v637_v33 = vmax.f32 %v509_v41, 0.0 }
  0x78   :  { %v639_v38 = vmax.f32 %v511_v46, 0.0  ;;  %v379_v39 = vmul.f32 %v4172_v26, %v2981_v3  ;;  %v380_v43 = vmul.f32 %v4172_v26, %v2982_v20  ;;  %v701_v48 = vpack.c.bf16 %v601_v54, %v600_v63 }
  0x79   :  { %v636_v32 = vmax.f32 %v508_v18, 0.0  ;;  %v477_v51 = vadd.f32 %v4180_v29, %v342_v22  ;;  %v478_v35 = vadd.f32 %v4180_v29, %v343_v24  ;;  %v2914_v52 = vunpack.c.h.bf16 %v3393_v58 }
  0x7a   :  { %3622 = vmatmul.mubr.bf16.gmra.mrb[44].mxu0 %v697_v40  ;;  %v2978_v40 = vunpack.c.h.bf16 %v3409_v50  ;;  %v702_v53 = vpack.c.bf16 %v603_v23, %v602_v21  ;;  %v479_v55 = vadd.f32 %v4180_v29, %v344_v27  ;;  %v2985_v60 = vunpack.c.l.bf16 %v3411_v44 }
  0x7b   :  { %3625 = vmatprep.mubr.bf16.mxu0 %v698_v42  ;;  %v510_v42 = vadd.f32 %v3784_v8, %v375_v4  ;;  %v377_v8 = vmul.f32 %v4172_v26, %v2977_v17  ;;  %v2986_v45 = vunpack.c.h.bf16 %v3411_v44  ;;  %v2989_v61 = vunpack.c.l.bf16 %v3412_v31 }
  0x7c   :  { %v378_v28 = vmul.f32 %v4172_v26, %v2978_v40  ;;  %v514_v34 = vadd.f32 %v4180_v29, %v379_v39  ;;  %v515_v63 = vadd.f32 %v4180_v29, %v380_v43  ;;  %v2990_v47 = vunpack.c.h.bf16 %v3412_v31  ;;  %v3414_v40 = vld [vmem:[%s5651_s0 + $0x1a0] sm:$0xff]  }
  0x7d   :  { %v638_v37 = vmax.f32 %v510_v42, 0.0  ;;  %v512_v56 = vadd.f32 %v4180_v29, %v377_v8  ;;  %v604_v0 = vmax.f32 %v476_v5, 0.0  ;;  %v605_v1 = vmax.f32 %v477_v51, 0.0  ;;  %v3415_v5 = vld [vmem:[%s5651_s0 + $0x1a8] sm:$0xff]  }
  0x7e   :  { %3662 = vmatmul.mubr.bf16.gmra.mrb[20].mxu1 %v717_v25  ;;  %v513_v57 = vadd.f32 %v4180_v29, %v378_v28  ;;  %v345_v2 = vmul.f32 %v4172_v26, %v2913_v30  ;;  %v346_v49 = vmul.f32 %v4172_v26, %v2914_v52  ;;  %v606_v4 = vmax.f32 %v478_v35, 0.0 }
  0x7f   :  { %3665 = vmatprep.mubr.bf16.mxu1 %v718_v19  ;;  %v720_v62 = vpack.c.bf16 %v639_v38, %v638_v37  ;;  %v607_v50 = vmax.f32 %v479_v55, 0.0  ;;  %v640_v6 = vmax.f32 %v512_v56, 0.0  ;;  %v381_v9 = vmul.f32 %v4172_v26, %v2985_v60  ;;  %v3416_v38 = vld [vmem:[%s5651_s0 + $0x1b0] sm:$0xff]  }
  0x80   :  { %v641_v7 = vmax.f32 %v513_v57, 0.0  ;;  %v382_v10 = vmul.f32 %v4172_v26, %v2986_v45  ;;  %v642_v13 = vmax.f32 %v514_v34, 0.0  ;;  %v643_v14 = vmax.f32 %v515_v63, 0.0 }
  0x81   :  { %v384_v15 = vmul.f32 %v4172_v26, %v2990_v47  ;;  %v703_v36 = vpack.c.bf16 %v605_v1, %v604_v0  ;;  %v480_v16 = vadd.f32 %v4180_v29, %v345_v2  ;;  %v481_v17 = vadd.f32 %v4180_v29, %v346_v49  ;;  %v3418_v0 = vld [vmem:[%s5651_s0 + $0x1c0] sm:$0xff]  }
  0x82   :  { %3626 = vmatmul.mubr.bf16.gmra.mrb[48].mxu0 %v699_v59  ;;  %v719_v59 = vpack.c.bf16 %v637_v33, %v636_v32  ;;  %v704_v25 = vpack.c.bf16 %v607_v50, %v606_v4  ;;  %v721_v18 = vpack.c.bf16 %v641_v7, %v640_v6  ;;  %v2993_v41 = vunpack.c.l.bf16 %v3413_v12 }
  0x83   :  { %3629 = vmatprep.mubr.bf16.mxu0 %v700_v11  ;;  %v383_v11 = vmul.f32 %v4172_v26, %v2989_v61  ;;  %v516_v42 = vadd.f32 %v4180_v29, %v381_v9  ;;  %v517_v58 = vadd.f32 %v4180_v29, %v382_v10  ;;  %v2994_v46 = vunpack.c.h.bf16 %v3413_v12 }
  0x84   :  { %v722_v3 = vpack.c.bf16 %v643_v14, %v642_v13  ;;  %v519_v20 = vadd.f32 %v4180_v29, %v384_v15  ;;  %v2997_v54 = vunpack.c.l.bf16 %v3414_v40  ;;  %v2998_v21 = vunpack.c.h.bf16 %v3414_v40 }
  0x85   :  { %v518_v19 = vadd.f32 %v4180_v29, %v383_v11  ;;  %v608_v22 = vmax.f32 %v480_v16, 0.0  ;;  %v609_v24 = vmax.f32 %v481_v17, 0.0  ;;  %v385_v23 = vmul.f32 %v4172_v26, %v2993_v41 }
  0x86   :  { %3666 = vmatmul.mubr.bf16.gmra.mrb[24].mxu1 %v719_v59  ;;  %v644_v27 = vmax.f32 %v516_v42, 0.0  ;;  %v645_v8 = vmax.f32 %v517_v58, 0.0  ;;  %v386_v28 = vmul.f32 %v4172_v26, %v2994_v46  ;;  %v647_v32 = vmax.f32 %v519_v20, 0.0 }
  0x87   :  { %3669 = vmatprep.mubr.bf16.mxu1 %v720_v62  ;;  %v646_v30 = vmax.f32 %v518_v19, 0.0  ;;  %v387_v33 = vmul.f32 %v4172_v26, %v2997_v54  ;;  %v388_v37 = vmul.f32 %v4172_v26, %v2998_v21  ;;  %v705_v39 = vpack.c.bf16 %v609_v24, %v608_v22  ;;  %v3417_v62 = vld [vmem:[%s5651_s0 + $0x1b8] sm:$0xff]  }
  0x88   :  { %v520_v43 = vadd.f32 %v4180_v29, %v385_v23  ;;  %v3001_v44 = vunpack.c.l.bf16 %v3415_v5  ;;  %v723_v31 = vpack.c.bf16 %v645_v8, %v644_v27  ;;  %v3002_v51 = vunpack.c.h.bf16 %v3415_v5 }
  0x89   :  { %v3005_v35 = vunpack.c.l.bf16 %v3416_v38  ;;  %v724_v52 = vpack.c.bf16 %v647_v32, %v646_v30  ;;  %v523_v55 = vadd.f32 %v4180_v29, %v388_v37  ;;  %v3006_v56 = vunpack.c.h.bf16 %v3416_v38  ;;  %v3421_v30 = vld [vmem:[%s5651_s0 + $0x1d8] sm:$0xff]   ;;  %v3422_v37 = vld [vmem:[%s5651_s0 + $0x1e0] sm:$0xff]  }
  0x8a   :  { %3630 = vmatmul.mubr.bf16.gmra.mrb[52].mxu0 %v701_v48  ;;  %v521_v48 = vadd.f32 %v4180_v29, %v386_v28  ;;  %v648_v57 = vmax.f32 %v520_v43, 0.0  ;;  %v389_v60 = vmul.f32 %v4172_v26, %v3001_v44  ;;  %v390_v45 = vmul.f32 %v4172_v26, %v3002_v51 }
  0x8b   :  { %3633 = vmatprep.mubr.bf16.mxu0 %v702_v53  ;;  %v522_v53 = vadd.f32 %v4180_v29, %v387_v33  ;;  %v391_v61 = vmul.f32 %v4172_v26, %v3005_v35  ;;  %v651_v63 = vmax.f32 %v523_v55, 0.0  ;;  %v392_v47 = vmul.f32 %v4172_v26, %v3006_v56 }
  0x8c   :  { %v649_v59 = vmax.f32 %v521_v48, 0.0  ;;  %v3009_v1 = vunpack.c.l.bf16 %v3417_v62  ;;  %v3010_v2 = vunpack.c.h.bf16 %v3417_v62  ;;  %v524_v4 = vadd.f32 %v4180_v29, %v389_v60 }
  0x8d   :  { %v650_v34 = vmax.f32 %v522_v53, 0.0  ;;  %v525_v50 = vadd.f32 %v4180_v29, %v390_v45  ;;  %v526_v6 = vadd.f32 %v4180_v29, %v391_v61  ;;  %v527_v9 = vadd.f32 %v4180_v29, %v392_v47  ;;  %v3423_v61 = vld [vmem:[%s5651_s0 + $0x1e8] sm:$0xff]  }
  0x8e   :  { %3670 = vmatmul.mubr.bf16.gmra.mrb[28].mxu1 %v721_v18  ;;  %v725_v49 = vpack.c.bf16 %v649_v59, %v648_v57  ;;  %v3013_v10 = vunpack.c.l.bf16 %v3418_v0  ;;  %v3014_v11 = vunpack.c.h.bf16 %v3418_v0  ;;  %v393_v12 = vmul.f32 %v4172_v26, %v3009_v1  ;;  %v3420_v18 = vld [vmem:[%s5651_s0 + $0x1d0] sm:$0xff]  }
  0x8f   :  { %3673 = vmatprep.mubr.bf16.mxu1 %v722_v3  ;;  %v726_v7 = vpack.c.bf16 %v651_v63, %v650_v34  ;;  %v394_v13 = vmul.f32 %v4172_v26, %v3010_v2  ;;  %v652_v14 = vmax.f32 %v524_v4, 0.0  ;;  %v653_v15 = vmax.f32 %v525_v50, 0.0  ;;  %v3424_v63 = vld [vmem:[%s5651_s0 + $0x1f0] sm:$0xff]  }
  0x90   :  { %v654_v16 = vmax.f32 %v526_v6, 0.0  ;;  %v655_v17 = vmax.f32 %v527_v9, 0.0  ;;  %v395_v40 = vmul.f32 %v4172_v26, %v3013_v10  ;;  %v528_v41 = vadd.f32 %v4180_v29, %v393_v12 }
  0x91   :  { %v529_v42 = vadd.f32 %v4180_v29, %v394_v13  ;;  %v727_v19 = vpack.c.bf16 %v653_v15, %v652_v14  ;;  %v3021_v3 = vunpack.c.l.bf16 %v3420_v18  ;;  %v3022_v20 = vunpack.c.h.bf16 %v3420_v18 }
  0x92   :  { %3634 = vmatmul.mubr.bf16.gmra.mrb[56].mxu0 %v703_v36  ;;  %v3419_v36 = vld [vmem:[%s5651_s0 + $0x1c8] sm:$0xff]   ;;  %v728_v54 = vpack.c.bf16 %v655_v17, %v654_v16  ;;  %v530_v21 = vadd.f32 %v4180_v29, %v395_v40  ;;  %v656_v24 = vmax.f32 %v528_v41, 0.0  ;;  %v3025_v43 = vunpack.c.l.bf16 %v3421_v30  ;;  %v3425_v17 = vld [vmem:[%s5651_s0 + $0x1f8] sm:$0xff]  }
  0x93   :  { %3637 = vmatprep.mubr.bf16.mxu0 %v704_v25  ;;  %v396_v25 = vmul.f32 %v4172_v26, %v3014_v11  ;;  %v3017_v58 = vunpack.c.l.bf16 %v3419_v36  ;;  %v3018_v46 = vunpack.c.h.bf16 %v3419_v36  ;;  %v657_v23 = vmax.f32 %v529_v42, 0.0 }
  0x94   :  { %v399_v28 = vmul.f32 %v4172_v26, %v3021_v3  ;;  %v400_v5 = vmul.f32 %v4172_v26, %v3022_v20  ;;  %v658_v32 = vmax.f32 %v530_v21, 0.0  ;;  %v3026_v51 = vunpack.c.h.bf16 %v3421_v30 }
  0x95   :  { %v531_v22 = vadd.f32 %v4180_v29, %v396_v25  ;;  %v397_v27 = vmul.f32 %v4172_v26, %v3017_v58  ;;  %v398_v8 = vmul.f32 %v4172_v26, %v3018_v46  ;;  %v729_v38 = vpack.c.bf16 %v657_v23, %v656_v24 }
  0x96   :  { %3674 = vmatmul.mubr.bf16.gmra.mrb[32].mxu1 %v723_v31  ;;  %v534_v31 = vadd.f32 %v4180_v29, %v399_v28  ;;  %v535_v48 = vadd.f32 %v4180_v29, %v400_v5  ;;  %v3030_v53 = vunpack.c.h.bf16 %v3422_v37  ;;  %v401_v56 = vmul.f32 %v4172_v26, %v3025_v43 }
  0x97   :  { %3677 = vmatprep.mubr.bf16.mxu1 %v724_v52  ;;  %v659_v33 = vmax.f32 %v531_v22, 0.0  ;;  %v533_v44 = vadd.f32 %v4180_v29, %v398_v8  ;;  %v3029_v52 = vunpack.c.l.bf16 %v3422_v37  ;;  %v402_v45 = vmul.f32 %v4172_v26, %v3026_v51 }
  0x98   :  { %v662_v59 = vmax.f32 %v534_v31, 0.0  ;;  %v663_v60 = vmax.f32 %v535_v48, 0.0  ;;  %v404_v34 = vmul.f32 %v4172_v26, %v3030_v53  ;;  %v536_v47 = vadd.f32 %v4180_v29, %v401_v56 }
  0x99   :  { %v730_v35 = vpack.c.bf16 %v659_v33, %v658_v32  ;;  %v661_v57 = vmax.f32 %v533_v44, 0.0  ;;  %v403_v62 = vmul.f32 %v4172_v26, %v3029_v52  ;;  %v3033_v0 = vunpack.c.l.bf16 %v3423_v61 }
  0x9a   :  { %3638 = vmatmul.mubr.bf16.gmra.mrb[60].mxu0 %v705_v39  ;;  %v532_v39 = vadd.f32 %v4180_v29, %v397_v27  ;;  %v732_v2 = vpack.c.bf16 %v663_v60, %v662_v59  ;;  %v3034_v4 = vunpack.c.h.bf16 %v3423_v61  ;;  %v539_v6 = vadd.f32 %v4180_v29, %v404_v34 }
  0x9b   :  { %v538_v50 = vadd.f32 %v4180_v29, %v403_v62  ;;  %v3038_v9 = vunpack.c.h.bf16 %v3424_v63  ;;  %v405_v10 = vmul.f32 %v4172_v26, %v3033_v0  ;;  %v664_v11 = vmax.f32 %v536_v47, 0.0 }
  0x9c   :  { %v660_v55 = vmax.f32 %v532_v39, 0.0  ;;  %v406_v13 = vmul.f32 %v4172_v26, %v3034_v4  ;;  %v667_v15 = vmax.f32 %v539_v6, 0.0  ;;  %v3041_v41 = vunpack.c.l.bf16 %v3425_v17 }
  0x9d   :  { %v666_v14 = vmax.f32 %v538_v50, 0.0  ;;  %v408_v16 = vmul.f32 %v4172_v26, %v3038_v9  ;;  %v540_v40 = vadd.f32 %v4180_v29, %v405_v10  ;;  %v3042_v42 = vunpack.c.h.bf16 %v3425_v17 }
  0x9e   :  { %3678 = vmatmul.mubr.bf16.gmra.mrb[36].mxu1 %v725_v49  ;;  %v731_v1 = vpack.c.bf16 %v661_v57, %v660_v55  ;;  %v537_v49 = vadd.f32 %v4180_v29, %v402_v45  ;;  %v541_v18 = vadd.f32 %v4180_v29, %v406_v13 }
  0x9f   :  { %3681 = vmatprep.mubr.bf16.mxu1 %v726_v7  ;;  %v3037_v7 = vunpack.c.l.bf16 %v3424_v63  ;;  %v734_v58 = vpack.c.bf16 %v667_v15, %v666_v14  ;;  %v543_v46 = vadd.f32 %v4180_v29, %v408_v16  ;;  %v668_v3 = vmax.f32 %v540_v40, 0.0 }
  0xa0   :  { %v665_v12 = vmax.f32 %v537_v49, 0.0  ;;  %v669_v20 = vmax.f32 %v541_v18, 0.0  ;;  %v410_v21 = vmul.f32 %v4172_v26, %v3042_v42 }
  0xa1   :  { %v407_v36 = vmul.f32 %v4172_v26, %v3037_v7  ;;  %v671_v24 = vmax.f32 %v543_v46, 0.0 }
  0xa2   :  { %v733_v25 = vpack.c.bf16 %v665_v12, %v664_v11  ;;  %v735_v23 = vpack.c.bf16 %v669_v20, %v668_v3  ;;  %v545_v8 = vadd.f32 %v4180_v29, %v410_v21 }
  0xa4   :  { %v673_v30 = vmax.f32 %v545_v8, 0.0 }
  0xa6   :  { %3682 = vmatmul.mubr.bf16.gmra.mrb[40].mxu1 %v727_v19  ;;  %v542_v19 = vadd.f32 %v4180_v29, %v407_v36 }
  0xa7   :  { %3685 = vmatprep.mubr.bf16.mxu1 %v728_v54  ;;  %v409_v54 = vmul.f32 %v4172_v26, %v3041_v41 }
  0xa8   :  { %v670_v22 = vmax.f32 %v542_v19, 0.0 }
  0xa9   :  { %v544_v27 = vadd.f32 %v4180_v29, %v409_v54 }
  0xaa   :  { %v736_v28 = vpack.c.bf16 %v671_v24, %v670_v22 }
  0xab   :  { %v672_v5 = vmax.f32 %v544_v27, 0.0 }
  0xad   :  { %v737_v32 = vpack.c.bf16 %v673_v30, %v672_v5 }
  0xae   :  { %3686 = vmatmul.mubr.bf16.gmra.mrb[44].mxu1 %v729_v38 }
  0xaf   :  { %3689 = vmatprep.mubr.bf16.mxu1 %v730_v35 }
  0xb6   :  { %3690 = vmatmul.mubr.bf16.gmra.mrb[48].mxu1 %v731_v1 }
  0xb7   :  { %3693 = vmatprep.mubr.bf16.mxu1 %v732_v2 }
  0xbe   :  { %3694 = vmatmul.mubr.bf16.gmra.mrb[52].mxu1 %v733_v25 }
  0xbf   :  { %3697 = vmatprep.mubr.bf16.mxu1 %v734_v58 }
  0xc6   :  { %3698 = vmatmul.mubr.bf16.gmra.mrb[56].mxu1 %v735_v23 }
  0xc7   :  { %3701 = vmatprep.mubr.bf16.mxu1 %v736_v28 }
  0xce   :  { %3702 = vmatmul.mubr.bf16.gmra.mrb[60].mxu1 %v737_v32 }
  0xf5   :  { %v4301_v33 = vpop.f32.mrb[0].mxu0 }
  0xf6   :  { %5735 = vst [vmem:[#allocation2_spill] sm:$0xff] %v4301_v33  ;;  %v4303_v37 = vpop.f32.mrb[1].mxu0 }
  0xf7   :  { %5736 = vst [vmem:[#allocation3_spill] sm:$0xff] %v4303_v37  ;;  %v4305_v26 = vpop.f32.mrb[2].mxu0 }
  0xf8   :  { %5737 = vst [vmem:[#allocation4_spill] sm:$0xff] %v4305_v26  ;;  %v3051_v38 = vpack.c.bf16 %v4305_v26, %v4301_v33  ;;  %v4309_v39 = vpop.f32.mrb[3].mxu0 }
  0xf9   :  { %5738 = vst [vmem:[#allocation5_spill] sm:$0xff] %v4309_v39  ;;  %v3046_v29 = vpack.c.bf16 %v4309_v39, %v4303_v37  ;;  %v1987_v43 = vadd.f32 %v4309_v39, %v4303_v37 }
  0xfa   :  { %3426 = vst [vmem:[%s5654_s4 + $0x8] sm:$0xff] %v3051_v38  }
  0xfb   :  { %3047 = vst [vmem:[%s5654_s4] sm:$0xff] %v3046_v29   ;;  %v1988_v44 = vadd.f32 %v4301_v33, %v1987_v43 }
  0xfd   :  { %v1989_v31 = vadd.f32 %v4305_v26, %v1988_v44  ;;  %v4323_v48 = vpop.f32.mrb[4].mxu0 }
  0xfe   :  { %5739 = vst [vmem:[#allocation6_spill] sm:$0xff] %v4323_v48  ;;  %v4325_v51 = vpop.f32.mrb[5].mxu0 }
  0xff   :  { %5740 = vst [vmem:[#allocation7_spill] sm:$0xff] %v4325_v51  ;;  %v1990_v35 = vadd.f32 %v1989_v31, %v4325_v51  ;;  %v4328_v52 = vpop.f32.mrb[6].mxu0 }
 0x100   :  { %5741 = vst [vmem:[#allocation8_spill] sm:$0xff] %v4328_v52  ;;  %v3061_v53 = vpack.c.bf16 %v4328_v52, %v4323_v48  ;;  %v4332_v55 = vpop.f32.mrb[7].mxu0 }
 0x101   :  { %5742 = vst [vmem:[#allocation9_spill] sm:$0xff] %v4332_v55  ;;  %v3056_v56 = vpack.c.bf16 %v4332_v55, %v4325_v51  ;;  %v1991_v57 = vadd.f32 %v1990_v35, %v4332_v55 }
 0x102   :  { %3428 = vst [vmem:[%s5654_s4 + $0x18] sm:$0xff] %v3061_v53  }
 0x103   :  { %3427 = vst [vmem:[%s5654_s4 + $0x10] sm:$0xff] %v3056_v56   ;;  %v1992_v59 = vadd.f32 %v4323_v48, %v1991_v57 }
 0x105   :  { %v4344_v60 = vpop.f32.mrb[8].mxu0  ;;  %v1993_v45 = vadd.f32 %v4328_v52, %v1992_v59 }
 0x106   :  { %5743 = vst [vmem:[#allocation10_spill] sm:$0xff] %v4344_v60  ;;  %v4347_v61 = vpop.f32.mrb[9].mxu0 }
 0x107   :  { %5744 = vst [vmem:[#allocation11_spill] sm:$0xff] %v4347_v61  ;;  %v1994_v62 = vadd.f32 %v1993_v45, %v4347_v61  ;;  %v4350_v34 = vpop.f32.mrb[10].mxu0 }
 0x108   :  { %5745 = vst [vmem:[#allocation12_spill] sm:$0xff] %v4350_v34  ;;  %v3071_v63 = vpack.c.bf16 %v4350_v34, %v4344_v60  ;;  %v4354_v47 = vpop.f32.mrb[11].mxu0 }
 0x109   :  { %5746 = vst [vmem:[#allocation13_spill] sm:$0xff] %v4354_v47  ;;  %v3066_v0 = vpack.c.bf16 %v4354_v47, %v4347_v61  ;;  %v1995_v1 = vadd.f32 %v1994_v62, %v4354_v47 }
 0x10a   :  { %3430 = vst [vmem:[%s5654_s4 + $0x28] sm:$0xff] %v3071_v63  }
 0x10b   :  { %3429 = vst [vmem:[%s5654_s4 + $0x20] sm:$0xff] %v3066_v0   ;;  %v1996_v2 = vadd.f32 %v4344_v60, %v1995_v1 }
 0x10d   :  { %v4366_v49 = vpop.f32.mrb[12].mxu0  ;;  %v1997_v4 = vadd.f32 %v4350_v34, %v1996_v2 }
 0x10e   :  { %5747 = vst [vmem:[#allocation14_spill] sm:$0xff] %v4366_v49  ;;  %v4369_v50 = vpop.f32.mrb[13].mxu0 }
 0x10f   :  { %5748 = vst [vmem:[#allocation15_spill] sm:$0xff] %v4369_v50  ;;  %v1998_v6 = vadd.f32 %v1997_v4, %v4369_v50  ;;  %v4372_v7 = vpop.f32.mrb[14].mxu0 }
 0x110   :  { %5749 = vst [vmem:[#allocation16_spill] sm:$0xff] %v4372_v7  ;;  %v3081_v9 = vpack.c.bf16 %v4372_v7, %v4366_v49  ;;  %v4376_v10 = vpop.f32.mrb[15].mxu0 }
 0x111   :  { %5750 = vst [vmem:[#allocation17_spill] sm:$0xff] %v4376_v10  ;;  %v3076_v11 = vpack.c.bf16 %v4376_v10, %v4369_v50  ;;  %v1999_v12 = vadd.f32 %v1998_v6, %v4376_v10 }
 0x112   :  { %3432 = vst [vmem:[%s5654_s4 + $0x38] sm:$0xff] %v3081_v9  }
 0x113   :  { %3431 = vst [vmem:[%s5654_s4 + $0x30] sm:$0xff] %v3076_v11   ;;  %v2000_v13 = vadd.f32 %v4366_v49, %v1999_v12 }
 0x115   :  { %v4388_v14 = vpop.f32.mrb[16].mxu0  ;;  %v2001_v15 = vadd.f32 %v4372_v7, %v2000_v13 }
 0x116   :  { %5751 = vst [vmem:[#allocation18_spill] sm:$0xff] %v4388_v14  ;;  %v4391_v36 = vpop.f32.mrb[17].mxu0 }
 0x117   :  { %5752 = vst [vmem:[#allocation19_spill] sm:$0xff] %v4391_v36  ;;  %v2002_v16 = vadd.f32 %v2001_v15, %v4391_v36  ;;  %v4394_v17 = vpop.f32.mrb[18].mxu0 }
 0x118   :  { %5753 = vst [vmem:[#allocation20_spill] sm:$0xff] %v4394_v17  ;;  %v3091_v40 = vpack.c.bf16 %v4394_v17, %v4388_v14  ;;  %v4398_v25 = vpop.f32.mrb[19].mxu0 }
 0x119   :  { %5754 = vst [vmem:[#allocation21_spill] sm:$0xff] %v4398_v25  ;;  %v3086_v18 = vpack.c.bf16 %v4398_v25, %v4391_v36  ;;  %v2003_v41 = vadd.f32 %v2002_v16, %v4398_v25 }
 0x11a   :  { %3434 = vst [vmem:[%s5654_s4 + $0x48] sm:$0xff] %v3091_v40  }
 0x11b   :  { %3433 = vst [vmem:[%s5654_s4 + $0x40] sm:$0xff] %v3086_v18   ;;  %v2004_v42 = vadd.f32 %v4388_v14, %v2003_v41 }
 0x11d   :  { %v4410_v58 = vpop.f32.mrb[20].mxu0  ;;  %v2005_v19 = vadd.f32 %v4394_v17, %v2004_v42 }
 0x11e   :  { %5755 = vst [vmem:[#allocation22_spill] sm:$0xff] %v4410_v58  ;;  %v4413_v46 = vpop.f32.mrb[21].mxu0 }
 0x11f   :  { %5756 = vst [vmem:[#allocation23_spill] sm:$0xff] %v4413_v46  ;;  %v2006_v3 = vadd.f32 %v2005_v19, %v4413_v46  ;;  %v4416_v20 = vpop.f32.mrb[22].mxu0 }
 0x120   :  { %5757 = vst [vmem:[#allocation24_spill] sm:$0xff] %v4416_v20  ;;  %v3101_v54 = vpack.c.bf16 %v4416_v20, %v4410_v58  ;;  %v4420_v21 = vpop.f32.mrb[23].mxu0 }
 0x121   :  { %5758 = vst [vmem:[#allocation25_spill] sm:$0xff] %v4420_v21  ;;  %v3096_v22 = vpack.c.bf16 %v4420_v21, %v4413_v46  ;;  %v2007_v24 = vadd.f32 %v2006_v3, %v4420_v21 }
 0x122   :  { %3436 = vst [vmem:[%s5654_s4 + $0x58] sm:$0xff] %v3101_v54  }
 0x123   :  { %3435 = vst [vmem:[%s5654_s4 + $0x50] sm:$0xff] %v3096_v22   ;;  %v2008_v23 = vadd.f32 %v4410_v58, %v2007_v24 }
 0x125   :  { %v4432_v27 = vpop.f32.mrb[24].mxu0  ;;  %v2009_v8 = vadd.f32 %v4416_v20, %v2008_v23 }
 0x126   :  { %5759 = vst [vmem:[#allocation26_spill] sm:$0xff] %v4432_v27  ;;  %v4435_v28 = vpop.f32.mrb[25].mxu0 }
 0x127   :  { %5760 = vst [vmem:[#allocation27_spill] sm:$0xff] %v4435_v28  ;;  %v2010_v5 = vadd.f32 %v2009_v8, %v4435_v28  ;;  %v4438_v30 = vpop.f32.mrb[26].mxu0 }
 0x128   :  { %5761 = vst [vmem:[#allocation28_spill] sm:$0xff] %v4438_v30  ;;  %v3111_v32 = vpack.c.bf16 %v4438_v30, %v4432_v27  ;;  %v4442_v38 = vpop.f32.mrb[27].mxu0 }
 0x129   :  { %5762 = vst [vmem:[#allocation29_spill] sm:$0xff] %v4442_v38  ;;  %v3106_v29 = vpack.c.bf16 %v4442_v38, %v4435_v28  ;;  %v2011_v43 = vadd.f32 %v2010_v5, %v4442_v38  ;;  %v4462_v59 = vpop.f32.mrb[0].mxu1 }
 0x12a   :  { %3438 = vst [vmem:[%s5654_s4 + $0x68] sm:$0xff] %v3111_v32   ;;  %5766 = vst [vmem:[#allocation33_spill] sm:$0xff] %v4462_v59  ;;  %v4468_v63 = vpop.f32.mrb[1].mxu1 }
 0x12b   :  { %3437 = vst [vmem:[%s5654_s4 + $0x60] sm:$0xff] %v3106_v29   ;;  %v2012_v44 = vadd.f32 %v4432_v27, %v2011_v43  ;;  %5768 = vst [vmem:[#allocation35_spill] sm:$0xff] %v4468_v63  ;;  %v4473_v2 = vpop.f32.mrb[2].mxu1 }
 0x12c   :  { %5769 = vst [vmem:[#allocation36_spill] sm:$0xff] %v4473_v2  ;;  %v3211_v4 = vpack.c.bf16 %v4473_v2, %v4462_v59  ;;  %v4480_v6 = vpop.f32.mrb[3].mxu1 }
 0x12d   :  { %v4454_v31 = vpop.f32.mrb[28].mxu0  ;;  %v2013_v35 = vadd.f32 %v4438_v30, %v2012_v44  ;;  %5770 = vst [vmem:[#allocation37_spill] sm:$0xff] %v4480_v6  ;;  %v3206_v11 = vpack.c.bf16 %v4480_v6, %v4468_v63 }
 0x12e   :  { %5763 = vst [vmem:[#allocation30_spill] sm:$0xff] %v4454_v31  ;;  %v4457_v53 = vpop.f32.mrb[29].mxu0  ;;  %3458 = vst [vmem:[%s5654_s4 + $0x108] sm:$0xff] %v3211_v4  }
 0x12f   :  { %5764 = vst [vmem:[#allocation31_spill] sm:$0xff] %v4457_v53  ;;  %v2014_v56 = vadd.f32 %v2013_v35, %v4457_v53  ;;  %v4460_v57 = vpop.f32.mrb[30].mxu0  ;;  %3457 = vst [vmem:[%s5654_s4 + $0x100] sm:$0xff] %v3206_v11  }
 0x130   :  { %5765 = vst [vmem:[#allocation32_spill] sm:$0xff] %v4460_v57  ;;  %v3121_v45 = vpack.c.bf16 %v4460_v57, %v4454_v31  ;;  %v4466_v62 = vpop.f32.mrb[31].mxu0 }
 0x131   :  { %5767 = vst [vmem:[#allocation34_spill] sm:$0xff] %v4466_v62  ;;  %v3116_v0 = vpack.c.bf16 %v4466_v62, %v4457_v53  ;;  %v2015_v1 = vadd.f32 %v2014_v56, %v4466_v62  ;;  %v4502_v18 = vpop.f32.mrb[4].mxu1 }
 0x132   :  { %3440 = vst [vmem:[%s5654_s4 + $0x78] sm:$0xff] %v3121_v45   ;;  %5772 = vst [vmem:[#allocation39_spill] sm:$0xff] %v4502_v18  ;;  %v4508_v19 = vpop.f32.mrb[5].mxu1 }
 0x133   :  { %3439 = vst [vmem:[%s5654_s4 + $0x70] sm:$0xff] %v3116_v0   ;;  %v2016_v9 = vadd.f32 %v4454_v31, %v2015_v1  ;;  %5773 = vst [vmem:[#allocation40_spill] sm:$0xff] %v4508_v19  ;;  %v4513_v22 = vpop.f32.mrb[6].mxu1 }
 0x134   :  { %5774 = vst [vmem:[#allocation41_spill] sm:$0xff] %v4513_v22  ;;  %v3221_v24 = vpack.c.bf16 %v4513_v22, %v4502_v18  ;;  %v4520_v23 = vpop.f32.mrb[7].mxu1 }
 0x135   :  { %v4491_v12 = vpop.f32.mrb[32].mxu0  ;;  %v2017_v13 = vadd.f32 %v4460_v57, %v2016_v9  ;;  %5775 = vst [vmem:[#allocation42_spill] sm:$0xff] %v4520_v23  ;;  %v3216_v5 = vpack.c.bf16 %v4520_v23, %v4508_v19 }
 0x136   :  { %v4497_v15 = vpop.f32.mrb[33].mxu0  ;;  %3460 = vst [vmem:[%s5654_s4 + $0x118] sm:$0xff] %v3221_v24  }
 0x137   :  { %5771 = vst [vmem:[#allocation38_spill] sm:$0xff] %v4497_v15  ;;  %v2018_v16 = vadd.f32 %v2017_v13, %v4497_v15  ;;  %v4500_v40 = vpop.f32.mrb[34].mxu0  ;;  %3459 = vst [vmem:[%s5654_s4 + $0x110] sm:$0xff] %v3216_v5  }
 0x138   :  { %v3131_v41 = vpack.c.bf16 %v4500_v40, %v4491_v12  ;;  %v4506_v42 = vpop.f32.mrb[35].mxu0 }
 0x139   :  { %v3126_v3 = vpack.c.bf16 %v4506_v42, %v4497_v15  ;;  %v2019_v54 = vadd.f32 %v2018_v16, %v4506_v42  ;;  %v4542_v56 = vpop.f32.mrb[8].mxu1 }
 0x13a   :  { %3442 = vst [vmem:[%s5654_s4 + $0x88] sm:$0xff] %v3131_v41   ;;  %5776 = vst [vmem:[#allocation43_spill] sm:$0xff] %v4542_v56  ;;  %v4548_v1 = vpop.f32.mrb[9].mxu1 }
 0x13b   :  { %3441 = vst [vmem:[%s5654_s4 + $0x80] sm:$0xff] %v3126_v3   ;;  %v2020_v8 = vadd.f32 %v4491_v12, %v2019_v54  ;;  %5777 = vst [vmem:[#allocation44_spill] sm:$0xff] %v4548_v1  ;;  %v4553_v11 = vpop.f32.mrb[10].mxu1 }
 0x13c   :  { %5778 = vst [vmem:[#allocation45_spill] sm:$0xff] %v4553_v11  ;;  %v3231_v13 = vpack.c.bf16 %v4553_v11, %v4542_v56  ;;  %v4560_v16 = vpop.f32.mrb[11].mxu1 }
 0x13d   :  { %v4531_v32 = vpop.f32.mrb[36].mxu0  ;;  %v2021_v29 = vadd.f32 %v4500_v40, %v2020_v8  ;;  %5779 = vst [vmem:[#allocation46_spill] sm:$0xff] %v4560_v16  ;;  %v3226_v3 = vpack.c.bf16 %v4560_v16, %v4548_v1 }
 0x13e   :  { %v4537_v43 = vpop.f32.mrb[37].mxu0  ;;  %3462 = vst [vmem:[%s5654_s4 + $0x128] sm:$0xff] %v3231_v13  }
 0x13f   :  { %v2022_v44 = vadd.f32 %v2021_v29, %v4537_v43  ;;  %v4540_v35 = vpop.f32.mrb[38].mxu0  ;;  %3461 = vst [vmem:[%s5654_s4 + $0x120] sm:$0xff] %v3226_v3  }
 0x140   :  { %v3141_v45 = vpack.c.bf16 %v4540_v35, %v4531_v32  ;;  %v4546_v0 = vpop.f32.mrb[39].mxu0 }
 0x141   :  { %v3136_v4 = vpack.c.bf16 %v4546_v0, %v4537_v43  ;;  %v2023_v9 = vadd.f32 %v2022_v44, %v4546_v0  ;;  %v4582_v44 = vpop.f32.mrb[12].mxu1 }
 0x142   :  { %3444 = vst [vmem:[%s5654_s4 + $0x98] sm:$0xff] %v3141_v45   ;;  %5780 = vst [vmem:[#allocation47_spill] sm:$0xff] %v4582_v44 }
 0x143   :  { %3443 = vst [vmem:[%s5654_s4 + $0x90] sm:$0xff] %v3136_v4   ;;  %v2024_v41 = vadd.f32 %v4531_v32, %v2023_v9  ;;  %v4588_v9 = vpop.f32.mrb[13].mxu1 }
 0x144   :  { %5781 = vst [vmem:[#allocation48_spill] sm:$0xff] %v4588_v9  ;;  %v4593_v3 = vpop.f32.mrb[14].mxu1 }
 0x145   :  { %v4571_v54 = vpop.f32.mrb[40].mxu0  ;;  %v2025_v24 = vadd.f32 %v4540_v35, %v2024_v41  ;;  %5782 = vst [vmem:[#allocation49_spill] sm:$0xff] %v4593_v3  ;;  %v4600_v15 = vpop.f32.mrb[15].mxu1 }
 0x146   :  { %v4577_v8 = vpop.f32.mrb[41].mxu0  ;;  %5783 = vst [vmem:[#allocation50_spill] sm:$0xff] %v4600_v15 }
 0x147   :  { %v2026_v5 = vadd.f32 %v2025_v24, %v4577_v8  ;;  %v4580_v29 = vpop.f32.mrb[42].mxu0  ;;  %v3241_v24 = vpack.c.bf16 %v4593_v3, %v4582_v44 }
 0x148   :  { %v3151_v45 = vpack.c.bf16 %v4580_v29, %v4571_v54  ;;  %v4586_v4 = vpop.f32.mrb[43].mxu0 }
 0x149   :  { %v3146_v13 = vpack.c.bf16 %v4586_v4, %v4577_v8  ;;  %v2027_v41 = vadd.f32 %v2026_v5, %v4586_v4  ;;  %v3236_v5 = vpack.c.bf16 %v4600_v15, %v4588_v9  ;;  %3464 = vst [vmem:[%s5654_s4 + $0x138] sm:$0xff] %v3241_v24   ;;  %v4622_v53 = vpop.f32.mrb[16].mxu1 }
 0x14a   :  { %3446 = vst [vmem:[%s5654_s4 + $0xa8] sm:$0xff] %v3151_v45   ;;  %5784 = vst [vmem:[#allocation51_spill] sm:$0xff] %v4622_v53  ;;  %v4628_v27 = vpop.f32.mrb[17].mxu1 }
 0x14b   :  { %3445 = vst [vmem:[%s5654_s4 + $0xa0] sm:$0xff] %v3146_v13   ;;  %v2028_v57 = vadd.f32 %v4571_v54, %v2027_v41  ;;  %3463 = vst [vmem:[%s5654_s4 + $0x130] sm:$0xff] %v3236_v5   ;;  %v4633_v38 = vpop.f32.mrb[18].mxu1 }
 0x14c   :  { %5785 = vst [vmem:[#allocation52_spill] sm:$0xff] %v4628_v27  ;;  %5786 = vst [vmem:[#allocation53_spill] sm:$0xff] %v4633_v38  ;;  %v4640_v28 = vpop.f32.mrb[19].mxu1 }
 0x14d   :  { %v4611_v31 = vpop.f32.mrb[44].mxu0  ;;  %v2029_v45 = vadd.f32 %v4580_v29, %v2028_v57  ;;  %5787 = vst [vmem:[#allocation54_spill] sm:$0xff] %v4640_v28 }
 0x14e   :  { %v4617_v62 = vpop.f32.mrb[45].mxu0 }
 0x14f   :  { %v2030_v13 = vadd.f32 %v2029_v45, %v4617_v62  ;;  %v4620_v41 = vpop.f32.mrb[46].mxu0  ;;  %v3251_v45 = vpack.c.bf16 %v4633_v38, %v4622_v53 }
 0x150   :  { %v3161_v30 = vpack.c.bf16 %v4620_v41, %v4611_v31  ;;  %v4626_v24 = vpop.f32.mrb[47].mxu0 }
 0x151   :  { %v3156_v57 = vpack.c.bf16 %v4626_v24, %v4617_v62  ;;  %v2031_v5 = vadd.f32 %v2030_v13, %v4626_v24  ;;  %v3246_v13 = vpack.c.bf16 %v4640_v28, %v4628_v27  ;;  %3466 = vst [vmem:[%s5654_s4 + $0x148] sm:$0xff] %v3251_v45   ;;  %v4662_v46 = vpop.f32.mrb[20].mxu1 }
 0x152   :  { %3448 = vst [vmem:[%s5654_s4 + $0xb8] sm:$0xff] %v3161_v30   ;;  %5790 = vst [vmem:[#allocation57_spill] sm:$0xff] %v4662_v46  ;;  %v4668_v14 = vpop.f32.mrb[21].mxu1 }
 0x153   :  { %3447 = vst [vmem:[%s5654_s4 + $0xb0] sm:$0xff] %v3156_v57   ;;  %v2032_v20 = vadd.f32 %v4611_v31, %v2031_v5  ;;  %3465 = vst [vmem:[%s5654_s4 + $0x140] sm:$0xff] %v3246_v13   ;;  %v4673_v25 = vpop.f32.mrb[22].mxu1 }
 0x154   :  { %5791 = vst [vmem:[#allocation58_spill] sm:$0xff] %v4668_v14  ;;  %5792 = vst [vmem:[#allocation59_spill] sm:$0xff] %v4673_v25  ;;  %v4680_v36 = vpop.f32.mrb[23].mxu1 }
 0x155   :  { %v4651_v58 = vpop.f32.mrb[48].mxu0  ;;  %v2033_v30 = vadd.f32 %v4620_v41, %v2032_v20  ;;  %5793 = vst [vmem:[#allocation60_spill] sm:$0xff] %v4680_v36 }
 0x156   :  { %5788 = vst [vmem:[#allocation55_spill] sm:$0xff] %v4651_v58  ;;  %v4657_v21 = vpop.f32.mrb[49].mxu0 }
 0x157   :  { %v2034_v57 = vadd.f32 %v2033_v30, %v4657_v21  ;;  %v4660_v5 = vpop.f32.mrb[50].mxu0  ;;  %v3261_v30 = vpack.c.bf16 %v4673_v25, %v4662_v46 }
 0x158   :  { %5789 = vst [vmem:[#allocation56_spill] sm:$0xff] %v4660_v5  ;;  %v3171_v17 = vpack.c.bf16 %v4660_v5, %v4651_v58  ;;  %v4666_v45 = vpop.f32.mrb[51].mxu0 }
 0x159   :  { %v3166_v20 = vpack.c.bf16 %v4666_v45, %v4657_v21  ;;  %v2035_v13 = vadd.f32 %v2034_v57, %v4666_v45  ;;  %v3256_v57 = vpack.c.bf16 %v4680_v36, %v4668_v14  ;;  %3468 = vst [vmem:[%s5654_s4 + $0x158] sm:$0xff] %v3261_v30   ;;  %v4702_v50 = vpop.f32.mrb[24].mxu1 }
 0x15a   :  { %3450 = vst [vmem:[%s5654_s4 + $0xc8] sm:$0xff] %v3171_v17   ;;  %5797 = vst [vmem:[#allocation64_spill] sm:$0xff] %v4702_v50  ;;  %v4708_v60 = vpop.f32.mrb[25].mxu1 }
 0x15b   :  { %3449 = vst [vmem:[%s5654_s4 + $0xc0] sm:$0xff] %v3166_v20   ;;  %v2036_v7 = vadd.f32 %v4651_v58, %v2035_v13  ;;  %3467 = vst [vmem:[%s5654_s4 + $0x150] sm:$0xff] %v3256_v57   ;;  %v4713_v47 = vpop.f32.mrb[26].mxu1 }
 0x15c   :  { %5799 = vst [vmem:[#allocation66_spill] sm:$0xff] %v4708_v60  ;;  %5800 = vst [vmem:[#allocation67_spill] sm:$0xff] %v4713_v47  ;;  %v4720_v61 = vpop.f32.mrb[27].mxu1 }
 0x15d   :  { %v4691_v49 = vpop.f32.mrb[52].mxu0  ;;  %v2037_v17 = vadd.f32 %v4660_v5, %v2036_v7  ;;  %5801 = vst [vmem:[#allocation68_spill] sm:$0xff] %v4720_v61 }
 0x15e   :  { %5794 = vst [vmem:[#allocation61_spill] sm:$0xff] %v4691_v49  ;;  %v4697_v10 = vpop.f32.mrb[53].mxu0 }
 0x15f   :  { %5795 = vst [vmem:[#allocation62_spill] sm:$0xff] %v4697_v10  ;;  %v2038_v20 = vadd.f32 %v2037_v17, %v4697_v10  ;;  %v4700_v13 = vpop.f32.mrb[54].mxu0  ;;  %v3271_v17 = vpack.c.bf16 %v4713_v47, %v4702_v50 }
 0x160   :  { %5796 = vst [vmem:[#allocation63_spill] sm:$0xff] %v4700_v13  ;;  %v3181_v34 = vpack.c.bf16 %v4700_v13, %v4691_v49  ;;  %v4706_v30 = vpop.f32.mrb[55].mxu0 }
 0x161   :  { %5798 = vst [vmem:[#allocation65_spill] sm:$0xff] %v4706_v30  ;;  %v3176_v7 = vpack.c.bf16 %v4706_v30, %v4697_v10  ;;  %v2039_v57 = vadd.f32 %v2038_v20, %v4706_v30  ;;  %v3266_v20 = vpack.c.bf16 %v4720_v61, %v4708_v60  ;;  %3470 = vst [vmem:[%s5654_s4 + $0x168] sm:$0xff] %v3271_v17   ;;  %v4742_v51 = vpop.f32.mrb[28].mxu1 }
 0x162   :  { %3452 = vst [vmem:[%s5654_s4 + $0xd8] sm:$0xff] %v3181_v34   ;;  %v4748_v33 = vpop.f32.mrb[29].mxu1 }
 0x163   :  { %3451 = vst [vmem:[%s5654_s4 + $0xd0] sm:$0xff] %v3176_v7   ;;  %v2040_v52 = vadd.f32 %v4691_v49, %v2039_v57  ;;  %3469 = vst [vmem:[%s5654_s4 + $0x160] sm:$0xff] %v3266_v20   ;;  %v4753_v39 = vpop.f32.mrb[30].mxu1 }
 0x164   :  { %v4760_v37 = vpop.f32.mrb[31].mxu1 }
 0x165   :  { %v4731_v48 = vpop.f32.mrb[56].mxu0  ;;  %v2041_v34 = vadd.f32 %v4700_v13, %v2040_v52 }
 0x166   :  { %5802 = vst [vmem:[#allocation69_spill] sm:$0xff] %v4731_v48  ;;  %v4737_v55 = vpop.f32.mrb[57].mxu0 }
 0x167   :  { %5803 = vst [vmem:[#allocation70_spill] sm:$0xff] %v4737_v55  ;;  %v2042_v7 = vadd.f32 %v2041_v34, %v4737_v55  ;;  %v4740_v57 = vpop.f32.mrb[58].mxu0  ;;  %v3281_v34 = vpack.c.bf16 %v4753_v39, %v4742_v51 }
 0x168   :  { %5804 = vst [vmem:[#allocation71_spill] sm:$0xff] %v4740_v57  ;;  %v3191_v26 = vpack.c.bf16 %v4740_v57, %v4731_v48  ;;  %v4746_v17 = vpop.f32.mrb[59].mxu0 }
 0x169   :  { %5805 = vst [vmem:[#allocation72_spill] sm:$0xff] %v4746_v17  ;;  %v3186_v52 = vpack.c.bf16 %v4746_v17, %v4737_v55  ;;  %v2043_v20 = vadd.f32 %v2042_v7, %v4746_v17  ;;  %v3276_v7 = vpack.c.bf16 %v4760_v37, %v4748_v33  ;;  %3472 = vst [vmem:[%s5654_s4 + $0x178] sm:$0xff] %v3281_v34  }
 0x16a   :  { %3454 = vst [vmem:[%s5654_s4 + $0xe8] sm:$0xff] %v3191_v26  }
 0x16b   :  { %3453 = vst [vmem:[%s5654_s4 + $0xe0] sm:$0xff] %v3186_v52   ;;  %v2044_v13 = vadd.f32 %v4731_v48, %v2043_v20  ;;  %3471 = vst [vmem:[%s5654_s4 + $0x170] sm:$0xff] %v3276_v7   ;;  %v4782_v48 = vpop.f32.mrb[32].mxu1 }
 0x16c   :  { %v4788_v30 = vpop.f32.mrb[33].mxu1 }
 0x16d   :  { %v4771_v17 = vpop.f32.mrb[60].mxu0  ;;  %v2045_v26 = vadd.f32 %v4740_v57, %v2044_v13  ;;  %v4793_v57 = vpop.f32.mrb[34].mxu1 }
 0x16e   :  { %5806 = vst [vmem:[#allocation73_spill] sm:$0xff] %v4771_v17  ;;  %v4777_v55 = vpop.f32.mrb[61].mxu0  ;;  %v4800_v10 = vpop.f32.mrb[35].mxu1 }
 0x16f   :  { %5807 = vst [vmem:[#allocation74_spill] sm:$0xff] %v4777_v55  ;;  %v2046_v52 = vadd.f32 %v2045_v26, %v4777_v55  ;;  %v4780_v20 = vpop.f32.mrb[62].mxu0  ;;  %v3291_v26 = vpack.c.bf16 %v4793_v57, %v4782_v48 }
 0x170   :  { %5808 = vst [vmem:[#allocation75_spill] sm:$0xff] %v4780_v20  ;;  %v3201_v49 = vpack.c.bf16 %v4780_v20, %v4771_v17  ;;  %v4786_v34 = vpop.f32.mrb[63].mxu0 }
 0x171   :  { %5809 = vst [vmem:[#allocation76_spill] sm:$0xff] %v4786_v34  ;;  %v3196_v13 = vpack.c.bf16 %v4786_v34, %v4777_v55  ;;  %v2047_v7 = vadd.f32 %v2046_v52, %v4786_v34  ;;  %v3286_v52 = vpack.c.bf16 %v4800_v10, %v4788_v30  ;;  %3474 = vst [vmem:[%s5654_s4 + $0x188] sm:$0xff] %v3291_v26   ;;  %v4816_v55 = vpop.f32.mrb[36].mxu1 }
 0x172   :  { %3456 = vst [vmem:[%s5654_s4 + $0xf8] sm:$0xff] %v3201_v49  }
 0x173   :  { %3455 = vst [vmem:[%s5654_s4 + $0xf0] sm:$0xff] %v3196_v13   ;;  %v2048_v5 = vadd.f32 %v4771_v17, %v2047_v7  ;;  %3473 = vst [vmem:[%s5654_s4 + $0x180] sm:$0xff] %v3286_v52   ;;  %v4818_v13 = vpop.f32.mrb[37].mxu1 }
 0x174   :  { %v4821_v17 = vpop.f32.mrb[38].mxu1 }
 0x175   :  { %v2049_v49 = vadd.f32 %v4780_v20, %v2048_v5  ;;  %v3301_v58 = vpack.c.bf16 %v4821_v17, %v4816_v55  ;;  %v4825_v26 = vpop.f32.mrb[39].mxu1 }
 0x176   :  { %v3296_v52 = vpack.c.bf16 %v4825_v26, %v4818_v13 }
 0x177   :  { %v2050_v34 = vadd.f32 %v2049_v49, %v4468_v63  ;;  %3476 = vst [vmem:[%s5654_s4 + $0x198] sm:$0xff] %v3301_v58  }
 0x178   :  { %3475 = vst [vmem:[%s5654_s4 + $0x190] sm:$0xff] %v3296_v52  }
 0x179   :  { %v2051_v7 = vadd.f32 %v2050_v34, %v4480_v6  ;;  %v4838_v6 = vpop.f32.mrb[40].mxu1 }
 0x17a   :  { %v4840_v63 = vpop.f32.mrb[41].mxu1 }
 0x17b   :  { %v2052_v5 = vadd.f32 %v4462_v59, %v2051_v7  ;;  %v4843_v59 = vpop.f32.mrb[42].mxu1 }
 0x17c   :  { %v3311_v20 = vpack.c.bf16 %v4843_v59, %v4838_v6  ;;  %v4847_v58 = vpop.f32.mrb[43].mxu1 }
 0x17d   :  { %v2053_v49 = vadd.f32 %v4473_v2, %v2052_v5  ;;  %v3306_v52 = vpack.c.bf16 %v4847_v58, %v4840_v63 }
 0x17e   :  { %3478 = vst [vmem:[%s5654_s4 + $0x1a8] sm:$0xff] %v3311_v20  }
 0x17f   :  { %v2054_v34 = vadd.f32 %v2053_v49, %v4508_v19  ;;  %3477 = vst [vmem:[%s5654_s4 + $0x1a0] sm:$0xff] %v3306_v52  }
 0x181   :  { %v2055_v7 = vadd.f32 %v2054_v34, %v4520_v23  ;;  %v4860_v23 = vpop.f32.mrb[44].mxu1 }
 0x182   :  { %v4862_v19 = vpop.f32.mrb[45].mxu1 }
 0x183   :  { %v2056_v5 = vadd.f32 %v4502_v18, %v2055_v7  ;;  %v4865_v18 = vpop.f32.mrb[46].mxu1 }
 0x184   :  { %v3321_v2 = vpack.c.bf16 %v4865_v18, %v4860_v23  ;;  %v4869_v20 = vpop.f32.mrb[47].mxu1 }
 0x185   :  { %v2057_v49 = vadd.f32 %v4513_v22, %v2056_v5  ;;  %v3316_v52 = vpack.c.bf16 %v4869_v20, %v4862_v19 }
 0x186   :  { %3480 = vst [vmem:[%s5654_s4 + $0x1b8] sm:$0xff] %v3321_v2  }
 0x187   :  { %v2058_v34 = vadd.f32 %v2057_v49, %v4548_v1  ;;  %3479 = vst [vmem:[%s5654_s4 + $0x1b0] sm:$0xff] %v3316_v52  }
 0x189   :  { %v2059_v7 = vadd.f32 %v2058_v34, %v4560_v16  ;;  %v4882_v16 = vpop.f32.mrb[48].mxu1 }
 0x18a   :  { %v4884_v1 = vpop.f32.mrb[49].mxu1 }
 0x18b   :  { %v2060_v5 = vadd.f32 %v4542_v56, %v2059_v7  ;;  %v4887_v56 = vpop.f32.mrb[50].mxu1 }
 0x18c   :  { %v3331_v22 = vpack.c.bf16 %v4887_v56, %v4882_v16  ;;  %v4891_v2 = vpop.f32.mrb[51].mxu1 }
 0x18d   :  { %v2061_v49 = vadd.f32 %v4553_v11, %v2060_v5  ;;  %v3326_v52 = vpack.c.bf16 %v4891_v2, %v4884_v1 }
 0x18e   :  { %3482 = vst [vmem:[%s5654_s4 + $0x1c8] sm:$0xff] %v3331_v22  }
 0x18f   :  { %v2062_v34 = vadd.f32 %v2061_v49, %v4588_v9  ;;  %3481 = vst [vmem:[%s5654_s4 + $0x1c0] sm:$0xff] %v3326_v52  }
 0x191   :  { %v2063_v7 = vadd.f32 %v2062_v34, %v4600_v15  ;;  %v4904_v15 = vpop.f32.mrb[52].mxu1 }
 0x192   :  { %5810 = vst [vmem:[#allocation77_spill] sm:$0xff] %v4904_v15  ;;  %v4906_v9 = vpop.f32.mrb[53].mxu1 }
 0x193   :  { %v2064_v5 = vadd.f32 %v4582_v44, %v2063_v7  ;;  %v4909_v44 = vpop.f32.mrb[54].mxu1 }
 0x194   :  { %5811 = vst [vmem:[#allocation78_spill] sm:$0xff] %v4909_v44  ;;  %v3341_v11 = vpack.c.bf16 %v4909_v44, %v4904_v15  ;;  %v4913_v22 = vpop.f32.mrb[55].mxu1 }
 0x195   :  { %v2065_v49 = vadd.f32 %v4593_v3, %v2064_v5  ;;  %5812 = vst [vmem:[#allocation79_spill] sm:$0xff] %v4913_v22  ;;  %v3336_v52 = vpack.c.bf16 %v4913_v22, %v4906_v9 }
 0x196   :  { %3484 = vst [vmem:[%s5654_s4 + $0x1d8] sm:$0xff] %v3341_v11  }
 0x197   :  { %v2066_v34 = vadd.f32 %v2065_v49, %v4628_v27  ;;  %3483 = vst [vmem:[%s5654_s4 + $0x1d0] sm:$0xff] %v3336_v52  }
 0x199   :  { %v2067_v7 = vadd.f32 %v2066_v34, %v4640_v28  ;;  %v4926_v28 = vpop.f32.mrb[56].mxu1 }
 0x19a   :  { %v4928_v27 = vpop.f32.mrb[57].mxu1 }
 0x19b   :  { %v2068_v5 = vadd.f32 %v4622_v53, %v2067_v7  ;;  %v4931_v53 = vpop.f32.mrb[58].mxu1 }
 0x19c   :  { %v3351_v3 = vpack.c.bf16 %v4931_v53, %v4926_v28  ;;  %v4935_v11 = vpop.f32.mrb[59].mxu1 }
 0x19d   :  { %v2069_v49 = vadd.f32 %v4633_v38, %v2068_v5  ;;  %v3346_v52 = vpack.c.bf16 %v4935_v11, %v4928_v27 }
 0x19e   :  { %3486 = vst [vmem:[%s5654_s4 + $0x1e8] sm:$0xff] %v3351_v3  }
 0x19f   :  { %v2070_v34 = vadd.f32 %v2069_v49, %v4668_v14  ;;  %3485 = vst [vmem:[%s5654_s4 + $0x1e0] sm:$0xff] %v3346_v52  }
 0x1a1   :  { %v2071_v7 = vadd.f32 %v2070_v34, %v4680_v36  ;;  %v4948_v36 = vpop.f32.mrb[60].mxu1 }
 0x1a2   :  { %v4950_v14 = vpop.f32.mrb[61].mxu1 }
 0x1a3   :  { %v2072_v5 = vadd.f32 %v4662_v46, %v2071_v7  ;;  %v4953_v46 = vpop.f32.mrb[62].mxu1 }
 0x1a4   :  { %v3361_v38 = vpack.c.bf16 %v4953_v46, %v4948_v36  ;;  %v4957_v3 = vpop.f32.mrb[63].mxu1 }
 0x1a5   :  { %v2073_v49 = vadd.f32 %v4673_v25, %v2072_v5  ;;  %v3356_v52 = vpack.c.bf16 %v4957_v3, %v4950_v14 }
 0x1a6   :  { %3488 = vst [vmem:[%s5654_s4 + $0x1f8] sm:$0xff] %v3361_v38  }
 0x1a7   :  { %v2074_v34 = vadd.f32 %v2073_v49, %v4708_v60  ;;  %3487 = vst [vmem:[%s5654_s4 + $0x1f0] sm:$0xff] %v3356_v52  }
 0x1a9   :  { %v2075_v7 = vadd.f32 %v2074_v34, %v4720_v61 }
 0x1ab   :  { %v2076_v5 = vadd.f32 %v4702_v50, %v2075_v7 }
 0x1ad   :  { %v2077_v49 = vadd.f32 %v4713_v47, %v2076_v5 }
 0x1af   :  { %v2078_v34 = vadd.f32 %v2077_v49, %v4748_v33 }
 0x1b1   :  { %v2079_v61 = vadd.f32 %v2078_v34, %v4760_v37 }
 0x1b3   :  { %v2080_v60 = vadd.f32 %v4742_v51, %v2079_v61 }
 0x1b5   :  { %v2081_v7 = vadd.f32 %v4753_v39, %v2080_v60 }
 0x1b7   :  { %v2082_v50 = vadd.f32 %v2081_v7, %v4788_v30 }
 0x1b9   :  { %v2083_v25 = vadd.f32 %v2082_v50, %v4800_v10 }
 0x1bb   :  { %v2084_v38 = vadd.f32 %v4782_v48, %v2083_v25 }
 0x1bd   :  { %v2085_v5 = vadd.f32 %v4793_v57, %v2084_v38 }
 0x1bf   :  { %v2086_v47 = vadd.f32 %v2085_v5, %v4818_v13 }
 0x1c1   :  { %v2087_v52 = vadd.f32 %v2086_v47, %v4825_v26 }
 0x1c3   :  { %v2088_v49 = vadd.f32 %v4816_v55, %v2087_v52 }
 0x1c5   :  { %v2089_v34 = vadd.f32 %v4821_v17, %v2088_v49 }
 0x1c7   :  { %v2090_v61 = vadd.f32 %v2089_v34, %v4840_v63 }
 0x1c9   :  { %v2091_v60 = vadd.f32 %v2090_v61, %v4847_v58 }
 0x1cb   :  { %v2092_v7 = vadd.f32 %v4838_v6, %v2091_v60 }
 0x1cd   :  { %v2093_v50 = vadd.f32 %v4843_v59, %v2092_v7 }
 0x1cf   :  { %v2094_v25 = vadd.f32 %v2093_v50, %v4862_v19 }
 0x1d1   :  { %v2095_v38 = vadd.f32 %v2094_v25, %v4869_v20 }
 0x1d3   :  { %v2096_v5 = vadd.f32 %v4860_v23, %v2095_v38 }
 0x1d5   :  { %v2097_v47 = vadd.f32 %v4865_v18, %v2096_v5 }
 0x1d7   :  { %v2098_v52 = vadd.f32 %v2097_v47, %v4884_v1 }
 0x1d9   :  { %v2099_v49 = vadd.f32 %v2098_v52, %v4891_v2 }
 0x1db   :  { %v2100_v34 = vadd.f32 %v4882_v16, %v2099_v49 }
 0x1dd   :  { %v2101_v61 = vadd.f32 %v4887_v56, %v2100_v34 }
 0x1df   :  { %v2102_v60 = vadd.f32 %v2101_v61, %v4906_v9 }
 0x1e1   :  { %v2103_v7 = vadd.f32 %v2102_v60, %v4913_v22 }
 0x1e3   :  { %v2104_v50 = vadd.f32 %v4904_v15, %v2103_v7 }
 0x1e5   :  { %v2105_v25 = vadd.f32 %v4909_v44, %v2104_v50 }
 0x1e7   :  { %v2106_v38 = vadd.f32 %v2105_v25, %v4928_v27 }
 0x1e9   :  { %v2107_v5 = vadd.f32 %v2106_v38, %v4935_v11 }
 0x1eb   :  { %v2108_v47 = vadd.f32 %v4926_v28, %v2107_v5 }
 0x1ed   :  { %v2109_v52 = vadd.f32 %v4931_v53, %v2108_v47 }
 0x1ef   :  { %v2110_v49 = vadd.f32 %v2109_v52, %v4950_v14 }
 0x1f1   :  { %v2111_v34 = vadd.f32 %v2110_v49, %v4957_v3  ;;  %v5815_v49 = vld [vmem:[#allocation56_spill] sm:$0xff] }
 0x1f3   :  { %v2112_v61 = vadd.f32 %v4948_v36, %v2111_v34  ;;  %v5816_v34 = vld [vmem:[#allocation62_spill] sm:$0xff] }
 0x1f5   :  { %v2113_v60 = vadd.f32 %v4953_v46, %v2112_v61  ;;  %v5818_v61 = vld [vmem:[#allocation65_spill] sm:$0xff] }
 0x1f7   :  { %v2114_v22 = vrot.slane %v2113_v60, 4 }
 0x1f9   :  { %v2115_v7 = vadd.f32 %v2114_v22, %v2113_v60  ;;  %v5814_v22 = vld [vmem:[#allocation55_spill] sm:$0xff]  ;;  %v5820_v60 = vld [vmem:[#allocation61_spill] sm:$0xff] }
 0x1fb   :  { %v2116_v15 = vrot.slane %v2115_v7, 2 }
 0x1fd   :  { %v2117_v50 = vadd.f32 %v2116_v15, %v2115_v7  ;;  %v5822_v7 = vld [vmem:[#allocation63_spill] sm:$0xff] }
 0x1ff   :  { %v2118_v44 = vrot.slane %v2117_v50, 1 }
 0x201   :  { %v5005_v25 = vadd.f32 %v2118_v44, %v2117_v50 }
 0x203   :  { %5813 = vst [vmem:[#allocation80_spill] sm:$0xff] %v5005_v25  ;;  %v5008_v38 = vmul.f32 0.0009765625, %v5005_v25  ;;  %v5826_v25 = vld [vmem:[#allocation72_spill] sm:$0xff] }
 0x205   :  { %v5012_v5 = vsub.f32 %v4506_v42, %v5008_v38  ;;  %v5016_v47 = vsub.f32 %v4491_v12, %v5008_v38  ;;  %v5020_v52 = vsub.f32 %v4500_v40, %v5008_v38  ;;  %v5024_v15 = vsub.f32 %v4537_v43, %v5008_v38 }
 0x206   :  { %v5028_v44 = vsub.f32 %v4546_v0, %v5008_v38  ;;  %v5032_v42 = vsub.f32 %v4531_v32, %v5008_v38  ;;  %v5036_v12 = vsub.f32 %v4540_v35, %v5008_v38  ;;  %v5040_v40 = vsub.f32 %v4577_v8, %v5008_v38 }
 0x207   :  { %v5044_v43 = vsub.f32 %v4586_v4, %v5008_v38  ;;  %v5048_v0 = vsub.f32 %v4571_v54, %v5008_v38  ;;  %v5052_v32 = vsub.f32 %v4580_v29, %v5008_v38  ;;  %v5056_v35 = vsub.f32 %v4617_v62, %v5008_v38 }
 0x208   :  { %v5060_v8 = vsub.f32 %v4626_v24, %v5008_v38  ;;  %v5064_v4 = vsub.f32 %v4611_v31, %v5008_v38  ;;  %v5068_v54 = vsub.f32 %v4620_v41, %v5008_v38  ;;  %v5072_v29 = vsub.f32 %v4657_v21, %v5008_v38 }
 0x209   :  { %v5076_v62 = vsub.f32 %v4666_v45, %v5008_v38  ;;  %v5080_v24 = vsub.f32 %v5814_v22, %v5008_v38  ;;  %v5084_v31 = vsub.f32 %v5815_v49, %v5008_v38  ;;  %v5088_v41 = vsub.f32 %v5816_v34, %v5008_v38  ;;  %v5824_v22 = vld [vmem:[#allocation70_spill] sm:$0xff] }
 0x20a   :  { %v5092_v21 = vsub.f32 %v5818_v61, %v5008_v38  ;;  %v5096_v45 = vsub.f32 %v5820_v60, %v5008_v38  ;;  %v5100_v50 = vsub.f32 %v5822_v7, %v5008_v38  ;;  %v5104_v49 = vsub.f32 %v5824_v22, %v5008_v38 }
 0x20b   :  { %5817 = vst [vmem:[#allocation55_spill] sm:$0xff] %v5088_v41  ;;  %v5108_v34 = vsub.f32 %v5826_v25, %v5008_v38  ;;  %v5828_v41 = vld [vmem:[#allocation69_spill] sm:$0xff] }
 0x20c   :  { %5819 = vst [vmem:[#allocation56_spill] sm:$0xff] %v5092_v21  ;;  %5821 = vst [vmem:[#allocation62_spill] sm:$0xff] %v5096_v45  ;;  %v5112_v61 = vsub.f32 %v5828_v41, %v5008_v38  ;;  %v5830_v21 = vld [vmem:[#allocation71_spill] sm:$0xff]  ;;  %v5832_v45 = vld [vmem:[#allocation74_spill] sm:$0xff] }
 0x20d   :  { %5823 = vst [vmem:[#allocation65_spill] sm:$0xff] %v5100_v50  ;;  %5825 = vst [vmem:[#allocation61_spill] sm:$0xff] %v5104_v49  ;;  %v5116_v60 = vsub.f32 %v5830_v21, %v5008_v38  ;;  %v5120_v7 = vsub.f32 %v5832_v45, %v5008_v38  ;;  %v5834_v50 = vld [vmem:[#allocation76_spill] sm:$0xff]  ;;  %v5836_v49 = vld [vmem:[#allocation73_spill] sm:$0xff] }
 0x20e   :  { %5827 = vst [vmem:[#allocation63_spill] sm:$0xff] %v5108_v34  ;;  %5829 = vst [vmem:[#allocation70_spill] sm:$0xff] %v5112_v61  ;;  %v5124_v22 = vsub.f32 %v5834_v50, %v5008_v38  ;;  %v5128_v25 = vsub.f32 %v5836_v49, %v5008_v38  ;;  %v5838_v34 = vld [vmem:[#allocation75_spill] sm:$0xff] }
 0x20f   :  { %5831 = vst [vmem:[#allocation72_spill] sm:$0xff] %v5116_v60  ;;  %5833 = vst [vmem:[#allocation69_spill] sm:$0xff] %v5120_v7  ;;  %v5132_v41 = vsub.f32 %v5838_v34, %v5008_v38  ;;  %v5840_v61 = vld [vmem:[#allocation35_spill] sm:$0xff]  ;;  %v5842_v60 = vld [vmem:[#allocation37_spill] sm:$0xff] }
 0x210   :  { %5835 = vst [vmem:[#allocation71_spill] sm:$0xff] %v5124_v22  ;;  %5837 = vst [vmem:[#allocation74_spill] sm:$0xff] %v5128_v25  ;;  %v5136_v21 = vsub.f32 %v5840_v61, %v5008_v38  ;;  %v5140_v45 = vsub.f32 %v5842_v60, %v5008_v38  ;;  %v5844_v7 = vld [vmem:[#allocation33_spill] sm:$0xff]  ;;  %v5846_v22 = vld [vmem:[#allocation36_spill] sm:$0xff] }
 0x211   :  { %5839 = vst [vmem:[#allocation76_spill] sm:$0xff] %v5132_v41  ;;  %v5144_v50 = vsub.f32 %v5844_v7, %v5008_v38  ;;  %v5148_v49 = vsub.f32 %v5846_v22, %v5008_v38  ;;  %v5848_v25 = vld [vmem:[#allocation40_spill] sm:$0xff]  ;;  %v5850_v41 = vld [vmem:[#allocation42_spill] sm:$0xff] }
 0x212   :  { %5841 = vst [vmem:[#allocation73_spill] sm:$0xff] %v5136_v21  ;;  %5843 = vst [vmem:[#allocation75_spill] sm:$0xff] %v5140_v45  ;;  %v5152_v34 = vsub.f32 %v5848_v25, %v5008_v38  ;;  %v5156_v61 = vsub.f32 %v5850_v41, %v5008_v38  ;;  %v5852_v21 = vld [vmem:[#allocation39_spill] sm:$0xff]  ;;  %v5854_v45 = vld [vmem:[#allocation41_spill] sm:$0xff] }
 0x213   :  { %5845 = vst [vmem:[#allocation35_spill] sm:$0xff] %v5144_v50  ;;  %5847 = vst [vmem:[#allocation37_spill] sm:$0xff] %v5148_v49  ;;  %v5160_v60 = vsub.f32 %v5852_v21, %v5008_v38  ;;  %v5164_v7 = vsub.f32 %v5854_v45, %v5008_v38  ;;  %v5856_v50 = vld [vmem:[#allocation44_spill] sm:$0xff]  ;;  %v5858_v49 = vld [vmem:[#allocation46_spill] sm:$0xff] }
 0x214   :  { %5849 = vst [vmem:[#allocation33_spill] sm:$0xff] %v5152_v34  ;;  %5851 = vst [vmem:[#allocation36_spill] sm:$0xff] %v5156_v61  ;;  %v5168_v22 = vsub.f32 %v5856_v50, %v5008_v38  ;;  %v5172_v25 = vsub.f32 %v5858_v49, %v5008_v38  ;;  %v5860_v34 = vld [vmem:[#allocation43_spill] sm:$0xff]  ;;  %v5862_v61 = vld [vmem:[#allocation45_spill] sm:$0xff] }
 0x215   :  { %5853 = vst [vmem:[#allocation40_spill] sm:$0xff] %v5160_v60  ;;  %5855 = vst [vmem:[#allocation42_spill] sm:$0xff] %v5164_v7  ;;  %v5176_v41 = vsub.f32 %v5860_v34, %v5008_v38  ;;  %v5180_v21 = vsub.f32 %v5862_v61, %v5008_v38  ;;  %v5864_v60 = vld [vmem:[#allocation48_spill] sm:$0xff]  ;;  %v5866_v7 = vld [vmem:[#allocation50_spill] sm:$0xff] }
 0x216   :  { %5857 = vst [vmem:[#allocation39_spill] sm:$0xff] %v5168_v22  ;;  %5859 = vst [vmem:[#allocation41_spill] sm:$0xff] %v5172_v25  ;;  %v5184_v45 = vsub.f32 %v5864_v60, %v5008_v38  ;;  %v5188_v50 = vsub.f32 %v5866_v7, %v5008_v38  ;;  %v5868_v22 = vld [vmem:[#allocation47_spill] sm:$0xff]  ;;  %v5870_v25 = vld [vmem:[#allocation49_spill] sm:$0xff] }
 0x217   :  { %5861 = vst [vmem:[#allocation44_spill] sm:$0xff] %v5176_v41  ;;  %5863 = vst [vmem:[#allocation46_spill] sm:$0xff] %v5180_v21  ;;  %v5192_v49 = vsub.f32 %v5868_v22, %v5008_v38  ;;  %v5196_v34 = vsub.f32 %v5870_v25, %v5008_v38  ;;  %v5872_v41 = vld [vmem:[#allocation52_spill] sm:$0xff]  ;;  %v5874_v21 = vld [vmem:[#allocation54_spill] sm:$0xff] }
 0x218   :  { %5865 = vst [vmem:[#allocation43_spill] sm:$0xff] %v5184_v45  ;;  %5867 = vst [vmem:[#allocation45_spill] sm:$0xff] %v5188_v50  ;;  %v5200_v61 = vsub.f32 %v5872_v41, %v5008_v38  ;;  %v5204_v60 = vsub.f32 %v5874_v21, %v5008_v38  ;;  %v5876_v45 = vld [vmem:[#allocation51_spill] sm:$0xff]  ;;  %v5878_v50 = vld [vmem:[#allocation53_spill] sm:$0xff] }
 0x219   :  { %5869 = vst [vmem:[#allocation48_spill] sm:$0xff] %v5192_v49  ;;  %5871 = vst [vmem:[#allocation50_spill] sm:$0xff] %v5196_v34  ;;  %v5208_v7 = vsub.f32 %v5876_v45, %v5008_v38  ;;  %v5212_v22 = vsub.f32 %v5878_v50, %v5008_v38  ;;  %v5880_v49 = vld [vmem:[#allocation58_spill] sm:$0xff]  ;;  %v5882_v34 = vld [vmem:[#allocation60_spill] sm:$0xff] }
 0x21a   :  { %5873 = vst [vmem:[#allocation47_spill] sm:$0xff] %v5200_v61  ;;  %5875 = vst [vmem:[#allocation49_spill] sm:$0xff] %v5204_v60  ;;  %v5216_v25 = vsub.f32 %v5880_v49, %v5008_v38  ;;  %v5220_v41 = vsub.f32 %v5882_v34, %v5008_v38  ;;  %v5884_v61 = vld [vmem:[#allocation57_spill] sm:$0xff]  ;;  %v5885_v60 = vld [vmem:[#allocation59_spill] sm:$0xff] }
 0x21b   :  { %5877 = vst [vmem:[#allocation52_spill] sm:$0xff] %v5208_v7  ;;  %5879 = vst [vmem:[#allocation54_spill] sm:$0xff] %v5212_v22  ;;  %v5224_v21 = vsub.f32 %v5884_v61, %v5008_v38  ;;  %v5228_v45 = vsub.f32 %v5885_v60, %v5008_v38  ;;  %v5886_v7 = vld [vmem:[#allocation66_spill] sm:$0xff]  ;;  %v5887_v22 = vld [vmem:[#allocation68_spill] sm:$0xff]  ;;  %v5248_v60 = vsub.f32 %v4748_v33, %v5008_v38 }
 0x21c   :  { %5881 = vst [vmem:[#allocation51_spill] sm:$0xff] %v5216_v25  ;;  %5883 = vst [vmem:[#allocation53_spill] sm:$0xff] %v5220_v41  ;;  %v5232_v50 = vsub.f32 %v5886_v7, %v5008_v38  ;;  %v5236_v49 = vsub.f32 %v5887_v22, %v5008_v38  ;;  %v5888_v25 = vld [vmem:[#allocation64_spill] sm:$0xff]  ;;  %v5889_v41 = vld [vmem:[#allocation67_spill] sm:$0xff]  ;;  %v5252_v7 = vsub.f32 %v4760_v37, %v5008_v38 }
 0x21d   :  { %v5240_v34 = vsub.f32 %v5888_v25, %v5008_v38  ;;  %v5244_v61 = vsub.f32 %v5889_v41, %v5008_v38  ;;  %v5256_v22 = vsub.f32 %v4742_v51, %v5008_v38  ;;  %v5260_v25 = vsub.f32 %v4753_v39, %v5008_v38 }
 0x21e   :  { %v5264_v41 = vsub.f32 %v4788_v30, %v5008_v38  ;;  %v5268_v33 = vsub.f32 %v4800_v10, %v5008_v38  ;;  %v5272_v37 = vsub.f32 %v4782_v48, %v5008_v38  ;;  %v5276_v51 = vsub.f32 %v4793_v57, %v5008_v38 }
 0x21f   :  { %v5280_v39 = vsub.f32 %v4818_v13, %v5008_v38  ;;  %v5284_v30 = vsub.f32 %v4825_v26, %v5008_v38  ;;  %v5288_v10 = vsub.f32 %v4816_v55, %v5008_v38  ;;  %v5292_v48 = vsub.f32 %v4821_v17, %v5008_v38 }
 0x220   :  { %v5296_v57 = vsub.f32 %v4840_v63, %v5008_v38  ;;  %v5300_v13 = vsub.f32 %v4847_v58, %v5008_v38  ;;  %v5304_v26 = vsub.f32 %v4838_v6, %v5008_v38  ;;  %v5308_v55 = vsub.f32 %v4843_v59, %v5008_v38 }
 0x221   :  { %v5312_v17 = vsub.f32 %v4862_v19, %v5008_v38  ;;  %v5316_v63 = vsub.f32 %v4869_v20, %v5008_v38  ;;  %v5320_v58 = vsub.f32 %v4860_v23, %v5008_v38  ;;  %v5324_v6 = vsub.f32 %v4865_v18, %v5008_v38 }
 0x222   :  { %v5328_v59 = vsub.f32 %v4884_v1, %v5008_v38  ;;  %v5332_v19 = vsub.f32 %v4891_v2, %v5008_v38  ;;  %v5336_v20 = vsub.f32 %v4882_v16, %v5008_v38  ;;  %v5340_v23 = vsub.f32 %v4887_v56, %v5008_v38 }
 0x223   :  { %5890 = vst [vmem:[#allocation58_spill] sm:$0xff] %v5312_v17  ;;  %5891 = vst [vmem:[#allocation60_spill] sm:$0xff] %v5316_v63  ;;  %v5344_v18 = vsub.f32 %v4906_v9, %v5008_v38  ;;  %v5360_v56 = vsub.f32 %v4928_v27, %v5008_v38  ;;  %v5364_v9 = vsub.f32 %v4935_v11, %v5008_v38  ;;  %v5921_v63 = vld [vmem:[#allocation11_spill] sm:$0xff] }
 0x224   :  { %5892 = vst [vmem:[#allocation57_spill] sm:$0xff] %v5320_v58  ;;  %5893 = vst [vmem:[#allocation59_spill] sm:$0xff] %v5324_v6  ;;  %v5899_v6 = vld [vmem:[#allocation79_spill] sm:$0xff]  ;;  %v5380_v27 = vsub.f32 %v4957_v3, %v5008_v38  ;;  %v5384_v11 = vsub.f32 %v4948_v36, %v5008_v38 }
 0x225   :  { %5894 = vst [vmem:[#allocation66_spill] sm:$0xff] %v5328_v59  ;;  %5895 = vst [vmem:[#allocation68_spill] sm:$0xff] %v5332_v19  ;;  %v5348_v1 = vsub.f32 %v5899_v6, %v5008_v38  ;;  %v5901_v59 = vld [vmem:[#allocation77_spill] sm:$0xff]  ;;  %v5903_v19 = vld [vmem:[#allocation78_spill] sm:$0xff]  ;;  %v5368_v6 = vsub.f32 %v4926_v28, %v5008_v38  ;;  %v5388_v28 = vsub.f32 %v4953_v46, %v5008_v38 }
 0x226   :  { %5896 = vst [vmem:[#allocation64_spill] sm:$0xff] %v5336_v20  ;;  %5897 = vst [vmem:[#allocation67_spill] sm:$0xff] %v5340_v23  ;;  %v5352_v2 = vsub.f32 %v5901_v59, %v5008_v38  ;;  %v5356_v16 = vsub.f32 %v5903_v19, %v5008_v38  ;;  %v5372_v59 = vsub.f32 %v4931_v53, %v5008_v38  ;;  %v5917_v36 = vld [vmem:[#allocation7_spill] sm:$0xff] }
 0x227   :  { %5898 = vst [vmem:[#allocation81_spill] sm:$0xff] %v5344_v18  ;;  %5900 = vst [vmem:[#allocation79_spill] sm:$0xff] %v5348_v1  ;;  %v5376_v19 = vsub.f32 %v4950_v14, %v5008_v38  ;;  %v5915_v14 = vld [vmem:[#allocation2_spill] sm:$0xff] }
 0x228   :  { %5902 = vst [vmem:[#allocation77_spill] sm:$0xff] %v5352_v2  ;;  %5904 = vst [vmem:[#allocation78_spill] sm:$0xff] %v5356_v16 }
 0x229   :  { %5905 = vst [vmem:[#allocation82_spill] sm:$0xff] %v5360_v56  ;;  %5906 = vst [vmem:[#allocation83_spill] sm:$0xff] %v5364_v9 }
 0x22a   :  { %5907 = vst [vmem:[#allocation84_spill] sm:$0xff] %v5368_v6  ;;  %5908 = vst [vmem:[#allocation85_spill] sm:$0xff] %v5372_v59  ;;  %v5913_v6 = vld [vmem:[#allocation3_spill] sm:$0xff]  ;;  %v5914_v59 = vld [vmem:[#allocation5_spill] sm:$0xff] }
 0x22b   :  { %5909 = vst [vmem:[#allocation86_spill] sm:$0xff] %v5376_v19  ;;  %5910 = vst [vmem:[#allocation87_spill] sm:$0xff] %v5380_v27  ;;  %v2121_v53 = vsub.f32 %v5913_v6, %v5008_v38  ;;  %v2122_v9 = vsub.f32 %v5914_v59, %v5008_v38  ;;  %v2123_v19 = vsub.f32 %v5915_v14, %v5008_v38  ;;  %v5916_v27 = vld [vmem:[#allocation4_spill] sm:$0xff]  ;;  %v5919_v59 = vld [vmem:[#allocation6_spill] sm:$0xff] }
 0x22c   :  { %5911 = vst [vmem:[#allocation88_spill] sm:$0xff] %v5384_v11  ;;  %5912 = vst [vmem:[#allocation89_spill] sm:$0xff] %v5388_v28  ;;  %v2124_v16 = vsub.f32 %v5916_v27, %v5008_v38  ;;  %v2125_v11 = vsub.f32 %v5917_v36, %v5008_v38  ;;  %v5918_v28 = vld [vmem:[#allocation9_spill] sm:$0xff]  ;;  %v2127_v23 = vsub.f32 %v5919_v59, %v5008_v38 }
 0x22d   :  { %v2249_v56 = vmul.f32 %v2121_v53, %v2121_v53  ;;  %v2250_v3 = vmul.f32 %v2122_v9, %v2122_v9  ;;  %v2251_v2 = vmul.f32 %v2123_v19, %v2123_v19  ;;  %v2126_v1 = vsub.f32 %v5918_v28, %v5008_v38  ;;  %v5920_v9 = vld [vmem:[#allocation8_spill] sm:$0xff] }
 0x22e   :  { %v2252_v6 = vmul.f32 %v2124_v16, %v2124_v16  ;;  %v2253_v20 = vmul.f32 %v2125_v11, %v2125_v11  ;;  %v2128_v53 = vsub.f32 %v5920_v9, %v5008_v38  ;;  %v2129_v36 = vsub.f32 %v5921_v63, %v5008_v38 }
 0x22f   :  { %v2377_v46 = vadd.f32 %v2250_v3, %v2249_v56  ;;  %v2254_v58 = vmul.f32 %v2126_v1, %v2126_v1  ;;  %v2255_v19 = vmul.f32 %v2127_v23, %v2127_v23  ;;  %v5922_v3 = vld [vmem:[#allocation13_spill] sm:$0xff] }
 0x230   :  { %v2130_v28 = vsub.f32 %v5922_v3, %v5008_v38  ;;  %v2256_v16 = vmul.f32 %v2128_v53, %v2128_v53  ;;  %v2257_v11 = vmul.f32 %v2129_v36, %v2129_v36 }
 0x231   :  { %v2378_v18 = vadd.f32 %v2377_v46, %v2251_v2  ;;  %v5923_v46 = vld [vmem:[#allocation10_spill] sm:$0xff] }
 0x232   :  { %v2131_v59 = vsub.f32 %v5923_v46, %v5008_v38  ;;  %v2258_v1 = vmul.f32 %v2130_v28, %v2130_v28 }
 0x233   :  { %v2379_v14 = vadd.f32 %v2378_v18, %v2252_v6  ;;  %v5924_v6 = vld [vmem:[#allocation12_spill] sm:$0xff] }
 0x234   :  { %v2132_v9 = vsub.f32 %v5924_v6, %v5008_v38  ;;  %v2259_v23 = vmul.f32 %v2131_v59, %v2131_v59 }
 0x235   :  { %v2380_v27 = vadd.f32 %v2379_v14, %v2253_v20  ;;  %v5925_v14 = vld [vmem:[#allocation15_spill] sm:$0xff] }
 0x236   :  { %v2133_v63 = vsub.f32 %v5925_v14, %v5008_v38  ;;  %v2260_v53 = vmul.f32 %v2132_v9, %v2132_v9 }
 0x237   :  { %v2381_v56 = vadd.f32 %v2380_v27, %v2254_v58  ;;  %v5926_v27 = vld [vmem:[#allocation17_spill] sm:$0xff] }
 0x238   :  { %v2134_v3 = vsub.f32 %v5926_v27, %v5008_v38  ;;  %v2261_v36 = vmul.f32 %v2133_v63, %v2133_v63 }
 0x239   :  { %v2382_v2 = vadd.f32 %v2381_v56, %v2255_v19  ;;  %v5927_v56 = vld [vmem:[#allocation14_spill] sm:$0xff] }
 0x23a   :  { %v2135_v46 = vsub.f32 %v5927_v56, %v5008_v38  ;;  %v2262_v28 = vmul.f32 %v2134_v3, %v2134_v3 }
 0x23b   :  { %v2383_v18 = vadd.f32 %v2382_v2, %v2256_v16  ;;  %v5928_v2 = vld [vmem:[#allocation16_spill] sm:$0xff] }
 0x23c   :  { %v2136_v6 = vsub.f32 %v5928_v2, %v5008_v38  ;;  %v2263_v59 = vmul.f32 %v2135_v46, %v2135_v46 }
 0x23d   :  { %v2384_v20 = vadd.f32 %v2383_v18, %v2257_v11  ;;  %v5929_v18 = vld [vmem:[#allocation19_spill] sm:$0xff] }
 0x23e   :  { %v2137_v14 = vsub.f32 %v5929_v18, %v5008_v38  ;;  %v2264_v9 = vmul.f32 %v2136_v6, %v2136_v6 }
 0x23f   :  { %v2385_v58 = vadd.f32 %v2384_v20, %v2258_v1  ;;  %v5930_v20 = vld [vmem:[#allocation21_spill] sm:$0xff] }
 0x240   :  { %v2138_v27 = vsub.f32 %v5930_v20, %v5008_v38  ;;  %v2265_v63 = vmul.f32 %v2137_v14, %v2137_v14 }
 0x241   :  { %v2386_v19 = vadd.f32 %v2385_v58, %v2259_v23  ;;  %v5931_v58 = vld [vmem:[#allocation18_spill] sm:$0xff] }
 0x242   :  { %v2139_v56 = vsub.f32 %v5931_v58, %v5008_v38  ;;  %v2266_v3 = vmul.f32 %v2138_v27, %v2138_v27 }
 0x243   :  { %v2387_v16 = vadd.f32 %v2386_v19, %v2260_v53  ;;  %v5932_v19 = vld [vmem:[#allocation20_spill] sm:$0xff] }
 0x244   :  { %v2140_v2 = vsub.f32 %v5932_v19, %v5008_v38  ;;  %v2267_v46 = vmul.f32 %v2139_v56, %v2139_v56 }
 0x245   :  { %v2388_v11 = vadd.f32 %v2387_v16, %v2261_v36  ;;  %v5933_v16 = vld [vmem:[#allocation23_spill] sm:$0xff] }
 0x246   :  { %v2141_v18 = vsub.f32 %v5933_v16, %v5008_v38  ;;  %v2268_v6 = vmul.f32 %v2140_v2, %v2140_v2 }
 0x247   :  { %v2389_v1 = vadd.f32 %v2388_v11, %v2262_v28  ;;  %v5934_v11 = vld [vmem:[#allocation25_spill] sm:$0xff] }
 0x248   :  { %v2142_v20 = vsub.f32 %v5934_v11, %v5008_v38  ;;  %v2269_v14 = vmul.f32 %v2141_v18, %v2141_v18 }
 0x249   :  { %v2390_v23 = vadd.f32 %v2389_v1, %v2263_v59  ;;  %v5935_v1 = vld [vmem:[#allocation22_spill] sm:$0xff] }
 0x24a   :  { %v2143_v58 = vsub.f32 %v5935_v1, %v5008_v38  ;;  %v2270_v27 = vmul.f32 %v2142_v20, %v2142_v20 }
 0x24b   :  { %v2391_v53 = vadd.f32 %v2390_v23, %v2264_v9  ;;  %v5936_v23 = vld [vmem:[#allocation24_spill] sm:$0xff] }
 0x24c   :  { %v2144_v19 = vsub.f32 %v5936_v23, %v5008_v38  ;;  %v2271_v56 = vmul.f32 %v2143_v58, %v2143_v58 }
 0x24d   :  { %v2392_v36 = vadd.f32 %v2391_v53, %v2265_v63  ;;  %v5937_v53 = vld [vmem:[#allocation27_spill] sm:$0xff] }
 0x24e   :  { %v2145_v16 = vsub.f32 %v5937_v53, %v5008_v38  ;;  %v2272_v2 = vmul.f32 %v2144_v19, %v2144_v19 }
 0x24f   :  { %v2393_v28 = vadd.f32 %v2392_v36, %v2266_v3  ;;  %v5938_v36 = vld [vmem:[#allocation29_spill] sm:$0xff] }
 0x250   :  { %v2146_v11 = vsub.f32 %v5938_v36, %v5008_v38  ;;  %v2273_v18 = vmul.f32 %v2145_v16, %v2145_v16 }
 0x251   :  { %v2394_v59 = vadd.f32 %v2393_v28, %v2267_v46  ;;  %v5939_v28 = vld [vmem:[#allocation26_spill] sm:$0xff] }
 0x252   :  { %v2147_v1 = vsub.f32 %v5939_v28, %v5008_v38  ;;  %v2274_v20 = vmul.f32 %v2146_v11, %v2146_v11 }
 0x253   :  { %v2395_v9 = vadd.f32 %v2394_v59, %v2268_v6  ;;  %v5940_v59 = vld [vmem:[#allocation28_spill] sm:$0xff] }
 0x254   :  { %v2148_v23 = vsub.f32 %v5940_v59, %v5008_v38  ;;  %v2275_v58 = vmul.f32 %v2147_v1, %v2147_v1 }
 0x255   :  { %v2396_v63 = vadd.f32 %v2395_v9, %v2269_v14  ;;  %v5941_v9 = vld [vmem:[#allocation31_spill] sm:$0xff] }
 0x256   :  { %v2149_v53 = vsub.f32 %v5941_v9, %v5008_v38  ;;  %v2276_v19 = vmul.f32 %v2148_v23, %v2148_v23 }
 0x257   :  { %v2397_v3 = vadd.f32 %v2396_v63, %v2270_v27  ;;  %v5942_v63 = vld [vmem:[#allocation34_spill] sm:$0xff] }
 0x258   :  { %v2150_v36 = vsub.f32 %v5942_v63, %v5008_v38  ;;  %v2277_v16 = vmul.f32 %v2149_v53, %v2149_v53  ;;  %v2283_v53 = vmul.f32 %v5016_v47, %v5016_v47  ;;  %v2288_v47 = vmul.f32 %v5036_v12, %v5036_v12 }
 0x259   :  { %v2398_v46 = vadd.f32 %v2397_v3, %v2271_v56  ;;  %v5943_v3 = vld [vmem:[#allocation30_spill] sm:$0xff]  ;;  %v2293_v12 = vmul.f32 %v5056_v35, %v5056_v35  ;;  %v2298_v35 = vmul.f32 %v5076_v62, %v5076_v62 }
 0x25a   :  { %v2151_v28 = vsub.f32 %v5943_v3, %v5008_v38  ;;  %v2278_v11 = vmul.f32 %v2150_v36, %v2150_v36  ;;  %v2284_v36 = vmul.f32 %v5020_v52, %v5020_v52  ;;  %v2289_v52 = vmul.f32 %v5040_v40, %v5040_v40 }
 0x25b   :  { %v2399_v6 = vadd.f32 %v2398_v46, %v2272_v2  ;;  %v5944_v46 = vld [vmem:[#allocation32_spill] sm:$0xff]  ;;  %v2294_v40 = vmul.f32 %v5060_v8, %v5060_v8  ;;  %v2299_v8 = vmul.f32 %v5080_v24, %v5080_v24 }
 0x25c   :  { %v2152_v59 = vsub.f32 %v5944_v46, %v5008_v38  ;;  %v2279_v1 = vmul.f32 %v2151_v28, %v2151_v28  ;;  %v2286_v28 = vmul.f32 %v5028_v44, %v5028_v44  ;;  %v2291_v44 = vmul.f32 %v5048_v0, %v5048_v0 }
 0x25d   :  { %v2400_v14 = vadd.f32 %v2399_v6, %v2273_v18  ;;  %v5945_v6 = vld [vmem:[#allocation38_spill] sm:$0xff]  ;;  %v2296_v0 = vmul.f32 %v5068_v54, %v5068_v54 }
 0x25e   :  { %v2153_v9 = vsub.f32 %v5945_v6, %v5008_v38  ;;  %v2285_v38 = vmul.f32 %v5024_v15, %v5024_v15  ;;  %v2290_v15 = vmul.f32 %v5044_v43, %v5044_v43  ;;  %v2295_v43 = vmul.f32 %v5064_v4, %v5064_v4 }
 0x25f   :  { %v2401_v27 = vadd.f32 %v2400_v14, %v2274_v20  ;;  %v2280_v14 = vmul.f32 %v2152_v59, %v2152_v59  ;;  %v2300_v4 = vmul.f32 %v5084_v31, %v5084_v31 }
 0x260   :  { %v2281_v63 = vmul.f32 %v2153_v9, %v2153_v9 }
 0x261   :  { %v2402_v56 = vadd.f32 %v2401_v27, %v2275_v58  ;;  %v2282_v58 = vmul.f32 %v5012_v5, %v5012_v5  ;;  %v2287_v5 = vmul.f32 %v5032_v42, %v5032_v42  ;;  %v2292_v42 = vmul.f32 %v5052_v32, %v5052_v32 }
 0x262   :  { %v2297_v32 = vmul.f32 %v5072_v29, %v5072_v29 }
 0x263   :  { %v2403_v2 = vadd.f32 %v2402_v56, %v2276_v19 }
 0x265   :  { %v2404_v18 = vadd.f32 %v2403_v2, %v2277_v16 }
 0x267   :  { %v2405_v20 = vadd.f32 %v2404_v18, %v2278_v11 }
 0x269   :  { %v2406_v17 = vadd.f32 %v2405_v20, %v2279_v1 }
 0x26b   :  { %v2407_v23 = vadd.f32 %v2406_v17, %v2280_v14 }
 0x26d   :  { %v2408_v27 = vadd.f32 %v2407_v23, %v2281_v63 }
 0x26f   :  { %v2409_v19 = vadd.f32 %v2408_v27, %v2282_v58  ;;  %v5946_v27 = vld [vmem:[#allocation55_spill] sm:$0xff] }
 0x270   :  { %v2301_v54 = vmul.f32 %v5946_v27, %v5946_v27  ;;  %v5960_v27 = vld [vmem:[#allocation35_spill] sm:$0xff] }
 0x271   :  { %v2410_v56 = vadd.f32 %v2409_v19, %v2283_v53  ;;  %v5947_v19 = vld [vmem:[#allocation56_spill] sm:$0xff] }
 0x272   :  { %v2302_v29 = vmul.f32 %v5947_v19, %v5947_v19  ;;  %v5961_v19 = vld [vmem:[#allocation37_spill] sm:$0xff] }
 0x273   :  { %v2411_v3 = vadd.f32 %v2410_v56, %v2284_v36  ;;  %v5948_v56 = vld [vmem:[#allocation62_spill] sm:$0xff] }
 0x274   :  { %v2303_v62 = vmul.f32 %v5948_v56, %v5948_v56  ;;  %v5962_v56 = vld [vmem:[#allocation33_spill] sm:$0xff] }
 0x275   :  { %v2412_v17 = vadd.f32 %v2411_v3, %v2285_v38  ;;  %v5949_v3 = vld [vmem:[#allocation65_spill] sm:$0xff] }
 0x276   :  { %v2304_v24 = vmul.f32 %v5949_v3, %v5949_v3  ;;  %v5963_v3 = vld [vmem:[#allocation36_spill] sm:$0xff] }
 0x277   :  { %v2413_v16 = vadd.f32 %v2412_v17, %v2286_v28  ;;  %v5950_v17 = vld [vmem:[#allocation61_spill] sm:$0xff] }
 0x278   :  { %v2305_v31 = vmul.f32 %v5950_v17, %v5950_v17  ;;  %v5964_v17 = vld [vmem:[#allocation40_spill] sm:$0xff] }
 0x279   :  { %v2414_v2 = vadd.f32 %v2413_v16, %v2287_v5  ;;  %v5951_v16 = vld [vmem:[#allocation63_spill] sm:$0xff] }
 0x27b   :  { %v2415_v46 = vadd.f32 %v2414_v2, %v2288_v47  ;;  %v2306_v47 = vmul.f32 %v5951_v16, %v5951_v16  ;;  %v5965_v16 = vld [vmem:[#allocation42_spill] sm:$0xff] }
 0x27d   :  { %v2416_v59 = vadd.f32 %v2415_v46, %v2289_v52  ;;  %v5952_v52 = vld [vmem:[#allocation70_spill] sm:$0xff] }
 0x27e   :  { %v2307_v46 = vmul.f32 %v5952_v52, %v5952_v52  ;;  %v5966_v52 = vld [vmem:[#allocation39_spill] sm:$0xff] }
 0x27f   :  { %v2417_v11 = vadd.f32 %v2416_v59, %v2290_v15  ;;  %v5953_v59 = vld [vmem:[#allocation72_spill] sm:$0xff] }
 0x281   :  { %v2418_v18 = vadd.f32 %v2417_v11, %v2291_v44  ;;  %v2308_v44 = vmul.f32 %v5953_v59, %v5953_v59  ;;  %v5967_v59 = vld [vmem:[#allocation41_spill] sm:$0xff] }
 0x283   :  { %v2419_v6 = vadd.f32 %v2418_v18, %v2292_v42  ;;  %v5954_v42 = vld [vmem:[#allocation69_spill] sm:$0xff] }
 0x284   :  { %v2309_v18 = vmul.f32 %v5954_v42, %v5954_v42  ;;  %v5968_v42 = vld [vmem:[#allocation44_spill] sm:$0xff] }
 0x285   :  { %v2420_v9 = vadd.f32 %v2419_v6, %v2293_v12  ;;  %v5955_v6 = vld [vmem:[#allocation71_spill] sm:$0xff] }
 0x287   :  { %v2421_v1 = vadd.f32 %v2420_v9, %v2294_v40  ;;  %v2310_v40 = vmul.f32 %v5955_v6, %v5955_v6  ;;  %v5969_v6 = vld [vmem:[#allocation46_spill] sm:$0xff] }
 0x289   :  { %v2422_v20 = vadd.f32 %v2421_v1, %v2295_v43  ;;  %v5956_v43 = vld [vmem:[#allocation74_spill] sm:$0xff] }
 0x28a   :  { %v2311_v1 = vmul.f32 %v5956_v43, %v5956_v43  ;;  %v5970_v43 = vld [vmem:[#allocation43_spill] sm:$0xff] }
 0x28b   :  { %v2423_v14 = vadd.f32 %v2422_v20, %v2296_v0  ;;  %v5957_v20 = vld [vmem:[#allocation76_spill] sm:$0xff] }
 0x28d   :  { %v2424_v63 = vadd.f32 %v2423_v14, %v2297_v32  ;;  %v2312_v32 = vmul.f32 %v5957_v20, %v5957_v20  ;;  %v5971_v20 = vld [vmem:[#allocation45_spill] sm:$0xff] }
 0x28f   :  { %v2425_v23 = vadd.f32 %v2424_v63, %v2298_v35  ;;  %v5958_v35 = vld [vmem:[#allocation73_spill] sm:$0xff] }
 0x290   :  { %v2313_v63 = vmul.f32 %v5958_v35, %v5958_v35  ;;  %v5972_v35 = vld [vmem:[#allocation48_spill] sm:$0xff] }
 0x291   :  { %v2426_v58 = vadd.f32 %v2425_v23, %v2299_v8  ;;  %v5959_v23 = vld [vmem:[#allocation75_spill] sm:$0xff] }
 0x293   :  { %v2427_v53 = vadd.f32 %v2426_v58, %v2300_v4  ;;  %v2314_v4 = vmul.f32 %v5959_v23, %v5959_v23  ;;  %v5973_v23 = vld [vmem:[#allocation50_spill] sm:$0xff] }
 0x295   :  { %v2428_v36 = vadd.f32 %v2427_v53, %v2301_v54  ;;  %v2315_v54 = vmul.f32 %v5960_v27, %v5960_v27  ;;  %v5974_v27 = vld [vmem:[#allocation47_spill] sm:$0xff] }
 0x297   :  { %v2429_v38 = vadd.f32 %v2428_v36, %v2302_v29  ;;  %v2316_v29 = vmul.f32 %v5961_v19, %v5961_v19  ;;  %v5975_v19 = vld [vmem:[#allocation49_spill] sm:$0xff] }
 0x299   :  { %v2430_v28 = vadd.f32 %v2429_v38, %v2303_v62  ;;  %v2317_v62 = vmul.f32 %v5962_v56, %v5962_v56  ;;  %v5976_v56 = vld [vmem:[#allocation52_spill] sm:$0xff] }
 0x29b   :  { %v2431_v5 = vadd.f32 %v2430_v28, %v2304_v24  ;;  %v2318_v24 = vmul.f32 %v5963_v3, %v5963_v3  ;;  %v5977_v3 = vld [vmem:[#allocation54_spill] sm:$0xff] }
 0x29d   :  { %v2432_v2 = vadd.f32 %v2431_v5, %v2305_v31  ;;  %v2319_v31 = vmul.f32 %v5964_v17, %v5964_v17  ;;  %v5978_v17 = vld [vmem:[#allocation51_spill] sm:$0xff] }
 0x29f   :  { %v2433_v15 = vadd.f32 %v2432_v2, %v2306_v47  ;;  %v2320_v47 = vmul.f32 %v5965_v16, %v5965_v16  ;;  %v5979_v16 = vld [vmem:[#allocation53_spill] sm:$0xff] }
 0x2a1   :  { %v2434_v11 = vadd.f32 %v2433_v15, %v2307_v46  ;;  %v2321_v46 = vmul.f32 %v5966_v52, %v5966_v52  ;;  %v2335_v52 = vmul.f32 %v5224_v21, %v5224_v21  ;;  %v2340_v21 = vmul.f32 %v5244_v61, %v5244_v61 }
 0x2a2   :  { %v2345_v61 = vmul.f32 %v5264_v41, %v5264_v41  ;;  %v2350_v41 = vmul.f32 %v5284_v30, %v5284_v30  ;;  %v2355_v30 = vmul.f32 %v5304_v26, %v5304_v26 }
 0x2a3   :  { %v2435_v12 = vadd.f32 %v2434_v11, %v2308_v44  ;;  %v2322_v44 = vmul.f32 %v5967_v59, %v5967_v59 }
 0x2a5   :  { %v2436_v9 = vadd.f32 %v2435_v12, %v2309_v18  ;;  %v2323_v18 = vmul.f32 %v5968_v42, %v5968_v42  ;;  %v2338_v42 = vmul.f32 %v5236_v49, %v5236_v49  ;;  %v2343_v49 = vmul.f32 %v5256_v22, %v5256_v22 }
 0x2a6   :  { %v2348_v22 = vmul.f32 %v5276_v51, %v5276_v51  ;;  %v2353_v51 = vmul.f32 %v5296_v57, %v5296_v57 }
 0x2a7   :  { %v2437_v0 = vadd.f32 %v2436_v9, %v2310_v40  ;;  %v2324_v40 = vmul.f32 %v5969_v6, %v5969_v6 }
 0x2a9   :  { %v2438_v14 = vadd.f32 %v2437_v0, %v2311_v1  ;;  %v2325_v1 = vmul.f32 %v5970_v43, %v5970_v43 }
 0x2ab   :  { %v2439_v8 = vadd.f32 %v2438_v14, %v2312_v32  ;;  %v2326_v32 = vmul.f32 %v5971_v20, %v5971_v20 }
 0x2ad   :  { %v2440_v58 = vadd.f32 %v2439_v8, %v2313_v63  ;;  %v2327_v63 = vmul.f32 %v5972_v35, %v5972_v35 }
 0x2af   :  { %v2441_v53 = vadd.f32 %v2440_v58, %v2314_v4  ;;  %v2328_v4 = vmul.f32 %v5973_v23, %v5973_v23 }
 0x2b1   :  { %v2442_v36 = vadd.f32 %v2441_v53, %v2315_v54  ;;  %v2329_v54 = vmul.f32 %v5974_v27, %v5974_v27 }
 0x2b3   :  { %v2443_v38 = vadd.f32 %v2442_v36, %v2316_v29  ;;  %v2330_v29 = vmul.f32 %v5975_v19, %v5975_v19  ;;  %v5980_v19 = vld [vmem:[#allocation58_spill] sm:$0xff] }
 0x2b5   :  { %v2444_v28 = vadd.f32 %v2443_v38, %v2317_v62  ;;  %v2331_v62 = vmul.f32 %v5976_v56, %v5976_v56 }
 0x2b7   :  { %v2445_v5 = vadd.f32 %v2444_v28, %v2318_v24  ;;  %v2332_v24 = vmul.f32 %v5977_v3, %v5977_v3  ;;  %v5983_v3 = vld [vmem:[#allocation59_spill] sm:$0xff] }
 0x2b8   :  { %v2360_v26 = vmul.f32 %v5983_v3, %v5983_v3 }
 0x2b9   :  { %v2446_v2 = vadd.f32 %v2445_v5, %v2319_v31  ;;  %v2333_v31 = vmul.f32 %v5978_v17, %v5978_v17 }
 0x2bb   :  { %v2447_v15 = vadd.f32 %v2446_v2, %v2320_v47  ;;  %v2334_v47 = vmul.f32 %v5979_v16, %v5979_v16 }
 0x2bd   :  { %v2448_v11 = vadd.f32 %v2447_v15, %v2321_v46  ;;  %v2336_v15 = vmul.f32 %v5228_v45, %v5228_v45  ;;  %v2341_v45 = vmul.f32 %v5248_v60, %v5248_v60  ;;  %v2346_v60 = vmul.f32 %v5268_v33, %v5268_v33 }
 0x2be   :  { %v2351_v33 = vmul.f32 %v5288_v10, %v5288_v10  ;;  %v2356_v10 = vmul.f32 %v5308_v55, %v5308_v55 }
 0x2bf   :  { %v2449_v12 = vadd.f32 %v2448_v11, %v2322_v44  ;;  %v2337_v44 = vmul.f32 %v5232_v50, %v5232_v50  ;;  %v2342_v50 = vmul.f32 %v5252_v7, %v5252_v7  ;;  %v2347_v7 = vmul.f32 %v5272_v37, %v5272_v37 }
 0x2c0   :  { %v2352_v37 = vmul.f32 %v5292_v48, %v5292_v48  ;;  %v2357_v48 = vmul.f32 %v5980_v19, %v5980_v19 }
 0x2c1   :  { %v2450_v9 = vadd.f32 %v2449_v12, %v2323_v18  ;;  %v2339_v12 = vmul.f32 %v5240_v34, %v5240_v34  ;;  %v2344_v34 = vmul.f32 %v5260_v25, %v5260_v25  ;;  %v2349_v25 = vmul.f32 %v5280_v39, %v5280_v39 }
 0x2c2   :  { %v2354_v39 = vmul.f32 %v5300_v13, %v5300_v13 }
 0x2c3   :  { %v2451_v0 = vadd.f32 %v2450_v9, %v2324_v40 }
 0x2c5   :  { %v2452_v14 = vadd.f32 %v2451_v0, %v2325_v1 }
 0x2c7   :  { %v2453_v8 = vadd.f32 %v2452_v14, %v2326_v32 }
 0x2c9   :  { %v2454_v58 = vadd.f32 %v2453_v8, %v2327_v63 }
 0x2cb   :  { %v2455_v53 = vadd.f32 %v2454_v58, %v2328_v4 }
 0x2cd   :  { %v2456_v36 = vadd.f32 %v2455_v53, %v2329_v54 }
 0x2cf   :  { %v2457_v38 = vadd.f32 %v2456_v36, %v2330_v29  ;;  %v5981_v36 = vld [vmem:[#allocation60_spill] sm:$0xff] }
 0x2d0   :  { %v2358_v57 = vmul.f32 %v5981_v36, %v5981_v36  ;;  %v6000_v36 = vld [vmem:[#allocation80_spill] sm:$0xff] }
 0x2d1   :  { %v2458_v28 = vadd.f32 %v2457_v38, %v2331_v62  ;;  %v5982_v62 = vld [vmem:[#allocation57_spill] sm:$0xff] }
 0x2d2   :  { %v2359_v13 = vmul.f32 %v5982_v62, %v5982_v62 }
 0x2d3   :  { %v2459_v5 = vadd.f32 %v2458_v28, %v2332_v24  ;;  %v5984_v28 = vld [vmem:[#allocation66_spill] sm:$0xff] }
 0x2d4   :  { %v2361_v55 = vmul.f32 %v5984_v28, %v5984_v28 }
 0x2d5   :  { %v2460_v2 = vadd.f32 %v2459_v5, %v2333_v31  ;;  %v5985_v31 = vld [vmem:[#allocation68_spill] sm:$0xff] }
 0x2d6   :  { %v2362_v5 = vmul.f32 %v5985_v31, %v5985_v31 }
 0x2d7   :  { %v2461_v46 = vadd.f32 %v2460_v2, %v2334_v47  ;;  %v5986_v47 = vld [vmem:[#allocation64_spill] sm:$0xff] }
 0x2d8   :  { %v2363_v2 = vmul.f32 %v5986_v47, %v5986_v47 }
 0x2d9   :  { %v2462_v59 = vadd.f32 %v2461_v46, %v2335_v52  ;;  %v5987_v46 = vld [vmem:[#allocation67_spill] sm:$0xff] }
 0x2db   :  { %v2463_v11 = vadd.f32 %v2462_v59, %v2336_v15  ;;  %v2364_v15 = vmul.f32 %v5987_v46, %v5987_v46 }
 0x2dd   :  { %v2464_v18 = vadd.f32 %v2463_v11, %v2337_v44  ;;  %v5988_v44 = vld [vmem:[#allocation81_spill] sm:$0xff] }
 0x2de   :  { %v2365_v11 = vmul.f32 %v5988_v44, %v5988_v44 }
 0x2df   :  { %v2465_v6 = vadd.f32 %v2464_v18, %v2338_v42  ;;  %v5989_v18 = vld [vmem:[#allocation79_spill] sm:$0xff] }
 0x2e1   :  { %v2466_v40 = vadd.f32 %v2465_v6, %v2339_v12  ;;  %v2366_v12 = vmul.f32 %v5989_v18, %v5989_v18 }
 0x2e3   :  { %v2467_v9 = vadd.f32 %v2466_v40, %v2340_v21  ;;  %v5990_v21 = vld [vmem:[#allocation77_spill] sm:$0xff] }
 0x2e4   :  { %v2367_v40 = vmul.f32 %v5990_v21, %v5990_v21 }
 0x2e5   :  { %v2468_v43 = vadd.f32 %v2467_v9, %v2341_v45  ;;  %v5991_v9 = vld [vmem:[#allocation78_spill] sm:$0xff] }
 0x2e7   :  { %v2469_v1 = vadd.f32 %v2468_v43, %v2342_v50  ;;  %v2368_v50 = vmul.f32 %v5991_v9, %v5991_v9 }
 0x2e9   :  { %v2470_v0 = vadd.f32 %v2469_v1, %v2343_v49  ;;  %v5992_v49 = vld [vmem:[#allocation82_spill] sm:$0xff] }
 0x2ea   :  { %v2369_v1 = vmul.f32 %v5992_v49, %v5992_v49 }
 0x2eb   :  { %v2471_v20 = vadd.f32 %v2470_v0, %v2344_v34  ;;  %v5993_v0 = vld [vmem:[#allocation83_spill] sm:$0xff] }
 0x2ed   :  { %v2472_v32 = vadd.f32 %v2471_v20, %v2345_v61  ;;  %v2370_v61 = vmul.f32 %v5993_v0, %v5993_v0 }
 0x2ef   :  { %v2473_v14 = vadd.f32 %v2472_v32, %v2346_v60  ;;  %v5994_v60 = vld [vmem:[#allocation84_spill] sm:$0xff] }
 0x2f0   :  { %v2371_v32 = vmul.f32 %v5994_v60, %v5994_v60 }
 0x2f1   :  { %v2474_v35 = vadd.f32 %v2473_v14, %v2347_v7  ;;  %v5995_v14 = vld [vmem:[#allocation85_spill] sm:$0xff] }
 0x2f3   :  { %v2475_v63 = vadd.f32 %v2474_v35, %v2348_v22  ;;  %v2372_v22 = vmul.f32 %v5995_v14, %v5995_v14 }
 0x2f5   :  { %v2476_v8 = vadd.f32 %v2475_v63, %v2349_v25  ;;  %v5996_v25 = vld [vmem:[#allocation86_spill] sm:$0xff] }
 0x2f6   :  { %v2373_v63 = vmul.f32 %v5996_v25, %v5996_v25 }
 0x2f7   :  { %v2477_v23 = vadd.f32 %v2476_v8, %v2350_v41  ;;  %v5997_v8 = vld [vmem:[#allocation87_spill] sm:$0xff] }
 0x2f9   :  { %v2478_v4 = vadd.f32 %v2477_v23, %v2351_v33  ;;  %v2374_v33 = vmul.f32 %v5997_v8, %v5997_v8 }
 0x2fb   :  { %v2479_v58 = vadd.f32 %v2478_v4, %v2352_v37  ;;  %v5998_v37 = vld [vmem:[#allocation88_spill] sm:$0xff] }
 0x2fc   :  { %v2375_v4 = vmul.f32 %v5998_v37, %v5998_v37 }
 0x2fd   :  { %v2480_v27 = vadd.f32 %v2479_v58, %v2353_v51  ;;  %v5999_v58 = vld [vmem:[#allocation89_spill] sm:$0xff] }
 0x2ff   :  { %v2481_v54 = vadd.f32 %v2480_v27, %v2354_v39  ;;  %v2376_v39 = vmul.f32 %v5999_v58, %v5999_v58 }
 0x301   :  { %v2482_v53 = vadd.f32 %v2481_v54, %v2355_v30 }
 0x303   :  { %v2483_v29 = vadd.f32 %v2482_v53, %v2356_v10 }
 0x305   :  { %v2484_v56 = vadd.f32 %v2483_v29, %v2357_v48 }
 0x307   :  { %v2485_v38 = vadd.f32 %v2484_v56, %v2358_v57 }
 0x309   :  { %v2486_v24 = vadd.f32 %v2485_v38, %v2359_v13 }
 0x30b   :  { %v2487_v17 = vadd.f32 %v2486_v24, %v2360_v26 }
 0x30d   :  { %v2488_v16 = vadd.f32 %v2487_v17, %v2361_v55 }
 0x30f   :  { %v2489_v52 = vadd.f32 %v2488_v16, %v2362_v5 }
 0x311   :  { %v2490_v59 = vadd.f32 %v2489_v52, %v2363_v2 }
 0x313   :  { %v2491_v42 = vadd.f32 %v2490_v59, %v2364_v15 }
 0x315   :  { %v2492_v6 = vadd.f32 %v2491_v42, %v2365_v11 }
 0x317   :  { %v2493_v45 = vadd.f32 %v2492_v6, %v2366_v12 }
 0x319   :  { %v2494_v43 = vadd.f32 %v2493_v45, %v2367_v40 }
 0x31b   :  { %v2495_v34 = vadd.f32 %v2494_v43, %v2368_v50 }
 0x31d   :  { %v2496_v20 = vadd.f32 %v2495_v34, %v2369_v1 }
 0x31f   :  { %v2497_v7 = vadd.f32 %v2496_v20, %v2370_v61 }
 0x321   :  { %v2498_v35 = vadd.f32 %v2497_v7, %v2371_v32 }
 0x323   :  { %v2499_v41 = vadd.f32 %v2498_v35, %v2372_v22 }
 0x325   :  { %v2500_v23 = vadd.f32 %v2499_v41, %v2373_v63 }
 0x327   :  { %v2501_v51 = vadd.f32 %v2500_v23, %v2374_v33 }
 0x329   :  { %v2502_v27 = vadd.f32 %v2501_v51, %v2375_v4 }
 0x32b   :  { %v2503_v30 = vadd.f32 %v2502_v27, %v2376_v39 }
 0x32d   :  { %v2504_v54 = vrot.slane %v2503_v30, 4 }
 0x32f   :  { %v2505_v10 = vadd.f32 %v2504_v54, %v2503_v30 }
 0x331   :  { %v2506_v53 = vrot.slane %v2505_v10, 2 }
 0x333   :  { %v2507_v19 = vadd.f32 %v2506_v53, %v2505_v10 }
 0x335   :  { %v2508_v48 = vrot.slane %v2507_v19, 1 }
 0x337   :  { %v2509_v29 = vadd.f32 %v2508_v48, %v2507_v19 }
 0x339   :  { %v2511_v57 = vsel %vm2510_vm0, %v6000_v36, %v2509_v29 }
 0x33a   :  { %2512 = vst [vmem:[%s5655_s5] sm:$0x3] %v2511_v57 }

// kernel: bottleneck_forward.7
= control target key start
LH: loop header
LB: loop body
LE: loop exit
PB: predicated region body
PF: predicated region fallthrough
CT: control target
= control target key end

     0   :  { %s2898_s0 = inlined_call_operand.vmem [shape: bf16[1024,128], index: 0, kind: input, shape index: {}]   ;;  %s2899_s1 = inlined_call_operand.vmem [shape: f32[1,128], index: 1, kind: input, shape index: {}]   ;;  %s2900_s2 = inlined_call_operand.vmem [shape: f32[1,128], index: 2, kind: input, shape index: {}]   ;;  %s2901_s3 = inlined_call_operand.vmem [shape: bf16[1024,128], index: 3, kind: input, shape index: {}]   ;;  %s2902_s4 = inlined_call_operand.vmem [shape: f32[1024,128], index: 4, kind: output, shape index: {}]  }
   0x1   :  { %v1190_v0 = vld [vmem:[%s2898_s0] sm:$0xff]   ;;  %v1701_v5 = vld [vmem:[%s2898_s0 + $0x8] sm:$0xff]   ;;  %v1702_v12 = vld [vmem:[%s2898_s0 + $0x10] sm:$0xff]  }
   0x2   :  { %v1860_v1 = vld [vmem:[%s2899_s1] ss:$0 sm:$0xff]  ;;  %v1191_v2 = vunpack.c.l.bf16 %v1190_v0  ;;  %v1192_v4 = vunpack.c.h.bf16 %v1190_v0  ;;  %v1764_v6 = vld [vmem:[%s2901_s3 + $0x8] sm:$0xff]   ;;  %v1195_v10 = vunpack.c.l.bf16 %v1701_v5  ;;  %v1765_v13 = vld [vmem:[%s2901_s3 + $0x10] sm:$0xff]   ;;  %v1196_v16 = vunpack.c.h.bf16 %v1701_v5 }
   0x3   :  { %v1446_v3 = vld [vmem:[%s2901_s3] sm:$0xff]   ;;  %v1451_v11 = vunpack.c.l.bf16 %v1764_v6  ;;  %v1452_v17 = vunpack.c.h.bf16 %v1764_v6  ;;  %v1703_v18 = vld [vmem:[%s2898_s0 + $0x18] sm:$0xff]   ;;  %v1199_v20 = vunpack.c.l.bf16 %v1702_v12  ;;  %v1455_v21 = vunpack.c.l.bf16 %v1765_v13  ;;  %v1705_v54 = vld [vmem:[%s2898_s0 + $0x28] sm:$0xff]  }
   0x4   :  { %v1874_v7 = vld [vmem:[%s2900_s2] ss:$0 sm:$0xff]  ;;  %v1447_v8 = vunpack.c.l.bf16 %v1446_v3  ;;  %v1448_v9 = vunpack.c.h.bf16 %v1446_v3  ;;  %v280_v14 = vmul.f32 %v1191_v2, %v1860_v1  ;;  %v281_v15 = vmul.f32 %v1192_v4, %v1860_v1  ;;  %v1766_v23 = vld [vmem:[%s2901_s3 + $0x18] sm:$0xff]   ;;  %v1768_v55 = vld [vmem:[%s2901_s3 + $0x28] sm:$0xff]  }
   0x5   :  { %v282_v19 = vmul.f32 %v1195_v10, %v1860_v1  ;;  %v1200_v22 = vunpack.c.h.bf16 %v1702_v12  ;;  %v283_v26 = vmul.f32 %v1196_v16, %v1860_v1  ;;  %v1456_v27 = vunpack.c.h.bf16 %v1765_v13  ;;  %v1704_v40 = vld [vmem:[%s2898_s0 + $0x20] sm:$0xff]   ;;  %v1706_v0 = vld [vmem:[%s2898_s0 + $0x30] sm:$0xff]   ;;  %v1707_v16 = vld [vmem:[%s2898_s0 + $0x38] sm:$0xff]  }
   0x6   :  { %v415_v24 = vadd.f32 %v1874_v7, %v280_v14  ;;  %v416_v25 = vadd.f32 %v1874_v7, %v281_v15  ;;  %v284_v29 = vmul.f32 %v1199_v20, %v1860_v1  ;;  %v1203_v31 = vunpack.c.l.bf16 %v1703_v18  ;;  %v1767_v45 = vld [vmem:[%s2901_s3 + $0x20] sm:$0xff]   ;;  %v1769_v2 = vld [vmem:[%s2901_s3 + $0x30] sm:$0xff]  }
   0x7   :  { %v417_v28 = vadd.f32 %v1874_v7, %v282_v19  ;;  %v285_v30 = vmul.f32 %v1200_v22, %v1860_v1  ;;  %v418_v34 = vadd.f32 %v1874_v7, %v283_v26  ;;  %v1459_v35 = vunpack.c.l.bf16 %v1766_v23 }
   0x8   :  { %v799_v32 = vadd.f32 %v1447_v8, %v415_v24  ;;  %v800_v33 = vadd.f32 %v1448_v9, %v416_v25  ;;  %v419_v37 = vadd.f32 %v1874_v7, %v284_v29  ;;  %v286_v39 = vmul.f32 %v1203_v31, %v1860_v1 }
   0x9   :  { %v801_v36 = vadd.f32 %v1451_v11, %v417_v28  ;;  %v420_v38 = vadd.f32 %v1874_v7, %v285_v30  ;;  %v802_v43 = vadd.f32 %v1452_v17, %v418_v34  ;;  %v1204_v44 = vunpack.c.h.bf16 %v1703_v18  ;;  %v1708_v34 = vld [vmem:[%s2898_s0 + $0x40] sm:$0xff]  }
   0xa   :  { %v927_v41 = vmax.f32 %v799_v32, 0.0  ;;  %v928_v42 = vmax.f32 %v800_v33, 0.0  ;;  %v803_v47 = vadd.f32 %v1455_v21, %v419_v37  ;;  %v421_v49 = vadd.f32 %v1874_v7, %v286_v39  ;;  %v1770_v21 = vld [vmem:[%s2901_s3 + $0x38] sm:$0xff]   ;;  %v1771_v39 = vld [vmem:[%s2901_s3 + $0x40] sm:$0xff]  }
   0xb   :  { %v929_v46 = vmax.f32 %v801_v36, 0.0  ;;  %v804_v48 = vadd.f32 %v1456_v27, %v420_v38  ;;  %v930_v50 = vmax.f32 %v802_v43, 0.0  ;;  %v287_v51 = vmul.f32 %v1204_v44, %v1860_v1 }
   0xc   :  { %1055 = vst [vmem:[%s2902_s4] sm:$0xff] %v927_v41  ;;  %1056 = vst [vmem:[%s2902_s4 + $0x8] sm:$0xff] %v928_v42  ;;  %v1460_v52 = vunpack.c.h.bf16 %v1766_v23  ;;  %v1207_v53 = vunpack.c.l.bf16 %v1704_v40  ;;  %v931_v56 = vmax.f32 %v803_v47, 0.0  ;;  %v805_v58 = vadd.f32 %v1459_v35, %v421_v49  ;;  %v1772_v49 = vld [vmem:[%s2901_s3 + $0x48] sm:$0xff]  }
   0xd   :  { %1057 = vst [vmem:[%s2902_s4 + $0x10] sm:$0xff] %v929_v46  ;;  %v932_v57 = vmax.f32 %v804_v48, 0.0  ;;  %v1463_v59 = vunpack.c.l.bf16 %v1767_v45  ;;  %1058 = vst [vmem:[%s2902_s4 + $0x18] sm:$0xff] %v930_v50  ;;  %v422_v60 = vadd.f32 %v1874_v7, %v287_v51  ;;  %v1208_v62 = vunpack.c.h.bf16 %v1704_v40  ;;  %v1709_v48 = vld [vmem:[%s2898_s0 + $0x48] sm:$0xff]  }
   0xe   :  { %v288_v61 = vmul.f32 %v1207_v53, %v1860_v1  ;;  %v1464_v63 = vunpack.c.h.bf16 %v1767_v45  ;;  %1059 = vst [vmem:[%s2902_s4 + $0x20] sm:$0xff] %v931_v56  ;;  %v933_v3 = vmax.f32 %v805_v58, 0.0  ;;  %v1211_v4 = vunpack.c.l.bf16 %v1705_v54  ;;  %v1710_v58 = vld [vmem:[%s2898_s0 + $0x50] sm:$0xff]  }
   0xf   :  { %1060 = vst [vmem:[%s2902_s4 + $0x28] sm:$0xff] %v932_v57  ;;  %v1467_v5 = vunpack.c.l.bf16 %v1768_v55  ;;  %v1212_v6 = vunpack.c.h.bf16 %v1705_v54  ;;  %v806_v8 = vadd.f32 %v1460_v52, %v422_v60  ;;  %v289_v10 = vmul.f32 %v1208_v62, %v1860_v1 }
  0x10   :  { %v423_v9 = vadd.f32 %v1874_v7, %v288_v61  ;;  %v1468_v11 = vunpack.c.h.bf16 %v1768_v55  ;;  %1061 = vst [vmem:[%s2902_s4 + $0x30] sm:$0xff] %v933_v3  ;;  %v290_v12 = vmul.f32 %v1211_v4, %v1860_v1  ;;  %v1215_v14 = vunpack.c.l.bf16 %v1706_v0 }
  0x11   :  { %v291_v13 = vmul.f32 %v1212_v6, %v1860_v1  ;;  %v1471_v15 = vunpack.c.l.bf16 %v1769_v2  ;;  %v934_v17 = vmax.f32 %v806_v8, 0.0  ;;  %v424_v19 = vadd.f32 %v1874_v7, %v289_v10  ;;  %v1711_v10 = vld [vmem:[%s2898_s0 + $0x58] sm:$0xff]  }
  0x12   :  { %v807_v18 = vadd.f32 %v1463_v59, %v423_v9  ;;  %v1216_v20 = vunpack.c.h.bf16 %v1706_v0  ;;  %v425_v22 = vadd.f32 %v1874_v7, %v290_v12  ;;  %v292_v24 = vmul.f32 %v1215_v14, %v1860_v1 }
  0x13   :  { %v426_v23 = vadd.f32 %v1874_v7, %v291_v13  ;;  %v1472_v25 = vunpack.c.h.bf16 %v1769_v2  ;;  %1062 = vst [vmem:[%s2902_s4 + $0x38] sm:$0xff] %v934_v17  ;;  %v808_v27 = vadd.f32 %v1464_v63, %v424_v19  ;;  %v1219_v29 = vunpack.c.l.bf16 %v1707_v16  ;;  %v1773_v63 = vld [vmem:[%s2901_s3 + $0x50] sm:$0xff]   ;;  %v1774_v19 = vld [vmem:[%s2901_s3 + $0x58] sm:$0xff]  }
  0x14   :  { %v935_v26 = vmax.f32 %v807_v18, 0.0  ;;  %v293_v28 = vmul.f32 %v1216_v20, %v1860_v1  ;;  %v809_v30 = vadd.f32 %v1467_v5, %v425_v22  ;;  %v427_v32 = vadd.f32 %v1874_v7, %v292_v24 }
  0x15   :  { %v810_v31 = vadd.f32 %v1468_v11, %v426_v23  ;;  %v1475_v33 = vunpack.c.l.bf16 %v1770_v21  ;;  %v936_v35 = vmax.f32 %v808_v27, 0.0  ;;  %v294_v37 = vmul.f32 %v1219_v29, %v1860_v1 }
  0x16   :  { %1063 = vst [vmem:[%s2902_s4 + $0x40] sm:$0xff] %v935_v26  ;;  %v428_v36 = vadd.f32 %v1874_v7, %v293_v28  ;;  %v1220_v38 = vunpack.c.h.bf16 %v1707_v16  ;;  %v937_v40 = vmax.f32 %v809_v30, 0.0  ;;  %v811_v42 = vadd.f32 %v1471_v15, %v427_v32  ;;  %v1712_v28 = vld [vmem:[%s2898_s0 + $0x60] sm:$0xff]  }
  0x17   :  { %v938_v41 = vmax.f32 %v810_v31, 0.0  ;;  %v1476_v43 = vunpack.c.h.bf16 %v1770_v21  ;;  %1064 = vst [vmem:[%s2902_s4 + $0x48] sm:$0xff] %v936_v35  ;;  %v429_v45 = vadd.f32 %v1874_v7, %v294_v37  ;;  %v1223_v47 = vunpack.c.l.bf16 %v1708_v34 }
  0x18   :  { %v812_v44 = vadd.f32 %v1472_v25, %v428_v36  ;;  %v295_v46 = vmul.f32 %v1220_v38, %v1860_v1  ;;  %1065 = vst [vmem:[%s2902_s4 + $0x50] sm:$0xff] %v937_v40  ;;  %v939_v50 = vmax.f32 %v811_v42, 0.0  ;;  %v1479_v51 = vunpack.c.l.bf16 %v1771_v39  ;;  %v1713_v42 = vld [vmem:[%s2898_s0 + $0x68] sm:$0xff]  }
  0x19   :  { %1066 = vst [vmem:[%s2902_s4 + $0x58] sm:$0xff] %v938_v41  ;;  %v1224_v52 = vunpack.c.h.bf16 %v1708_v34  ;;  %v1480_v53 = vunpack.c.h.bf16 %v1771_v39  ;;  %v813_v55 = vadd.f32 %v1475_v33, %v429_v45  ;;  %v296_v57 = vmul.f32 %v1223_v47, %v1860_v1  ;;  %v1775_v33 = vld [vmem:[%s2901_s3 + $0x60] sm:$0xff]  }
  0x1a   :  { %v940_v54 = vmax.f32 %v812_v44, 0.0  ;;  %v430_v56 = vadd.f32 %v1874_v7, %v295_v46  ;;  %1067 = vst [vmem:[%s2902_s4 + $0x60] sm:$0xff] %v939_v50  ;;  %v1227_v60 = vunpack.c.l.bf16 %v1709_v48  ;;  %v1483_v61 = vunpack.c.l.bf16 %v1772_v49 }
  0x1b   :  { %v297_v59 = vmul.f32 %v1224_v52, %v1860_v1  ;;  %v1228_v62 = vunpack.c.h.bf16 %v1709_v48  ;;  %v941_v0 = vmax.f32 %v813_v55, 0.0  ;;  %v431_v3 = vadd.f32 %v1874_v7, %v296_v57  ;;  %v1714_v52 = vld [vmem:[%s2898_s0 + $0x70] sm:$0xff]  }
  0x1c   :  { %1068 = vst [vmem:[%s2902_s4 + $0x68] sm:$0xff] %v940_v54  ;;  %v814_v2 = vadd.f32 %v1476_v43, %v430_v56  ;;  %v1484_v4 = vunpack.c.h.bf16 %v1772_v49  ;;  %v298_v6 = vmul.f32 %v1227_v60, %v1860_v1  ;;  %v1231_v9 = vunpack.c.l.bf16 %v1710_v58  ;;  %v1776_v43 = vld [vmem:[%s2901_s3 + $0x68] sm:$0xff]   ;;  %v1777_v57 = vld [vmem:[%s2901_s3 + $0x70] sm:$0xff]  }
  0x1d   :  { %v432_v5 = vadd.f32 %v1874_v7, %v297_v59  ;;  %v299_v8 = vmul.f32 %v1228_v62, %v1860_v1  ;;  %1069 = vst [vmem:[%s2902_s4 + $0x70] sm:$0xff] %v941_v0  ;;  %v815_v12 = vadd.f32 %v1479_v51, %v431_v3  ;;  %v1487_v13 = vunpack.c.l.bf16 %v1773_v63  ;;  %v1715_v3 = vld [vmem:[%s2898_s0 + $0x78] sm:$0xff]  }
  0x1e   :  { %v942_v11 = vmax.f32 %v814_v2, 0.0  ;;  %v1232_v14 = vunpack.c.h.bf16 %v1710_v58  ;;  %v433_v16 = vadd.f32 %v1874_v7, %v298_v6  ;;  %v300_v18 = vmul.f32 %v1231_v9, %v1860_v1 }
  0x1f   :  { %v816_v15 = vadd.f32 %v1480_v53, %v432_v5  ;;  %v434_v17 = vadd.f32 %v1874_v7, %v299_v8  ;;  %v943_v20 = vmax.f32 %v815_v12, 0.0  ;;  %v1488_v22 = vunpack.c.h.bf16 %v1773_v63 }
  0x20   :  { %1070 = vst [vmem:[%s2902_s4 + $0x78] sm:$0xff] %v942_v11  ;;  %v301_v21 = vmul.f32 %v1232_v14, %v1860_v1  ;;  %v1235_v23 = vunpack.c.l.bf16 %v1711_v10  ;;  %v817_v25 = vadd.f32 %v1483_v61, %v433_v16  ;;  %v435_v27 = vadd.f32 %v1874_v7, %v300_v18 }
  0x21   :  { %v944_v24 = vmax.f32 %v816_v15, 0.0  ;;  %v818_v26 = vadd.f32 %v1484_v4, %v434_v17  ;;  %1071 = vst [vmem:[%s2902_s4 + $0x80] sm:$0xff] %v943_v20  ;;  %v1491_v31 = vunpack.c.l.bf16 %v1774_v19  ;;  %v1236_v32 = vunpack.c.h.bf16 %v1711_v10 }
  0x22   :  { %v436_v29 = vadd.f32 %v1874_v7, %v301_v21  ;;  %v302_v30 = vmul.f32 %v1235_v23, %v1860_v1  ;;  %v945_v34 = vmax.f32 %v817_v25, 0.0  ;;  %v819_v36 = vadd.f32 %v1487_v13, %v435_v27  ;;  %v1778_v13 = vld [vmem:[%s2901_s3 + $0x78] sm:$0xff]   ;;  %v1779_v27 = vld [vmem:[%s2901_s3 + $0x80] sm:$0xff]  }
  0x23   :  { %1072 = vst [vmem:[%s2902_s4 + $0x88] sm:$0xff] %v944_v24  ;;  %v946_v35 = vmax.f32 %v818_v26, 0.0  ;;  %v1492_v37 = vunpack.c.h.bf16 %v1774_v19  ;;  %v303_v40 = vmul.f32 %v1236_v32, %v1860_v1  ;;  %v1239_v41 = vunpack.c.l.bf16 %v1712_v28 }
  0x24   :  { %v820_v38 = vadd.f32 %v1488_v22, %v436_v29  ;;  %v437_v39 = vadd.f32 %v1874_v7, %v302_v30  ;;  %1073 = vst [vmem:[%s2902_s4 + $0x90] sm:$0xff] %v945_v34  ;;  %v947_v44 = vmax.f32 %v819_v36, 0.0  ;;  %v1495_v45 = vunpack.c.l.bf16 %v1775_v33  ;;  %v1716_v22 = vld [vmem:[%s2898_s0 + $0x80] sm:$0xff]   ;;  %v1717_v36 = vld [vmem:[%s2898_s0 + $0x88] sm:$0xff]  }
  0x25   :  { %1074 = vst [vmem:[%s2902_s4 + $0x98] sm:$0xff] %v946_v35  ;;  %v1240_v46 = vunpack.c.h.bf16 %v1712_v28  ;;  %v1496_v47 = vunpack.c.h.bf16 %v1775_v33  ;;  %v438_v50 = vadd.f32 %v1874_v7, %v303_v40  ;;  %v304_v51 = vmul.f32 %v1239_v41, %v1860_v1 }
  0x26   :  { %v948_v48 = vmax.f32 %v820_v38, 0.0  ;;  %v821_v49 = vadd.f32 %v1491_v31, %v437_v39  ;;  %1075 = vst [vmem:[%s2902_s4 + $0xa0] sm:$0xff] %v947_v44  ;;  %v1243_v54 = vunpack.c.l.bf16 %v1713_v42  ;;  %v1499_v55 = vunpack.c.l.bf16 %v1776_v43 }
  0x27   :  { %v305_v53 = vmul.f32 %v1240_v46, %v1860_v1  ;;  %v1244_v56 = vunpack.c.h.bf16 %v1713_v42  ;;  %v822_v59 = vadd.f32 %v1492_v37, %v438_v50  ;;  %v439_v60 = vadd.f32 %v1874_v7, %v304_v51  ;;  %v1780_v37 = vld [vmem:[%s2901_s3 + $0x88] sm:$0xff]   ;;  %v1718_v46 = vld [vmem:[%s2898_s0 + $0x90] sm:$0xff]  }
  0x28   :  { %1076 = vst [vmem:[%s2902_s4 + $0xa8] sm:$0xff] %v948_v48  ;;  %v949_v58 = vmax.f32 %v821_v49, 0.0  ;;  %v1500_v61 = vunpack.c.h.bf16 %v1776_v43  ;;  %v306_v63 = vmul.f32 %v1243_v54, %v1860_v1  ;;  %v1247_v2 = vunpack.c.l.bf16 %v1714_v52  ;;  %v1781_v51 = vld [vmem:[%s2901_s3 + $0x90] sm:$0xff]  }
  0x29   :  { %v440_v62 = vadd.f32 %v1874_v7, %v305_v53  ;;  %v307_v0 = vmul.f32 %v1244_v56, %v1860_v1  ;;  %v950_v4 = vmax.f32 %v822_v59, 0.0  ;;  %v823_v5 = vadd.f32 %v1495_v45, %v439_v60  ;;  %v1719_v60 = vld [vmem:[%s2898_s0 + $0x98] sm:$0xff]  }
  0x2a   :  { %1077 = vst [vmem:[%s2902_s4 + $0xb0] sm:$0xff] %v949_v58  ;;  %v1503_v6 = vunpack.c.l.bf16 %v1777_v57  ;;  %v1248_v8 = vunpack.c.h.bf16 %v1714_v52  ;;  %v441_v10 = vadd.f32 %v1874_v7, %v306_v63  ;;  %v308_v12 = vmul.f32 %v1247_v2, %v1860_v1 }
  0x2b   :  { %v824_v9 = vadd.f32 %v1496_v47, %v440_v62  ;;  %v442_v11 = vadd.f32 %v1874_v7, %v307_v0  ;;  %1078 = vst [vmem:[%s2902_s4 + $0xb8] sm:$0xff] %v950_v4  ;;  %v951_v14 = vmax.f32 %v823_v5, 0.0  ;;  %v1504_v16 = vunpack.c.h.bf16 %v1777_v57 }
  0x2c   :  { %v309_v15 = vmul.f32 %v1248_v8, %v1860_v1  ;;  %v1251_v17 = vunpack.c.l.bf16 %v1715_v3  ;;  %v825_v19 = vadd.f32 %v1499_v55, %v441_v10  ;;  %v443_v21 = vadd.f32 %v1874_v7, %v308_v12 }
  0x2d   :  { %v952_v18 = vmax.f32 %v824_v9, 0.0  ;;  %v826_v20 = vadd.f32 %v1500_v61, %v442_v11  ;;  %1079 = vst [vmem:[%s2902_s4 + $0xc0] sm:$0xff] %v951_v14  ;;  %v1507_v25 = vunpack.c.l.bf16 %v1778_v13  ;;  %v1252_v26 = vunpack.c.h.bf16 %v1715_v3 }
  0x2e   :  { %v444_v23 = vadd.f32 %v1874_v7, %v309_v15  ;;  %v310_v24 = vmul.f32 %v1251_v17, %v1860_v1  ;;  %v953_v28 = vmax.f32 %v825_v19, 0.0  ;;  %v827_v30 = vadd.f32 %v1503_v6, %v443_v21  ;;  %v1782_v6 = vld [vmem:[%s2901_s3 + $0x98] sm:$0xff]   ;;  %v1783_v21 = vld [vmem:[%s2901_s3 + $0xa0] sm:$0xff]  }
  0x2f   :  { %1080 = vst [vmem:[%s2902_s4 + $0xc8] sm:$0xff] %v952_v18  ;;  %v954_v29 = vmax.f32 %v826_v20, 0.0  ;;  %v1508_v31 = vunpack.c.h.bf16 %v1778_v13  ;;  %v311_v34 = vmul.f32 %v1252_v26, %v1860_v1  ;;  %v1255_v35 = vunpack.c.l.bf16 %v1716_v22 }
  0x30   :  { %v828_v32 = vadd.f32 %v1504_v16, %v444_v23  ;;  %v445_v33 = vadd.f32 %v1874_v7, %v310_v24  ;;  %1081 = vst [vmem:[%s2902_s4 + $0xd0] sm:$0xff] %v953_v28  ;;  %v955_v38 = vmax.f32 %v827_v30, 0.0  ;;  %v1511_v39 = vunpack.c.l.bf16 %v1779_v27  ;;  %v1720_v16 = vld [vmem:[%s2898_s0 + $0xa0] sm:$0xff]   ;;  %v1721_v30 = vld [vmem:[%s2898_s0 + $0xa8] sm:$0xff]  }
  0x31   :  { %1082 = vst [vmem:[%s2902_s4 + $0xd8] sm:$0xff] %v954_v29  ;;  %v1256_v40 = vunpack.c.h.bf16 %v1716_v22  ;;  %v1512_v41 = vunpack.c.h.bf16 %v1779_v27  ;;  %v446_v44 = vadd.f32 %v1874_v7, %v311_v34  ;;  %v312_v45 = vmul.f32 %v1255_v35, %v1860_v1 }
  0x32   :  { %v956_v42 = vmax.f32 %v828_v32, 0.0  ;;  %v829_v43 = vadd.f32 %v1507_v25, %v445_v33  ;;  %1083 = vst [vmem:[%s2902_s4 + $0xe0] sm:$0xff] %v955_v38  ;;  %v1259_v48 = vunpack.c.l.bf16 %v1717_v36  ;;  %v1515_v49 = vunpack.c.l.bf16 %v1780_v37 }
  0x33   :  { %v313_v47 = vmul.f32 %v1256_v40, %v1860_v1  ;;  %v1260_v50 = vunpack.c.h.bf16 %v1717_v36  ;;  %v830_v53 = vadd.f32 %v1508_v31, %v446_v44  ;;  %v447_v54 = vadd.f32 %v1874_v7, %v312_v45  ;;  %v1784_v31 = vld [vmem:[%s2901_s3 + $0xa8] sm:$0xff]   ;;  %v1722_v40 = vld [vmem:[%s2898_s0 + $0xb0] sm:$0xff]  }
  0x34   :  { %1084 = vst [vmem:[%s2902_s4 + $0xe8] sm:$0xff] %v956_v42  ;;  %v957_v52 = vmax.f32 %v829_v43, 0.0  ;;  %v1516_v55 = vunpack.c.h.bf16 %v1780_v37  ;;  %v314_v57 = vmul.f32 %v1259_v48, %v1860_v1  ;;  %v1263_v59 = vunpack.c.l.bf16 %v1718_v46  ;;  %v1785_v45 = vld [vmem:[%s2901_s3 + $0xb0] sm:$0xff]  }
  0x35   :  { %v448_v56 = vadd.f32 %v1874_v7, %v313_v47  ;;  %v315_v58 = vmul.f32 %v1260_v50, %v1860_v1  ;;  %v958_v61 = vmax.f32 %v830_v53, 0.0  ;;  %v831_v62 = vadd.f32 %v1511_v39, %v447_v54  ;;  %v1723_v54 = vld [vmem:[%s2898_s0 + $0xb8] sm:$0xff]  }
  0x36   :  { %1085 = vst [vmem:[%s2902_s4 + $0xf0] sm:$0xff] %v957_v52  ;;  %v1519_v63 = vunpack.c.l.bf16 %v1781_v51  ;;  %v1264_v0 = vunpack.c.h.bf16 %v1718_v46  ;;  %v449_v3 = vadd.f32 %v1874_v7, %v314_v57  ;;  %v316_v5 = vmul.f32 %v1263_v59, %v1860_v1 }
  0x37   :  { %v832_v2 = vadd.f32 %v1512_v41, %v448_v56  ;;  %v450_v4 = vadd.f32 %v1874_v7, %v315_v58  ;;  %1086 = vst [vmem:[%s2902_s4 + $0xf8] sm:$0xff] %v958_v61  ;;  %v959_v8 = vmax.f32 %v831_v62, 0.0  ;;  %v1520_v10 = vunpack.c.h.bf16 %v1781_v51 }
  0x38   :  { %v317_v9 = vmul.f32 %v1264_v0, %v1860_v1  ;;  %v1267_v11 = vunpack.c.l.bf16 %v1719_v60  ;;  %v833_v13 = vadd.f32 %v1515_v49, %v449_v3  ;;  %v451_v15 = vadd.f32 %v1874_v7, %v316_v5 }
  0x39   :  { %v960_v12 = vmax.f32 %v832_v2, 0.0  ;;  %v834_v14 = vadd.f32 %v1516_v55, %v450_v4  ;;  %1087 = vst [vmem:[%s2902_s4 + $0x100] sm:$0xff] %v959_v8  ;;  %v1523_v19 = vunpack.c.l.bf16 %v1782_v6  ;;  %v1268_v20 = vunpack.c.h.bf16 %v1719_v60 }
  0x3a   :  { %v452_v17 = vadd.f32 %v1874_v7, %v317_v9  ;;  %v318_v18 = vmul.f32 %v1267_v11, %v1860_v1  ;;  %v961_v22 = vmax.f32 %v833_v13, 0.0  ;;  %v835_v24 = vadd.f32 %v1519_v63, %v451_v15  ;;  %v1786_v63 = vld [vmem:[%s2901_s3 + $0xb8] sm:$0xff]   ;;  %v1787_v15 = vld [vmem:[%s2901_s3 + $0xc0] sm:$0xff]  }
  0x3b   :  { %1088 = vst [vmem:[%s2902_s4 + $0x108] sm:$0xff] %v960_v12  ;;  %v962_v23 = vmax.f32 %v834_v14, 0.0  ;;  %v1524_v25 = vunpack.c.h.bf16 %v1782_v6  ;;  %v319_v28 = vmul.f32 %v1268_v20, %v1860_v1  ;;  %v1271_v29 = vunpack.c.l.bf16 %v1720_v16 }
  0x3c   :  { %v836_v26 = vadd.f32 %v1520_v10, %v452_v17  ;;  %v453_v27 = vadd.f32 %v1874_v7, %v318_v18  ;;  %1089 = vst [vmem:[%s2902_s4 + $0x110] sm:$0xff] %v961_v22  ;;  %v963_v32 = vmax.f32 %v835_v24, 0.0  ;;  %v1527_v33 = vunpack.c.l.bf16 %v1783_v21  ;;  %v1724_v10 = vld [vmem:[%s2898_s0 + $0xc0] sm:$0xff]   ;;  %v1725_v24 = vld [vmem:[%s2898_s0 + $0xc8] sm:$0xff]  }
  0x3d   :  { %1090 = vst [vmem:[%s2902_s4 + $0x118] sm:$0xff] %v962_v23  ;;  %v1272_v34 = vunpack.c.h.bf16 %v1720_v16  ;;  %v1528_v35 = vunpack.c.h.bf16 %v1783_v21  ;;  %v454_v38 = vadd.f32 %v1874_v7, %v319_v28  ;;  %v320_v39 = vmul.f32 %v1271_v29, %v1860_v1 }
  0x3e   :  { %v964_v36 = vmax.f32 %v836_v26, 0.0  ;;  %v837_v37 = vadd.f32 %v1523_v19, %v453_v27  ;;  %1091 = vst [vmem:[%s2902_s4 + $0x120] sm:$0xff] %v963_v32  ;;  %v1275_v42 = vunpack.c.l.bf16 %v1721_v30  ;;  %v1531_v43 = vunpack.c.l.bf16 %v1784_v31 }
  0x3f   :  { %v321_v41 = vmul.f32 %v1272_v34, %v1860_v1  ;;  %v1276_v44 = vunpack.c.h.bf16 %v1721_v30  ;;  %v838_v47 = vadd.f32 %v1524_v25, %v454_v38  ;;  %v455_v48 = vadd.f32 %v1874_v7, %v320_v39  ;;  %v1788_v25 = vld [vmem:[%s2901_s3 + $0xc8] sm:$0xff]   ;;  %v1726_v34 = vld [vmem:[%s2898_s0 + $0xd0] sm:$0xff]  }
  0x40   :  { %1092 = vst [vmem:[%s2902_s4 + $0x128] sm:$0xff] %v964_v36  ;;  %v965_v46 = vmax.f32 %v837_v37, 0.0  ;;  %v1532_v49 = vunpack.c.h.bf16 %v1784_v31  ;;  %v322_v51 = vmul.f32 %v1275_v42, %v1860_v1  ;;  %v1279_v53 = vunpack.c.l.bf16 %v1722_v40  ;;  %v1789_v39 = vld [vmem:[%s2901_s3 + $0xd0] sm:$0xff]  }
  0x41   :  { %v456_v50 = vadd.f32 %v1874_v7, %v321_v41  ;;  %v323_v52 = vmul.f32 %v1276_v44, %v1860_v1  ;;  %v966_v55 = vmax.f32 %v838_v47, 0.0  ;;  %v839_v56 = vadd.f32 %v1527_v33, %v455_v48  ;;  %v1727_v48 = vld [vmem:[%s2898_s0 + $0xd8] sm:$0xff]  }
  0x42   :  { %1093 = vst [vmem:[%s2902_s4 + $0x130] sm:$0xff] %v965_v46  ;;  %v1535_v57 = vunpack.c.l.bf16 %v1785_v45  ;;  %v1280_v58 = vunpack.c.h.bf16 %v1722_v40  ;;  %v457_v60 = vadd.f32 %v1874_v7, %v322_v51  ;;  %v324_v62 = vmul.f32 %v1279_v53, %v1860_v1 }
  0x43   :  { %v840_v59 = vadd.f32 %v1528_v35, %v456_v50  ;;  %v458_v61 = vadd.f32 %v1874_v7, %v323_v52  ;;  %1094 = vst [vmem:[%s2902_s4 + $0x138] sm:$0xff] %v966_v55  ;;  %v967_v0 = vmax.f32 %v839_v56, 0.0  ;;  %v1536_v3 = vunpack.c.h.bf16 %v1785_v45 }
  0x44   :  { %v325_v2 = vmul.f32 %v1280_v58, %v1860_v1  ;;  %v1283_v4 = vunpack.c.l.bf16 %v1723_v54  ;;  %v841_v6 = vadd.f32 %v1531_v43, %v457_v60  ;;  %v459_v9 = vadd.f32 %v1874_v7, %v324_v62 }
  0x45   :  { %v968_v5 = vmax.f32 %v840_v59, 0.0  ;;  %v842_v8 = vadd.f32 %v1532_v49, %v458_v61  ;;  %1095 = vst [vmem:[%s2902_s4 + $0x140] sm:$0xff] %v967_v0  ;;  %v1539_v13 = vunpack.c.l.bf16 %v1786_v63  ;;  %v1284_v14 = vunpack.c.h.bf16 %v1723_v54 }
  0x46   :  { %v460_v11 = vadd.f32 %v1874_v7, %v325_v2  ;;  %v326_v12 = vmul.f32 %v1283_v4, %v1860_v1  ;;  %v969_v16 = vmax.f32 %v841_v6, 0.0  ;;  %v843_v18 = vadd.f32 %v1535_v57, %v459_v9  ;;  %v1790_v57 = vld [vmem:[%s2901_s3 + $0xd8] sm:$0xff]   ;;  %v1791_v9 = vld [vmem:[%s2901_s3 + $0xe0] sm:$0xff]  }
  0x47   :  { %1096 = vst [vmem:[%s2902_s4 + $0x148] sm:$0xff] %v968_v5  ;;  %v970_v17 = vmax.f32 %v842_v8, 0.0  ;;  %v1540_v19 = vunpack.c.h.bf16 %v1786_v63  ;;  %v327_v22 = vmul.f32 %v1284_v14, %v1860_v1  ;;  %v1287_v23 = vunpack.c.l.bf16 %v1724_v10 }
  0x48   :  { %v844_v20 = vadd.f32 %v1536_v3, %v460_v11  ;;  %v461_v21 = vadd.f32 %v1874_v7, %v326_v12  ;;  %1097 = vst [vmem:[%s2902_s4 + $0x150] sm:$0xff] %v969_v16  ;;  %v971_v26 = vmax.f32 %v843_v18, 0.0  ;;  %v1543_v27 = vunpack.c.l.bf16 %v1787_v15  ;;  %v1728_v3 = vld [vmem:[%s2898_s0 + $0xe0] sm:$0xff]   ;;  %v1729_v18 = vld [vmem:[%s2898_s0 + $0xe8] sm:$0xff]  }
  0x49   :  { %1098 = vst [vmem:[%s2902_s4 + $0x158] sm:$0xff] %v970_v17  ;;  %v1288_v28 = vunpack.c.h.bf16 %v1724_v10  ;;  %v1544_v29 = vunpack.c.h.bf16 %v1787_v15  ;;  %v462_v32 = vadd.f32 %v1874_v7, %v327_v22  ;;  %v328_v33 = vmul.f32 %v1287_v23, %v1860_v1 }
  0x4a   :  { %v972_v30 = vmax.f32 %v844_v20, 0.0  ;;  %v845_v31 = vadd.f32 %v1539_v13, %v461_v21  ;;  %1099 = vst [vmem:[%s2902_s4 + $0x160] sm:$0xff] %v971_v26  ;;  %v1291_v36 = vunpack.c.l.bf16 %v1725_v24  ;;  %v1547_v37 = vunpack.c.l.bf16 %v1788_v25 }
  0x4b   :  { %v329_v35 = vmul.f32 %v1288_v28, %v1860_v1  ;;  %v1292_v38 = vunpack.c.h.bf16 %v1725_v24  ;;  %v846_v41 = vadd.f32 %v1540_v19, %v462_v32  ;;  %v463_v42 = vadd.f32 %v1874_v7, %v328_v33  ;;  %v1792_v19 = vld [vmem:[%s2901_s3 + $0xe8] sm:$0xff]   ;;  %v1730_v28 = vld [vmem:[%s2898_s0 + $0xf0] sm:$0xff]  }
  0x4c   :  { %1100 = vst [vmem:[%s2902_s4 + $0x168] sm:$0xff] %v972_v30  ;;  %v973_v40 = vmax.f32 %v845_v31, 0.0  ;;  %v1548_v43 = vunpack.c.h.bf16 %v1788_v25  ;;  %v330_v45 = vmul.f32 %v1291_v36, %v1860_v1  ;;  %v1295_v47 = vunpack.c.l.bf16 %v1726_v34  ;;  %v1793_v33 = vld [vmem:[%s2901_s3 + $0xf0] sm:$0xff]  }
  0x4d   :  { %v464_v44 = vadd.f32 %v1874_v7, %v329_v35  ;;  %v331_v46 = vmul.f32 %v1292_v38, %v1860_v1  ;;  %v974_v49 = vmax.f32 %v846_v41, 0.0  ;;  %v847_v50 = vadd.f32 %v1543_v27, %v463_v42  ;;  %v1731_v42 = vld [vmem:[%s2898_s0 + $0xf8] sm:$0xff]  }
  0x4e   :  { %1101 = vst [vmem:[%s2902_s4 + $0x170] sm:$0xff] %v973_v40  ;;  %v1551_v51 = vunpack.c.l.bf16 %v1789_v39  ;;  %v1296_v52 = vunpack.c.h.bf16 %v1726_v34  ;;  %v465_v54 = vadd.f32 %v1874_v7, %v330_v45  ;;  %v332_v56 = vmul.f32 %v1295_v47, %v1860_v1 }
  0x4f   :  { %v848_v53 = vadd.f32 %v1544_v29, %v464_v44  ;;  %v466_v55 = vadd.f32 %v1874_v7, %v331_v46  ;;  %1102 = vst [vmem:[%s2902_s4 + $0x178] sm:$0xff] %v974_v49  ;;  %v975_v58 = vmax.f32 %v847_v50, 0.0  ;;  %v1552_v60 = vunpack.c.h.bf16 %v1789_v39 }
  0x50   :  { %v333_v59 = vmul.f32 %v1296_v52, %v1860_v1  ;;  %v1299_v61 = vunpack.c.l.bf16 %v1727_v48  ;;  %v849_v63 = vadd.f32 %v1547_v37, %v465_v54  ;;  %v467_v2 = vadd.f32 %v1874_v7, %v332_v56 }
  0x51   :  { %v976_v62 = vmax.f32 %v848_v53, 0.0  ;;  %v850_v0 = vadd.f32 %v1548_v43, %v466_v55  ;;  %1103 = vst [vmem:[%s2902_s4 + $0x180] sm:$0xff] %v975_v58  ;;  %v1555_v6 = vunpack.c.l.bf16 %v1790_v57  ;;  %v1300_v8 = vunpack.c.h.bf16 %v1727_v48 }
  0x52   :  { %v468_v4 = vadd.f32 %v1874_v7, %v333_v59  ;;  %v334_v5 = vmul.f32 %v1299_v61, %v1860_v1  ;;  %v977_v10 = vmax.f32 %v849_v63, 0.0  ;;  %v851_v12 = vadd.f32 %v1551_v51, %v467_v2  ;;  %v1794_v51 = vld [vmem:[%s2901_s3 + $0xf8] sm:$0xff]   ;;  %v1795_v2 = vld [vmem:[%s2901_s3 + $0x100] sm:$0xff]  }
  0x53   :  { %1104 = vst [vmem:[%s2902_s4 + $0x188] sm:$0xff] %v976_v62  ;;  %v978_v11 = vmax.f32 %v850_v0, 0.0  ;;  %v1556_v13 = vunpack.c.h.bf16 %v1790_v57  ;;  %v335_v16 = vmul.f32 %v1300_v8, %v1860_v1  ;;  %v1303_v17 = vunpack.c.l.bf16 %v1728_v3 }
  0x54   :  { %v852_v14 = vadd.f32 %v1552_v60, %v468_v4  ;;  %v469_v15 = vadd.f32 %v1874_v7, %v334_v5  ;;  %1105 = vst [vmem:[%s2902_s4 + $0x190] sm:$0xff] %v977_v10  ;;  %v979_v20 = vmax.f32 %v851_v12, 0.0  ;;  %v1559_v21 = vunpack.c.l.bf16 %v1791_v9  ;;  %v1732_v60 = vld [vmem:[%s2898_s0 + $0x100] sm:$0xff]   ;;  %v1733_v12 = vld [vmem:[%s2898_s0 + $0x108] sm:$0xff]  }
  0x55   :  { %1106 = vst [vmem:[%s2902_s4 + $0x198] sm:$0xff] %v978_v11  ;;  %v1304_v22 = vunpack.c.h.bf16 %v1728_v3  ;;  %v1560_v23 = vunpack.c.h.bf16 %v1791_v9  ;;  %v470_v26 = vadd.f32 %v1874_v7, %v335_v16  ;;  %v336_v27 = vmul.f32 %v1303_v17, %v1860_v1 }
  0x56   :  { %v980_v24 = vmax.f32 %v852_v14, 0.0  ;;  %v853_v25 = vadd.f32 %v1555_v6, %v469_v15  ;;  %1107 = vst [vmem:[%s2902_s4 + $0x1a0] sm:$0xff] %v979_v20  ;;  %v1307_v30 = vunpack.c.l.bf16 %v1729_v18  ;;  %v1563_v31 = vunpack.c.l.bf16 %v1792_v19  ;;  %v2379_v20 = vld [vmem:[%s2899_s1] ss:$0 sm:$0xff] }
  0x57   :  { %v337_v29 = vmul.f32 %v1304_v22, %v1860_v1  ;;  %v1308_v32 = vunpack.c.h.bf16 %v1729_v18  ;;  %v854_v35 = vadd.f32 %v1556_v13, %v470_v26  ;;  %v471_v36 = vadd.f32 %v1874_v7, %v336_v27  ;;  %v1796_v13 = vld [vmem:[%s2901_s3 + $0x108] sm:$0xff]   ;;  %v1734_v22 = vld [vmem:[%s2898_s0 + $0x110] sm:$0xff]  }
  0x58   :  { %1108 = vst [vmem:[%s2902_s4 + $0x1a8] sm:$0xff] %v980_v24  ;;  %v981_v34 = vmax.f32 %v853_v25, 0.0  ;;  %v1564_v37 = vunpack.c.h.bf16 %v1792_v19  ;;  %v338_v39 = vmul.f32 %v1307_v30, %v1860_v1  ;;  %v1311_v41 = vunpack.c.l.bf16 %v1730_v28  ;;  %v1797_v26 = vld [vmem:[%s2901_s3 + $0x110] sm:$0xff]  }
  0x59   :  { %v472_v38 = vadd.f32 %v1874_v7, %v337_v29  ;;  %v339_v40 = vmul.f32 %v1308_v32, %v1860_v1  ;;  %v982_v43 = vmax.f32 %v854_v35, 0.0  ;;  %v855_v44 = vadd.f32 %v1559_v21, %v471_v36  ;;  %v2398_v29 = vld [vmem:[%s2900_s2] ss:$0 sm:$0xff]  ;;  %v1735_v36 = vld [vmem:[%s2898_s0 + $0x118] sm:$0xff]  }
  0x5a   :  { %1109 = vst [vmem:[%s2902_s4 + $0x1b0] sm:$0xff] %v981_v34  ;;  %v1567_v45 = vunpack.c.l.bf16 %v1793_v33  ;;  %v1312_v46 = vunpack.c.h.bf16 %v1730_v28  ;;  %v473_v48 = vadd.f32 %v1874_v7, %v338_v39  ;;  %v340_v50 = vmul.f32 %v1311_v41, %v1860_v1 }
  0x5b   :  { %v856_v47 = vadd.f32 %v1560_v23, %v472_v38  ;;  %v474_v49 = vadd.f32 %v1874_v7, %v339_v40  ;;  %1110 = vst [vmem:[%s2902_s4 + $0x1b8] sm:$0xff] %v982_v43  ;;  %v983_v52 = vmax.f32 %v855_v44, 0.0  ;;  %v1568_v54 = vunpack.c.h.bf16 %v1793_v33 }
  0x5c   :  { %v341_v53 = vmul.f32 %v1312_v46, %v1860_v1  ;;  %v1315_v55 = vunpack.c.l.bf16 %v1731_v42  ;;  %v857_v57 = vadd.f32 %v1563_v31, %v473_v48  ;;  %v475_v59 = vadd.f32 %v1874_v7, %v340_v50 }
  0x5d   :  { %v984_v56 = vmax.f32 %v856_v47, 0.0  ;;  %v858_v58 = vadd.f32 %v1564_v37, %v474_v49  ;;  %1111 = vst [vmem:[%s2902_s4 + $0x1c0] sm:$0xff] %v983_v52  ;;  %v1571_v63 = vunpack.c.l.bf16 %v1794_v51  ;;  %v1316_v0 = vunpack.c.h.bf16 %v1731_v42 }
  0x5e   :  { %v476_v61 = vadd.f32 %v1874_v7, %v341_v53  ;;  %v342_v62 = vmul.f32 %v1315_v55, %v1860_v1  ;;  %v985_v3 = vmax.f32 %v857_v57, 0.0  ;;  %v859_v5 = vadd.f32 %v1567_v45, %v475_v59  ;;  %v1798_v45 = vld [vmem:[%s2901_s3 + $0x118] sm:$0xff]   ;;  %v1799_v59 = vld [vmem:[%s2901_s3 + $0x120] sm:$0xff]  }
  0x5f   :  { %1112 = vst [vmem:[%s2902_s4 + $0x1c8] sm:$0xff] %v984_v56  ;;  %v986_v4 = vmax.f32 %v858_v58, 0.0  ;;  %v1572_v6 = vunpack.c.h.bf16 %v1794_v51  ;;  %v343_v10 = vmul.f32 %v1316_v0, %v1860_v1  ;;  %v1319_v11 = vunpack.c.l.bf16 %v1732_v60 }
  0x60   :  { %v860_v8 = vadd.f32 %v1568_v54, %v476_v61  ;;  %v477_v9 = vadd.f32 %v1874_v7, %v342_v62  ;;  %1113 = vst [vmem:[%s2902_s4 + $0x1d0] sm:$0xff] %v985_v3  ;;  %v987_v14 = vmax.f32 %v859_v5, 0.0  ;;  %v1575_v15 = vunpack.c.l.bf16 %v1795_v2  ;;  %v1736_v54 = vld [vmem:[%s2898_s0 + $0x120] sm:$0xff]   ;;  %v1737_v5 = vld [vmem:[%s2898_s0 + $0x128] sm:$0xff]  }
  0x61   :  { %1114 = vst [vmem:[%s2902_s4 + $0x1d8] sm:$0xff] %v986_v4  ;;  %v1320_v1 = vunpack.c.h.bf16 %v1732_v60  ;;  %v1576_v16 = vunpack.c.h.bf16 %v1795_v2  ;;  %v478_v19 = vadd.f32 %v1874_v7, %v343_v10  ;;  %v344_v21 = vmul.f32 %v2379_v20, %v1319_v11 }
  0x62   :  { %v988_v17 = vmax.f32 %v860_v8, 0.0  ;;  %v861_v18 = vadd.f32 %v1571_v63, %v477_v9  ;;  %1115 = vst [vmem:[%s2902_s4 + $0x1e0] sm:$0xff] %v987_v14  ;;  %v1323_v24 = vunpack.c.l.bf16 %v1733_v12  ;;  %v1579_v25 = vunpack.c.l.bf16 %v1796_v13 }
  0x63   :  { %v345_v23 = vmul.f32 %v2379_v20, %v1320_v1  ;;  %v1324_v7 = vunpack.c.h.bf16 %v1733_v12  ;;  %v862_v28 = vadd.f32 %v1572_v6, %v478_v19  ;;  %v479_v30 = vadd.f32 %v2398_v29, %v344_v21  ;;  %v1800_v6 = vld [vmem:[%s2901_s3 + $0x128] sm:$0xff]   ;;  %v1738_v1 = vld [vmem:[%s2898_s0 + $0x130] sm:$0xff]  }
  0x64   :  { %1116 = vst [vmem:[%s2902_s4 + $0x1e8] sm:$0xff] %v988_v17  ;;  %v989_v27 = vmax.f32 %v861_v18, 0.0  ;;  %v1580_v31 = vunpack.c.h.bf16 %v1796_v13  ;;  %v346_v33 = vmul.f32 %v2379_v20, %v1323_v24  ;;  %v1327_v35 = vunpack.c.l.bf16 %v1734_v22  ;;  %v1801_v21 = vld [vmem:[%s2901_s3 + $0x130] sm:$0xff]  }
  0x65   :  { %v480_v32 = vadd.f32 %v2398_v29, %v345_v23  ;;  %v347_v34 = vmul.f32 %v2379_v20, %v1324_v7  ;;  %v990_v37 = vmax.f32 %v862_v28, 0.0  ;;  %v863_v38 = vadd.f32 %v1575_v15, %v479_v30  ;;  %v1739_v30 = vld [vmem:[%s2898_s0 + $0x138] sm:$0xff]  }
  0x66   :  { %1117 = vst [vmem:[%s2902_s4 + $0x1f0] sm:$0xff] %v989_v27  ;;  %v1583_v39 = vunpack.c.l.bf16 %v1797_v26  ;;  %v1328_v40 = vunpack.c.h.bf16 %v1734_v22  ;;  %v481_v42 = vadd.f32 %v2398_v29, %v346_v33  ;;  %v348_v44 = vmul.f32 %v2379_v20, %v1327_v35 }
  0x67   :  { %v864_v41 = vadd.f32 %v1576_v16, %v480_v32  ;;  %v482_v43 = vadd.f32 %v2398_v29, %v347_v34  ;;  %1118 = vst [vmem:[%s2902_s4 + $0x1f8] sm:$0xff] %v990_v37  ;;  %v991_v46 = vmax.f32 %v863_v38, 0.0  ;;  %v1584_v48 = vunpack.c.h.bf16 %v1797_v26 }
  0x68   :  { %v349_v47 = vmul.f32 %v2379_v20, %v1328_v40  ;;  %v1331_v49 = vunpack.c.l.bf16 %v1735_v36  ;;  %v865_v51 = vadd.f32 %v1579_v25, %v481_v42  ;;  %v483_v53 = vadd.f32 %v2398_v29, %v348_v44 }
  0x69   :  { %v992_v50 = vmax.f32 %v864_v41, 0.0  ;;  %v866_v52 = vadd.f32 %v1580_v31, %v482_v43  ;;  %1119 = vst [vmem:[%s2902_s4 + $0x200] sm:$0xff] %v991_v46  ;;  %v1587_v57 = vunpack.c.l.bf16 %v1798_v45  ;;  %v1332_v58 = vunpack.c.h.bf16 %v1735_v36 }
  0x6a   :  { %v484_v55 = vadd.f32 %v2398_v29, %v349_v47  ;;  %v350_v56 = vmul.f32 %v2379_v20, %v1331_v49  ;;  %v993_v60 = vmax.f32 %v865_v51, 0.0  ;;  %v867_v62 = vadd.f32 %v1583_v39, %v483_v53  ;;  %v1802_v39 = vld [vmem:[%s2901_s3 + $0x138] sm:$0xff]   ;;  %v1803_v53 = vld [vmem:[%s2901_s3 + $0x140] sm:$0xff]  }
  0x6b   :  { %1120 = vst [vmem:[%s2902_s4 + $0x208] sm:$0xff] %v992_v50  ;;  %v994_v61 = vmax.f32 %v866_v52, 0.0  ;;  %v1588_v63 = vunpack.c.h.bf16 %v1798_v45  ;;  %v351_v3 = vmul.f32 %v2379_v20, %v1332_v58  ;;  %v1335_v4 = vunpack.c.l.bf16 %v1736_v54 }
  0x6c   :  { %v868_v0 = vadd.f32 %v1584_v48, %v484_v55  ;;  %v485_v2 = vadd.f32 %v2398_v29, %v350_v56  ;;  %1121 = vst [vmem:[%s2902_s4 + $0x210] sm:$0xff] %v993_v60  ;;  %v995_v8 = vmax.f32 %v867_v62, 0.0  ;;  %v1591_v9 = vunpack.c.l.bf16 %v1799_v59  ;;  %v1740_v48 = vld [vmem:[%s2898_s0 + $0x140] sm:$0xff]   ;;  %v1741_v62 = vld [vmem:[%s2898_s0 + $0x148] sm:$0xff]  }
  0x6d   :  { %1122 = vst [vmem:[%s2902_s4 + $0x218] sm:$0xff] %v994_v61  ;;  %v1336_v10 = vunpack.c.h.bf16 %v1736_v54  ;;  %v1592_v11 = vunpack.c.h.bf16 %v1799_v59  ;;  %v486_v14 = vadd.f32 %v2398_v29, %v351_v3  ;;  %v352_v15 = vmul.f32 %v2379_v20, %v1335_v4 }
  0x6e   :  { %v996_v12 = vmax.f32 %v868_v0, 0.0  ;;  %v869_v13 = vadd.f32 %v1587_v57, %v485_v2  ;;  %1123 = vst [vmem:[%s2902_s4 + $0x220] sm:$0xff] %v995_v8  ;;  %v1339_v17 = vunpack.c.l.bf16 %v1737_v5  ;;  %v1595_v18 = vunpack.c.l.bf16 %v1800_v6 }
  0x6f   :  { %v353_v16 = vmul.f32 %v2379_v20, %v1336_v10  ;;  %v1340_v19 = vunpack.c.h.bf16 %v1737_v5  ;;  %v870_v23 = vadd.f32 %v1588_v63, %v486_v14  ;;  %v487_v24 = vadd.f32 %v2398_v29, %v352_v15  ;;  %v1804_v63 = vld [vmem:[%s2901_s3 + $0x148] sm:$0xff]   ;;  %v1742_v10 = vld [vmem:[%s2898_s0 + $0x150] sm:$0xff]  }
  0x70   :  { %1124 = vst [vmem:[%s2902_s4 + $0x228] sm:$0xff] %v996_v12  ;;  %v997_v22 = vmax.f32 %v869_v13, 0.0  ;;  %v1596_v25 = vunpack.c.h.bf16 %v1800_v6  ;;  %v354_v26 = vmul.f32 %v2379_v20, %v1339_v17  ;;  %v1343_v28 = vunpack.c.l.bf16 %v1738_v1  ;;  %v1805_v15 = vld [vmem:[%s2901_s3 + $0x150] sm:$0xff]  }
  0x71   :  { %v488_v7 = vadd.f32 %v2398_v29, %v353_v16  ;;  %v355_v27 = vmul.f32 %v2379_v20, %v1340_v19  ;;  %v998_v31 = vmax.f32 %v870_v23, 0.0  ;;  %v871_v32 = vadd.f32 %v1591_v9, %v487_v24  ;;  %v1743_v24 = vld [vmem:[%s2898_s0 + $0x158] sm:$0xff]  }
  0x72   :  { %1125 = vst [vmem:[%s2902_s4 + $0x230] sm:$0xff] %v997_v22  ;;  %v1599_v33 = vunpack.c.l.bf16 %v1801_v21  ;;  %v1344_v34 = vunpack.c.h.bf16 %v1738_v1  ;;  %v489_v36 = vadd.f32 %v2398_v29, %v354_v26  ;;  %v356_v38 = vmul.f32 %v2379_v20, %v1343_v28 }
  0x73   :  { %v872_v35 = vadd.f32 %v1592_v11, %v488_v7  ;;  %v490_v37 = vadd.f32 %v2398_v29, %v355_v27  ;;  %1126 = vst [vmem:[%s2902_s4 + $0x238] sm:$0xff] %v998_v31  ;;  %v999_v40 = vmax.f32 %v871_v32, 0.0  ;;  %v1600_v42 = vunpack.c.h.bf16 %v1801_v21 }
  0x74   :  { %v357_v41 = vmul.f32 %v2379_v20, %v1344_v34  ;;  %v1347_v43 = vunpack.c.l.bf16 %v1739_v30  ;;  %v873_v45 = vadd.f32 %v1595_v18, %v489_v36  ;;  %v491_v47 = vadd.f32 %v2398_v29, %v356_v38 }
  0x75   :  { %v1000_v44 = vmax.f32 %v872_v35, 0.0  ;;  %v874_v46 = vadd.f32 %v1596_v25, %v490_v37  ;;  %1127 = vst [vmem:[%s2902_s4 + $0x240] sm:$0xff] %v999_v40  ;;  %v1603_v51 = vunpack.c.l.bf16 %v1802_v39  ;;  %v1348_v52 = vunpack.c.h.bf16 %v1739_v30 }
  0x76   :  { %v492_v49 = vadd.f32 %v2398_v29, %v357_v41  ;;  %v358_v50 = vmul.f32 %v2379_v20, %v1347_v43  ;;  %v1001_v54 = vmax.f32 %v873_v45, 0.0  ;;  %v875_v56 = vadd.f32 %v1599_v33, %v491_v47  ;;  %v1806_v33 = vld [vmem:[%s2901_s3 + $0x158] sm:$0xff]   ;;  %v1807_v47 = vld [vmem:[%s2901_s3 + $0x160] sm:$0xff]  }
  0x77   :  { %1128 = vst [vmem:[%s2902_s4 + $0x248] sm:$0xff] %v1000_v44  ;;  %v1002_v55 = vmax.f32 %v874_v46, 0.0  ;;  %v1604_v57 = vunpack.c.h.bf16 %v1802_v39  ;;  %v359_v60 = vmul.f32 %v2379_v20, %v1348_v52  ;;  %v1351_v61 = vunpack.c.l.bf16 %v1740_v48 }
  0x78   :  { %v876_v58 = vadd.f32 %v1600_v42, %v492_v49  ;;  %v493_v59 = vadd.f32 %v2398_v29, %v358_v50  ;;  %1129 = vst [vmem:[%s2902_s4 + $0x250] sm:$0xff] %v1001_v54  ;;  %v1003_v0 = vmax.f32 %v875_v56, 0.0  ;;  %v1607_v2 = vunpack.c.l.bf16 %v1803_v53  ;;  %v1744_v42 = vld [vmem:[%s2898_s0 + $0x160] sm:$0xff]   ;;  %v1745_v56 = vld [vmem:[%s2898_s0 + $0x168] sm:$0xff]  }
  0x79   :  { %1130 = vst [vmem:[%s2902_s4 + $0x258] sm:$0xff] %v1002_v55  ;;  %v1352_v3 = vunpack.c.h.bf16 %v1740_v48  ;;  %v1608_v4 = vunpack.c.h.bf16 %v1803_v53  ;;  %v494_v8 = vadd.f32 %v2398_v29, %v359_v60  ;;  %v360_v9 = vmul.f32 %v2379_v20, %v1351_v61 }
  0x7a   :  { %v1004_v5 = vmax.f32 %v876_v58, 0.0  ;;  %v877_v6 = vadd.f32 %v1603_v51, %v493_v59  ;;  %1131 = vst [vmem:[%s2902_s4 + $0x260] sm:$0xff] %v1003_v0  ;;  %v1355_v12 = vunpack.c.l.bf16 %v1741_v62  ;;  %v1611_v13 = vunpack.c.l.bf16 %v1804_v63 }
  0x7b   :  { %v361_v11 = vmul.f32 %v2379_v20, %v1352_v3  ;;  %v1356_v14 = vunpack.c.h.bf16 %v1741_v62  ;;  %v878_v16 = vadd.f32 %v1604_v57, %v494_v8  ;;  %v495_v17 = vadd.f32 %v2398_v29, %v360_v9  ;;  %v1808_v57 = vld [vmem:[%s2901_s3 + $0x168] sm:$0xff]   ;;  %v1746_v3 = vld [vmem:[%s2898_s0 + $0x170] sm:$0xff]  }
  0x7c   :  { %1132 = vst [vmem:[%s2902_s4 + $0x268] sm:$0xff] %v1004_v5  ;;  %v1005_v1 = vmax.f32 %v877_v6, 0.0  ;;  %v1612_v18 = vunpack.c.h.bf16 %v1804_v63  ;;  %v362_v21 = vmul.f32 %v2379_v20, %v1355_v12  ;;  %v1359_v23 = vunpack.c.l.bf16 %v1742_v10  ;;  %v1809_v9 = vld [vmem:[%s2901_s3 + $0x170] sm:$0xff]  }
  0x7d   :  { %v496_v19 = vadd.f32 %v2398_v29, %v361_v11  ;;  %v363_v22 = vmul.f32 %v2379_v20, %v1356_v14  ;;  %v1006_v25 = vmax.f32 %v878_v16, 0.0  ;;  %v879_v7 = vadd.f32 %v1607_v2, %v495_v17  ;;  %v1747_v17 = vld [vmem:[%s2898_s0 + $0x178] sm:$0xff]  }
  0x7e   :  { %1133 = vst [vmem:[%s2902_s4 + $0x270] sm:$0xff] %v1005_v1  ;;  %v1615_v26 = vunpack.c.l.bf16 %v1805_v15  ;;  %v1360_v27 = vunpack.c.h.bf16 %v1742_v10  ;;  %v497_v30 = vadd.f32 %v2398_v29, %v362_v21  ;;  %v364_v32 = vmul.f32 %v2379_v20, %v1359_v23 }
  0x7f   :  { %v880_v28 = vadd.f32 %v1608_v4, %v496_v19  ;;  %v498_v31 = vadd.f32 %v2398_v29, %v363_v22  ;;  %1134 = vst [vmem:[%s2902_s4 + $0x278] sm:$0xff] %v1006_v25  ;;  %v1007_v34 = vmax.f32 %v879_v7, 0.0  ;;  %v1616_v36 = vunpack.c.h.bf16 %v1805_v15 }
  0x80   :  { %v365_v35 = vmul.f32 %v2379_v20, %v1360_v27  ;;  %v1363_v37 = vunpack.c.l.bf16 %v1743_v24  ;;  %v881_v39 = vadd.f32 %v1611_v13, %v497_v30  ;;  %v499_v41 = vadd.f32 %v2398_v29, %v364_v32 }
  0x81   :  { %v1008_v38 = vmax.f32 %v880_v28, 0.0  ;;  %v882_v40 = vadd.f32 %v1612_v18, %v498_v31  ;;  %1135 = vst [vmem:[%s2902_s4 + $0x280] sm:$0xff] %v1007_v34  ;;  %v1619_v45 = vunpack.c.l.bf16 %v1806_v33  ;;  %v1364_v46 = vunpack.c.h.bf16 %v1743_v24 }
  0x82   :  { %v500_v43 = vadd.f32 %v2398_v29, %v365_v35  ;;  %v366_v44 = vmul.f32 %v2379_v20, %v1363_v37  ;;  %v1009_v48 = vmax.f32 %v881_v39, 0.0  ;;  %v883_v50 = vadd.f32 %v1615_v26, %v499_v41  ;;  %v1810_v26 = vld [vmem:[%s2901_s3 + $0x178] sm:$0xff]   ;;  %v1811_v41 = vld [vmem:[%s2901_s3 + $0x180] sm:$0xff]  }
  0x83   :  { %1136 = vst [vmem:[%s2902_s4 + $0x288] sm:$0xff] %v1008_v38  ;;  %v1010_v49 = vmax.f32 %v882_v40, 0.0  ;;  %v1620_v51 = vunpack.c.h.bf16 %v1806_v33  ;;  %v367_v54 = vmul.f32 %v2379_v20, %v1364_v46  ;;  %v1367_v55 = vunpack.c.l.bf16 %v1744_v42 }
  0x84   :  { %v884_v52 = vadd.f32 %v1616_v36, %v500_v43  ;;  %v501_v53 = vadd.f32 %v2398_v29, %v366_v44  ;;  %1137 = vst [vmem:[%s2902_s4 + $0x290] sm:$0xff] %v1009_v48  ;;  %v1011_v58 = vmax.f32 %v883_v50, 0.0  ;;  %v1623_v59 = vunpack.c.l.bf16 %v1807_v47  ;;  %v1748_v36 = vld [vmem:[%s2898_s0 + $0x180] sm:$0xff]   ;;  %v1749_v50 = vld [vmem:[%s2898_s0 + $0x188] sm:$0xff]  }
  0x85   :  { %1138 = vst [vmem:[%s2902_s4 + $0x298] sm:$0xff] %v1010_v49  ;;  %v1368_v60 = vunpack.c.h.bf16 %v1744_v42  ;;  %v1624_v61 = vunpack.c.h.bf16 %v1807_v47  ;;  %v502_v0 = vadd.f32 %v2398_v29, %v367_v54  ;;  %v368_v2 = vmul.f32 %v2379_v20, %v1367_v55 }
  0x86   :  { %v1012_v62 = vmax.f32 %v884_v52, 0.0  ;;  %v885_v63 = vadd.f32 %v1619_v45, %v501_v53  ;;  %1139 = vst [vmem:[%s2902_s4 + $0x2a0] sm:$0xff] %v1011_v58  ;;  %v1371_v5 = vunpack.c.l.bf16 %v1745_v56  ;;  %v1627_v6 = vunpack.c.l.bf16 %v1808_v57 }
  0x87   :  { %v369_v4 = vmul.f32 %v2379_v20, %v1368_v60  ;;  %v1372_v8 = vunpack.c.h.bf16 %v1745_v56  ;;  %v886_v11 = vadd.f32 %v1620_v51, %v502_v0  ;;  %v503_v12 = vadd.f32 %v2398_v29, %v368_v2  ;;  %v1812_v51 = vld [vmem:[%s2901_s3 + $0x188] sm:$0xff]   ;;  %v1750_v60 = vld [vmem:[%s2898_s0 + $0x190] sm:$0xff]  }
  0x88   :  { %1140 = vst [vmem:[%s2902_s4 + $0x2a8] sm:$0xff] %v1012_v62  ;;  %v1013_v10 = vmax.f32 %v885_v63, 0.0  ;;  %v1628_v13 = vunpack.c.h.bf16 %v1808_v57  ;;  %v370_v15 = vmul.f32 %v2379_v20, %v1371_v5  ;;  %v1375_v16 = vunpack.c.l.bf16 %v1746_v3  ;;  %v1813_v2 = vld [vmem:[%s2901_s3 + $0x190] sm:$0xff]  }
  0x89   :  { %v504_v14 = vadd.f32 %v2398_v29, %v369_v4  ;;  %v371_v1 = vmul.f32 %v2379_v20, %v1372_v8  ;;  %v1014_v18 = vmax.f32 %v886_v11, 0.0  ;;  %v887_v19 = vadd.f32 %v1623_v59, %v503_v12  ;;  %v1751_v12 = vld [vmem:[%s2898_s0 + $0x198] sm:$0xff]  }
  0x8a   :  { %1141 = vst [vmem:[%s2902_s4 + $0x2b0] sm:$0xff] %v1013_v10  ;;  %v1631_v21 = vunpack.c.l.bf16 %v1809_v9  ;;  %v1376_v22 = vunpack.c.h.bf16 %v1746_v3  ;;  %v505_v24 = vadd.f32 %v2398_v29, %v370_v15  ;;  %v372_v7 = vmul.f32 %v2379_v20, %v1375_v16 }
  0x8b   :  { %v888_v23 = vadd.f32 %v1624_v61, %v504_v14  ;;  %v506_v25 = vadd.f32 %v2398_v29, %v371_v1  ;;  %1142 = vst [vmem:[%s2902_s4 + $0x2b8] sm:$0xff] %v1014_v18  ;;  %v1015_v27 = vmax.f32 %v887_v19, 0.0  ;;  %v1632_v30 = vunpack.c.h.bf16 %v1809_v9 }
  0x8c   :  { %v373_v28 = vmul.f32 %v2379_v20, %v1376_v22  ;;  %v1379_v31 = vunpack.c.l.bf16 %v1747_v17  ;;  %v889_v33 = vadd.f32 %v1627_v6, %v505_v24  ;;  %v507_v35 = vadd.f32 %v2398_v29, %v372_v7 }
  0x8d   :  { %v1016_v32 = vmax.f32 %v888_v23, 0.0  ;;  %v890_v34 = vadd.f32 %v1628_v13, %v506_v25  ;;  %1143 = vst [vmem:[%s2902_s4 + $0x2c0] sm:$0xff] %v1015_v27  ;;  %v1635_v39 = vunpack.c.l.bf16 %v1810_v26  ;;  %v1380_v40 = vunpack.c.h.bf16 %v1747_v17 }
  0x8e   :  { %v508_v37 = vadd.f32 %v2398_v29, %v373_v28  ;;  %v374_v38 = vmul.f32 %v2379_v20, %v1379_v31  ;;  %v1017_v42 = vmax.f32 %v889_v33, 0.0  ;;  %v891_v44 = vadd.f32 %v1631_v21, %v507_v35  ;;  %v1814_v21 = vld [vmem:[%s2901_s3 + $0x198] sm:$0xff]   ;;  %v1815_v35 = vld [vmem:[%s2901_s3 + $0x1a0] sm:$0xff]  }
  0x8f   :  { %1144 = vst [vmem:[%s2902_s4 + $0x2c8] sm:$0xff] %v1016_v32  ;;  %v1018_v43 = vmax.f32 %v890_v34, 0.0  ;;  %v1636_v45 = vunpack.c.h.bf16 %v1810_v26  ;;  %v375_v48 = vmul.f32 %v2379_v20, %v1380_v40  ;;  %v1383_v49 = vunpack.c.l.bf16 %v1748_v36 }
  0x90   :  { %v892_v46 = vadd.f32 %v1632_v30, %v508_v37  ;;  %v509_v47 = vadd.f32 %v2398_v29, %v374_v38  ;;  %1145 = vst [vmem:[%s2902_s4 + $0x2d0] sm:$0xff] %v1017_v42  ;;  %v1019_v52 = vmax.f32 %v891_v44, 0.0  ;;  %v1639_v53 = vunpack.c.l.bf16 %v1811_v41  ;;  %v1752_v30 = vld [vmem:[%s2898_s0 + $0x1a0] sm:$0xff]   ;;  %v1753_v44 = vld [vmem:[%s2898_s0 + $0x1a8] sm:$0xff]  }
  0x91   :  { %1146 = vst [vmem:[%s2902_s4 + $0x2d8] sm:$0xff] %v1018_v43  ;;  %v1384_v54 = vunpack.c.h.bf16 %v1748_v36  ;;  %v1640_v55 = vunpack.c.h.bf16 %v1811_v41  ;;  %v510_v58 = vadd.f32 %v2398_v29, %v375_v48  ;;  %v376_v59 = vmul.f32 %v2379_v20, %v1383_v49 }
  0x92   :  { %v1020_v56 = vmax.f32 %v892_v46, 0.0  ;;  %v893_v57 = vadd.f32 %v1635_v39, %v509_v47  ;;  %1147 = vst [vmem:[%s2902_s4 + $0x2e0] sm:$0xff] %v1019_v52  ;;  %v1387_v62 = vunpack.c.l.bf16 %v1749_v50  ;;  %v1643_v63 = vunpack.c.l.bf16 %v1812_v51 }
  0x93   :  { %v377_v61 = vmul.f32 %v2379_v20, %v1384_v54  ;;  %v1388_v0 = vunpack.c.h.bf16 %v1749_v50  ;;  %v894_v4 = vadd.f32 %v1636_v45, %v510_v58  ;;  %v511_v5 = vadd.f32 %v2398_v29, %v376_v59  ;;  %v1816_v45 = vld [vmem:[%s2901_s3 + $0x1a8] sm:$0xff]   ;;  %v1754_v54 = vld [vmem:[%s2898_s0 + $0x1b0] sm:$0xff]  }
  0x94   :  { %1148 = vst [vmem:[%s2902_s4 + $0x2e8] sm:$0xff] %v1020_v56  ;;  %v1021_v3 = vmax.f32 %v893_v57, 0.0  ;;  %v1644_v6 = vunpack.c.h.bf16 %v1812_v51  ;;  %v378_v9 = vmul.f32 %v2379_v20, %v1387_v62  ;;  %v1391_v11 = vunpack.c.l.bf16 %v1750_v60  ;;  %v1817_v59 = vld [vmem:[%s2901_s3 + $0x1b0] sm:$0xff]  }
  0x95   :  { %v512_v8 = vadd.f32 %v2398_v29, %v377_v61  ;;  %v379_v10 = vmul.f32 %v2379_v20, %v1388_v0  ;;  %v1022_v13 = vmax.f32 %v894_v4, 0.0  ;;  %v895_v14 = vadd.f32 %v1639_v53, %v511_v5  ;;  %v1755_v5 = vld [vmem:[%s2898_s0 + $0x1b8] sm:$0xff]  }
  0x96   :  { %1149 = vst [vmem:[%s2902_s4 + $0x2f0] sm:$0xff] %v1021_v3  ;;  %v1647_v15 = vunpack.c.l.bf16 %v1813_v2  ;;  %v1392_v1 = vunpack.c.h.bf16 %v1750_v60  ;;  %v513_v17 = vadd.f32 %v2398_v29, %v378_v9  ;;  %v380_v19 = vmul.f32 %v2379_v20, %v1391_v11 }
  0x97   :  { %v896_v16 = vadd.f32 %v1640_v55, %v512_v8  ;;  %v514_v18 = vadd.f32 %v2398_v29, %v379_v10  ;;  %1150 = vst [vmem:[%s2902_s4 + $0x2f8] sm:$0xff] %v1022_v13  ;;  %v1023_v22 = vmax.f32 %v895_v14, 0.0  ;;  %v1648_v24 = vunpack.c.h.bf16 %v1813_v2 }
  0x98   :  { %v381_v23 = vmul.f32 %v2379_v20, %v1392_v1  ;;  %v1395_v25 = vunpack.c.l.bf16 %v1751_v12  ;;  %v897_v26 = vadd.f32 %v1643_v63, %v513_v17  ;;  %v515_v28 = vadd.f32 %v2398_v29, %v380_v19 }
  0x99   :  { %v1024_v7 = vmax.f32 %v896_v16, 0.0  ;;  %v898_v27 = vadd.f32 %v1644_v6, %v514_v18  ;;  %1151 = vst [vmem:[%s2902_s4 + $0x300] sm:$0xff] %v1023_v22  ;;  %v1651_v33 = vunpack.c.l.bf16 %v1814_v21  ;;  %v1396_v34 = vunpack.c.h.bf16 %v1751_v12 }
  0x9a   :  { %v516_v31 = vadd.f32 %v2398_v29, %v381_v23  ;;  %v382_v32 = vmul.f32 %v2379_v20, %v1395_v25  ;;  %v1025_v36 = vmax.f32 %v897_v26, 0.0  ;;  %v899_v38 = vadd.f32 %v1647_v15, %v515_v28  ;;  %v1818_v15 = vld [vmem:[%s2901_s3 + $0x1b8] sm:$0xff]   ;;  %v1819_v28 = vld [vmem:[%s2901_s3 + $0x1c0] sm:$0xff]  }
  0x9b   :  { %1152 = vst [vmem:[%s2902_s4 + $0x308] sm:$0xff] %v1024_v7  ;;  %v1026_v37 = vmax.f32 %v898_v27, 0.0  ;;  %v1652_v39 = vunpack.c.h.bf16 %v1814_v21  ;;  %v383_v42 = vmul.f32 %v2379_v20, %v1396_v34  ;;  %v1399_v43 = vunpack.c.l.bf16 %v1752_v30 }
  0x9c   :  { %v900_v40 = vadd.f32 %v1648_v24, %v516_v31  ;;  %v517_v41 = vadd.f32 %v2398_v29, %v382_v32  ;;  %1153 = vst [vmem:[%s2902_s4 + $0x310] sm:$0xff] %v1025_v36  ;;  %v1027_v46 = vmax.f32 %v899_v38, 0.0  ;;  %v1655_v47 = vunpack.c.l.bf16 %v1815_v35  ;;  %v1756_v24 = vld [vmem:[%s2898_s0 + $0x1c0] sm:$0xff]   ;;  %v1757_v38 = vld [vmem:[%s2898_s0 + $0x1c8] sm:$0xff]  }
  0x9d   :  { %1154 = vst [vmem:[%s2902_s4 + $0x318] sm:$0xff] %v1026_v37  ;;  %v1400_v48 = vunpack.c.h.bf16 %v1752_v30  ;;  %v1656_v49 = vunpack.c.h.bf16 %v1815_v35  ;;  %v518_v52 = vadd.f32 %v2398_v29, %v383_v42  ;;  %v384_v53 = vmul.f32 %v2379_v20, %v1399_v43 }
  0x9e   :  { %v1028_v50 = vmax.f32 %v900_v40, 0.0  ;;  %v901_v51 = vadd.f32 %v1651_v33, %v517_v41  ;;  %1155 = vst [vmem:[%s2902_s4 + $0x320] sm:$0xff] %v1027_v46  ;;  %v1403_v56 = vunpack.c.l.bf16 %v1753_v44  ;;  %v1659_v57 = vunpack.c.l.bf16 %v1816_v45 }
  0x9f   :  { %v385_v55 = vmul.f32 %v2379_v20, %v1400_v48  ;;  %v1404_v58 = vunpack.c.h.bf16 %v1753_v44  ;;  %v902_v61 = vadd.f32 %v1652_v39, %v518_v52  ;;  %v519_v62 = vadd.f32 %v2398_v29, %v384_v53  ;;  %v1820_v39 = vld [vmem:[%s2901_s3 + $0x1c8] sm:$0xff]   ;;  %v1758_v48 = vld [vmem:[%s2898_s0 + $0x1d0] sm:$0xff]  }
  0xa0   :  { %1156 = vst [vmem:[%s2902_s4 + $0x328] sm:$0xff] %v1028_v50  ;;  %v1029_v60 = vmax.f32 %v901_v51, 0.0  ;;  %v1660_v63 = vunpack.c.h.bf16 %v1816_v45  ;;  %v386_v2 = vmul.f32 %v2379_v20, %v1403_v56  ;;  %v1407_v4 = vunpack.c.l.bf16 %v1754_v54  ;;  %v1821_v53 = vld [vmem:[%s2901_s3 + $0x1d0] sm:$0xff]  }
  0xa1   :  { %v520_v0 = vadd.f32 %v2398_v29, %v385_v55  ;;  %v387_v3 = vmul.f32 %v2379_v20, %v1404_v58  ;;  %v1030_v6 = vmax.f32 %v902_v61, 0.0  ;;  %v903_v8 = vadd.f32 %v1655_v47, %v519_v62  ;;  %v1759_v62 = vld [vmem:[%s2898_s0 + $0x1d8] sm:$0xff]  }
  0xa2   :  { %1157 = vst [vmem:[%s2902_s4 + $0x330] sm:$0xff] %v1029_v60  ;;  %v1663_v9 = vunpack.c.l.bf16 %v1817_v59  ;;  %v1408_v10 = vunpack.c.h.bf16 %v1754_v54  ;;  %v521_v12 = vadd.f32 %v2398_v29, %v386_v2  ;;  %v388_v14 = vmul.f32 %v2379_v20, %v1407_v4 }
  0xa3   :  { %v904_v11 = vadd.f32 %v1656_v49, %v520_v0  ;;  %v522_v13 = vadd.f32 %v2398_v29, %v387_v3  ;;  %1158 = vst [vmem:[%s2902_s4 + $0x338] sm:$0xff] %v1030_v6  ;;  %v1031_v1 = vmax.f32 %v903_v8, 0.0  ;;  %v1664_v17 = vunpack.c.h.bf16 %v1817_v59 }
  0xa4   :  { %v389_v16 = vmul.f32 %v2379_v20, %v1408_v10  ;;  %v1411_v18 = vunpack.c.l.bf16 %v1755_v5  ;;  %v905_v21 = vadd.f32 %v1659_v57, %v521_v12  ;;  %v523_v23 = vadd.f32 %v2398_v29, %v388_v14 }
  0xa5   :  { %v1032_v19 = vmax.f32 %v904_v11, 0.0  ;;  %v906_v22 = vadd.f32 %v1660_v63, %v522_v13  ;;  %1159 = vst [vmem:[%s2902_s4 + $0x340] sm:$0xff] %v1031_v1  ;;  %v1667_v26 = vunpack.c.l.bf16 %v1818_v15  ;;  %v1412_v27 = vunpack.c.h.bf16 %v1755_v5 }
  0xa6   :  { %v524_v25 = vadd.f32 %v2398_v29, %v389_v16  ;;  %v390_v7 = vmul.f32 %v2379_v20, %v1411_v18  ;;  %v1033_v30 = vmax.f32 %v905_v21, 0.0  ;;  %v907_v32 = vadd.f32 %v1663_v9, %v523_v23  ;;  %v1822_v9 = vld [vmem:[%s2901_s3 + $0x1d8] sm:$0xff]   ;;  %v1823_v23 = vld [vmem:[%s2901_s3 + $0x1e0] sm:$0xff]  }
  0xa7   :  { %1160 = vst [vmem:[%s2902_s4 + $0x348] sm:$0xff] %v1032_v19  ;;  %v1034_v31 = vmax.f32 %v906_v22, 0.0  ;;  %v1668_v33 = vunpack.c.h.bf16 %v1818_v15  ;;  %v391_v36 = vmul.f32 %v2379_v20, %v1412_v27  ;;  %v1415_v37 = vunpack.c.l.bf16 %v1756_v24 }
  0xa8   :  { %v908_v34 = vadd.f32 %v1664_v17, %v524_v25  ;;  %v525_v35 = vadd.f32 %v2398_v29, %v390_v7  ;;  %1161 = vst [vmem:[%s2902_s4 + $0x350] sm:$0xff] %v1033_v30  ;;  %v1035_v40 = vmax.f32 %v907_v32, 0.0  ;;  %v1671_v41 = vunpack.c.l.bf16 %v1819_v28  ;;  %v1760_v17 = vld [vmem:[%s2898_s0 + $0x1e0] sm:$0xff]   ;;  %v1761_v32 = vld [vmem:[%s2898_s0 + $0x1e8] sm:$0xff]  }
  0xa9   :  { %1162 = vst [vmem:[%s2902_s4 + $0x358] sm:$0xff] %v1034_v31  ;;  %v1416_v42 = vunpack.c.h.bf16 %v1756_v24  ;;  %v1672_v43 = vunpack.c.h.bf16 %v1819_v28  ;;  %v526_v46 = vadd.f32 %v2398_v29, %v391_v36  ;;  %v392_v47 = vmul.f32 %v2379_v20, %v1415_v37 }
  0xaa   :  { %v1036_v44 = vmax.f32 %v908_v34, 0.0  ;;  %v909_v45 = vadd.f32 %v1667_v26, %v525_v35  ;;  %1163 = vst [vmem:[%s2902_s4 + $0x360] sm:$0xff] %v1035_v40  ;;  %v1419_v50 = vunpack.c.l.bf16 %v1757_v38  ;;  %v1675_v51 = vunpack.c.l.bf16 %v1820_v39 }
  0xab   :  { %v393_v49 = vmul.f32 %v2379_v20, %v1416_v42  ;;  %v1420_v52 = vunpack.c.h.bf16 %v1757_v38  ;;  %v910_v55 = vadd.f32 %v1668_v33, %v526_v46  ;;  %v527_v56 = vadd.f32 %v2398_v29, %v392_v47  ;;  %v1824_v33 = vld [vmem:[%s2901_s3 + $0x1e8] sm:$0xff]   ;;  %v1762_v42 = vld [vmem:[%s2898_s0 + $0x1f0] sm:$0xff]  }
  0xac   :  { %1164 = vst [vmem:[%s2902_s4 + $0x368] sm:$0xff] %v1036_v44  ;;  %v1037_v54 = vmax.f32 %v909_v45, 0.0  ;;  %v1676_v57 = vunpack.c.h.bf16 %v1820_v39  ;;  %v394_v59 = vmul.f32 %v2379_v20, %v1419_v50  ;;  %v1423_v61 = vunpack.c.l.bf16 %v1758_v48  ;;  %v1825_v47 = vld [vmem:[%s2901_s3 + $0x1f0] sm:$0xff]  }
  0xad   :  { %v528_v58 = vadd.f32 %v2398_v29, %v393_v49  ;;  %v395_v60 = vmul.f32 %v2379_v20, %v1420_v52  ;;  %v1038_v63 = vmax.f32 %v910_v55, 0.0  ;;  %v911_v0 = vadd.f32 %v1671_v41, %v527_v56  ;;  %v1763_v56 = vld [vmem:[%s2898_s0 + $0x1f8] sm:$0xff]  }
  0xae   :  { %1165 = vst [vmem:[%s2902_s4 + $0x370] sm:$0xff] %v1037_v54  ;;  %v1679_v2 = vunpack.c.l.bf16 %v1821_v53  ;;  %v1424_v3 = vunpack.c.h.bf16 %v1758_v48  ;;  %v529_v5 = vadd.f32 %v2398_v29, %v394_v59  ;;  %v396_v8 = vmul.f32 %v2379_v20, %v1423_v61 }
  0xaf   :  { %v912_v4 = vadd.f32 %v1672_v43, %v528_v58  ;;  %v530_v6 = vadd.f32 %v2398_v29, %v395_v60  ;;  %1166 = vst [vmem:[%s2902_s4 + $0x378] sm:$0xff] %v1038_v63  ;;  %v1039_v10 = vmax.f32 %v911_v0, 0.0  ;;  %v1680_v12 = vunpack.c.h.bf16 %v1821_v53 }
  0xb0   :  { %v397_v11 = vmul.f32 %v2379_v20, %v1424_v3  ;;  %v1427_v13 = vunpack.c.l.bf16 %v1759_v62  ;;  %v913_v15 = vadd.f32 %v1675_v51, %v529_v5  ;;  %v531_v16 = vadd.f32 %v2398_v29, %v396_v8 }
  0xb1   :  { %v1040_v14 = vmax.f32 %v912_v4, 0.0  ;;  %v914_v1 = vadd.f32 %v1676_v57, %v530_v6  ;;  %1167 = vst [vmem:[%s2902_s4 + $0x380] sm:$0xff] %v1039_v10  ;;  %v1683_v21 = vunpack.c.l.bf16 %v1822_v9  ;;  %v1428_v22 = vunpack.c.h.bf16 %v1759_v62 }
  0xb2   :  { %v532_v18 = vadd.f32 %v2398_v29, %v397_v11  ;;  %v398_v19 = vmul.f32 %v2379_v20, %v1427_v13  ;;  %v1041_v24 = vmax.f32 %v913_v15, 0.0  ;;  %v915_v7 = vadd.f32 %v1679_v2, %v531_v16  ;;  %v1826_v2 = vld [vmem:[%s2901_s3 + $0x1f8] sm:$0xff]  }
  0xb3   :  { %1168 = vst [vmem:[%s2902_s4 + $0x388] sm:$0xff] %v1040_v14  ;;  %v1042_v25 = vmax.f32 %v914_v1, 0.0  ;;  %v1684_v26 = vunpack.c.h.bf16 %v1822_v9  ;;  %v399_v30 = vmul.f32 %v2379_v20, %v1428_v22  ;;  %v1431_v31 = vunpack.c.l.bf16 %v1760_v17 }
  0xb4   :  { %v916_v27 = vadd.f32 %v1680_v12, %v532_v18  ;;  %v533_v28 = vadd.f32 %v2398_v29, %v398_v19  ;;  %1169 = vst [vmem:[%s2902_s4 + $0x390] sm:$0xff] %v1041_v24  ;;  %v1043_v34 = vmax.f32 %v915_v7, 0.0  ;;  %v1687_v35 = vunpack.c.l.bf16 %v1823_v23 }
  0xb5   :  { %1170 = vst [vmem:[%s2902_s4 + $0x398] sm:$0xff] %v1042_v25  ;;  %v1432_v36 = vunpack.c.h.bf16 %v1760_v17  ;;  %v1688_v37 = vunpack.c.h.bf16 %v1823_v23  ;;  %v534_v40 = vadd.f32 %v2398_v29, %v399_v30  ;;  %v400_v41 = vmul.f32 %v2379_v20, %v1431_v31 }
  0xb6   :  { %v1044_v38 = vmax.f32 %v916_v27, 0.0  ;;  %v917_v39 = vadd.f32 %v1683_v21, %v533_v28  ;;  %1171 = vst [vmem:[%s2902_s4 + $0x3a0] sm:$0xff] %v1043_v34  ;;  %v1435_v44 = vunpack.c.l.bf16 %v1761_v32  ;;  %v1691_v45 = vunpack.c.l.bf16 %v1824_v33 }
  0xb7   :  { %v401_v43 = vmul.f32 %v2379_v20, %v1432_v36  ;;  %v1436_v46 = vunpack.c.h.bf16 %v1761_v32  ;;  %v918_v49 = vadd.f32 %v1684_v26, %v534_v40  ;;  %v535_v50 = vadd.f32 %v2398_v29, %v400_v41 }
  0xb8   :  { %1172 = vst [vmem:[%s2902_s4 + $0x3a8] sm:$0xff] %v1044_v38  ;;  %v1045_v48 = vmax.f32 %v917_v39, 0.0  ;;  %v1692_v51 = vunpack.c.h.bf16 %v1824_v33  ;;  %v402_v53 = vmul.f32 %v2379_v20, %v1435_v44  ;;  %v1439_v55 = vunpack.c.l.bf16 %v1762_v42 }
  0xb9   :  { %v536_v52 = vadd.f32 %v2398_v29, %v401_v43  ;;  %v403_v54 = vmul.f32 %v2379_v20, %v1436_v46  ;;  %v1046_v57 = vmax.f32 %v918_v49, 0.0  ;;  %v919_v58 = vadd.f32 %v1687_v35, %v535_v50 }
  0xba   :  { %1173 = vst [vmem:[%s2902_s4 + $0x3b0] sm:$0xff] %v1045_v48  ;;  %v1695_v59 = vunpack.c.l.bf16 %v1825_v47  ;;  %v1440_v60 = vunpack.c.h.bf16 %v1762_v42  ;;  %v537_v62 = vadd.f32 %v2398_v29, %v402_v53  ;;  %v404_v0 = vmul.f32 %v2379_v20, %v1439_v55 }
  0xbb   :  { %v920_v61 = vadd.f32 %v1688_v37, %v536_v52  ;;  %v538_v63 = vadd.f32 %v2398_v29, %v403_v54  ;;  %1174 = vst [vmem:[%s2902_s4 + $0x3b8] sm:$0xff] %v1046_v57  ;;  %v1047_v3 = vmax.f32 %v919_v58, 0.0  ;;  %v1696_v5 = vunpack.c.h.bf16 %v1825_v47 }
  0xbc   :  { %v405_v4 = vmul.f32 %v2379_v20, %v1440_v60  ;;  %v1443_v6 = vunpack.c.l.bf16 %v1763_v56  ;;  %v921_v9 = vadd.f32 %v1691_v45, %v537_v62  ;;  %v539_v11 = vadd.f32 %v2398_v29, %v404_v0 }
  0xbd   :  { %v1048_v8 = vmax.f32 %v920_v61, 0.0  ;;  %v922_v10 = vadd.f32 %v1692_v51, %v538_v63  ;;  %1175 = vst [vmem:[%s2902_s4 + $0x3c0] sm:$0xff] %v1047_v3  ;;  %v1699_v14 = vunpack.c.l.bf16 %v1826_v2  ;;  %v1444_v15 = vunpack.c.h.bf16 %v1763_v56 }
  0xbe   :  { %v540_v12 = vadd.f32 %v2398_v29, %v405_v4  ;;  %v406_v13 = vmul.f32 %v2379_v20, %v1443_v6  ;;  %v1049_v1 = vmax.f32 %v921_v9, 0.0  ;;  %v923_v17 = vadd.f32 %v1695_v59, %v539_v11 }
  0xbf   :  { %1176 = vst [vmem:[%s2902_s4 + $0x3c8] sm:$0xff] %v1048_v8  ;;  %v1050_v16 = vmax.f32 %v922_v10, 0.0  ;;  %v407_v21 = vmul.f32 %v2379_v20, %v1444_v15  ;;  %v1700_v22 = vunpack.c.h.bf16 %v1826_v2 }
  0xc0   :  { %v924_v18 = vadd.f32 %v1696_v5, %v540_v12  ;;  %v541_v19 = vadd.f32 %v2398_v29, %v406_v13  ;;  %1177 = vst [vmem:[%s2902_s4 + $0x3d0] sm:$0xff] %v1049_v1  ;;  %v1051_v23 = vmax.f32 %v923_v17, 0.0 }
  0xc1   :  { %1178 = vst [vmem:[%s2902_s4 + $0x3d8] sm:$0xff] %v1050_v16  ;;  %v542_v7 = vadd.f32 %v2398_v29, %v407_v21 }
  0xc2   :  { %v1052_v24 = vmax.f32 %v924_v18, 0.0  ;;  %v925_v25 = vadd.f32 %v1699_v14, %v541_v19  ;;  %1179 = vst [vmem:[%s2902_s4 + $0x3e0] sm:$0xff] %v1051_v23 }
  0xc3   :  { %v926_v26 = vadd.f32 %v1700_v22, %v542_v7 }
  0xc4   :  { %1180 = vst [vmem:[%s2902_s4 + $0x3e8] sm:$0xff] %v1052_v24  ;;  %v1053_v20 = vmax.f32 %v925_v25, 0.0 }
  0xc5   :  { %v1054_v27 = vmax.f32 %v926_v26, 0.0 }
  0xc6   :  { %1181 = vst [vmem:[%s2902_s4 + $0x3f0] sm:$0xff] %v1053_v20 }
  0xc7   :  { %1182 = vst [vmem:[%s2902_s4 + $0x3f8] sm:$0xff] %v1054_v27 }

// kernel: bottleneck_forward.5
= control target key start
LH: loop header
LB: loop body
LE: loop exit
PB: predicated region body
PF: predicated region fallthrough
CT: control target
= control target key end

     0   :  { %s9880_s18 = smov 0   ;;  %s10818_s0 = inlined_call_operand.vmem [shape: bf16[4,16,16,128], index: 0, kind: input, shape index: {}]   ;;  %s10819_s1 = inlined_call_operand.vmem [shape: f32[1,128], index: 1, kind: input, shape index: {}]   ;;  %s10820_s2 = inlined_call_operand.vmem [shape: f32[1,128], index: 2, kind: input, shape index: {}]   ;;  %s10821_s3 = inlined_call_operand.vmem [shape: bf16[9,128,128], index: 3, kind: input, shape index: {}]   ;;  %s10822_s4 = inlined_call_operand.vmem [shape: bf16[4,256,128], index: 4, kind: output, shape index: {0}]   ;;  %s10823_s5 = inlined_call_operand.vmem [shape: f32[4,2,128], index: 5, kind: output, shape index: {1}]  }
   0x1 LB: > { %s7555_s19 = sadd.s32 4294967295, %s9847_s18   ;;  %p7559_p0 = scmp.ge.s32.totalorder %s9847_s18, 1  ;;  %s9847_s18 = sphi %s9880_s18, %s16_s18  }
   0x2   : > { %p190_p1 = scmp.lt.s32.totalorder %s9847_s18, 5 }
   0x4   : > { %p191_p2 = pnand %p7559_p0, %p190_p1 }
   0x5   : > { %v9536_v0 = vld [vmem:[%s10821_s3] sm:$0xff] (!%p191_p2)   ;;  %v9537_v1 = vld [vmem:[%s10821_s3 + $0x8] sm:$0xff] (!%p191_p2)   ;;  %v9849_v2 = vmov (!%p191_p2), 0   ;;  %p222_p3 = scmp.lt.s32.totalorder (!%p191_p2), %s7555_s19, 3  ;;  %v9539_v4 = vld [vmem:[%s10821_s3 + $0x10] sm:$0xff] (!%p191_p2)   ;;  %vm578_vm0 = vcmask (!%p191_p2), 1040384  }
   0x6   : > { %194 = sbr.rel (%p191_p2) target bundleno = 793 (0x319), region = 36  ;;  %237 = vst [vmem:[#allocation2] sm:$0xf] (!%p191_p2), %v9849_v2  ;;  %238 = vst [vmem:[#allocation2 + $0x4] sm:$0xf] (!%p191_p2), %v9849_v2  ;;  %8567 = vmatprep.subr.bf16.mxu1 (!%p191_p2), %v9536_v0  ;;  %v9538_v3 = vld [vmem:[%s10821_s3 + $0x100] sm:$0xff] (!%p191_p2)  }
   0x7   : > { %239 = vst [vmem:[#allocation2 + $0x8] sm:$0xf] (!%p191_p2), %v9849_v2  ;;  %240 = vst [vmem:[#allocation2 + $0xcc] sm:$0xf] (!%p191_p2), %v9849_v2  ;;  %8568 = vmatpush3.bf16.msra.mxu1 (!%p191_p2), %v9536_v0  ;;  %8823 = vmatprep.subr.bf16.mxu0 (!%p191_p2), %v9538_v3  ;;  %v9540_v5 = vld [vmem:[%s10821_s3 + $0x108] sm:$0xff] (!%p191_p2)   ;;  %v9542_v6 = vld [vmem:[%s10821_s3 + $0x110] sm:$0xff] (!%p191_p2)  }
   0x8   : > { %241 = vst [vmem:[#allocation2 + $0xd0] sm:$0xf] (!%p191_p2), %v9849_v2  ;;  %242 = vst [vmem:[#allocation2 + $0xd4] sm:$0xf] (!%p191_p2), %v9849_v2  ;;  %8569 = vmatprep.subr.bf16.mxu1 (!%p191_p2), %v9537_v1  ;;  %8824 = vmatpush3.bf16.msra.mxu0 (!%p191_p2), %v9538_v3  ;;  %v9541_v7 = vld [vmem:[%s10821_s3 + $0x18] sm:$0xff] (!%p191_p2)   ;;  %v9543_v9 = vld [vmem:[%s10821_s3 + $0x20] sm:$0xff] (!%p191_p2)  }
   0x9   : > { %243 = vst [vmem:[#allocation2 + $0xd8] sm:$0xf] (!%p191_p2), %v9849_v2  ;;  %8825 = vmatprep.subr.bf16.mxu0 (!%p191_p2), %v9540_v5  ;;  %v9544_v8 = vld [vmem:[%s10821_s3 + $0x118] sm:$0xff] (!%p191_p2)   ;;  %v9546_v10 = vld [vmem:[%s10821_s3 + $0x120] sm:$0xff] (!%p191_p2)   ;;  %v9545_v12 = vld [vmem:[%s10821_s3 + $0x28] sm:$0xff] (!%p191_p2)   ;;  %vm2382_vm4 = vcmask (!%p191_p2), 1046528  }
   0xa   : > { %v9935_v14 = vld [vmem:[%s10819_s1] ss:$0 sm:$0xff] (!%p191_p2)  ;;  %v9548_v17 = vld [vmem:[%s10821_s3 + $0x128] sm:$0xff] (!%p191_p2)   ;;  %v9547_v19 = vld [vmem:[%s10821_s3 + $0x30] sm:$0xff] (!%p191_p2)   ;;  %vm579_vm1 = vsmask.f32 (!%p191_p2), 256 }
   0xb   : > { %8570 = vmatpush3.bf16.msra.mxu1 (!%p191_p2), %v9537_v1  ;;  %v9943_v18 = vld [vmem:[%s10820_s2] ss:$0 sm:$0xff] (!%p191_p2)  ;;  %v9551_v27 = vld [vmem:[%s10821_s3 + $0x130] sm:$0xff] (!%p191_p2)   ;;  %v9549_v34 = vld [vmem:[%s10821_s3 + $0x38] sm:$0xff] (!%p191_p2)   ;;  %vm1555_vm3 = vsmask.f32 (!%p191_p2), 7424 }
   0xc   : > { %8571 = vmatprep.subr.bf16.mxu1 (!%p191_p2), %v9539_v4  ;;  %8826 = vmatpush3.bf16.msra.mxu0 (!%p191_p2), %v9540_v5  ;;  %v9553_v40 = vld [vmem:[%s10821_s3 + $0x138] sm:$0xff] (!%p191_p2)   ;;  %vm9975_vm2 = vmand (!%p191_p2), %vm578_vm0, %vm579_vm1  ;;  %v9982_v53 = vld [vmem:[%s10821_s3 + $0x40] sm:$0xff] (!%p191_p2)  }
   0xd   : > { %s10827_s19 = smov (!%p222_p3, %s7555_s19), 3  ;;  %8827 = vmatprep.subr.bf16.mxu0 %v9542_v6  ;;  %v9550_v11 = vld [vmem:[#allocation2] sm:$0xff]  }
   0xe   : > { %s8071_s11 = sshll.u32 %s10827_s19, 7  ;;  %8583 = vmatprep.mubr.bf16.mxu1 %v9550_v11  ;;  %v9987_v54 = vld [vmem:[%s10821_s3 + $0x140] sm:$0xff]  }
   0xf   : > { %8572 = vmatpush3.bf16.msra.mxu1 %v9539_v4  ;;  %s9926_s20 = scalar_lea.vmem %s10818_s0, %s8071_s11  ;;  %s10598_s17 = scalar_lea.vmem %s10822_s4, %s8071_s11 }
  0x10   : > { %8573 = vmatprep.subr.bf16.mxu1 %v9541_v7  ;;  %8828 = vmatpush3.bf16.msra.mxu0 %v9542_v6  ;;  %v8106_v13 = vld [vmem:[%s9926_s20] sm:$0xff]   ;;  %v8249_v22 = vld [vmem:[%s9926_s20 + $0x8] sm:$0xff]   ;;  %v8250_v28 = vld [vmem:[%s9926_s20 + $0x10] sm:$0xff]   ;;  %s7564_s11 = sshll.u32 %s10827_s19, 1 }
  0x11   : > { %8829 = vmatprep.subr.bf16.mxu0 %v9544_v8  ;;  %v8107_v15 = vunpack.c.l.bf16 %v8106_v13  ;;  %v8108_v16 = vunpack.c.h.bf16 %v8106_v13  ;;  %v8111_v25 = vunpack.c.l.bf16 %v8249_v22  ;;  %v8112_v26 = vunpack.c.h.bf16 %v8249_v22  ;;  %v8251_v29 = vld [vmem:[%s9926_s20 + $0x18] sm:$0xff]   ;;  %v8252_v47 = vld [vmem:[%s9926_s20 + $0x20] sm:$0xff]   ;;  %v8253_v63 = vld [vmem:[%s9926_s20 + $0x28] sm:$0xff]   ;;  %s235_s23 = scalar_lea.vmem %s10823_s5, %s7564_s11 }
  0x12   : > { %v8115_v35 = vunpack.c.l.bf16 %v8250_v28  ;;  %v8116_v36 = vunpack.c.h.bf16 %v8250_v28  ;;  %v8119_v37 = vunpack.c.l.bf16 %v8251_v29  ;;  %v8120_v38 = vunpack.c.h.bf16 %v8251_v29 }
  0x13   : > { %8574 = vmatpush3.bf16.msra.mxu1 %v9541_v7  ;;  %v315_v20 = vmul.f32 %v8107_v15, %v9935_v14  ;;  %v316_v21 = vmul.f32 %v8108_v16, %v9935_v14  ;;  %v317_v32 = vmul.f32 %v8111_v25, %v9935_v14  ;;  %v318_v33 = vmul.f32 %v8112_v26, %v9935_v14 }
  0x14   : > { %8575 = vmatprep.subr.bf16.mxu1 %v9543_v9  ;;  %8830 = vmatpush3.bf16.msra.mxu0 %v9544_v8  ;;  %v319_v43 = vmul.f32 %v8115_v35, %v9935_v14  ;;  %v320_v44 = vmul.f32 %v8116_v36, %v9935_v14  ;;  %v321_v45 = vmul.f32 %v8119_v37, %v9935_v14  ;;  %v8123_v61 = vunpack.c.l.bf16 %v8252_v47 }
  0x15   : > { %8831 = vmatprep.subr.bf16.mxu0 %v9546_v10  ;;  %v354_v23 = vadd.f32 %v9943_v18, %v315_v20  ;;  %v355_v24 = vadd.f32 %v9943_v18, %v316_v21  ;;  %v356_v41 = vadd.f32 %v9943_v18, %v317_v32  ;;  %v357_v42 = vadd.f32 %v9943_v18, %v318_v33 }
  0x16   : > { %v322_v46 = vmul.f32 %v8120_v38, %v9935_v14  ;;  %v358_v55 = vadd.f32 %v9943_v18, %v319_v43  ;;  %v359_v56 = vadd.f32 %v9943_v18, %v320_v44  ;;  %v360_v57 = vadd.f32 %v9943_v18, %v321_v45 }
  0x17   : > { %8576 = vmatpush3.bf16.msra.mxu1 %v9543_v9  ;;  %v386_v30 = vmax.f32 %v354_v23, 0.0  ;;  %v387_v31 = vmax.f32 %v355_v24, 0.0  ;;  %v388_v51 = vmax.f32 %v356_v41, 0.0  ;;  %v389_v52 = vmax.f32 %v357_v42, 0.0 }
  0x18   : > { %8577 = vmatprep.subr.bf16.mxu1 %v9545_v12  ;;  %8832 = vmatpush3.bf16.msra.mxu0 %v9546_v10  ;;  %v361_v58 = vadd.f32 %v9943_v18, %v322_v46  ;;  %v8124_v62 = vunpack.c.h.bf16 %v8252_v47  ;;  %v390_v0 = vmax.f32 %v358_v55, 0.0  ;;  %v391_v1 = vmax.f32 %v359_v56, 0.0  ;;  %v8254_v46 = vld [vmem:[%s9926_s20 + $0x30] sm:$0xff]   ;;  %v8255_v47 = vld [vmem:[%s9926_s20 + $0x38] sm:$0xff]   ;;  %v8256_v55 = vld [vmem:[%s9926_s20 + $0x40] sm:$0xff]  }
  0x19   : > { %8833 = vmatprep.subr.bf16.mxu0 %v9548_v17  ;;  %v418_v39 = vpack.c.bf16 %v387_v31, %v386_v30  ;;  %v419_v60 = vpack.c.bf16 %v389_v52, %v388_v51  ;;  %v392_v2 = vmax.f32 %v360_v57, 0.0  ;;  %v323_v11 = vmul.f32 %v8123_v61, %v9935_v14  ;;  %v9566_v57 = vld [vmem:[%s10821_s3 + $0x48] sm:$0xff]  }
  0x1a   : > { %v393_v3 = vmax.f32 %v361_v58, 0.0  ;;  %v420_v9 = vpack.c.bf16 %v391_v1, %v390_v0  ;;  %v324_v15 = vmul.f32 %v8124_v62, %v9935_v14  ;;  %v8127_v16 = vunpack.c.l.bf16 %v8253_v63 }
  0x1b   : > { %8578 = vmatpush3.bf16.msra.mxu1 %v9545_v12  ;;  %v435_v48 = vshrl.u32 %v418_v39, 16  ;;  %v438_v49 = vshll.u32 %v418_v39, 16  ;;  %v442_v6 = vshrl.u32 %v419_v60, 16  ;;  %v445_v7 = vshll.u32 %v419_v60, 16 }
  0x1c   : > { %8579 = vmatprep.subr.bf16.mxu1 %v9547_v19  ;;  %8834 = vmatpush3.bf16.msra.mxu0 %v9548_v17  ;;  %v421_v10 = vpack.c.bf16 %v393_v3, %v392_v2  ;;  %v449_v20 = vshrl.u32 %v420_v9, 16  ;;  %v452_v21 = vshll.u32 %v420_v9, 16  ;;  %v362_v28 = vadd.f32 %v9943_v18, %v323_v11  ;;  %v9574_v9 = vld [vmem:[%s10821_s3 + $0x50] sm:$0xff]  }
  0x1d   : > { %8835 = vmatprep.subr.bf16.mxu0 %v9551_v27  ;;  %v437_v59 = vrot.slane %v435_v48, 7  ;;  %v444_v13 = vrot.slane %v442_v6, 7  ;;  %v363_v29 = vadd.f32 %v9943_v18, %v324_v15  ;;  %v8128_v32 = vunpack.c.h.bf16 %v8253_v63 }
  0x1e   : > { %v456_v24 = vshrl.u32 %v421_v10, 16  ;;  %v459_v25 = vshll.u32 %v421_v10, 16  ;;  %v325_v33 = vmul.f32 %v8127_v16, %v9935_v14  ;;  %v394_v41 = vmax.f32 %v362_v28, 0.0 }
  0x1f   : > { %8580 = vmatpush3.bf16.msra.mxu1 %v9547_v19  ;;  %v440_v4 = vor.u32 %v438_v49, %v437_v59  ;;  %v597_v5 = vsel %vm9975_vm2, %v437_v59, 0  ;;  %v447_v22 = vor.u32 %v445_v7, %v444_v13  ;;  %v598_v23 = vsel %vm9975_vm2, %v444_v13, 0 }
  0x20   : > { %8581 = vmatprep.subr.bf16.mxu1 %v9549_v34  ;;  %8836 = vmatpush3.bf16.msra.mxu0 %v9551_v27  ;;  %v7569_v8 = vcombine.low %v597_v5, %v597_v5  ;;  %v7572_v26 = vcombine.low %v598_v23, %v598_v23  ;;  %v451_v27 = vrot.slane %v449_v20, 7  ;;  %v458_v31 = vrot.slane %v456_v24, 7  ;;  %v10036_v23 = vld [vmem:[%s9926_s20 + $0x48] sm:$0xff]  }
  0x21   : > { %8837 = vmatprep.subr.bf16.mxu0 %v9553_v40  ;;  %v581_v12 = vsel %vm9975_vm2, 0, %v440_v4  ;;  %v582_v30 = vsel %vm9975_vm2, 0, %v447_v22  ;;  %v395_v44 = vmax.f32 %v363_v29, 0.0  ;;  %v326_v45 = vmul.f32 %v8128_v32, %v9935_v14 }
  0x22   : > { %v7567_v17 = vcombine.low %v581_v12, %v581_v12  ;;  %v7568_v19 = vcombine.high %v581_v12, %v581_v12  ;;  %791 = vst [vmem:[#allocation2 + $0x14] sm:$0xf] %v7569_v8  ;;  %v7571_v35 = vcombine.high %v582_v30, %v582_v30  ;;  %794 = vst [vmem:[#allocation2 + $0x20] sm:$0xf] %v7572_v26  ;;  %v599_v37 = vsel %vm9975_vm2, %v451_v27, 0 }
  0x23   : > { %8582 = vmatpush3.bf16.msra.mxu1 %v9549_v34  ;;  %v7570_v34 = vcombine.low %v582_v30, %v582_v30  ;;  %v454_v36 = vor.u32 %v452_v21, %v451_v27  ;;  %v7575_v38 = vcombine.low %v599_v37, %v599_v37  ;;  %v461_v39 = vor.u32 %v459_v25, %v458_v31 }
  0x24   : > { %8631 = vmatprep.subr.bf16.mxu1 %v9982_v53  ;;  %8838 = vmatpush3.bf16.msra.mxu0 %v9553_v40  ;;  %789 = vst [vmem:[#allocation2 + $0xc] sm:$0xf] %v7567_v17  ;;  %790 = vst [vmem:[#allocation2 + $0x10] sm:$0xf] %v7568_v19  ;;  %v600_v40 = vsel %vm9975_vm2, %v458_v31, 0  ;;  %v364_v52 = vadd.f32 %v9943_v18, %v325_v33  ;;  %v422_v59 = vpack.c.bf16 %v395_v44, %v394_v41 }
  0x25   : > { %8887 = vmatprep.subr.bf16.mxu0 %v9987_v54  ;;  %792 = vst [vmem:[#allocation2 + $0x18] sm:$0xf] %v7570_v34  ;;  %793 = vst [vmem:[#allocation2 + $0x1c] sm:$0xf] %v7571_v35  ;;  %v583_v42 = vsel %vm9975_vm2, 0, %v454_v36  ;;  %v7578_v43 = vcombine.low %v600_v40, %v600_v40  ;;  %v584_v51 = vsel %vm9975_vm2, 0, %v461_v39  ;;  %v365_v60 = vadd.f32 %v9943_v18, %v326_v45 }
  0x26   : > { %v7573_v48 = vcombine.low %v583_v42, %v583_v42  ;;  %v7574_v49 = vcombine.high %v583_v42, %v583_v42  ;;  %797 = vst [vmem:[#allocation2 + $0x2c] sm:$0xf] %v7575_v38  ;;  %v7576_v56 = vcombine.low %v584_v51, %v584_v51  ;;  %v7577_v58 = vcombine.high %v584_v51, %v584_v51  ;;  %v9584_v45 = vld [vmem:[%s10821_s3 + $0x58] sm:$0xff]   ;;  %v9561_v51 = vld [vmem:[%s10821_s3 + $0x148] sm:$0xff]  }
  0x27   : > { %800 = vst [vmem:[#allocation2 + $0x38] sm:$0xf] %v7578_v43  ;;  %v396_v62 = vmax.f32 %v364_v52, 0.0  ;;  %v8131_v63 = vunpack.c.l.bf16 %v8254_v46  ;;  %v8132_v0 = vunpack.c.h.bf16 %v8254_v46  ;;  %v8135_v1 = vunpack.c.l.bf16 %v8255_v47 }
  0x28   : > { %795 = vst [vmem:[#allocation2 + $0x24] sm:$0xf] %v7573_v48  ;;  %796 = vst [vmem:[#allocation2 + $0x28] sm:$0xf] %v7574_v49  ;;  %v463_v3 = vshrl.u32 %v422_v59, 16  ;;  %v8136_v4 = vunpack.c.h.bf16 %v8255_v47  ;;  %v8139_v5 = vunpack.c.l.bf16 %v8256_v55  ;;  %v8140_v6 = vunpack.c.h.bf16 %v8256_v55 }
  0x29   : > { %798 = vst [vmem:[#allocation2 + $0x30] sm:$0xf] %v7576_v56  ;;  %799 = vst [vmem:[#allocation2 + $0x34] sm:$0xf] %v7577_v58  ;;  %v466_v8 = vshll.u32 %v422_v59, 16  ;;  %v327_v10 = vmul.f32 %v8131_v63, %v9935_v14  ;;  %v328_v11 = vmul.f32 %v8132_v0, %v9935_v14  ;;  %v329_v12 = vmul.f32 %v8135_v1, %v9935_v14 }
  0x2a   : > { %v465_v13 = vrot.slane %v463_v3, 7  ;;  %v397_v15 = vmax.f32 %v365_v60, 0.0  ;;  %v330_v16 = vmul.f32 %v8136_v4, %v9935_v14  ;;  %v331_v17 = vmul.f32 %v8139_v5, %v9935_v14  ;;  %v9592_v60 = vld [vmem:[%s10821_s3 + $0x60] sm:$0xff]  }
  0x2b   : > { %v9552_v61 = vld [vmem:[#allocation2 + $0x8] sm:$0xff]   ;;  %v9554_v2 = vld [vmem:[#allocation2 + $0x10] sm:$0xff]   ;;  %v10041_v26 = vadd.f32 %v9943_v18, %v327_v10  ;;  %v10047_v31 = vadd.f32 %v9943_v18, %v329_v12  ;;  %v332_v35 = vmul.f32 %v8140_v6, %v9935_v14  ;;  %v8143_v46 = vunpack.c.l.bf16 %v10036_v23 }
  0x2c   : > { %8584 = vmatmul.mubr.bf16.vlgmr.msra.gmra.mrb[0].mxu1 %v9552_v61  ;;  %v9556_v7 = vld [vmem:[#allocation2 + $0xc] sm:$0xff]   ;;  %v9557_v19 = vld [vmem:[#allocation2 + $0x14] sm:$0xff]   ;;  %v468_v24 = vor.u32 %v466_v8, %v465_v13  ;;  %v10038_v25 = vpack.c.bf16 %v397_v15, %v396_v62  ;;  %v9560_v29 = vld [vmem:[#allocation2 + $0x1c] sm:$0xff]   ;;  %v10052_v34 = vadd.f32 %v9943_v18, %v330_v16  ;;  %v10056_v36 = vadd.f32 %v9943_v18, %v331_v17 }
  0x2d   : > { %8587 = vmatprep.mubr.bf16.mxu1 %v9554_v2  ;;  %8632 = vmatpush3.bf16.msra.mxu1 %v9982_v53  ;;  %v3689_v20 = vshrl.u32 %v9556_v7, 16  ;;  %v3691_v21 = vshll.u32 %v9556_v7, 16  ;;  %v9559_v22 = vld [vmem:[#allocation2 + $0x18] sm:$0xff]   ;;  %v10044_v53 = vadd.f32 %v9943_v18, %v328_v11  ;;  %v3696_v28 = vshll.u32 %v9557_v19, 16 }
  0x2e   : > { %8633 = vmatprep.subr.bf16.mxu1 %v9566_v57  ;;  %v3700_v30 = vshrl.u32 %v9557_v19, 16  ;;  %v585_v33 = vsel %vm9975_vm2, 0, %v468_v24  ;;  %v3704_v39 = vshll.u32 %v9560_v29, 16  ;;  %v3708_v41 = vshrl.u32 %v9560_v29, 16 }
  0x2f   : > { %v3693_v27 = vrot.slane %v3691_v21, 1  ;;  %v9562_v32 = vld [vmem:[#allocation2 + $0x20] sm:$0xff]   ;;  %v3698_v38 = vrot.slane %v3696_v28, 1  ;;  %v7579_v42 = vcombine.low %v585_v33, %v585_v33  ;;  %v7580_v43 = vcombine.high %v585_v33, %v585_v33  ;;  %v9564_v7 = vld [vmem:[#allocation2 + $0x28] sm:$0xff]  }
  0x30   : > { %v9563_v40 = vld [vmem:[#allocation2 + $0x24] sm:$0xff]   ;;  %v601_v44 = vsel %vm9975_vm2, %v465_v13, 0  ;;  %v3706_v49 = vrot.slane %v3704_v39, 1  ;;  %v9565_v55 = vld [vmem:[#allocation2 + $0x2c] sm:$0xff]   ;;  %v10069_v59 = vadd.f32 %v9943_v18, %v332_v35  ;;  %v8144_v61 = vunpack.c.h.bf16 %v10036_v23 }
  0x31   : > { %8634 = vmatpush3.bf16.msra.mxu1 %v9566_v57  ;;  %v3694_v37 = vor.u32 %v3693_v27, %v3689_v20  ;;  %v3702_v48 = vor.u32 %v3700_v30, %v3698_v38  ;;  %v3712_v52 = vshll.u32 %v9563_v40, 16  ;;  %v3716_v56 = vshrl.u32 %v9563_v40, 16  ;;  %v9569_v57 = vld [vmem:[#allocation2 + $0x34] sm:$0xff]   ;;  %801 = vst [vmem:[#allocation2 + $0x3c] sm:$0xf] %v7579_v42 }
  0x32   : > { %8635 = vmatprep.subr.bf16.mxu1 %v9574_v9  ;;  %802 = vst [vmem:[#allocation2 + $0x40] sm:$0xf] %v7580_v43  ;;  %v7581_v58 = vcombine.low %v601_v44, %v601_v44  ;;  %v3710_v63 = vor.u32 %v3708_v41, %v3706_v49  ;;  %v3720_v1 = vshll.u32 %v9565_v55, 16  ;;  %v3724_v2 = vshrl.u32 %v9565_v55, 16  ;;  %v9568_v12 = vld [vmem:[#allocation2 + $0x30] sm:$0xff]   ;;  %v9576_v41 = vld [vmem:[%s10821_s3 + $0x160] sm:$0xff]  }
  0x33   : > { %v3699_v47 = vsel %vm1555_vm3, %v3694_v37, %v3698_v38  ;;  %v3707_v62 = vsel %vm1555_vm3, %v3702_v48, %v3706_v49  ;;  %v3714_v0 = vrot.slane %v3712_v52, 1  ;;  %v3728_v3 = vshll.u32 %v9569_v57, 16 }
  0x34   : > { %8588 = vmatmul.mubr.bf16.gmra.mrb[4].mxu1 %v9559_v22  ;;  %8839 = vmatprep.mubr.bf16.mxu0 %v3699_v47  ;;  %v3732_v4 = vshrl.u32 %v9569_v57, 16  ;;  %803 = vst [vmem:[#allocation2 + $0x44] sm:$0xf] %v7581_v58  ;;  %v470_v5 = vshrl.u32 %v10038_v25, 16  ;;  %v3722_v10 = vrot.slane %v3720_v1, 1  ;;  %v473_v11 = vshll.u32 %v10038_v25, 16 }
  0x35   : > { %8591 = vmatprep.mubr.bf16.mxu1 %v9562_v32  ;;  %8636 = vmatpush3.bf16.msra.mxu1 %v9574_v9  ;;  %v3715_v6 = vsel %vm1555_vm3, %v3710_v63, %v3714_v0  ;;  %v3718_v8 = vor.u32 %v3716_v56, %v3714_v0  ;;  %v9567_v9 = vld [vmem:[%s10821_s3 + $0x150] sm:$0xff]   ;;  %v3730_v13 = vrot.slane %v3728_v3, 1  ;;  %v398_v16 = vmax.f32 %v10041_v26, 0.0  ;;  %v9572_v22 = vld [vmem:[%s10821_s3 + $0x158] sm:$0xff]   ;;  %v9579_v0 = vld [vmem:[%s10821_s3 + $0x168] sm:$0xff]  }
  0x36   : > { %8840 = vmatmul.mubr.bf16.vlgmr.msra.gmra.mrb[0].mxu0 %v3707_v62  ;;  %8637 = vmatprep.subr.bf16.mxu1 %v9584_v45  ;;  %v472_v15 = vrot.slane %v470_v5, 7  ;;  %v3726_v17 = vor.u32 %v3724_v2, %v3722_v10  ;;  %v400_v19 = vmax.f32 %v10047_v31, 0.0  ;;  %v401_v20 = vmax.f32 %v10052_v34, 0.0  ;;  %v10100_v31 = vld [vmem:[%s9926_s20 + $0x50] sm:$0xff]  }
  0x37   : > { %8888 = vmatpush3.bf16.msra.mxu0 %v9987_v54  ;;  %8843 = vmatprep.mubr.bf16.mxu0 %v3715_v6  ;;  %v399_v54 = vmax.f32 %v10044_v53, 0.0  ;;  %v333_v21 = vmul.f32 %v8143_v46, %v9935_v14  ;;  %v334_v26 = vmul.f32 %v8144_v61, %v9935_v14  ;;  %v9602_v53 = vld [vmem:[%s10821_s3 + $0x68] sm:$0xff]   ;;  %v3723_v27 = vsel %vm1555_vm3, %v3718_v8, %v3722_v10 }
  0x38   : > { %8889 = vmatprep.subr.bf16.mxu0 %v9561_v51  ;;  %v475_v23 = vor.u32 %v473_v11, %v472_v15  ;;  %v602_v24 = vsel %vm9975_vm2, %v472_v15, 0  ;;  %v425_v29 = vpack.c.bf16 %v401_v20, %v400_v19  ;;  %v402_v30 = vmax.f32 %v10056_v36, 0.0  ;;  %v10118_v57 = vld [vmem:[#allocation2 + $0xc] sm:$0xfe]  }
  0x39   : > { %8638 = vmatpush3.bf16.msra.mxu1 %v9584_v45  ;;  %v424_v25 = vpack.c.bf16 %v399_v54, %v398_v16  ;;  %v7584_v28 = vcombine.low %v602_v24, %v602_v24  ;;  %v3731_v32 = vsel %vm1555_vm3, %v3726_v17, %v3730_v13  ;;  %v10103_v33 = vld [vmem:[#allocation2 + $0x3c] sm:$0xff]   ;;  %v3734_v34 = vor.u32 %v3732_v4, %v3730_v13  ;;  %v9609_v13 = vld [vmem:[%s10821_s3 + $0x70] sm:$0xff]  }
  0x3a   : > { %8639 = vmatprep.subr.bf16.mxu1 %v9592_v60  ;;  %v586_v35 = vsel %vm9975_vm2, 0, %v475_v23  ;;  %v10108_v40 = vadd.f32 %v9943_v18, %v333_v21  ;;  %v3736_v36 = vshll.u32 %v10103_v33, 16  ;;  %v484_v43 = vshrl.u32 %v425_v29, 16  ;;  %v9570_v45 = vld [vmem:[#allocation2 + $0x38] sm:$0xff]   ;;  %v10143_v20 = vld [vmem:[%s10821_s3 + $0x170] sm:$0xff]  }
  0x3b   : > { %8890 = vmatpush3.bf16.msra.mxu0 %v9561_v51  ;;  %v7582_v37 = vcombine.low %v586_v35, %v586_v35  ;;  %v7583_v38 = vcombine.high %v586_v35, %v586_v35  ;;  %806 = vst [vmem:[#allocation2 + $0x50] sm:$0xf] %v7584_v28  ;;  %v477_v39 = vshrl.u32 %v424_v25, 16  ;;  %v480_v42 = vshll.u32 %v424_v25, 16  ;;  %v9573_v52 = vld [vmem:[#allocation2 + $0x40] sm:$0xff]   ;;  %v10129_v4 = vld [vmem:[%s9926_s20 + $0x58] sm:$0xff]  }
  0x3c   : > { %8592 = vmatmul.mubr.bf16.gmra.mrb[8].mxu1 %v9564_v7  ;;  %8891 = vmatprep.subr.bf16.mxu0 %v9567_v9  ;;  %v373_v44 = vadd.f32 %v9943_v18, %v334_v26  ;;  %v487_v47 = vshll.u32 %v425_v29, 16  ;;  %v403_v48 = vmax.f32 %v10069_v59, 0.0  ;;  %v8147_v49 = vunpack.c.l.bf16 %v10100_v31  ;;  %v10145_v21 = vld [vmem:[#allocation2 + $0x14] sm:$0xff]  }
  0x3d   : > { %8595 = vmatprep.mubr.bf16.mxu1 %v9568_v12  ;;  %8640 = vmatpush3.bf16.msra.mxu1 %v9592_v60  ;;  %804 = vst [vmem:[#allocation2 + $0x48] sm:$0xf] %v7582_v37  ;;  %805 = vst [vmem:[#allocation2 + $0x4c] sm:$0xf] %v7583_v38  ;;  %v479_v46 = vrot.slane %v477_v39, 7  ;;  %v3738_v51 = vrot.slane %v3736_v36, 1  ;;  %v8148_v58 = vunpack.c.h.bf16 %v10100_v31  ;;  %v8151_v28 = vunpack.c.l.bf16 %v10129_v4 }
  0x3e   : > { %8844 = vmatmul.mubr.bf16.gmra.mrb[4].mxu0 %v3723_v27  ;;  %8641 = vmatprep.subr.bf16.mxu1 %v9602_v53  ;;  %v3740_v55 = vshrl.u32 %v10103_v33, 16  ;;  %v486_v56 = vrot.slane %v484_v43, 7  ;;  %v426_v62 = vpack.c.bf16 %v403_v48, %v402_v30  ;;  %v404_v59 = vmax.f32 %v10108_v40, 0.0  ;;  %v9590_v43 = vld [vmem:[%s10821_s3 + $0x178] sm:$0xff]  }
  0x3f   : > { %8892 = vmatpush3.bf16.msra.mxu0 %v9567_v9  ;;  %8847 = vmatprep.mubr.bf16.mxu0 %v3731_v32  ;;  %v482_v60 = vor.u32 %v480_v42, %v479_v46  ;;  %v603_v61 = vsel %vm9975_vm2, %v479_v46, 0  ;;  %v3739_v63 = vsel %vm1555_vm3, %v3734_v34, %v3738_v51  ;;  %v405_v3 = vmax.f32 %v373_v44, 0.0 }
  0x40   : > { %8893 = vmatprep.subr.bf16.mxu0 %v9572_v22  ;;  %v7587_v1 = vcombine.low %v603_v61, %v603_v61  ;;  %v489_v2 = vor.u32 %v487_v47, %v486_v56  ;;  %v604_v6 = vsel %vm9975_vm2, %v486_v56, 0  ;;  %v491_v7 = vshrl.u32 %v426_v62, 16 }
  0x41   : > { %8642 = vmatpush3.bf16.msra.mxu1 %v9602_v53  ;;  %v587_v5 = vsel %vm9975_vm2, 0, %v482_v60  ;;  %v494_v8 = vshll.u32 %v426_v62, 16  ;;  %v7590_v12 = vcombine.low %v604_v6, %v604_v6  ;;  %v3742_v19 = vor.u32 %v3740_v55, %v3738_v51  ;;  %v10166_v60 = vld [vmem:[%s9926_s20 + $0x60] sm:$0xff]  }
  0x42   : > { %v7585_v10 = vcombine.low %v587_v5, %v587_v5  ;;  %v7586_v11 = vcombine.high %v587_v5, %v587_v5  ;;  %809 = vst [vmem:[#allocation2 + $0x5c] sm:$0xf] %v7587_v1  ;;  %v588_v9 = vsel %vm9975_vm2, 0, %v489_v2  ;;  %v493_v54 = vrot.slane %v491_v7, 7  ;;  %8643 = vmatprep.subr.bf16.mxu1 %v9609_v13 }
  0x43   : > { %8894 = vmatpush3.bf16.msra.mxu0 %v9572_v22  ;;  %v7588_v15 = vcombine.low %v588_v9, %v588_v9  ;;  %v7589_v16 = vcombine.high %v588_v9, %v588_v9  ;;  %812 = vst [vmem:[#allocation2 + $0x68] sm:$0xf] %v7590_v12  ;;  %v4514_v22 = vrot.slane %v10118_v57, 1  ;;  %v427_v23 = vpack.c.bf16 %v405_v3, %v404_v59 }
  0x44   : > { %8596 = vmatmul.mubr.bf16.gmra.mrb[12].mxu1 %v9570_v45  ;;  %8895 = vmatprep.subr.bf16.mxu0 %v9576_v41  ;;  %v9575_v17 = vld [vmem:[#allocation2 + $0x44] sm:$0xff]   ;;  %807 = vst [vmem:[#allocation2 + $0x54] sm:$0xf] %v7585_v10  ;;  %808 = vst [vmem:[#allocation2 + $0x58] sm:$0xf] %v7586_v11  ;;  %v335_v24 = vmul.f32 %v8147_v49, %v9935_v14  ;;  %v496_v26 = vor.u32 %v494_v8, %v493_v54  ;;  %v605_v53 = vsel %vm9975_vm2, %v493_v54, 0 }
  0x45   : > { %8599 = vmatprep.mubr.bf16.mxu1 %v9573_v52  ;;  %v9577_v25 = vld [vmem:[#allocation2 + $0x48] sm:$0xff]   ;;  %810 = vst [vmem:[#allocation2 + $0x60] sm:$0xf] %v7588_v15  ;;  %811 = vst [vmem:[#allocation2 + $0x64] sm:$0xf] %v7589_v16  ;;  %v336_v27 = vmul.f32 %v8148_v58, %v9935_v14  ;;  %8644 = vmatpush3.bf16.msra.mxu1 %v9609_v13  ;;  %v3744_v29 = vshll.u32 %v9575_v17, 16  ;;  %v7593_v32 = vcombine.low %v605_v53, %v605_v53 }
  0x46   : > { %8848 = vmatmul.mubr.bf16.gmra.mrb[8].mxu0 %v3739_v63  ;;  %v9578_v30 = vld [vmem:[#allocation2 + $0x4c] sm:$0xff]   ;;  %v3748_v31 = vshrl.u32 %v9575_v17, 16  ;;  %v498_v33 = vshrl.u32 %v427_v23, 16  ;;  %v589_v34 = vsel %vm9975_vm2, 0, %v496_v26  ;;  %v501_v35 = vshll.u32 %v427_v23, 16 }
  0x47   : > { %8896 = vmatpush3.bf16.msra.mxu0 %v9576_v41  ;;  %v374_v37 = vadd.f32 %v9943_v18, %v335_v24  ;;  %v8152_v38 = vunpack.c.h.bf16 %v10129_v4  ;;  %v3746_v39 = vrot.slane %v3744_v29, 1  ;;  %v3752_v40 = vshll.u32 %v9578_v30, 16  ;;  %815 = vst [vmem:[#allocation2 + $0x74] sm:$0xf] %v7593_v32  ;;  %v10178_v4 = vld [vmem:[%s10821_s3 + $0x180] sm:$0xff]  }
  0x48   : > { %8897 = vmatprep.subr.bf16.mxu0 %v9579_v0  ;;  %v3756_v36 = vshrl.u32 %v9578_v30, 16  ;;  %v7591_v41 = vcombine.low %v589_v34, %v589_v34  ;;  %v7592_v42 = vcombine.high %v589_v34, %v589_v34  ;;  %v500_v44 = vrot.slane %v498_v33, 7 }
  0x49   : > { %v375_v45 = vadd.f32 %v9943_v18, %v336_v27  ;;  %v406_v46 = vmax.f32 %v374_v37, 0.0  ;;  %v3747_v47 = vsel %vm1555_vm3, %v3742_v19, %v3746_v39  ;;  %v3750_v48 = vor.u32 %v3748_v31, %v3746_v39 }
  0x4a   : > { %v3754_v49 = vrot.slane %v3752_v40, 1  ;;  %813 = vst [vmem:[#allocation2 + $0x6c] sm:$0xf] %v7591_v41  ;;  %v4515_v51 = vrot.slane %v10145_v21, 1  ;;  %8851 = vmatprep.mubr.bf16.mxu0 %v3747_v47  ;;  %814 = vst [vmem:[#allocation2 + $0x70] sm:$0xf] %v7592_v42  ;;  %v503_v55 = vor.u32 %v501_v35, %v500_v44  ;;  %v337_v58 = vmul.f32 %v8151_v28, %v9935_v14 }
  0x4b   : > { %8898 = vmatpush3.bf16.msra.mxu0 %v9579_v0  ;;  %v9580_v52 = vld [vmem:[#allocation2 + $0x50] sm:$0xff]   ;;  %v407_v56 = vmax.f32 %v375_v45, 0.0  ;;  %v606_v59 = vsel %vm9975_vm2, %v500_v44, 0  ;;  %v338_v63 = vmul.f32 %v8152_v38, %v9935_v14  ;;  %v10173_v0 = vld [vmem:[%s9926_s20 + $0x68] sm:$0xff]   ;;  %v9582_v2 = vld [vmem:[#allocation2 + $0x58] sm:$0xff]   ;;  %v8155_v19 = vunpack.c.l.bf16 %v10166_v60 }
  0x4c   : > { %8600 = vmatmul.mubr.bf16.gmra.mrb[16].mxu1 %v9577_v25  ;;  %8899 = vmatprep.subr.bf16.mxu0 %v10143_v20  ;;  %v3755_v61 = vsel %vm1555_vm3, %v3750_v48, %v3754_v49  ;;  %v9581_v62 = vld [vmem:[#allocation2 + $0x54] sm:$0xff]   ;;  %v3758_v1 = vor.u32 %v3756_v36, %v3754_v49  ;;  %v9583_v3 = vld [vmem:[#allocation2 + $0x5c] sm:$0xff]   ;;  %v590_v5 = vsel %vm9975_vm2, 0, %v503_v55  ;;  %v7596_v7 = vcombine.low %v606_v59, %v606_v59  ;;  %v9587_v16 = vld [vmem:[#allocation2 + $0x64] sm:$0xff]  }
  0x4d   : > { %8603 = vmatprep.mubr.bf16.mxu1 %v9580_v52  ;;  %v428_v6 = vpack.c.bf16 %v407_v56, %v406_v46  ;;  %v3760_v8 = vshll.u32 %v9581_v62, 16  ;;  %v3764_v10 = vshrl.u32 %v9581_v62, 16  ;;  %v7594_v14 = vcombine.low %v590_v5, %v590_v5  ;;  %v9586_v12 = vld [vmem:[#allocation2 + $0x60] sm:$0xff]  }
  0x4e   : > { %8852 = vmatmul.mubr.bf16.gmra.mrb[12].mxu0 %v3755_v61  ;;  %v7595_v11 = vcombine.high %v590_v5, %v590_v5  ;;  %v3768_v9 = vshll.u32 %v9583_v3, 16  ;;  %818 = vst [vmem:[#allocation2 + $0x80] sm:$0xf] %v7596_v7  ;;  %v376_v13 = vadd.f32 %v9943_v18, %v337_v58  ;;  %v3772_v54 = vshrl.u32 %v9583_v3, 16  ;;  %v10197_v40 = vld [vmem:[#allocation2 + $0x1c] sm:$0xff]   ;;  %v10207_v52 = vld [vmem:[#allocation2 + $0x24] sm:$0xff]  }
  0x4f   : > { %8900 = vmatpush3.bf16.msra.mxu0 %v10143_v20  ;;  %v3762_v15 = vrot.slane %v3760_v8, 1  ;;  %816 = vst [vmem:[#allocation2 + $0x78] sm:$0xf] %v7594_v14  ;;  %v505_v17 = vshrl.u32 %v428_v6, 16  ;;  %v377_v20 = vadd.f32 %v9943_v18, %v338_v63  ;;  %v8156_v24 = vunpack.c.h.bf16 %v10166_v60  ;;  %v10193_v18 = vld [vmem:[%s10819_s1] ss:$0 sm:$0xff] }
  0x50   : > { %8901 = vmatprep.subr.bf16.mxu0 %v9590_v43  ;;  %817 = vst [vmem:[#allocation2 + $0x7c] sm:$0xf] %v7595_v11  ;;  %v3770_v23 = vrot.slane %v3768_v9, 1  ;;  %v8159_v25 = vunpack.c.l.bf16 %v10173_v0  ;;  %v3776_v27 = vshll.u32 %v9587_v16, 16  ;;  %v3780_v29 = vshrl.u32 %v9587_v16, 16  ;;  %v9618_v3 = vld [vmem:[%s10821_s3 + $0x78] sm:$0xff]  }
  0x51   : > { %v3763_v26 = vsel %vm1555_vm3, %v3758_v1, %v3762_v15  ;;  %v3766_v53 = vor.u32 %v3764_v10, %v3762_v15  ;;  %v9589_v28 = vld [vmem:[#allocation2 + $0x6c] sm:$0xff]   ;;  %v507_v31 = vrot.slane %v505_v17, 7  ;;  %v508_v32 = vshll.u32 %v428_v6, 16  ;;  %v10213_v61 = vld [vmem:[%s10820_s2] ss:$0 sm:$0xff]  ;;  %8645 = vmatprep.subr.bf16.mxu1 %v9618_v3 }
  0x52   : > { %8855 = vmatprep.mubr.bf16.mxu0 %v3763_v26  ;;  %v3774_v30 = vor.u32 %v3772_v54, %v3770_v23  ;;  %v339_v33 = vmul.f32 %v10193_v18, %v8155_v19  ;;  %v3778_v35 = vrot.slane %v3776_v27, 1  ;;  %v3784_v37 = vshll.u32 %v9589_v28, 16  ;;  %v9588_v39 = vld [vmem:[#allocation2 + $0x68] sm:$0xff]   ;;  %v9591_v47 = vld [vmem:[#allocation2 + $0x70] sm:$0xff]   ;;  %8646 = vmatpush3.bf16.msra.mxu1 %v9618_v3 }
  0x53   : > { %8902 = vmatpush3.bf16.msra.mxu0 %v9590_v43  ;;  %v3771_v34 = vsel %vm1555_vm3, %v3766_v53, %v3770_v23  ;;  %v408_v38 = vmax.f32 %v376_v13, 0.0  ;;  %v510_v36 = vor.u32 %v508_v32, %v507_v31  ;;  %v607_v41 = vsel %vm9975_vm2, %v507_v31, 0  ;;  %v9601_v27 = vld [vmem:[#allocation2 + $0x2c] sm:$0xff]  }
  0x54   : > { %8604 = vmatmul.mubr.bf16.gmra.mrb[20].mxu1 %v9582_v2  ;;  %8951 = vmatprep.subr.bf16.mxu0 %v10178_v4  ;;  %v409_v42 = vmax.f32 %v377_v20, 0.0  ;;  %v8160_v43 = vunpack.c.h.bf16 %v10173_v0  ;;  %v3779_v44 = vsel %vm1555_vm3, %v3774_v30, %v3778_v35  ;;  %v3782_v45 = vor.u32 %v3780_v29, %v3778_v35  ;;  %v8262_v2 = vld [vmem:[%s9926_s20 + $0x70] sm:$0xff]  }
  0x55   : > { %8607 = vmatprep.mubr.bf16.mxu1 %v9586_v12  ;;  %v10203_v46 = vrot.slane %v3784_v37, 1  ;;  %v7599_v48 = vcombine.low %v607_v41, %v607_v41  ;;  %v591_v49 = vsel %vm9975_vm2, 0, %v510_v36  ;;  %v340_v56 = vmul.f32 %v10193_v18, %v8156_v24  ;;  %v9603_v36 = vld [vmem:[%s10821_s3 + $0x188] sm:$0xff]   ;;  %v10251_v41 = vld [vmem:[#allocation2 + $0x34] sm:$0xff]  }
  0x56   : > { %8856 = vmatmul.mubr.bf16.gmra.mrb[16].mxu0 %v3771_v34  ;;  %v429_v55 = vpack.c.bf16 %v409_v42, %v408_v38  ;;  %v7597_v58 = vcombine.low %v591_v49, %v591_v49  ;;  %v7598_v60 = vcombine.high %v591_v49, %v591_v49  ;;  %v378_v62 = vadd.f32 %v10213_v61, %v339_v33 }
  0x57   : > { %8859 = vmatprep.mubr.bf16.mxu0 %v3779_v44  ;;  %821 = vst [vmem:[#allocation2 + $0x8c] sm:$0xf] %v7599_v48  ;;  %v4516_v59 = vsel %vm2382_vm4, %v4514_v22, %v4515_v51  ;;  %v379_v1 = vadd.f32 %v10213_v61, %v340_v56  ;;  %v3787_v5 = vsel %vm1555_vm3, %v3782_v45, %v10203_v46  ;;  %v4517_v7 = vrot.slane %v10197_v40, 1  ;;  %v9596_v13 = vld [vmem:[#allocation2 + $0x78] sm:$0xff]  }
  0x58   : > { %v512_v63 = vshrl.u32 %v429_v55, 16  ;;  %v515_v0 = vshll.u32 %v429_v55, 16  ;;  %819 = vst [vmem:[#allocation2 + $0x84] sm:$0xf] %v7597_v58  ;;  %820 = vst [vmem:[#allocation2 + $0x88] sm:$0xf] %v7598_v60  ;;  %v341_v57 = vmul.f32 %v10193_v18, %v8159_v25  ;;  %v342_v22 = vmul.f32 %v10193_v18, %v8160_v43 }
  0x59   : > { %v410_v6 = vmax.f32 %v378_v62, 0.0  ;;  %v4519_v8 = vrot.slane %v10207_v52, 1  ;;  %v411_v14 = vmax.f32 %v379_v1, 0.0  ;;  %v8163_v12 = vunpack.c.l.bf16 %v8262_v2  ;;  %v10260_v55 = vld [vmem:[%s10821_s3 + $0x80] sm:$0xff]  }
  0x5a   : > { %v514_v10 = vrot.slane %v512_v63, 7  ;;  %v380_v11 = vadd.f32 %v10213_v61, %v341_v57  ;;  %v381_v9 = vadd.f32 %v10213_v61, %v342_v22  ;;  %v8164_v20 = vunpack.c.h.bf16 %v8262_v2  ;;  %v9611_v63 = vld [vmem:[%s10821_s3 + $0x190] sm:$0xff]   ;;  %8695 = vmatprep.subr.bf16.mxu1 %v10260_v55 }
  0x5b   : > { %v430_v16 = vpack.c.bf16 %v411_v14, %v410_v6  ;;  %v343_v53 = vmul.f32 %v10193_v18, %v8163_v12  ;;  %v4518_v35 = vsel %vm2382_vm4, %v4515_v51, %v4517_v7  ;;  %v4520_v40 = vsel %vm2382_vm4, %v4517_v7, %v4519_v8  ;;  %v9610_v7 = vld [vmem:[#allocation2 + $0x44] sm:$0xff]  }
  0x5c   : > { %8608 = vmatmul.mubr.bf16.gmra.mrb[24].mxu1 %v9588_v39  ;;  %v517_v15 = vor.u32 %v515_v0, %v514_v10  ;;  %v608_v54 = vsel %vm9975_vm2, %v514_v10, 0  ;;  %v412_v19 = vmax.f32 %v380_v11, 0.0  ;;  %v413_v23 = vmax.f32 %v381_v9, 0.0  ;;  %v9619_v9 = vld [vmem:[%s10821_s3 + $0x198] sm:$0xff]  }
  0x5d   : > { %8611 = vmatprep.mubr.bf16.mxu1 %v9591_v47  ;;  %v7602_v17 = vcombine.low %v608_v54, %v608_v54  ;;  %v519_v25 = vshrl.u32 %v430_v16, 16  ;;  %v522_v26 = vshll.u32 %v430_v16, 16  ;;  %v344_v31 = vmul.f32 %v10193_v18, %v8164_v20  ;;  %v9613_v16 = vld [vmem:[#allocation2 + $0x4c] sm:$0xff]  }
  0x5e   : > { %8860 = vmatmul.mubr.bf16.gmra.mrb[20].mxu0 %v3787_v5  ;;  %v592_v24 = vsel %vm9975_vm2, 0, %v517_v15  ;;  %v431_v30 = vpack.c.bf16 %v413_v23, %v412_v19  ;;  %v382_v34 = vadd.f32 %v10213_v61, %v343_v53  ;;  %v4521_v48 = vrot.slane %v9601_v27, 1 }
  0x5f   : > { %8903 = vmatprep.mubr.bf16.mxu0 %v4516_v59  ;;  %v7600_v28 = vcombine.low %v592_v24, %v592_v24  ;;  %v7601_v29 = vcombine.high %v592_v24, %v592_v24  ;;  %824 = vst [vmem:[#allocation2 + $0x98] sm:$0xf] %v7602_v17  ;;  %v9598_v32 = vld [vmem:[#allocation2 + $0x80] sm:$0xff]   ;;  %v521_v33 = vrot.slane %v519_v25, 7  ;;  %v383_v39 = vadd.f32 %v10213_v61, %v344_v31  ;;  %v9600_v47 = vld [vmem:[#allocation2 + $0x88] sm:$0xff]  }
  0x60   : > { %v526_v37 = vshrl.u32 %v431_v30, 16  ;;  %v529_v38 = vshll.u32 %v431_v30, 16  ;;  %v414_v42 = vmax.f32 %v382_v34, 0.0  ;;  %v4523_v59 = vrot.slane %v10251_v41, 1  ;;  %v9628_v17 = vld [vmem:[%s10821_s3 + $0x1a0] sm:$0xff]   ;;  %v9636_v34 = vld [vmem:[%s10821_s3 + $0x1a8] sm:$0xff]  }
  0x61   : > { %822 = vst [vmem:[#allocation2 + $0x90] sm:$0xf] %v7600_v28  ;;  %823 = vst [vmem:[#allocation2 + $0x94] sm:$0xf] %v7601_v29  ;;  %v524_v21 = vor.u32 %v522_v26, %v521_v33  ;;  %v609_v51 = vsel %vm9975_vm2, %v521_v33, 0  ;;  %v415_v45 = vmax.f32 %v383_v39, 0.0  ;;  %v4522_v22 = vsel %vm2382_vm4, %v4519_v8, %v4521_v48 }
  0x62   : > { %v7605_v43 = vcombine.low %v609_v51, %v609_v51  ;;  %v528_v44 = vrot.slane %v526_v37, 7  ;;  %v4524_v14 = vsel %vm2382_vm4, %v4521_v48, %v4523_v59  ;;  %v9620_v8 = vld [vmem:[#allocation2] sm:$0xff]   ;;  %v4527_v15 = vrot.slane %v9610_v7, 1  ;;  %v9615_v26 = vld [vmem:[#allocation2 + $0x54] sm:$0xff]   ;;  %v9621_v28 = vld [vmem:[#allocation2 + $0x8] sm:$0xff]  }
  0x63   : > { %v593_v49 = vsel %vm9975_vm2, 0, %v524_v21  ;;  %v432_v0 = vpack.c.bf16 %v415_v45, %v414_v42  ;;  %v1559_v29 = vshll.u32 %v9620_v8, 16  ;;  %v4529_v30 = vrot.slane %v9613_v16, 1  ;;  %v9623_v39 = vld [vmem:[#allocation2 + $0x10] sm:$0xff]   ;;  %v9622_v41 = vld [vmem:[#allocation2 + $0x64] sm:$0xff]  }
  0x64   : > { %8612 = vmatmul.mubr.bf16.gmra.mrb[28].mxu1 %v9596_v13  ;;  %v7603_v56 = vcombine.low %v593_v49, %v593_v49  ;;  %v7604_v58 = vcombine.high %v593_v49, %v593_v49  ;;  %827 = vst [vmem:[#allocation2 + $0xa4] sm:$0xf] %v7605_v43  ;;  %v531_v60 = vor.u32 %v529_v38, %v528_v44  ;;  %v610_v62 = vsel %vm9975_vm2, %v528_v44, 0  ;;  %v9625_v43 = vld [vmem:[#allocation2 + $0x18] sm:$0xff]   ;;  %v9633_v16 = vld [vmem:[#allocation2 + $0x30] sm:$0xff]  }
  0x65   : > { %8615 = vmatprep.mubr.bf16.mxu1 %v9598_v32  ;;  %v7608_v1 = vcombine.low %v610_v62, %v610_v62  ;;  %v533_v57 = vshrl.u32 %v432_v0, 16  ;;  %v536_v10 = vshll.u32 %v432_v0, 16  ;;  %v4531_v32 = vrot.slane %v9615_v26, 1 }
  0x66   : > { %8904 = vmatmul.mubr.bf16.vlgmr.msra.gmra.mrb[0].mxu0 %v4518_v35  ;;  %825 = vst [vmem:[#allocation2 + $0x9c] sm:$0xf] %v7603_v56  ;;  %826 = vst [vmem:[#allocation2 + $0xa0] sm:$0xf] %v7604_v58  ;;  %v594_v2 = vsel %vm9975_vm2, 0, %v531_v60  ;;  %v1557_v33 = vshrl.u32 %v9620_v8, 16 }
  0x67   : > { %8952 = vmatpush3.bf16.msra.mxu0 %v10178_v4  ;;  %8907 = vmatprep.mubr.bf16.mxu0 %v4520_v40  ;;  %v9607_v4 = vld [vmem:[#allocation2 + $0x3c] sm:$0xff]   ;;  %v7606_v5 = vcombine.low %v594_v2, %v594_v2  ;;  %v7607_v6 = vcombine.high %v594_v2, %v594_v2  ;;  %830 = vst [vmem:[#allocation2 + $0xb0] sm:$0xf] %v7608_v1  ;;  %v535_v11 = vrot.slane %v533_v57, 7  ;;  %v1561_v37 = vrot.slane %v1559_v29, 1  ;;  %v9624_v58 = vld [vmem:[#allocation2 + $0x6c] sm:$0xff]  }
  0x68   : > { %8953 = vmatprep.subr.bf16.mxu0 %v9603_v36  ;;  %v9604_v3 = vld [vmem:[#allocation2 + $0x90] sm:$0xff]   ;;  %v4525_v12 = vrot.slane %v9607_v4, 1  ;;  %v9617_v35 = vld [vmem:[#allocation2 + $0x5c] sm:$0xff]   ;;  %v1564_v38 = vshll.u32 %v9621_v28, 16  ;;  %v4532_v21 = vsel %vm2382_vm4, %v4529_v30, %v4531_v32  ;;  %v1568_v48 = vshrl.u32 %v9621_v28, 16  ;;  %v9631_v57 = vld [vmem:[#allocation2 + $0x28] sm:$0xff]  }
  0x69   : > { %828 = vst [vmem:[#allocation2 + $0xa8] sm:$0xf] %v7606_v5  ;;  %829 = vst [vmem:[#allocation2 + $0xac] sm:$0xf] %v7607_v6  ;;  %v538_v13 = vor.u32 %v536_v10, %v535_v11  ;;  %v611_v52 = vsel %vm9975_vm2, %v535_v11, 0  ;;  %v1562_v51 = vor.u32 %v1561_v37, %v1557_v33  ;;  %v4533_v45 = vrot.slane %v9617_v35, 1 }
  0x6a   : > { %v7611_v54 = vcombine.low %v611_v52, %v611_v52  ;;  %v4526_v53 = vsel %vm2382_vm4, %v4523_v59, %v4525_v12  ;;  %v4528_v27 = vsel %vm2382_vm4, %v4525_v12, %v4527_v15  ;;  %v1566_v42 = vrot.slane %v1564_v38, 1  ;;  %v10294_v59 = vld [vmem:[#allocation2 + $0x74] sm:$0xff]   ;;  %v9629_v1 = vld [vmem:[#allocation2 + $0x20] sm:$0xff]  }
  0x6b   : > { %8954 = vmatpush3.bf16.msra.mxu0 %v9603_v36  ;;  %v595_v23 = vsel %vm9975_vm2, 0, %v538_v13  ;;  %v4530_v36 = vsel %vm2382_vm4, %v4527_v15, %v4529_v30  ;;  %v4535_v49 = vrot.slane %v9622_v41, 1  ;;  %v1576_v60 = vshrl.u32 %v9623_v39, 16  ;;  %v8263_v12 = vld [vmem:[%s9926_s20 + $0x78] sm:$0xff]   ;;  %v9635_v15 = vld [vmem:[%s10821_s3 + $0x88] sm:$0xff]  }
  0x6c   : > { %8616 = vmatmul.mubr.bf16.gmra.mrb[32].mxu1 %v9600_v47  ;;  %8955 = vmatprep.subr.bf16.mxu0 %v9611_v63  ;;  %v7609_v24 = vcombine.low %v595_v23, %v595_v23  ;;  %v7610_v25 = vcombine.high %v595_v23, %v595_v23  ;;  %833 = vst [vmem:[#allocation2 + $0xbc] sm:$0xf] %v7611_v54  ;;  %v1572_v47 = vshll.u32 %v9623_v39, 16  ;;  %v1580_v62 = vshll.u32 %v9625_v43, 16  ;;  %v9630_v52 = vld [vmem:[#allocation2 + $0x7c] sm:$0xff]  }
  0x6d   : > { %8619 = vmatprep.mubr.bf16.mxu1 %v9604_v3  ;;  %v9606_v19 = vld [vmem:[#allocation2 + $0x98] sm:$0xff]   ;;  %v9608_v20 = vld [vmem:[#allocation2 + $0xa0] sm:$0xff]   ;;  %v1567_v56 = vsel %vm1555_vm3, %v1562_v51, %v1566_v42  ;;  %v4534_v4 = vsel %vm2382_vm4, %v4531_v32, %v4533_v45  ;;  %v1570_v2 = vor.u32 %v1568_v48, %v1566_v42  ;;  %v4536_v3 = vsel %vm2382_vm4, %v4533_v45, %v4535_v49 }
  0x6e   : > { %8908 = vmatmul.mubr.bf16.gmra.mrb[4].mxu0 %v4522_v22  ;;  %831 = vst [vmem:[#allocation2 + $0xb4] sm:$0xf] %v7609_v24  ;;  %832 = vst [vmem:[#allocation2 + $0xb8] sm:$0xf] %v7610_v25  ;;  %v1574_v0 = vrot.slane %v1572_v47, 1  ;;  %v1582_v6 = vrot.slane %v1580_v62, 1  ;;  %v8167_v54 = vunpack.c.l.bf16 %v8263_v12 }
  0x6f   : > { %8911 = vmatprep.mubr.bf16.mxu0 %v4524_v14  ;;  %8956 = vmatpush3.bf16.msra.mxu0 %v9611_v63  ;;  %v9644_v63 = vld [vmem:[%s10821_s3 + $0x1b0] sm:$0xff]   ;;  %v4537_v22 = vrot.slane %v9624_v58, 1  ;;  %v4539_v7 = vrot.slane %v10294_v59, 1  ;;  %v1584_v10 = vshrl.u32 %v9625_v43, 16  ;;  %v1588_v14 = vshll.u32 %v9629_v1, 16  ;;  %v10313_v25 = vld [vmem:[#allocation2 + $0x84] sm:$0xff]  }
  0x70   : > { %8957 = vmatprep.subr.bf16.mxu0 %v9619_v9  ;;  %v9612_v31 = vld [vmem:[#allocation2 + $0xa8] sm:$0xff]   ;;  %v1578_v5 = vor.u32 %v1576_v60, %v1574_v0  ;;  %v1575_v11 = vsel %vm1555_vm3, %v1570_v2, %v1574_v0  ;;  %v1596_v8 = vshll.u32 %v9631_v57, 16  ;;  %v345_v26 = vmul.f32 %v10193_v18, %v8167_v54  ;;  %v10318_v30 = vld [vmem:[#allocation2 + $0x38] sm:$0xff]   ;;  %v9639_v51 = vld [vmem:[#allocation2 + $0x40] sm:$0xff]  }
  0x71   : > { %v1590_v23 = vrot.slane %v1588_v14, 1  ;;  %v1586_v24 = vor.u32 %v1584_v10, %v1582_v6  ;;  %v1604_v32 = vshll.u32 %v9633_v16, 16  ;;  %v4543_v37 = vrot.slane %v10313_v25, 1  ;;  %v10338_v48 = vld [vmem:[#allocation2 + $0x94] sm:$0xff]  }
  0x72   : > { %v1583_v13 = vsel %vm1555_vm3, %v1578_v5, %v1582_v6  ;;  %v1598_v29 = vrot.slane %v1596_v8, 1  ;;  %v1608_v41 = vshrl.u32 %v9633_v16, 16  ;;  %v1620_v2 = vshll.u32 %v9639_v51, 16 }
  0x73   : > { %8958 = vmatpush3.bf16.msra.mxu0 %v9619_v9  ;;  %v1592_v9 = vshrl.u32 %v9629_v1, 16  ;;  %v1591_v35 = vsel %vm1555_vm3, %v1586_v24, %v1590_v23  ;;  %v1606_v42 = vrot.slane %v1604_v32, 1  ;;  %v1616_v5 = vshrl.u32 %v10318_v30, 16 }
  0x74   : > { %8620 = vmatmul.mubr.bf16.gmra.mrb[36].mxu1 %v9606_v19  ;;  %8959 = vmatprep.subr.bf16.mxu0 %v9628_v17  ;;  %v4538_v19 = vsel %vm2382_vm4, %v4535_v49, %v4537_v22  ;;  %v10340_v49 = vld [vmem:[#allocation2 + $0x48] sm:$0xff]   ;;  %v1624_v10 = vshrl.u32 %v9639_v51, 16 }
  0x75   : > { %8623 = vmatprep.mubr.bf16.mxu1 %v9608_v20  ;;  %v9614_v40 = vld [vmem:[#allocation2 + $0xb0] sm:$0xff]   ;;  %v9616_v44 = vld [vmem:[#allocation2 + $0xb8] sm:$0xff]   ;;  %v1594_v28 = vor.u32 %v1592_v9, %v1590_v23  ;;  %v1610_v62 = vor.u32 %v1608_v41, %v1606_v42  ;;  %v1628_v14 = vshll.u32 %v10340_v49, 16  ;;  %v1632_v25 = vshrl.u32 %v10340_v49, 16 }
  0x76   : > { %8912 = vmatmul.mubr.bf16.gmra.mrb[8].mxu0 %v4526_v53  ;;  %v9652_v20 = vld [vmem:[%s10821_s3 + $0x1b8] sm:$0xff]   ;;  %v9645_v9 = vld [vmem:[#allocation2 + $0x50] sm:$0xff]  }
  0x77   : > { %8915 = vmatprep.mubr.bf16.mxu0 %v4528_v27  ;;  %8960 = vmatpush3.bf16.msra.mxu0 %v9628_v17  ;;  %v8168_v17 = vunpack.c.h.bf16 %v8263_v12  ;;  %v4540_v27 = vsel %vm2382_vm4, %v4537_v22, %v4539_v7  ;;  %v1630_v50 = vrot.slane %v1628_v14, 1  ;;  %v9657_v49 = vld [vmem:[#allocation2 + $0x78] sm:$0xff]  }
  0x78   : > { %8961 = vmatprep.subr.bf16.mxu0 %v9636_v34 }
  0x79   : > { %v346_v53 = vmul.f32 %v10193_v18, %v8168_v17  ;;  %v4541_v18 = vrot.slane %v9630_v52, 1  ;;  %v9643_v17 = vld [vmem:[#allocation2 + $0xa4] sm:$0xff]  }
  0x7b   : > { %8962 = vmatpush3.bf16.msra.mxu0 %v9636_v34  ;;  %v385_v33 = vadd.f32 %v10213_v61, %v346_v53  ;;  %v1600_v34 = vshrl.u32 %v9631_v57, 16  ;;  %v4542_v47 = vsel %vm2382_vm4, %v4539_v7, %v4541_v18  ;;  %v4544_v60 = vsel %vm2382_vm4, %v4541_v18, %v4543_v37  ;;  %v9640_v7 = vld [vmem:[#allocation2 + $0x9c] sm:$0xff]  }
  0x7c   : > { %8624 = vmatmul.mubr.bf16.gmra.mrb[40].mxu1 %v9612_v31  ;;  %8963 = vmatprep.subr.bf16.mxu0 %v9644_v63  ;;  %v9642_v31 = vld [vmem:[%s10821_s3 + $0x90] sm:$0xff]   ;;  %v4549_v24 = vrot.slane %v9640_v7, 1  ;;  %v1676_v7 = vshll.u32 %v9657_v49, 16 }
  0x7d   : > { %8627 = vmatprep.mubr.bf16.mxu1 %v9614_v40  ;;  %v417_v39 = vmax.f32 %v385_v33, 0.0  ;;  %v1599_v40 = vsel %vm1555_vm3, %v1594_v28, %v1598_v29  ;;  %v1602_v45 = vor.u32 %v1600_v34, %v1598_v29  ;;  %v4551_v28 = vrot.slane %v9643_v17, 1  ;;  %v9674_v33 = vld [vmem:[%s10821_s3 + $0xb0] sm:$0xff]  }
  0x7e   : > { %8916 = vmatmul.mubr.bf16.gmra.mrb[12].mxu0 %v4530_v36  ;;  %v9634_v36 = vld [vmem:[#allocation2 + $0x8c] sm:$0xff]   ;;  %v1640_v29 = vshrl.u32 %v9645_v9, 16  ;;  %v1634_v34 = vor.u32 %v1632_v25, %v1630_v50 }
  0x7f   : > { %8919 = vmatprep.mubr.bf16.mxu0 %v4532_v21  ;;  %8964 = vmatpush3.bf16.msra.mxu0 %v9644_v63  ;;  %v1612_v21 = vshll.u32 %v10318_v30, 16  ;;  %v9658_v63 = vld [vmem:[%s10821_s3 + $0xa0] sm:$0xff]   ;;  %v1607_v1 = vsel %vm1555_vm3, %v1602_v45, %v1606_v42 }
  0x80   : > { %8965 = vmatprep.subr.bf16.mxu0 %v9652_v20 }
  0x81   : > { %v1614_v59 = vrot.slane %v1612_v21, 1 }
  0x83   : > { %8966 = vmatpush3.bf16.msra.mxu0 %v9652_v20  ;;  %v1615_v22 = vsel %vm1555_vm3, %v1610_v62, %v1614_v59  ;;  %v1618_v54 = vor.u32 %v1616_v5, %v1614_v59  ;;  %v9647_v20 = vld [vmem:[#allocation2 + $0x58] sm:$0xff]  }
  0x84   : > { %8628 = vmatmul.mubr.bf16.gmra.mrb[44].mxu1 %v9616_v44  ;;  %v10335_v44 = vld [vmem:[%s10821_s3 + $0x1c0] sm:$0xff]   ;;  %v1644_v30 = vshll.u32 %v9647_v20, 16  ;;  %v1648_v51 = vshrl.u32 %v9647_v20, 16 }
  0x85   : > { %8647 = vmatprep.mubr.bf16.mxu1 %v1567_v56  ;;  %9015 = vmatprep.subr.bf16.mxu0 %v10335_v44 }
  0x86   : > { %8920 = vmatmul.mubr.bf16.gmra.mrb[16].mxu0 %v4534_v4  ;;  %v4545_v4 = vrot.slane %v9634_v36, 1 }
  0x87   : > { %8923 = vmatprep.mubr.bf16.mxu0 %v4536_v3  ;;  %v4547_v3 = vrot.slane %v10338_v48, 1  ;;  %v9655_v48 = vld [vmem:[#allocation2 + $0x70] sm:$0xff]  }
  0x88   : > { %v4546_v16 = vsel %vm2382_vm4, %v4543_v37, %v4545_v4  ;;  %v4552_v37 = vsel %vm2382_vm4, %v4549_v24, %v4551_v28 }
  0x89   : > { %v4550_v18 = vsel %vm2382_vm4, %v4547_v3, %v4549_v24 }
  0x8c   : > { %8648 = vmatmul.mubr.bf16.vlgmr.msra.gmra.mrb[0].mxu1 %v1575_v11 }
  0x8d   : > { %8651 = vmatprep.mubr.bf16.mxu1 %v1583_v13  ;;  %8696 = vmatpush3.bf16.msra.mxu1 %v10260_v55  ;;  %v384_v55 = vadd.f32 %v10213_v61, %v345_v26  ;;  %v9651_v61 = vld [vmem:[%s10821_s3 + $0x98] sm:$0xff]   ;;  %v1622_v13 = vrot.slane %v1620_v2, 1  ;;  %v1636_v26 = vshll.u32 %v9645_v9, 16  ;;  %v1668_v2 = vshll.u32 %v9655_v48, 16 }
  0x8e   : > { %8697 = vmatprep.subr.bf16.mxu1 %v9635_v15  ;;  %8924 = vmatmul.mubr.bf16.gmra.mrb[20].mxu0 %v4538_v19  ;;  %v4548_v19 = vsel %vm2382_vm4, %v4545_v4, %v4547_v3 }
  0x8f   : > { %8927 = vmatprep.mubr.bf16.mxu0 %v4540_v27  ;;  %v416_v38 = vmax.f32 %v384_v55, 0.0  ;;  %v1626_v23 = vor.u32 %v1624_v10, %v1622_v13  ;;  %v1623_v53 = vsel %vm1555_vm3, %v1618_v54, %v1622_v13  ;;  %v1638_v32 = vrot.slane %v1636_v26, 1  ;;  %v9649_v55 = vld [vmem:[#allocation2 + $0x60] sm:$0xff]   ;;  %v9656_v10 = vld [vmem:[#allocation2 + $0xcc] ss:$0 sps:$4 sm:$0x11]  }
  0x90   : > { %v1652_v36 = vshll.u32 %v9649_v55, 16  ;;  %v1670_v14 = vrot.slane %v1668_v2, 1  ;;  %v9665_v26 = vld [vmem:[#allocation2 + $0x90] sm:$0xff]  }
  0x91   : > { %8698 = vmatpush3.bf16.msra.mxu1 %v9635_v15  ;;  %v433_v43 = vpack.c.bf16 %v417_v39, %v416_v38  ;;  %v9667_v15 = vld [vmem:[%s10821_s3 + $0xa8] sm:$0xff]   ;;  %v1631_v27 = vsel %vm1555_vm3, %v1626_v23, %v1630_v50  ;;  %v1642_v38 = vor.u32 %v1640_v29, %v1638_v32  ;;  %v1646_v39 = vrot.slane %v1644_v30, 1 }
  0x92   : > { %8699 = vmatprep.subr.bf16.mxu1 %v9642_v31  ;;  %v1639_v41 = vsel %vm1555_vm3, %v1634_v34, %v1638_v32  ;;  %v1680_v23 = vshrl.u32 %v9657_v49, 16  ;;  %v1700_v32 = vshll.u32 %v9665_v26, 16 }
  0x93   : > { %v540_v56 = vshrl.u32 %v433_v43, 16  ;;  %v543_v58 = vshll.u32 %v433_v43, 16  ;;  %v1656_v43 = vshrl.u32 %v9649_v55, 16 }
  0x94   : > { %8652 = vmatmul.mubr.bf16.gmra.mrb[4].mxu1 %v1591_v35  ;;  %v9648_v35 = vld [vmem:[#allocation2 + $0xb4] sm:$0xff]  }
  0x95   : > { %8655 = vmatprep.mubr.bf16.mxu1 %v1599_v40  ;;  %8700 = vmatpush3.bf16.msra.mxu1 %v9642_v31  ;;  %v542_v0 = vrot.slane %v540_v56, 7  ;;  %v9646_v31 = vld [vmem:[#allocation2 + $0xac] sm:$0xff]   ;;  %v4555_v42 = vrot.slane %v9648_v35, 1  ;;  %v1704_v35 = vshrl.u32 %v9665_v26, 16 }
  0x96   : > { %8701 = vmatprep.subr.bf16.mxu1 %v9651_v61  ;;  %8928 = vmatmul.mubr.bf16.gmra.mrb[24].mxu0 %v4542_v47  ;;  %v9653_v40 = vld [vmem:[#allocation2 + $0x68] sm:$0xff]   ;;  %v4553_v21 = vrot.slane %v9646_v31, 1  ;;  %v1654_v47 = vrot.slane %v1652_v36, 1  ;;  %v9669_v31 = vld [vmem:[#allocation2 + $0x98] sm:$0xff]  }
  0x97   : > { %8931 = vmatprep.mubr.bf16.mxu0 %v4544_v60  ;;  %v545_v6 = vor.u32 %v543_v58, %v542_v0  ;;  %v612_v57 = vsel %vm9975_vm2, %v542_v0, 0  ;;  %v1660_v45 = vshll.u32 %v9653_v40, 16  ;;  %v1650_v58 = vor.u32 %v1648_v51, %v1646_v39 }
  0x98   : > { %v7614_v11 = vcombine.low %v612_v57, %v612_v57  ;;  %v4554_v56 = vsel %vm2382_vm4, %v4551_v28, %v4553_v21  ;;  %v4556_v62 = vsel %vm2382_vm4, %v4553_v21, %v4555_v42  ;;  %v1658_v59 = vor.u32 %v1656_v43, %v1654_v47 }
  0x99   : > { %8702 = vmatpush3.bf16.msra.mxu1 %v9651_v61  ;;  %v596_v12 = vsel %vm9975_vm2, 0, %v545_v6  ;;  %v1647_v61 = vsel %vm1555_vm3, %v1642_v38, %v1646_v39  ;;  %v1664_v4 = vshrl.u32 %v9653_v40, 16  ;;  %v1655_v3 = vsel %vm1555_vm3, %v1650_v58, %v1654_v47  ;;  %v9664_v38 = vld [vmem:[#allocation2 + $0x28] sm:$0xff]   ;;  %v9671_v40 = vld [vmem:[#allocation2 + $0xa0] sm:$0xff]   ;;  %v9676_v58 = vld [vmem:[%s10821_s3 + $0x1d0] sm:$0xff]  }
  0x9a   : > { %8703 = vmatprep.subr.bf16.mxu1 %v9658_v63  ;;  %v7612_v52 = vcombine.low %v596_v12, %v596_v12  ;;  %v7613_v8 = vcombine.high %v596_v12, %v596_v12  ;;  %836 = vst [vmem:[#allocation2 + $0xc8] sm:$0xf] %v7614_v11  ;;  %v1672_v6 = vshrl.u32 %v9655_v48, 16  ;;  %v9661_v11 = vld [vmem:[#allocation2 + $0x80] sm:$0xff]   ;;  %v1702_v39 = vrot.slane %v1700_v32, 1  ;;  %v9666_v48 = vld [vmem:[#allocation2 + $0x30] sm:$0xff]  }
  0x9b   : > { %v1684_v54 = vshll.u32 %v9661_v11, 16  ;;  %v1688_v20 = vshrl.u32 %v9661_v11, 16  ;;  %v1720_v47 = vshrl.u32 %v9671_v40, 16  ;;  %v9690_v32 = vld [vmem:[#allocation2 + $0x18] sm:$0xff]  }
  0x9c   : > { %8656 = vmatmul.mubr.bf16.gmra.mrb[8].mxu1 %v1607_v1  ;;  %834 = vst [vmem:[#allocation2 + $0xc0] sm:$0xf] %v7612_v52  ;;  %835 = vst [vmem:[#allocation2 + $0xc4] sm:$0xf] %v7613_v8  ;;  %v9683_v1 = vld [vmem:[%s10821_s3 + $0xb8] sm:$0xff]   ;;  %v1674_v52 = vor.u32 %v1672_v6, %v1670_v14  ;;  %v1678_v8 = vrot.slane %v1676_v7, 1  ;;  %v1706_v21 = vor.u32 %v1704_v35, %v1702_v39 }
  0x9d   : > { %8659 = vmatprep.mubr.bf16.mxu1 %v1615_v22  ;;  %8704 = vmatpush3.bf16.msra.mxu1 %v9658_v63  ;;  %v1662_v63 = vrot.slane %v1660_v45, 1  ;;  %v1686_v25 = vrot.slane %v1684_v54, 1  ;;  %v1712_v45 = vshrl.u32 %v9669_v31, 16 }
  0x9e   : > { %8705 = vmatprep.subr.bf16.mxu1 %v9667_v15  ;;  %8932 = vmatmul.mubr.bf16.gmra.mrb[28].mxu0 %v4546_v16  ;;  %v10383_v16 = vld [vmem:[%s10821_s3 + $0xc0] sm:$0xff]   ;;  %v1679_v50 = vsel %vm1555_vm3, %v1674_v52, %v1678_v8  ;;  %v1682_v28 = vor.u32 %v1680_v23, %v1678_v8  ;;  %v9701_v8 = vld [vmem:[%s10821_s3 + $0x1e8] sm:$0xff]  }
  0x9f   : > { %8935 = vmatprep.mubr.bf16.mxu0 %v4548_v19  ;;  %v1663_v57 = vsel %vm1555_vm3, %v1658_v59, %v1662_v63  ;;  %v1666_v12 = vor.u32 %v1664_v4, %v1662_v63  ;;  %v4561_v19 = vrot.slane %v9656_v10, 1  ;;  %v1690_v29 = vor.u32 %v1688_v20, %v1686_v25  ;;  %v9677_v59 = vld [vmem:[#allocation2 + $0xb0] sm:$0xff]   ;;  %v9679_v63 = vld [vmem:[#allocation2 + $0xb8] sm:$0xff]   ;;  %v9693_v10 = vld [vmem:[%s10821_s3 + $0x1e0] sm:$0xff]  }
  0xa0   : > { %v1687_v55 = vsel %vm1555_vm3, %v1682_v28, %v1686_v25  ;;  %v9684_v4 = vld [vmem:[%s10821_s3 + $0x1d8] sm:$0xff]   ;;  %v1732_v2 = vshll.u32 %v9677_v59, 16  ;;  %v1736_v6 = vshrl.u32 %v9677_v59, 16  ;;  %v9709_v20 = vld [vmem:[%s10821_s3 + $0x1f0] sm:$0xff]   ;;  %v9723_v59 = vld [vmem:[%s10821_s3 + $0xe0] sm:$0xff]  }
  0xa1   : > { %8706 = vmatpush3.bf16.msra.mxu1 %v9667_v15  ;;  %v9663_v15 = vld [vmem:[#allocation2 + $0x88] sm:$0xff]   ;;  %v1671_v17 = vsel %vm1555_vm3, %v1666_v12, %v1670_v14  ;;  %v9672_v14 = vld [vmem:[#allocation2 + $0x40] sm:$0xff]   ;;  %v9680_v25 = vld [vmem:[#allocation2 + $0x58] sm:$0xff]  }
  0xa2   : > { %8707 = vmatprep.subr.bf16.mxu1 %v9674_v33  ;;  %v1692_v24 = vshll.u32 %v9663_v15, 16  ;;  %v1734_v11 = vrot.slane %v1732_v2, 1  ;;  %v9699_v2 = vld [vmem:[#allocation2 + $0x90] sm:$0xff]  }
  0xa3   : > { %v9650_v60 = vld [vmem:[#allocation2 + $0xbc] sm:$0xff]   ;;  %v9654_v0 = vld [vmem:[#allocation2 + $0xc4] sm:$0xff]  }
  0xa4   : > { %8660 = vmatmul.mubr.bf16.gmra.mrb[12].mxu1 %v1623_v53  ;;  %v4557_v5 = vrot.slane %v9650_v60, 1  ;;  %v4559_v22 = vrot.slane %v9654_v0, 1  ;;  %v1694_v30 = vrot.slane %v1692_v24, 1  ;;  %v9670_v60 = vld [vmem:[#allocation2 + $0x38] sm:$0xff]   ;;  %v9678_v24 = vld [vmem:[#allocation2 + $0x50] sm:$0xff]  }
  0xa5   : > { %8663 = vmatprep.mubr.bf16.mxu1 %v1631_v27  ;;  %8708 = vmatpush3.bf16.msra.mxu1 %v9674_v33  ;;  %v9659_v27 = vld [vmem:[#allocation2 + $0x18] sm:$0xff]   ;;  %v1696_v33 = vshrl.u32 %v9663_v15, 16  ;;  %v9681_v7 = vld [vmem:[#allocation2 + $0xc0] ss:$0 sps:$4 sm:$0x11]   ;;  %v1744_v15 = vshrl.u32 %v9679_v63, 16 }
  0xa6   : > { %8936 = vmatmul.mubr.bf16.gmra.mrb[32].mxu0 %v4550_v18  ;;  %8709 = vmatprep.subr.bf16.mxu1 %v9683_v1  ;;  %v4558_v9 = vsel %vm2382_vm4, %v4555_v42, %v4557_v5  ;;  %v4560_v13 = vsel %vm2382_vm4, %v4557_v5, %v4559_v22  ;;  %v4562_v53 = vsel %vm2382_vm4, %v4559_v22, %v4561_v19  ;;  %v9662_v18 = vld [vmem:[#allocation2 + $0x20] sm:$0xff]   ;;  %v1716_v42 = vshll.u32 %v9671_v40, 16  ;;  %v9696_v40 = vld [vmem:[#allocation2 + $0x28] sm:$0xff]  }
  0xa7   : > { %8939 = vmatprep.mubr.bf16.mxu0 %v4552_v37  ;;  %v1695_v34 = vsel %vm1555_vm3, %v1690_v29, %v1694_v30  ;;  %v1708_v37 = vshll.u32 %v9669_v31, 16  ;;  %v1698_v36 = vor.u32 %v1696_v33, %v1694_v30  ;;  %v1740_v22 = vshll.u32 %v9679_v63, 16  ;;  %v9685_v19 = vld [vmem:[#allocation2] sm:$0xfe]   ;;  %v9717_v29 = vld [vmem:[%s10821_s3 + $0x1f8] sm:$0xff]   ;;  %v9688_v31 = vld [vmem:[#allocation2 + $0x10] sm:$0xff]  }
  0xa8   : > { %v1748_v54 = vshll.u32 %v9681_v7, 16  ;;  %v10424_v33 = vld [vmem:[%s10821_s3 + $0x200] sm:$0xff]   ;;  %v2386_v35 = vrot.slane %v9688_v31, 1 }
  0xa9   : > { %8710 = vmatpush3.bf16.msra.mxu1 %v9683_v1  ;;  %v1710_v51 = vrot.slane %v1708_v37, 1  ;;  %v1703_v43 = vsel %vm1555_vm3, %v1698_v36, %v1702_v39  ;;  %v1742_v52 = vrot.slane %v1740_v22, 1  ;;  %v2388_v37 = vrot.slane %v9690_v32, 1  ;;  %v9710_v22 = vld [vmem:[#allocation2 + $0x50] sm:$0xff]   ;;  %v9715_v31 = vld [vmem:[#allocation2 + $0xc0] sm:$0xff]   ;;  %v9719_v32 = vld [vmem:[#allocation2 + $0xc8] sm:$0xff]  }
  0xaa   : > { %8759 = vmatprep.subr.bf16.mxu1 %v10383_v16 }
  0xab   : > { %v1711_v49 = vsel %vm1555_vm3, %v1706_v21, %v1710_v51  ;;  %v1746_v26 = vor.u32 %v1744_v15, %v1742_v52  ;;  %v2389_v36 = vsel %vm2382_vm4, %v2386_v35, %v2388_v37  ;;  %v9689_v21 = vld [vmem:[#allocation2 + $0x70] sm:$0xff]  }
  0xac   : > { %8664 = vmatmul.mubr.bf16.gmra.mrb[16].mxu1 %v1639_v41  ;;  %v9668_v41 = vld [vmem:[%s10821_s3 + $0x1c8] sm:$0xff]  }
  0xad   : > { %8667 = vmatprep.mubr.bf16.mxu1 %v1647_v61  ;;  %v9673_v61 = vld [vmem:[#allocation2 + $0xa8] sm:$0xff]  }
  0xae   : > { %8940 = vmatmul.mubr.bf16.gmra.mrb[36].mxu0 %v4554_v56  ;;  %v1724_v56 = vshll.u32 %v9673_v61, 16  ;;  %v1728_v5 = vshrl.u32 %v9673_v61, 16 }
  0xaf   : > { %8943 = vmatprep.mubr.bf16.mxu0 %v4556_v62  ;;  %v1718_v62 = vrot.slane %v1716_v42, 1  ;;  %v2392_v42 = vrot.slane %v9696_v40, 1  ;;  %v9729_v40 = vld [vmem:[#allocation2 + $0x88] sm:$0xff]  }
  0xb0   : > { %v1726_v1 = vrot.slane %v1724_v56, 1  ;;  %v9695_v56 = vld [vmem:[#allocation2 + $0x80] sm:$0xff]  }
  0xb1   : > { %v1722_v0 = vor.u32 %v1720_v47, %v1718_v62  ;;  %v9698_v47 = vld [vmem:[#allocation2 + $0x30] sm:$0xff]  }
  0xb2   : > { %v1730_v12 = vor.u32 %v1728_v5, %v1726_v1 }
  0xb4   : > { %8668 = vmatmul.mubr.bf16.gmra.mrb[20].mxu1 %v1655_v3 }
  0xb5   : > { %8671 = vmatprep.mubr.bf16.mxu1 %v1663_v57  ;;  %v1727_v57 = vsel %vm1555_vm3, %v1722_v0, %v1726_v1  ;;  %v9706_v0 = vld [vmem:[#allocation2 + $0x48] sm:$0xff]  }
  0xb6   : > { %8944 = vmatmul.mubr.bf16.gmra.mrb[40].mxu0 %v4558_v9  ;;  %v9675_v9 = vld [vmem:[#allocation2 + $0x48] sm:$0xff]  }
  0xb7   : > { %8947 = vmatprep.mubr.bf16.mxu0 %v4560_v13  ;;  %v1738_v13 = vor.u32 %v1736_v6, %v1734_v11  ;;  %v9733_v1 = vld [vmem:[%s10821_s3 + $0xe8] sm:$0xff]   ;;  %v2400_v6 = vrot.slane %v9706_v0, 1 }
  0xb9   : > { %v1743_v23 = vsel %vm1555_vm3, %v1738_v13, %v1742_v52  ;;  %v2402_v13 = vrot.slane %v9710_v22, 1 }
  0xbb   : > { %v2403_v15 = vsel %vm2382_vm4, %v2400_v6, %v2402_v13 }
  0xbc   : > { %8672 = vmatmul.mubr.bf16.gmra.mrb[24].mxu1 %v1671_v17  ;;  %v1735_v17 = vsel %vm1555_vm3, %v1730_v12, %v1734_v11  ;;  %v9749_v11 = vld [vmem:[%s10821_s3 + $0xf8] sm:$0xff]   ;;  %v9708_v12 = vld [vmem:[#allocation2 + $0xa8] sm:$0xff]  }
  0xbd   : > { %8675 = vmatprep.mubr.bf16.mxu1 %v1679_v50  ;;  %v9686_v50 = vld [vmem:[#allocation2 + $0x8] sm:$0xff]  }
  0xbe   : > { %8948 = vmatmul.mubr.bf16.gmra.mrb[44].mxu0 %v4562_v53  ;;  %v1750_v53 = vrot.slane %v1748_v54, 1  ;;  %v2384_v28 = vrot.slane %v9686_v50, 1  ;;  %v9713_v50 = vld [vmem:[#allocation2 + $0xb8] sm:$0xff]  }
  0xbf   : > { %8967 = vmatprep.mubr.bf16.mxu0 %v9659_v27  ;;  %v2383_v27 = vrot.slane %v9685_v19, 1  ;;  %v10462_v19 = vld [vmem:[%s10821_s3 + $0x100] sm:$0xff]  }
  0xc0   : > { %v1751_v30 = vsel %vm1555_vm3, %v1746_v26, %v1750_v53  ;;  %v2387_v39 = vsel %vm2382_vm4, %v2384_v28, %v2386_v35  ;;  %v9720_v26 = vld [vmem:[#allocation2 + $0x70] sm:$0xff]  }
  0xc4   : > { %8676 = vmatmul.mubr.bf16.gmra.mrb[28].mxu1 %v1687_v55  ;;  %v2385_v55 = vsel %vm2382_vm4, %v2383_v27, %v2384_v28  ;;  %v9722_v27 = vld [vmem:[#allocation2 + $0x78] sm:$0xff]  }
  0xc5   : > { %8679 = vmatprep.mubr.bf16.mxu1 %v1695_v34  ;;  %v9687_v34 = vld [vmem:[#allocation2 + $0x68] sm:$0xff]  }
  0xc6   : > { %8968 = vmatmul.mubr.bf16.vlgmr.msra.gmra.mrb[0].mxu0 %v9662_v18  ;;  %v9682_v18 = vld [vmem:[#allocation2 + $0x60] sm:$0xff]  }
  0xc7   : > { %9016 = vmatpush3.bf16.msra.mxu0 %v10335_v44  ;;  %8971 = vmatprep.mubr.bf16.mxu0 %v9664_v38  ;;  %v1714_v44 = vor.u32 %v1712_v45, %v1710_v51  ;;  %v9694_v38 = vld [vmem:[#allocation2 + $0x20] sm:$0xff]   ;;  %v9692_v51 = vld [vmem:[#allocation2 + $0x78] sm:$0xff]  }
  0xc8   : > { %9017 = vmatprep.subr.bf16.mxu0 %v9668_v41  ;;  %v2390_v61 = vrot.slane %v9694_v38, 1  ;;  %v9727_v38 = vld [vmem:[#allocation2 + $0x80] sm:$0xff]  }
  0xc9   : > { %v1719_v3 = vsel %vm1555_vm3, %v1714_v44, %v1718_v62  ;;  %v9704_v44 = vld [vmem:[#allocation2 + $0x40] sm:$0xff]  }
  0xca   : > { %v2391_v45 = vsel %vm2382_vm4, %v2388_v37, %v2390_v61  ;;  %v2398_v5 = vrot.slane %v9704_v44, 1 }
  0xcb   : > { %9018 = vmatpush3.bf16.msra.mxu0 %v9668_v41  ;;  %v9700_v41 = vld [vmem:[%s10821_s3 + $0xc8] sm:$0xff]  }
  0xcc   : > { %8680 = vmatmul.mubr.bf16.gmra.mrb[32].mxu1 %v1703_v43  ;;  %9019 = vmatprep.subr.bf16.mxu0 %v9676_v58  ;;  %v9707_v43 = vld [vmem:[%s10821_s3 + $0xd0] sm:$0xff]  }
  0xcd   : > { %8683 = vmatprep.mubr.bf16.mxu1 %v1711_v49  ;;  %v9702_v49 = vld [vmem:[#allocation2 + $0x38] sm:$0xff]  }
  0xce   : > { %8972 = vmatmul.mubr.bf16.gmra.mrb[4].mxu0 %v9666_v48  ;;  %v2393_v48 = vsel %vm2382_vm4, %v2390_v61, %v2392_v42  ;;  %v2396_v62 = vrot.slane %v9702_v49, 1 }
  0xcf   : > { %8975 = vmatprep.mubr.bf16.mxu0 %v9670_v60  ;;  %9020 = vmatpush3.bf16.msra.mxu0 %v9676_v58  ;;  %v9697_v58 = vld [vmem:[#allocation2 + $0x88] sm:$0xff]   ;;  %v2394_v60 = vrot.slane %v9698_v47, 1 }
  0xd0   : > { %9021 = vmatprep.subr.bf16.mxu0 %v9684_v4  ;;  %v2399_v7 = vsel %vm2382_vm4, %v2396_v62, %v2398_v5 }
  0xd1   : > { %v2395_v63 = vsel %vm2382_vm4, %v2392_v42, %v2394_v60 }
  0xd3   : > { %9022 = vmatpush3.bf16.msra.mxu0 %v9684_v4  ;;  %v2397_v4 = vsel %vm2382_vm4, %v2394_v60, %v2396_v62  ;;  %v9732_v62 = vld [vmem:[#allocation2 + $0x38] sm:$0xff]  }
  0xd4   : > { %8684 = vmatmul.mubr.bf16.gmra.mrb[36].mxu1 %v1719_v3  ;;  %9023 = vmatprep.subr.bf16.mxu0 %v9693_v10  ;;  %v9703_v3 = vld [vmem:[#allocation2 + $0x98] sm:$0xff]  }
  0xd5   : > { %8687 = vmatprep.mubr.bf16.mxu1 %v1727_v57  ;;  %v9740_v57 = vld [vmem:[%s10821_s3 + $0xf0] sm:$0xff]  }
  0xd6   : > { %8976 = vmatmul.mubr.bf16.gmra.mrb[8].mxu0 %v9672_v14  ;;  %v2401_v14 = vsel %vm2382_vm4, %v2398_v5, %v2400_v6  ;;  %v5851_v6 = vshll.u32 %v9732_v62, 16 }
  0xd7   : > { %8979 = vmatprep.mubr.bf16.mxu0 %v9675_v9  ;;  %9024 = vmatpush3.bf16.msra.mxu0 %v9693_v10  ;;  %v9712_v10 = vld [vmem:[#allocation2 + $0x58] sm:$0xff]   ;;  %v9705_v9 = vld [vmem:[#allocation2 + $0xa0] sm:$0xff]  }
  0xd8   : > { %9025 = vmatprep.subr.bf16.mxu0 %v9701_v8  ;;  %v2404_v52 = vrot.slane %v9712_v10, 1  ;;  %v5855_v10 = vshrl.u32 %v9732_v62, 16  ;;  %v9752_v62 = vld [vmem:[#allocation2 + $0x70] sm:$0xff]  }
  0xda   : > { %v2405_v54 = vsel %vm2382_vm4, %v2402_v13, %v2404_v52  ;;  %v5853_v13 = vrot.slane %v5851_v6, 1  ;;  %v5907_v6 = vshll.u32 %v9752_v62, 16 }
  0xdb   : > { %9026 = vmatpush3.bf16.msra.mxu0 %v9701_v8  ;;  %v9714_v8 = vld [vmem:[#allocation2 + $0x60] sm:$0xff]  }
  0xdc   : > { %8688 = vmatmul.mubr.bf16.gmra.mrb[40].mxu1 %v1735_v17  ;;  %9027 = vmatprep.subr.bf16.mxu0 %v9709_v20  ;;  %v9718_v17 = vld [vmem:[#allocation2 + $0x68] sm:$0xff]  }
  0xdd   : > { %8691 = vmatprep.mubr.bf16.mxu1 %v1743_v23  ;;  %v9711_v23 = vld [vmem:[#allocation2 + $0xb0] sm:$0xff]  }
  0xde   : > { %8980 = vmatmul.mubr.bf16.gmra.mrb[12].mxu0 %v9678_v24  ;;  %v2408_v24 = vrot.slane %v9718_v17, 1 }
  0xdf   : > { %8983 = vmatprep.mubr.bf16.mxu0 %v9680_v25  ;;  %9028 = vmatpush3.bf16.msra.mxu0 %v9709_v20  ;;  %v2406_v20 = vrot.slane %v9714_v8, 1  ;;  %v9724_v25 = vld [vmem:[#allocation2 + $0x18] sm:$0xff]  }
  0xe0   : > { %9029 = vmatprep.subr.bf16.mxu0 %v9717_v29 }
  0xe1   : > { %v2407_v53 = vsel %vm2382_vm4, %v2404_v52, %v2406_v20  ;;  %v2409_v28 = vsel %vm2382_vm4, %v2406_v20, %v2408_v24  ;;  %v9739_v52 = vld [vmem:[#allocation2 + $0xa8] sm:$0xff]   ;;  %v9742_v20 = vld [vmem:[%s10821_s3 + $0x210] sm:$0xff]  }
  0xe3   : > { %9030 = vmatpush3.bf16.msra.mxu0 %v9717_v29  ;;  %v9725_v29 = vld [vmem:[#allocation2 + $0x20] sm:$0xff]  }
  0xe4   : > { %8692 = vmatmul.mubr.bf16.gmra.mrb[44].mxu1 %v1751_v30  ;;  %9079 = vmatprep.subr.bf16.mxu0 %v10424_v33  ;;  %v5822_v30 = vshll.u32 %v9724_v25, 16  ;;  %v5827_v37 = vshll.u32 %v9725_v29, 16 }
  0xe5   : > { %8711 = vmatprep.mubr.bf16.mxu1 %v2385_v55  ;;  %v2410_v55 = vrot.slane %v9720_v26, 1 }
  0xe6   : > { %8984 = vmatmul.mubr.bf16.gmra.mrb[16].mxu0 %v9682_v18  ;;  %v2412_v18 = vrot.slane %v9722_v27, 1  ;;  %v5824_v35 = vrot.slane %v5822_v30, 1  ;;  %v5829_v42 = vrot.slane %v5827_v37, 1  ;;  %v9750_v30 = vld [vmem:[%s10821_s3 + $0x218] sm:$0xff]   ;;  %v9746_v37 = vld [vmem:[#allocation2 + $0x60] sm:$0xff]  }
  0xe7   : > { %8987 = vmatprep.mubr.bf16.mxu0 %v9687_v34  ;;  %v5820_v34 = vshrl.u32 %v9724_v25, 16 }
  0xe9   : > { %v5825_v61 = vor.u32 %v5824_v35, %v5820_v34  ;;  %v9745_v35 = vld [vmem:[#allocation2 + $0xb8] sm:$0xff]  }
  0xec   : > { %8712 = vmatmul.mubr.bf16.vlgmr.msra.gmra.mrb[0].mxu1 %v2387_v39  ;;  %v9728_v39 = vld [vmem:[#allocation2 + $0x28] sm:$0xff]  }
  0xed   : > { %8715 = vmatprep.mubr.bf16.mxu1 %v2389_v36  ;;  %8760 = vmatpush3.bf16.msra.mxu1 %v10383_v16  ;;  %v9716_v16 = vld [vmem:[%s10821_s3 + $0xd8] sm:$0xff]   ;;  %v2411_v36 = vsel %vm2382_vm4, %v2408_v24, %v2410_v55  ;;  %v5835_v47 = vshll.u32 %v9728_v39, 16  ;;  %v5839_v49 = vshrl.u32 %v9728_v39, 16 }
  0xee   : > { %8761 = vmatprep.subr.bf16.mxu1 %v9700_v41  ;;  %8988 = vmatmul.mubr.bf16.gmra.mrb[20].mxu0 %v9689_v21  ;;  %v9721_v21 = vld [vmem:[#allocation2 + $0xd0] sm:$0xff]  }
  0xef   : > { %8991 = vmatprep.mubr.bf16.mxu0 %v9692_v51  ;;  %v2413_v51 = vsel %vm2382_vm4, %v2410_v55, %v2412_v18  ;;  %v5837_v60 = vrot.slane %v5835_v47, 1  ;;  %v9744_v55 = vld [vmem:[#allocation2 + $0x58] sm:$0xff]  }
  0xf1   : > { %8762 = vmatpush3.bf16.msra.mxu1 %v9700_v41  ;;  %v9730_v41 = vld [vmem:[#allocation2 + $0x30] sm:$0xff]  }
  0xf2   : > { %8763 = vmatprep.subr.bf16.mxu1 %v9707_v43  ;;  %v5847_v5 = vshrl.u32 %v9730_v41, 16 }
  0xf4   : > { %8716 = vmatmul.mubr.bf16.gmra.mrb[4].mxu1 %v2391_v45  ;;  %v2414_v45 = vrot.slane %v9727_v38, 1 }
  0xf5   : > { %8719 = vmatprep.mubr.bf16.mxu1 %v2393_v48  ;;  %8764 = vmatpush3.bf16.msra.mxu1 %v9707_v43  ;;  %v5831_v43 = vshrl.u32 %v9725_v29, 16  ;;  %v2416_v48 = vrot.slane %v9729_v40, 1 }
  0xf6   : > { %8765 = vmatprep.subr.bf16.mxu1 %v9716_v16  ;;  %8992 = vmatmul.mubr.bf16.gmra.mrb[24].mxu0 %v9695_v56  ;;  %v5830_v56 = vsel %vm1555_vm3, %v5825_v61, %v5829_v42  ;;  %v2415_v44 = vsel %vm2382_vm4, %v2412_v18, %v2414_v45 }
  0xf7   : > { %8995 = vmatprep.mubr.bf16.mxu0 %v9697_v58  ;;  %v9731_v58 = vld [vmem:[#allocation2 + $0x90] sm:$0xff]   ;;  %v2417_v0 = vsel %vm2382_vm4, %v2414_v45, %v2416_v48  ;;  %v9747_v45 = vld [vmem:[#allocation2 + $0xc0] ss:$0 sps:$4 sm:$0x11]  }
  0xf9   : > { %8766 = vmatpush3.bf16.msra.mxu1 %v9716_v16  ;;  %v5843_v16 = vshll.u32 %v9730_v41, 16 }
  0xfa   : > { %8767 = vmatprep.subr.bf16.mxu1 %v9723_v59 }
  0xfc   : > { %8720 = vmatmul.mubr.bf16.gmra.mrb[8].mxu1 %v2395_v63  ;;  %v9735_v63 = vld [vmem:[#allocation2 + $0x98] sm:$0xff]  }
  0xfd   : > { %8723 = vmatprep.mubr.bf16.mxu1 %v2397_v4  ;;  %8768 = vmatpush3.bf16.msra.mxu1 %v9723_v59  ;;  %v5833_v59 = vor.u32 %v5831_v43, %v5829_v42  ;;  %v5845_v4 = vrot.slane %v5843_v16, 1  ;;  %v2428_v42 = vrot.slane %v9745_v35, 1  ;;  %v5887_v43 = vshrl.u32 %v9744_v55, 16  ;;  %v9748_v16 = vld [vmem:[#allocation2 + $0x68] sm:$0xff]  }
  0xfe   : > { %8769 = vmatprep.subr.bf16.mxu1 %v9733_v1  ;;  %8996 = vmatmul.mubr.bf16.gmra.mrb[28].mxu0 %v9699_v2  ;;  %v9736_v2 = vld [vmem:[#allocation2 + $0x40] sm:$0xff]  }
  0xff   : > { %8999 = vmatprep.mubr.bf16.mxu0 %v9703_v3  ;;  %v2418_v3 = vrot.slane %v9731_v58, 1  ;;  %v5838_v22 = vsel %vm1555_vm3, %v5833_v59, %v5837_v60  ;;  %v5863_v25 = vshrl.u32 %v9736_v2, 16  ;;  %v9758_v35 = vld [vmem:[#allocation2 + $0x24] sm:$0xff]  }
 0x101   : > { %8770 = vmatpush3.bf16.msra.mxu1 %v9733_v1  ;;  %v5841_v1 = vor.u32 %v5839_v49, %v5837_v60  ;;  %v2419_v8 = vsel %vm2382_vm4, %v2416_v48, %v2418_v3  ;;  %v5891_v48 = vshll.u32 %v9746_v37, 16  ;;  %v9764_v49 = vld [vmem:[%s10821_s3 + $0x228] sm:$0xff]  }
 0x102   : > { %8771 = vmatprep.subr.bf16.mxu1 %v9740_v57 }
 0x104   : > { %8724 = vmatmul.mubr.bf16.gmra.mrb[12].mxu1 %v2399_v7  ;;  %v2420_v7 = vrot.slane %v9735_v63, 1  ;;  %v5893_v63 = vrot.slane %v5891_v48, 1  ;;  %v9835_v48 = vld [vmem:[%s10821_s3 + $0x118] sm:$0xff]  }
 0x105   : > { %8727 = vmatprep.mubr.bf16.mxu1 %v2401_v14  ;;  %8772 = vmatpush3.bf16.msra.mxu1 %v9740_v57  ;;  %v9734_v57 = vld [vmem:[%s10821_s3 + $0x208] sm:$0xff]   ;;  %v5846_v14 = vsel %vm1555_vm3, %v5841_v1, %v5845_v4  ;;  %v2430_v1 = vrot.slane %v9747_v45, 1 }
 0x106   : > { %8773 = vmatprep.subr.bf16.mxu1 %v9749_v11  ;;  %9000 = vmatmul.mubr.bf16.gmra.mrb[32].mxu0 %v9705_v9  ;;  %v9737_v9 = vld [vmem:[#allocation2 + $0xa0] sm:$0xff]   ;;  %v2421_v17 = vsel %vm2382_vm4, %v2418_v3, %v2420_v7  ;;  %v5903_v3 = vshrl.u32 %v9748_v16, 16 }
 0x107   : > { %9003 = vmatprep.mubr.bf16.mxu0 %v9708_v12  ;;  %v9738_v12 = vld [vmem:[#allocation2 + $0x48] sm:$0xff]   ;;  %v2422_v24 = vrot.slane %v9737_v9, 1 }
 0x108   : > { %v5867_v26 = vshll.u32 %v9738_v12, 16  ;;  %v5871_v27 = vshrl.u32 %v9738_v12, 16  ;;  %v9751_v9 = vld [vmem:[#allocation2 + $0xc] sm:$0xff]  }
 0x109   : > { %8774 = vmatpush3.bf16.msra.mxu1 %v9749_v11  ;;  %v5859_v11 = vshll.u32 %v9736_v2, 16  ;;  %v2423_v18 = vsel %vm2382_vm4, %v2420_v7, %v2422_v24  ;;  %v5899_v2 = vshll.u32 %v9748_v16, 16  ;;  %v9754_v7 = vld [vmem:[#allocation2 + $0x78] sm:$0xff]  }
 0x10a   : > { %9143 = vmatprep.subr.bf16.mxu1 %v10462_v19 }
 0x10c   : > { %8728 = vmatmul.mubr.bf16.gmra.mrb[16].mxu1 %v2403_v15  ;;  %v5849_v15 = vor.u32 %v5847_v5, %v5845_v4  ;;  %v5895_v4 = vshrl.u32 %v9746_v37, 16 }
 0x10d   : > { %8731 = vmatprep.mubr.bf16.mxu1 %v2405_v54  ;;  %v9741_v54 = vld [vmem:[#allocation2 + $0x50] sm:$0xff]  }
 0x10e   : > { %9004 = vmatmul.mubr.bf16.gmra.mrb[36].mxu0 %v9711_v23  ;;  %v5857_v23 = vor.u32 %v5855_v10, %v5853_v13  ;;  %v5875_v29 = vshll.u32 %v9741_v54, 16  ;;  %v5901_v10 = vrot.slane %v5899_v2, 1 }
 0x10f   : > { %9007 = vmatprep.mubr.bf16.mxu0 %v9713_v50  ;;  %v5861_v50 = vrot.slane %v5859_v11, 1  ;;  %v5897_v11 = vor.u32 %v5895_v4, %v5893_v63 }
 0x110   : > { %v5877_v40 = vrot.slane %v5875_v29, 1  ;;  %v5905_v12 = vor.u32 %v5903_v3, %v5901_v10 }
 0x111   : > { %v5865_v34 = vor.u32 %v5863_v25, %v5861_v50  ;;  %v9759_v25 = vld [vmem:[#allocation2 + $0x88] sm:$0xff]  }
 0x112   : > { %v5931_v29 = vshll.u32 %v9759_v25, 16 }
 0x114   : > { %8732 = vmatmul.mubr.bf16.gmra.mrb[20].mxu1 %v2407_v53  ;;  %v2424_v53 = vrot.slane %v9739_v52, 1  ;;  %v9756_v52 = vld [vmem:[#allocation2 + $0x80] sm:$0xff]   ;;  %v5933_v37 = vrot.slane %v5931_v29, 1 }
 0x115   : > { %8735 = vmatprep.mubr.bf16.mxu1 %v2409_v28  ;;  %v5862_v28 = vsel %vm1555_vm3, %v5857_v23, %v5861_v50  ;;  %v5919_v23 = vshrl.u32 %v9754_v7, 16  ;;  %v5923_v50 = vshll.u32 %v9756_v52, 16 }
 0x116   : > { %9008 = vmatmul.mubr.bf16.gmra.mrb[40].mxu0 %v9715_v31  ;;  %v9743_v31 = vld [vmem:[#allocation2 + $0xb0] sm:$0xff]   ;;  %v2425_v38 = vsel %vm2382_vm4, %v2422_v24, %v2424_v53 }
 0x117   : > { %9011 = vmatprep.mubr.bf16.mxu0 %v9719_v32  ;;  %v5869_v32 = vrot.slane %v5867_v26, 1  ;;  %v2426_v41 = vrot.slane %v9743_v31, 1  ;;  %v5927_v31 = vshrl.u32 %v9756_v52, 16 }
 0x119   : > { %v5873_v39 = vor.u32 %v5871_v27, %v5869_v32  ;;  %v5870_v61 = vsel %vm1555_vm3, %v5865_v34, %v5869_v32  ;;  %v2427_v58 = vsel %vm2382_vm4, %v2424_v53, %v2426_v41  ;;  %v2429_v59 = vsel %vm2382_vm4, %v2426_v41, %v2428_v42  ;;  %v9833_v34 = vld [vmem:[%s10821_s3 + $0x108] sm:$0xff]   ;;  %v9766_v41 = vld [vmem:[#allocation2 + $0xa0] sm:$0xff]  }
 0x11a   : > { %v5925_v27 = vrot.slane %v5923_v50, 1  ;;  %v5959_v4 = vshrl.u32 %v9766_v41, 16  ;;  %v9839_v50 = vld [vmem:[%s10821_s3 + $0x138] sm:$0xff]  }
 0x11b   : > { %v5878_v47 = vsel %vm1555_vm3, %v5873_v39, %v5877_v40 }
 0x11c   : > { %8736 = vmatmul.mubr.bf16.gmra.mrb[24].mxu1 %v2411_v36  ;;  %v9757_v36 = vld [vmem:[%s10821_s3 + $0x220] sm:$0xff]   ;;  %v5929_v39 = vor.u32 %v5927_v31, %v5925_v27 }
 0x11d   : > { %8739 = vmatprep.mubr.bf16.mxu1 %v2413_v51  ;;  %v5883_v51 = vshll.u32 %v9744_v55, 16  ;;  %v5935_v55 = vshrl.u32 %v9759_v25, 16  ;;  %v9777_v25 = vld [vmem:[#allocation2 + $0xc8] sm:$0xff]  }
 0x11e   : > { %9012 = vmatmul.mubr.bf16.gmra.mrb[44].mxu0 %v9721_v21  ;;  %v5879_v21 = vshrl.u32 %v9741_v54, 16  ;;  %v5911_v54 = vshrl.u32 %v9752_v62, 16  ;;  %v5995_v29 = vshll.u32 %v9777_v25, 16 }
 0x11f   : > { %9031 = vmatprep.mubr.bf16.mxu0 %v5830_v56  ;;  %v5885_v56 = vrot.slane %v5883_v51, 1 }
 0x120   : > { %v5881_v60 = vor.u32 %v5879_v21, %v5877_v40  ;;  %v9760_v40 = vld [vmem:[#allocation2 + $0x2c] sm:$0xff]  }
 0x121   : > { %v9834_v21 = vld [vmem:[%s10821_s3 + $0x110] sm:$0xff]  }
 0x122   : > { %v5886_v5 = vsel %vm1555_vm3, %v5881_v60, %v5885_v56  ;;  %v9765_v60 = vld [vmem:[#allocation2 + $0x3c] sm:$0xff]  }
 0x124   : > { %8740 = vmatmul.mubr.bf16.gmra.mrb[28].mxu1 %v2415_v44  ;;  %v5889_v44 = vor.u32 %v5887_v43, %v5885_v56  ;;  %v9768_v56 = vld [vmem:[#allocation2 + $0xa8] sm:$0xff]  }
 0x125   : > { %8743 = vmatprep.mubr.bf16.mxu1 %v2417_v0  ;;  %v9771_v0 = vld [vmem:[%s10821_s3 + $0x230] sm:$0xff]   ;;  %v5967_v3 = vshrl.u32 %v9768_v56, 16 }
 0x126   : > { %9032 = vmatmul.mubr.bf16.vlgmr.msra.gmra.mrb[0].mxu0 %v5838_v22  ;;  %v5894_v22 = vsel %vm1555_vm3, %v5889_v44, %v5893_v63  ;;  %v9770_v44 = vld [vmem:[#allocation2 + $0xb0] sm:$0xff]   ;;  %v9836_v63 = vld [vmem:[%s10821_s3 + $0x120] sm:$0xff]  }
 0x127   : > { %9080 = vmatpush3.bf16.msra.mxu0 %v10424_v33  ;;  %9035 = vmatprep.mubr.bf16.mxu0 %v5846_v14  ;;  %v5854_v33 = vsel %vm1555_vm3, %v5849_v15, %v5853_v13  ;;  %v2431_v14 = vsel %vm2382_vm4, %v2428_v42, %v2430_v1  ;;  %v5909_v13 = vrot.slane %v5907_v6, 1  ;;  %v5902_v15 = vsel %vm1555_vm3, %v5897_v11, %v5901_v10  ;;  %v9837_v6 = vld [vmem:[%s10821_s3 + $0x128] sm:$0xff]  }
 0x128   : > { %9081 = vmatprep.subr.bf16.mxu0 %v9734_v57 }
 0x129   : > { %v5913_v26 = vor.u32 %v5911_v54, %v5909_v13 }
 0x12b   : > { %9082 = vmatpush3.bf16.msra.mxu0 %v9734_v57  ;;  %v9778_v57 = vld [vmem:[%s10821_s3 + $0x238] sm:$0xff]  }
 0x12c   : > { %8744 = vmatmul.mubr.bf16.gmra.mrb[32].mxu1 %v2419_v8  ;;  %9083 = vmatprep.subr.bf16.mxu0 %v9742_v20  ;;  %v5915_v8 = vshll.u32 %v9754_v7, 16  ;;  %v9773_v7 = vld [vmem:[#allocation2 + $0xb8] sm:$0xff]  }
 0x12d   : > { %8747 = vmatprep.mubr.bf16.mxu1 %v2421_v17  ;;  %v5910_v17 = vsel %vm1555_vm3, %v5905_v12, %v5909_v13  ;;  %v9775_v12 = vld [vmem:[#allocation2 + $0xc0] sm:$0xff]   ;;  %v9838_v13 = vld [vmem:[%s10821_s3 + $0x130] sm:$0xff]   ;;  %v5979_v52 = vshll.u32 %v9773_v7, 16 }
 0x12e   : > { %9036 = vmatmul.mubr.bf16.gmra.mrb[4].mxu0 %v5854_v33  ;;  %v5917_v24 = vrot.slane %v5915_v8, 1  ;;  %v9755_v33 = vld [vmem:[#allocation2 + $0x1c] sm:$0xff]   ;;  %v5991_v31 = vshrl.u32 %v9775_v12, 16 }
 0x12f   : > { %9039 = vmatprep.mubr.bf16.mxu0 %v5862_v28  ;;  %9084 = vmatpush3.bf16.msra.mxu0 %v9742_v20  ;;  %v9753_v20 = vld [vmem:[#allocation2 + $0x14] sm:$0xff]  }
 0x130   : > { %9085 = vmatprep.subr.bf16.mxu0 %v9750_v30  ;;  %v5921_v53 = vor.u32 %v5919_v23, %v5917_v24  ;;  %v9761_v28 = vld [vmem:[#allocation2 + $0x90] sm:$0xff]   ;;  %v5987_v23 = vshll.u32 %v9775_v12, 16 }
 0x131   : > { %v5943_v42 = vshrl.u32 %v9761_v28, 16 }
 0x132   : > { %v5926_v32 = vsel %vm1555_vm3, %v5921_v53, %v5925_v27  ;;  %v5989_v27 = vrot.slane %v5987_v23, 1  ;;  %v9804_v23 = vld [vmem:[#allocation2 + $0x74] sm:$0xff]  }
 0x133   : > { %9086 = vmatpush3.bf16.msra.mxu0 %v9750_v30  ;;  %v5918_v30 = vsel %vm1555_vm3, %v5913_v26, %v5917_v24  ;;  %v5981_v24 = vrot.slane %v5979_v52, 1 }
 0x134   : > { %8748 = vmatmul.mubr.bf16.gmra.mrb[36].mxu1 %v2423_v18  ;;  %9087 = vmatprep.subr.bf16.mxu0 %v9757_v36  ;;  %v5939_v18 = vshll.u32 %v9761_v28, 16  ;;  %v9780_v28 = vld [vmem:[#allocation2 + $0xd0] sm:$0xff]  }
 0x135   : > { %8751 = vmatprep.mubr.bf16.mxu1 %v2425_v38  ;;  %v9763_v38 = vld [vmem:[#allocation2 + $0x98] sm:$0xff]  }
 0x136   : > { %9040 = vmatmul.mubr.bf16.gmra.mrb[8].mxu0 %v5870_v61  ;;  %v5947_v51 = vshll.u32 %v9763_v38, 16  ;;  %v5934_v61 = vsel %vm1555_vm3, %v5929_v39, %v5933_v37  ;;  %v5951_v45 = vshrl.u32 %v9763_v38, 16  ;;  %v9779_v38 = vld [vmem:[#allocation2 + $0x6c] sm:$0xff]   ;;  %v9782_v39 = vld [vmem:[#allocation2 + $0xd8] ss:$0 sps:$4 sm:$0x11]  }
 0x137   : > { %9043 = vmatprep.mubr.bf16.mxu0 %v5878_v47  ;;  %9088 = vmatpush3.bf16.msra.mxu0 %v9757_v36  ;;  %v5937_v36 = vor.u32 %v5935_v55, %v5933_v37  ;;  %v5955_v47 = vshll.u32 %v9766_v41, 16  ;;  %v5999_v55 = vshrl.u32 %v9777_v25, 16  ;;  %v5993_v37 = vor.u32 %v5991_v31, %v5989_v27 }
 0x138   : > { %9089 = vmatprep.subr.bf16.mxu0 %v9764_v49  ;;  %v5949_v16 = vrot.slane %v5947_v51, 1  ;;  %v6007_v41 = vshrl.u32 %v9780_v28, 16 }
 0x13a   : > { %v5953_v62 = vor.u32 %v5951_v45, %v5949_v16 }
 0x13b   : > { %9090 = vmatpush3.bf16.msra.mxu0 %v9764_v49  ;;  %v9762_v49 = vld [vmem:[#allocation2 + $0x34] sm:$0xff]  }
 0x13c   : > { %8752 = vmatmul.mubr.bf16.gmra.mrb[40].mxu1 %v2427_v58  ;;  %9091 = vmatprep.subr.bf16.mxu0 %v9771_v0 }
 0x13d   : > { %8755 = vmatprep.mubr.bf16.mxu1 %v2429_v59  ;;  %v5957_v59 = vrot.slane %v5955_v47, 1 }
 0x13e   : > { %9044 = vmatmul.mubr.bf16.gmra.mrb[12].mxu0 %v5886_v5  ;;  %v5971_v5 = vshll.u32 %v9770_v44, 16 }
 0x13f   : > { %9047 = vmatprep.mubr.bf16.mxu0 %v5894_v22  ;;  %9092 = vmatpush3.bf16.msra.mxu0 %v9771_v0  ;;  %v5963_v0 = vshll.u32 %v9768_v56, 16  ;;  %v5958_v2 = vsel %vm1555_vm3, %v5953_v62, %v5957_v59  ;;  %v5961_v10 = vor.u32 %v5959_v4, %v5957_v59  ;;  %v9789_v62 = vld [vmem:[#allocation2 + $0x30] sm:$0xff]   ;;  %v9786_v59 = vld [vmem:[#allocation2 + $0x84] sm:$0xff]   ;;  %v9791_v4 = vld [vmem:[#allocation2 + $0x38] sm:$0xff]  }
 0x140   : > { %9093 = vmatprep.subr.bf16.mxu0 %v9778_v57 }
 0x141   : > { %v5965_v22 = vrot.slane %v5963_v0, 1  ;;  %v6650_v0 = vrot.slane %v9789_v62, 1 }
 0x143   : > { %9094 = vmatpush3.bf16.msra.mxu0 %v9778_v57  ;;  %v9767_v57 = vld [vmem:[#allocation2 + $0x44] sm:$0xff]   ;;  %v5969_v11 = vor.u32 %v5967_v3, %v5965_v22  ;;  %v5966_v8 = vsel %vm1555_vm3, %v5961_v10, %v5965_v22 }
 0x144   : > { %8756 = vmatmul.mubr.bf16.gmra.mrb[44].mxu1 %v2431_v14  ;;  %v9769_v14 = vld [vmem:[#allocation2 + $0x4c] sm:$0xff]   ;;  %v9793_v3 = vld [vmem:[#allocation2 + $0x40] sm:$0xff]  }
 0x145   : > { %8775 = vmatprep.mubr.bf16.mxu1 %v9751_v9  ;;  %v5973_v9 = vrot.slane %v5971_v5, 1  ;;  %v9790_v5 = vld [vmem:[#allocation2 + $0x94] sm:$0xff]   ;;  %v6654_v22 = vrot.slane %v9793_v3, 1  ;;  %v9795_v10 = vld [vmem:[#allocation2 + $0x48] sm:$0xff]  }
 0x146   : > { %9048 = vmatmul.mubr.bf16.gmra.mrb[16].mxu0 %v5902_v15  ;;  %v5975_v15 = vshrl.u32 %v9770_v44, 16  ;;  %v6656_v12 = vrot.slane %v9795_v10, 1 }
 0x147   : > { %9051 = vmatprep.mubr.bf16.mxu0 %v5910_v17  ;;  %v5974_v54 = vsel %vm1555_vm3, %v5969_v11, %v5973_v9  ;;  %v5983_v17 = vshrl.u32 %v9773_v7, 16  ;;  %v9797_v11 = vld [vmem:[#allocation2 + $0x50] sm:$0xff]  }
 0x148   : > { %v5977_v26 = vor.u32 %v5975_v15, %v5973_v9  ;;  %v9794_v9 = vld [vmem:[#allocation2 + $0xa4] sm:$0xff]   ;;  %v6658_v52 = vrot.slane %v9797_v11, 1  ;;  %v9799_v15 = vld [vmem:[#allocation2 + $0x58] sm:$0xff]  }
 0x149   : > { %v5985_v53 = vor.u32 %v5983_v17, %v5981_v24  ;;  %v9801_v17 = vld [vmem:[#allocation2 + $0x60] sm:$0xff]  }
 0x14a   : > { %v6662_v25 = vrot.slane %v9801_v17, 1 }
 0x14c   : > { %8776 = vmatmul.mubr.bf16.vlgmr.msra.gmra.mrb[0].mxu1 %v9753_v20  ;;  %v9772_v20 = vld [vmem:[#allocation2 + $0x54] sm:$0xff]  }
 0x14d   : > { %8779 = vmatprep.mubr.bf16.mxu1 %v9755_v33  ;;  %9151 = vmatpush3.bf16.msra.mxu1 %v10462_v19  ;;  %v5941_v19 = vrot.slane %v5939_v18, 1  ;;  %v9774_v33 = vld [vmem:[#allocation2 + $0x5c] sm:$0xff]   ;;  %v6003_v18 = vshll.u32 %v9780_v28, 16 }
 0x14e   : > { %9144 = vmatprep.subr.bf16.mxu1 %v9833_v34  ;;  %9052 = vmatmul.mubr.bf16.gmra.mrb[20].mxu0 %v5918_v30  ;;  %v5982_v30 = vsel %vm1555_vm3, %v5977_v26, %v5981_v24  ;;  %v9800_v24 = vld [vmem:[#allocation2 + $0xbc] sm:$0xff]   ;;  %v9840_v26 = vld [vmem:[#allocation2 + $0x6c] sm:$0xff]  }
 0x14f   : > { %9055 = vmatprep.mubr.bf16.mxu0 %v5926_v32  ;;  %v5942_v43 = vsel %vm1555_vm3, %v5937_v36, %v5941_v19  ;;  %v5945_v58 = vor.u32 %v5943_v42, %v5941_v19  ;;  %v5990_v32 = vsel %vm1555_vm3, %v5985_v53, %v5989_v27  ;;  %v6005_v36 = vrot.slane %v6003_v18, 1  ;;  %v9785_v42 = vld [vmem:[#allocation2 + $0x20] sm:$0xff]  }
 0x150   : > { %v3792_v53 = vshll.u32 %v9804_v23, 16  ;;  %v9806_v27 = vld [vmem:[#allocation2 + $0x7c] sm:$0xff]   ;;  %v9808_v18 = vld [vmem:[#allocation2 + $0x84] sm:$0xff]  }
 0x151   : > { %9152 = vmatpush3.bf16.msra.mxu1 %v9833_v34  ;;  %v5950_v1 = vsel %vm1555_vm3, %v5945_v58, %v5949_v16  ;;  %v9776_v34 = vld [vmem:[#allocation2 + $0x64] sm:$0xff]   ;;  %v6009_v45 = vor.u32 %v6007_v41, %v6005_v36  ;;  %v6646_v16 = vrot.slane %v9785_v42, 1 }
 0x152   : > { %9145 = vmatprep.subr.bf16.mxu1 %v9834_v21  ;;  %v9787_v58 = vld [vmem:[#allocation2 + $0x28] sm:$0xff]  }
 0x153   : > { %v6648_v44 = vrot.slane %v9787_v58, 1  ;;  %v3812_v58 = vshrl.u32 %v9808_v18, 16 }
 0x154   : > { %8780 = vmatmul.mubr.bf16.gmra.mrb[4].mxu1 %v9758_v35  ;;  %v5997_v35 = vrot.slane %v5995_v29, 1  ;;  %v9803_v29 = vld [vmem:[#allocation2 + $0x68] sm:$0xff]  }
 0x155   : > { %8783 = vmatprep.mubr.bf16.mxu1 %v9760_v40  ;;  %9153 = vmatpush3.bf16.msra.mxu1 %v9834_v21  ;;  %v6011_v21 = vshll.u32 %v9782_v39, 16 }
 0x156   : > { %9146 = vmatprep.subr.bf16.mxu1 %v9835_v48  ;;  %9056 = vmatmul.mubr.bf16.gmra.mrb[24].mxu0 %v5934_v61  ;;  %v6001_v40 = vor.u32 %v5999_v55, %v5997_v35  ;;  %v5998_v19 = vsel %vm1555_vm3, %v5993_v37, %v5997_v35  ;;  %v9784_v61 = vld [vmem:[#allocation2 + $0x18] sm:$0xfe]   ;;  %v9805_v55 = vld [vmem:[#allocation2 + $0x70] sm:$0xff]   ;;  %v3800_v35 = vshll.u32 %v9806_v27, 16  ;;  %v6664_v37 = vrot.slane %v9803_v29, 1 }
 0x157   : > { %9059 = vmatprep.mubr.bf16.mxu0 %v5942_v43  ;;  %v9781_v43 = vld [vmem:[#allocation2 + $0x74] sm:$0xff]   ;;  %v6013_v47 = vrot.slane %v6011_v21, 1  ;;  %v9810_v21 = vld [vmem:[#allocation2 + $0x8c] sm:$0xff]  }
 0x158   : > { %v6006_v51 = vsel %vm1555_vm3, %v6001_v40, %v6005_v36  ;;  %v6666_v40 = vrot.slane %v9805_v55, 1  ;;  %v3804_v36 = vshrl.u32 %v9806_v27, 16  ;;  %v3802_v41 = vrot.slane %v3800_v35, 1 }
 0x159   : > { %9154 = vmatpush3.bf16.msra.mxu1 %v9835_v48  ;;  %v9783_v48 = vld [vmem:[#allocation2 + $0x7c] sm:$0xff]   ;;  %v6014_v56 = vsel %vm1555_vm3, %v6009_v45, %v6013_v47 }
 0x15a   : > { %9147 = vmatprep.subr.bf16.mxu1 %v9836_v63  ;;  %v6667_v42 = vsel %vm2382_vm4, %v6664_v37, %v6666_v40  ;;  %v9809_v47 = vld [vmem:[#allocation2 + $0x80] sm:$0xff]  }
 0x15b   : > { %v6670_v62 = vrot.slane %v9809_v47, 1 }
 0x15c   : > { %8784 = vmatmul.mubr.bf16.gmra.mrb[8].mxu1 %v9762_v49  ;;  %v6645_v49 = vrot.slane %v9784_v61, 1  ;;  %v9807_v61 = vld [vmem:[#allocation2 + $0x78] sm:$0xff]  }
 0x15d   : > { %8787 = vmatprep.mubr.bf16.mxu1 %v9765_v60  ;;  %9155 = vmatpush3.bf16.msra.mxu1 %v9836_v63  ;;  %v9788_v63 = vld [vmem:[#allocation2 + $0x8c] sm:$0xff]  }
 0x15e   : > { %9148 = vmatprep.subr.bf16.mxu1 %v9837_v6  ;;  %9060 = vmatmul.mubr.bf16.gmra.mrb[28].mxu0 %v5950_v1  ;;  %v6647_v60 = vsel %vm2382_vm4, %v6645_v49, %v6646_v16  ;;  %v6649_v1 = vsel %vm2382_vm4, %v6646_v16, %v6648_v44  ;;  %v3816_v49 = vshll.u32 %v9810_v21, 16 }
 0x15f   : > { %9063 = vmatprep.mubr.bf16.mxu0 %v5958_v2  ;;  %v6651_v2 = vsel %vm2382_vm4, %v6648_v44, %v6650_v0 }
 0x161   : > { %9156 = vmatpush3.bf16.msra.mxu1 %v9837_v6  ;;  %v6652_v6 = vrot.slane %v9791_v4, 1 }
 0x162   : > { %9149 = vmatprep.subr.bf16.mxu1 %v9838_v13 }
 0x163   : > { %v6653_v7 = vsel %vm2382_vm4, %v6650_v0, %v6652_v6  ;;  %v9814_v0 = vld [vmem:[#allocation2 + $0x9c] sm:$0xff]  }
 0x164   : > { %8788 = vmatmul.mubr.bf16.gmra.mrb[12].mxu1 %v9767_v57  ;;  %v9792_v57 = vld [vmem:[#allocation2 + $0x9c] sm:$0xff]  }
 0x165   : > { %8791 = vmatprep.mubr.bf16.mxu1 %v9769_v14  ;;  %9157 = vmatpush3.bf16.msra.mxu1 %v9838_v13  ;;  %v6655_v14 = vsel %vm2382_vm4, %v6652_v6, %v6654_v22  ;;  %v9796_v13 = vld [vmem:[#allocation2 + $0xac] sm:$0xff]  }
 0x166   : > { %9150 = vmatprep.subr.bf16.mxu1 %v9839_v50  ;;  %9064 = vmatmul.mubr.bf16.gmra.mrb[32].mxu0 %v5966_v8  ;;  %v6657_v8 = vsel %vm2382_vm4, %v6654_v22, %v6656_v12  ;;  %v9816_v22 = vld [vmem:[#allocation2 + $0xa4] sm:$0xff]  }
 0x167   : > { %9067 = vmatprep.mubr.bf16.mxu0 %v5974_v54  ;;  %v6659_v54 = vsel %vm2382_vm4, %v6656_v12, %v6658_v52 }
 0x169   : > { %9158 = vmatpush3.bf16.msra.mxu1 %v9839_v50  ;;  %v9798_v50 = vld [vmem:[#allocation2 + $0xb4] sm:$0xff]  }
 0x16c   : > { %8792 = vmatmul.mubr.bf16.gmra.mrb[16].mxu1 %v9772_v20  ;;  %v6660_v20 = vrot.slane %v9799_v15, 1  ;;  %v9818_v15 = vld [vmem:[#allocation2 + $0xac] sm:$0xff]  }
 0x16d   : > { %8795 = vmatprep.mubr.bf16.mxu1 %v9774_v33  ;;  %v3788_v33 = vshrl.u32 %v9840_v26, 16  ;;  %v9820_v26 = vld [vmem:[#allocation2 + $0xb4] sm:$0xff]  }
 0x16e   : > { %9068 = vmatmul.mubr.bf16.gmra.mrb[36].mxu0 %v5982_v30  ;;  %v6661_v28 = vsel %vm2382_vm4, %v6658_v52, %v6660_v20  ;;  %v6663_v30 = vsel %vm2382_vm4, %v6660_v20, %v6662_v25  ;;  %v3840_v52 = vshll.u32 %v9816_v22, 16 }
 0x16f   : > { %9071 = vmatprep.mubr.bf16.mxu0 %v5990_v32  ;;  %v3790_v31 = vor.u32 %v3788_v33, %v10203_v46  ;;  %v3794_v32 = vrot.slane %v3792_v53, 1  ;;  %v3848_v33 = vshll.u32 %v9818_v15, 16 }
 0x171   : > { %v3795_v39 = vsel %vm1555_vm3, %v3790_v31, %v3794_v32  ;;  %v3852_v31 = vshrl.u32 %v9818_v15, 16  ;;  %v3850_v55 = vrot.slane %v3848_v33, 1 }
 0x174   : > { %8796 = vmatmul.mubr.bf16.gmra.mrb[20].mxu1 %v9776_v34  ;;  %v9802_v34 = vld [vmem:[#allocation2 + $0xc4] sm:$0xff]  }
 0x175   : > { %8799 = vmatprep.mubr.bf16.mxu1 %v9779_v38  ;;  %v3796_v38 = vshrl.u32 %v9804_v23, 16  ;;  %v9815_v23 = vld [vmem:[#allocation2 + $0x98] sm:$0xff]  }
 0x176   : > { %9072 = vmatmul.mubr.bf16.gmra.mrb[40].mxu0 %v5998_v19  ;;  %v3808_v19 = vshll.u32 %v9808_v18, 16  ;;  %v6676_v27 = vrot.slane %v9815_v23, 1  ;;  %v9822_v18 = vld [vmem:[#allocation2 + $0xbc] sm:$0xff]  }
 0x177   : > { %9075 = vmatprep.mubr.bf16.mxu0 %v6006_v51  ;;  %v6665_v51 = vsel %vm2382_vm4, %v6662_v25, %v6664_v37  ;;  %v3798_v46 = vor.u32 %v3796_v38, %v3794_v32  ;;  %v9817_v25 = vld [vmem:[#allocation2 + $0xa0] sm:$0xff]   ;;  %v3856_v32 = vshll.u32 %v9820_v26, 16  ;;  %v9819_v37 = vld [vmem:[#allocation2 + $0xa8] sm:$0xff]  }
 0x178   : > { %v3810_v45 = vrot.slane %v3808_v19, 1  ;;  %v9824_v19 = vld [vmem:[#allocation2 + $0xc4] sm:$0xff]  }
 0x179   : > { %v3803_v16 = vsel %vm1555_vm3, %v3798_v46, %v3802_v41  ;;  %v3860_v46 = vshrl.u32 %v9820_v26, 16 }
 0x17a   : > { %v3814_v4 = vor.u32 %v3812_v58, %v3810_v45 }
 0x17c   : > { %8800 = vmatmul.mubr.bf16.gmra.mrb[24].mxu1 %v9781_v43  ;;  %v3806_v43 = vor.u32 %v3804_v36, %v3802_v41  ;;  %v9821_v36 = vld [vmem:[#allocation2 + $0xb0] sm:$0xff]   ;;  %v3864_v41 = vshll.u32 %v9822_v18, 16 }
 0x17d   : > { %8803 = vmatprep.mubr.bf16.mxu1 %v9783_v48  ;;  %v9812_v48 = vld [vmem:[#allocation2 + $0x94] sm:$0xff]  }
 0x17e   : > { %9076 = vmatmul.mubr.bf16.gmra.mrb[44].mxu0 %v6014_v56  ;;  %v6668_v56 = vrot.slane %v9807_v61, 1  ;;  %v3824_v44 = vshll.u32 %v9812_v48, 16  ;;  %v3828_v11 = vshrl.u32 %v9812_v48, 16  ;;  %v3866_v47 = vrot.slane %v3864_v41, 1 }
 0x17f   : > { %9095 = vmatprep.mubr.bf16.mxu0 %v6647_v60  ;;  %v3811_v60 = vsel %vm1555_vm3, %v3806_v43, %v3810_v45  ;;  %v3868_v43 = vshrl.u32 %v9822_v18, 16  ;;  %v3872_v45 = vshll.u32 %v9824_v19, 16 }
 0x180   : > { %v6671_v3 = vsel %vm2382_vm4, %v6668_v56, %v6670_v62  ;;  %v3826_v6 = vrot.slane %v3824_v44, 1 }
 0x182   : > { %v3830_v17 = vor.u32 %v3828_v11, %v3826_v6 }
 0x184   : > { %8804 = vmatmul.mubr.bf16.gmra.mrb[28].mxu1 %v9786_v59  ;;  %v3820_v59 = vshrl.u32 %v9810_v21, 16 }
 0x185   : > { %8807 = vmatprep.mubr.bf16.mxu1 %v9788_v63  ;;  %v3818_v63 = vrot.slane %v3816_v49, 1 }
 0x186   : > { %9096 = vmatmul.mubr.bf16.vlgmr.msra.gmra.mrb[0].mxu0 %v6649_v1  ;;  %v6669_v1 = vsel %vm2382_vm4, %v6666_v40, %v6668_v56  ;;  %v3858_v40 = vrot.slane %v3856_v32, 1  ;;  %v9826_v56 = vld [vmem:[#allocation2 + $0xcc] ss:$0 sps:$4 sm:$0x11]  }
 0x187   : > { %9099 = vmatprep.mubr.bf16.mxu0 %v6651_v2  ;;  %v9811_v2 = vld [vmem:[#allocation2 + $0x88] sm:$0xff]   ;;  %v3819_v10 = vsel %vm1555_vm3, %v3814_v4, %v3818_v63 }
 0x188   : > { %v3862_v49 = vor.u32 %v3860_v46, %v3858_v40 }
 0x18a   : > { %v3867_v44 = vsel %vm1555_vm3, %v3862_v49, %v3866_v47 }
 0x18c   : > { %8808 = vmatmul.mubr.bf16.gmra.mrb[32].mxu1 %v9790_v5  ;;  %v3822_v5 = vor.u32 %v3820_v59, %v3818_v63  ;;  %v9825_v59 = vld [vmem:[#allocation2 + $0xc0] sm:$0xff]  }
 0x18d   : > { %8811 = vmatprep.mubr.bf16.mxu1 %v9792_v57  ;;  %v9813_v57 = vld [vmem:[#allocation2 + $0x90] sm:$0xff]  }
 0x18e   : > { %9100 = vmatmul.mubr.bf16.gmra.mrb[4].mxu0 %v6653_v7  ;;  %v3832_v7 = vshll.u32 %v9814_v0, 16  ;;  %v6674_v12 = vrot.slane %v9813_v57, 1  ;;  %v9827_v57 = vld [vmem:[#allocation2 + $0xc8] sm:$0xff]  }
 0x18f   : > { %9103 = vmatprep.mubr.bf16.mxu0 %v6655_v14  ;;  %v6672_v14 = vrot.slane %v9811_v2, 1  ;;  %v6686_v2 = vrot.slane %v9825_v59, 1 }
 0x194   : > { %8812 = vmatmul.mubr.bf16.gmra.mrb[36].mxu1 %v9794_v9  ;;  %v3827_v9 = vsel %vm1555_vm3, %v3822_v5, %v3826_v6 }
 0x195   : > { %8815 = vmatprep.mubr.bf16.mxu1 %v9796_v13  ;;  %v3836_v13 = vshrl.u32 %v9814_v0, 16  ;;  %v3876_v0 = vshrl.u32 %v9824_v19, 16 }
 0x196   : > { %9104 = vmatmul.mubr.bf16.gmra.mrb[8].mxu0 %v6657_v8  ;;  %v3834_v8 = vrot.slane %v3832_v7, 1  ;;  %v9828_v7 = vld [vmem:[#allocation2 + $0xd0] sm:$0xff]  }
 0x197   : > { %9107 = vmatprep.mubr.bf16.mxu0 %v6659_v54  ;;  %v6673_v54 = vsel %vm2382_vm4, %v6670_v62, %v6672_v14  ;;  %v3874_v62 = vrot.slane %v3872_v45, 1  ;;  %v6690_v11 = vrot.slane %v9828_v7, 1 }
 0x198   : > { %v3838_v20 = vor.u32 %v3836_v13, %v3834_v8  ;;  %v3835_v53 = vsel %vm1555_vm3, %v3830_v17, %v3834_v8 }
 0x199   : > { %v3878_v5 = vor.u32 %v3876_v0, %v3874_v62 }
 0x19c   : > { %8816 = vmatmul.mubr.bf16.gmra.mrb[40].mxu1 %v9798_v50  ;;  %v6675_v50 = vsel %vm2382_vm4, %v6672_v14, %v6674_v12  ;;  %v6688_v14 = vrot.slane %v9827_v57, 1 }
 0x19d   : > { %8819 = vmatprep.mubr.bf16.mxu1 %v9800_v24  ;;  %v3842_v24 = vrot.slane %v3840_v52, 1 }
 0x19e   : > { %9108 = vmatmul.mubr.bf16.gmra.mrb[12].mxu0 %v6661_v28  ;;  %v3844_v28 = vshrl.u32 %v9816_v22, 16  ;;  %v6691_v13 = vsel %vm2382_vm4, %v6688_v14, %v6690_v11 }
 0x19f   : > { %9111 = vmatprep.mubr.bf16.mxu0 %v6663_v30  ;;  %v3843_v29 = vsel %vm1555_vm3, %v3838_v20, %v3842_v24  ;;  %v6678_v30 = vrot.slane %v9817_v25, 1 }
 0x1a0   : > { %v3846_v35 = vor.u32 %v3844_v28, %v3842_v24 }
 0x1a1   : > { %v6679_v38 = vsel %vm2382_vm4, %v6676_v27, %v6678_v30 }
 0x1a2   : > { %v3851_v21 = vsel %vm1555_vm3, %v3846_v35, %v3850_v55 }
 0x1a4   : > { %8820 = vmatmul.mubr.bf16.gmra.mrb[44].mxu1 %v9802_v34  ;;  %v6677_v34 = vsel %vm2382_vm4, %v6674_v12, %v6676_v27  ;;  %v9829_v12 = vld [vmem:[#allocation2 + $0xd8] ss:$0 sps:$4 sm:$0x11]  }
 0x1a5   : > { %8863 = vmatprep.mubr.bf16.mxu1 %v3795_v39  ;;  %v3854_v39 = vor.u32 %v3852_v31, %v3850_v55  ;;  %v6692_v52 = vrot.slane %v9829_v12, 1 }
 0x1a6   : > { %9112 = vmatmul.mubr.bf16.gmra.mrb[16].mxu0 %v6665_v51  ;;  %v6680_v51 = vrot.slane %v9819_v37, 1 }
 0x1a7   : > { %9115 = vmatprep.mubr.bf16.mxu0 %v6667_v42  ;;  %v3859_v61 = vsel %vm1555_vm3, %v3854_v39, %v3858_v40  ;;  %v6682_v42 = vrot.slane %v9821_v36, 1  ;;  %v6693_v8 = vsel %vm2382_vm4, %v6690_v11, %v6692_v52 }
 0x1a8   : > { %v6681_v48 = vsel %vm2382_vm4, %v6678_v30, %v6680_v51 }
 0x1a9   : > { %v6683_v58 = vsel %vm2382_vm4, %v6680_v51, %v6682_v42 }
 0x1ac   : > { %8864 = vmatmul.mubr.bf16.vlgmr.msra.gmra.mrb[24].mxu1 %v3803_v16  ;;  %v9823_v16 = vld [vmem:[#allocation2 + $0xb8] sm:$0xff]  }
 0x1ad   : > { %8867 = vmatprep.mubr.bf16.mxu1 %v3811_v60  ;;  %v3870_v60 = vor.u32 %v3868_v43, %v3866_v47  ;;  %v6684_v63 = vrot.slane %v9823_v16, 1 }
 0x1ae   : > { %9116 = vmatmul.mubr.bf16.gmra.mrb[20].mxu0 %v6669_v1  ;;  %v3880_v1 = vshll.u32 %v9826_v56, 16 }
 0x1af   : > { %9119 = vmatprep.mubr.bf16.mxu0 %v6671_v3  ;;  %v3875_v4 = vsel %vm1555_vm3, %v3870_v60, %v3874_v62  ;;  %v6685_v3 = vsel %vm2382_vm4, %v6682_v42, %v6684_v63  ;;  %v6687_v22 = vsel %vm2382_vm4, %v6684_v63, %v6686_v2 }
 0x1b0   : > { %v3882_v6 = vrot.slane %v3880_v1, 1 }
 0x1b4   : > { %8868 = vmatmul.mubr.bf16.gmra.mrb[28].mxu1 %v3819_v10  ;;  %v3883_v10 = vsel %vm1555_vm3, %v3878_v5, %v3882_v6 }
 0x1b5   : > { %8871 = vmatprep.mubr.bf16.mxu1 %v3827_v9  ;;  %v6689_v9 = vsel %vm2382_vm4, %v6686_v2, %v6688_v14 }
 0x1b6   : > { %9120 = vmatmul.mubr.bf16.gmra.mrb[24].mxu0 %v6673_v54 }
 0x1b7   : > { %9123 = vmatprep.mubr.bf16.mxu0 %v6675_v50 }
 0x1bc   : > { %8872 = vmatmul.mubr.bf16.gmra.mrb[32].mxu1 %v3835_v53 }
 0x1bd   : > { %8875 = vmatprep.mubr.bf16.mxu1 %v3843_v29 }
 0x1be   : > { %9124 = vmatmul.mubr.bf16.gmra.mrb[28].mxu0 %v6677_v34 }
 0x1bf   : > { %9127 = vmatprep.mubr.bf16.mxu0 %v6679_v38 }
 0x1c4   : > { %8876 = vmatmul.mubr.bf16.gmra.mrb[36].mxu1 %v3851_v21 }
 0x1c5   : > { %8879 = vmatprep.mubr.bf16.mxu1 %v3859_v61 }
 0x1c6   : > { %9128 = vmatmul.mubr.bf16.gmra.mrb[32].mxu0 %v6681_v48 }
 0x1c7   : > { %9131 = vmatprep.mubr.bf16.mxu0 %v6683_v58 }
 0x1cc   : > { %8880 = vmatmul.mubr.bf16.gmra.mrb[40].mxu1 %v3867_v44 }
 0x1cd   : > { %8883 = vmatprep.mubr.bf16.mxu1 %v3875_v4 }
 0x1ce   : > { %9132 = vmatmul.mubr.bf16.gmra.mrb[36].mxu0 %v6685_v3 }
 0x1cf   : > { %9135 = vmatprep.mubr.bf16.mxu0 %v6687_v22 }
 0x1d4   : > { %8884 = vmatmul.mubr.bf16.gmra.mrb[44].mxu1 %v3883_v10 }
 0x1d6   : > { %9136 = vmatmul.mubr.bf16.gmra.mrb[40].mxu0 %v6689_v9 }
 0x1d7   : > { %9139 = vmatprep.mubr.bf16.mxu0 %v6691_v13 }
 0x1de   : > { %9140 = vmatmul.mubr.bf16.gmra.mrb[44].mxu0 %v6693_v8 }
 0x21f   : > { %v8777_v15 = vpop.f32.mrb[0].mxu1 }
 0x220   : > { %v3164_v54 = vpop.f32.mrb[1].mxu1 }
 0x221   : > { %v8778_v17 = vpop.f32.mrb[2].mxu1 }
 0x222   : > { %v3167_v23 = vpop.f32.mrb[3].mxu1 }
 0x227   : > { %v8781_v50 = vpop.f32.mrb[4].mxu1 }
 0x228   : > { %v3180_v20 = vpop.f32.mrb[5].mxu1 }
 0x229   : > { %v8782_v24 = vpop.f32.mrb[6].mxu1 }
 0x22a   : > { %v3183_v25 = vpop.f32.mrb[7].mxu1 }
 0x22f   : > { %v8785_v26 = vpop.f32.mrb[8].mxu1 }
 0x230   : > { %v3196_v33 = vpop.f32.mrb[9].mxu1 }
 0x231   : > { %v8786_v53 = vpop.f32.mrb[10].mxu1 }
 0x232   : > { %v3199_v27 = vpop.f32.mrb[11].mxu1 }
 0x237   : > { %v8789_v28 = vpop.f32.mrb[12].mxu1 }
 0x238   : > { %v3212_v29 = vpop.f32.mrb[13].mxu1 }
 0x239   : > { %v8790_v30 = vpop.f32.mrb[14].mxu1 }
 0x23a   : > { %v3215_v31 = vpop.f32.mrb[15].mxu1 }
 0x23f   : > { %v8793_v32 = vpop.f32.mrb[16].mxu1 }
 0x240   : > { %v3228_v55 = vpop.f32.mrb[17].mxu1 }
 0x241   : > { %v8794_v18 = vpop.f32.mrb[18].mxu1 }
 0x242   : > { %v3231_v34 = vpop.f32.mrb[19].mxu1 }
 0x247   : > { %v10583_v35 = vpop.f32.mrb[20].mxu1 }
 0x248   : > { %v3244_v37 = vpop.f32.mrb[21].mxu1 }
 0x249   : > { %v8798_v38 = vpop.f32.mrb[22].mxu1 }
 0x24a   : > { %v10585_v39 = vpop.f32.mrb[23].mxu1 }
 0x259   : > { %v9097_v40 = vpop.f32.mrb[0].mxu0 }
 0x25a   : > { %v6800_v36 = vpop.f32.mrb[1].mxu0 }
 0x25b   : > { %v10587_v19 = vadd.f32 %v6800_v36, %v3164_v54  ;;  %v9098_v41 = vpop.f32.mrb[2].mxu0 }
 0x25c   : > { %v10589_v21 = vadd.f32 %v9098_v41, %v8778_v17  ;;  %v6803_v51 = vpop.f32.mrb[3].mxu0 }
 0x25d   : > { %v10591_v46 = vadd.f32 %v6803_v51, %v3167_v23 }
 0x25f   : > { %v8172_v61 = vpack.c.bf16 %v10591_v46, %v10587_v19  ;;  %v7327_v42 = vadd.f32 %v10591_v46, %v10587_v19 }
 0x261   : > { %8173 = vst [vmem:[%s10598_s17] sm:$0xff] %v8172_v61   ;;  %v9101_v43 = vpop.f32.mrb[4].mxu0  ;;  %v7328_v49 = vadd.f32 %v10589_v21, %v7327_v42 }
 0x262   : > { %v10605_v45 = vadd.f32 %v9101_v43, %v8781_v50  ;;  %v6816_v47 = vpop.f32.mrb[5].mxu0 }
 0x263   : > { %v10607_v48 = vadd.f32 %v6816_v47, %v3180_v20  ;;  %v9102_v16 = vpop.f32.mrb[6].mxu0 }
 0x264   : > { %v10610_v56 = vadd.f32 %v9102_v16, %v8782_v24  ;;  %v6819_v58 = vpop.f32.mrb[7].mxu0 }
 0x265   : > { %v8177_v60 = vpack.c.bf16 %v10607_v48, %v10589_v21  ;;  %v7329_v62 = vadd.f32 %v10607_v48, %v7328_v49 }
 0x266   : > { %v8182_v59 = vpack.c.bf16 %v10610_v56, %v10605_v45 }
 0x267   : > { %8264 = vst [vmem:[%s10598_s17 + $0x8] sm:$0xff] %v8177_v60   ;;  %v7330_v44 = vadd.f32 %v10605_v45, %v7329_v62 }
 0x268   : > { %8265 = vst [vmem:[%s10598_s17 + $0x10] sm:$0xff] %v8182_v59  }
 0x269   : > { %v9105_v63 = vpop.f32.mrb[8].mxu0  ;;  %v7331_v3 = vadd.f32 %v10610_v56, %v7330_v44 }
 0x26a   : > { %v10620_v0 = vadd.f32 %v9105_v63, %v8785_v26  ;;  %v6832_v1 = vpop.f32.mrb[9].mxu0 }
 0x26b   : > { %v9106_v4 = vpop.f32.mrb[10].mxu0 }
 0x26c   : > { %v6835_v2 = vpop.f32.mrb[11].mxu0 }
 0x26d   : > { %v10623_v5 = vadd.f32 %v6835_v2, %v3199_v27 }
 0x26f   : > { %v8187_v6 = vpack.c.bf16 %v10620_v0, %v10623_v5  ;;  %v7332_v57 = vadd.f32 %v10623_v5, %v7331_v3 }
 0x271   : > { %8266 = vst [vmem:[%s10598_s17 + $0x18] sm:$0xff] %v8187_v6   ;;  %v9109_v22 = vpop.f32.mrb[12].mxu0  ;;  %v7333_v14 = vadd.f32 %v10620_v0, %v7332_v57 }
 0x272   : > { %v6848_v7 = vpop.f32.mrb[13].mxu0 }
 0x273   : > { %v10629_v10 = vadd.f32 %v6848_v7, %v3212_v29  ;;  %v9110_v11 = vpop.f32.mrb[14].mxu0 }
 0x274   : > { %v10632_v9 = vadd.f32 %v9110_v11, %v8790_v30  ;;  %v6851_v12 = vpop.f32.mrb[15].mxu0 }
 0x275   : > { %v7334_v13 = vadd.f32 %v10629_v10, %v7333_v14  ;;  %v10635_v52 = vadd.f32 %v6851_v12, %v3215_v31 }
 0x277   : > { %v8192_v8 = vpack.c.bf16 %v10635_v52, %v10629_v10  ;;  %v7335_v15 = vadd.f32 %v10635_v52, %v7334_v13 }
 0x279   : > { %8267 = vst [vmem:[%s10598_s17 + $0x20] sm:$0xff] %v8192_v8   ;;  %v9113_v54 = vpop.f32.mrb[16].mxu0  ;;  %v7336_v20 = vadd.f32 %v10632_v9, %v7335_v15 }
 0x27a   : > { %v10641_v17 = vadd.f32 %v9113_v54, %v8793_v32  ;;  %v6864_v23 = vpop.f32.mrb[17].mxu0 }
 0x27b   : > { %v10643_v50 = vadd.f32 %v6864_v23, %v3228_v55  ;;  %v9114_v24 = vpop.f32.mrb[18].mxu0 }
 0x27c   : > { %v10646_v25 = vadd.f32 %v9114_v24, %v8794_v18  ;;  %v6867_v26 = vpop.f32.mrb[19].mxu0 }
 0x27d   : > { %v8197_v33 = vpack.c.bf16 %v10643_v50, %v10632_v9  ;;  %v7337_v53 = vadd.f32 %v10643_v50, %v7336_v20 }
 0x27e   : > { %v8202_v28 = vpack.c.bf16 %v10646_v25, %v10641_v17 }
 0x27f   : > { %v8865_v27 = vpop.f32.mrb[24].mxu1  ;;  %8268 = vst [vmem:[%s10598_s17 + $0x28] sm:$0xff] %v8197_v33   ;;  %v7338_v32 = vadd.f32 %v10641_v17, %v7337_v53 }
 0x280   : > { %v4086_v29 = vpop.f32.mrb[25].mxu1  ;;  %8269 = vst [vmem:[%s10598_s17 + $0x30] sm:$0xff] %v8202_v28  }
 0x281   : > { %v8866_v30 = vpop.f32.mrb[26].mxu1  ;;  %v9117_v55 = vpop.f32.mrb[20].mxu0  ;;  %v7339_v40 = vadd.f32 %v10646_v25, %v7338_v32 }
 0x282   : > { %v4089_v31 = vpop.f32.mrb[27].mxu1  ;;  %v10657_v18 = vadd.f32 %v9117_v55, %v10583_v35  ;;  %v6880_v34 = vpop.f32.mrb[21].mxu0 }
 0x283   : > { %v9118_v37 = vpop.f32.mrb[22].mxu0 }
 0x284   : > { %v6883_v38 = vpop.f32.mrb[23].mxu0 }
 0x285   : > { %v10661_v36 = vadd.f32 %v6883_v38, %v10585_v39 }
 0x287   : > { %v8869_v41 = vpop.f32.mrb[28].mxu1  ;;  %v8207_v61 = vpack.c.bf16 %v10657_v18, %v10661_v36  ;;  %v7340_v42 = vadd.f32 %v10661_v36, %v7339_v40 }
 0x288   : > { %v4102_v51 = vpop.f32.mrb[29].mxu1 }
 0x289   : > { %v8870_v43 = vpop.f32.mrb[30].mxu1  ;;  %8270 = vst [vmem:[%s10598_s17 + $0x38] sm:$0xff] %v8207_v61   ;;  %v9121_v35 = vpop.f32.mrb[24].mxu0  ;;  %v7341_v58 = vadd.f32 %v10657_v18, %v7340_v42 }
 0x28a   : > { %v4105_v47 = vpop.f32.mrb[31].mxu1  ;;  %v6896_v49 = vpop.f32.mrb[25].mxu0 }
 0x28b   : > { %v10667_v16 = vadd.f32 %v6896_v49, %v4086_v29  ;;  %v9122_v60 = vpop.f32.mrb[26].mxu0 }
 0x28c   : > { %v10670_v39 = vadd.f32 %v9122_v60, %v8866_v30  ;;  %v6899_v62 = vpop.f32.mrb[27].mxu0 }
 0x28d   : > { %v7342_v59 = vadd.f32 %v10667_v16, %v7341_v58  ;;  %v10673_v44 = vadd.f32 %v6899_v62, %v4089_v31 }
 0x28f   : > { %v8873_v63 = vpop.f32.mrb[32].mxu1  ;;  %v8212_v4 = vpack.c.bf16 %v10673_v44, %v10667_v16  ;;  %v7343_v2 = vadd.f32 %v10673_v44, %v7342_v59 }
 0x290   : > { %v4118_v1 = vpop.f32.mrb[33].mxu1 }
 0x291   : > { %v8874_v3 = vpop.f32.mrb[34].mxu1  ;;  %8271 = vst [vmem:[%s10598_s17 + $0x40] sm:$0xff] %v8212_v4   ;;  %v9125_v57 = vpop.f32.mrb[28].mxu0  ;;  %v7344_v22 = vadd.f32 %v10670_v39, %v7343_v2 }
 0x292   : > { %v4121_v6 = vpop.f32.mrb[35].mxu1  ;;  %v10680_v7 = vadd.f32 %v9125_v57, %v8869_v41  ;;  %v6912_v14 = vpop.f32.mrb[29].mxu0 }
 0x293   : > { %v10682_v11 = vadd.f32 %v6912_v14, %v4102_v51  ;;  %v9126_v12 = vpop.f32.mrb[30].mxu0 }
 0x294   : > { %v10684_v13 = vadd.f32 %v9126_v12, %v8870_v43  ;;  %v6915_v8 = vpop.f32.mrb[31].mxu0 }
 0x295   : > { %v8217_v15 = vpack.c.bf16 %v10682_v11, %v10670_v39  ;;  %v7345_v54 = vadd.f32 %v10682_v11, %v7344_v22 }
 0x296   : > { %v8222_v20 = vpack.c.bf16 %v10684_v13, %v10680_v7 }
 0x297   : > { %v8877_v23 = vpop.f32.mrb[36].mxu1  ;;  %8272 = vst [vmem:[%s10598_s17 + $0x48] sm:$0xff] %v8217_v15   ;;  %v7346_v26 = vadd.f32 %v10680_v7, %v7345_v54 }
 0x298   : > { %v4134_v24 = vpop.f32.mrb[37].mxu1  ;;  %8273 = vst [vmem:[%s10598_s17 + $0x50] sm:$0xff] %v8222_v20  }
 0x299   : > { %v8878_v33 = vpop.f32.mrb[38].mxu1  ;;  %v7347_v27 = vadd.f32 %v10684_v13, %v7346_v26  ;;  %v9129_v28 = vpop.f32.mrb[32].mxu0 }
 0x29a   : > { %v4137_v53 = vpop.f32.mrb[39].mxu1  ;;  %v10695_v29 = vadd.f32 %v9129_v28, %v8873_v63  ;;  %v6928_v30 = vpop.f32.mrb[33].mxu0 }
 0x29b   : > { %v9130_v31 = vpop.f32.mrb[34].mxu0 }
 0x29c   : > { %v6931_v32 = vpop.f32.mrb[35].mxu0 }
 0x29d   : > { %v10697_v55 = vadd.f32 %v6931_v32, %v4121_v6 }
 0x29f   : > { %v8881_v34 = vpop.f32.mrb[40].mxu1  ;;  %v8227_v38 = vpack.c.bf16 %v10695_v29, %v10697_v55  ;;  %v7348_v40 = vadd.f32 %v10697_v55, %v7347_v27 }
 0x2a0   : > { %v4150_v37 = vpop.f32.mrb[41].mxu1 }
 0x2a1   : > { %v8882_v41 = vpop.f32.mrb[42].mxu1  ;;  %8274 = vst [vmem:[%s10598_s17 + $0x58] sm:$0xff] %v8227_v38   ;;  %v9133_v61 = vpop.f32.mrb[36].mxu0  ;;  %v7349_v42 = vadd.f32 %v10695_v29, %v7348_v40 }
 0x2a2   : > { %v4153_v51 = vpop.f32.mrb[43].mxu1  ;;  %v6944_v43 = vpop.f32.mrb[37].mxu0 }
 0x2a3   : > { %v10704_v47 = vadd.f32 %v6944_v43, %v4134_v24  ;;  %v9134_v35 = vpop.f32.mrb[38].mxu0 }
 0x2a4   : > { %v10706_v49 = vadd.f32 %v9134_v35, %v8878_v33  ;;  %v6947_v58 = vpop.f32.mrb[39].mxu0 }
 0x2a5   : > { %v7350_v60 = vadd.f32 %v10704_v47, %v7349_v42  ;;  %v10709_v62 = vadd.f32 %v6947_v58, %v4137_v53 }
 0x2a7   : > { %v8885_v59 = vpop.f32.mrb[44].mxu1  ;;  %v8232_v1 = vpack.c.bf16 %v10709_v62, %v10704_v47  ;;  %v7351_v4 = vadd.f32 %v10709_v62, %v7350_v60 }
 0x2a8   : > { %v4166_v63 = vpop.f32.mrb[45].mxu1 }
 0x2a9   : > { %v8886_v2 = vpop.f32.mrb[46].mxu1  ;;  %8275 = vst [vmem:[%s10598_s17 + $0x60] sm:$0xff] %v8232_v1   ;;  %v9137_v6 = vpop.f32.mrb[40].mxu0  ;;  %v7352_v57 = vadd.f32 %v10706_v49, %v7351_v4 }
 0x2aa   : > { %v4169_v3 = vpop.f32.mrb[47].mxu1  ;;  %v10716_v22 = vadd.f32 %v9137_v6, %v8881_v34  ;;  %v6960_v14 = vpop.f32.mrb[41].mxu0 }
 0x2ab   : > { %v10718_v12 = vadd.f32 %v6960_v14, %v4150_v37  ;;  %v9138_v8 = vpop.f32.mrb[42].mxu0 }
 0x2ac   : > { %v10720_v15 = vadd.f32 %v9138_v8, %v8882_v41  ;;  %v6963_v54 = vpop.f32.mrb[43].mxu0 }
 0x2ad   : > { %v8237_v23 = vpack.c.bf16 %v10718_v12, %v10706_v49  ;;  %v7353_v20 = vadd.f32 %v10718_v12, %v7352_v57 }
 0x2ae   : > { %v8242_v24 = vpack.c.bf16 %v10720_v15, %v10716_v22 }
 0x2af   : > { %8276 = vst [vmem:[%s10598_s17 + $0x68] sm:$0xff] %v8237_v23   ;;  %v7354_v26 = vadd.f32 %v10716_v22, %v7353_v20 }
 0x2b0   : > { %8277 = vst [vmem:[%s10598_s17 + $0x70] sm:$0xff] %v8242_v24  }
 0x2b1   : > { %v7355_v33 = vadd.f32 %v10720_v15, %v7354_v26  ;;  %v9141_v53 = vpop.f32.mrb[44].mxu0 }
 0x2b2   : > { %v10731_v27 = vadd.f32 %v9141_v53, %v8885_v59  ;;  %v6976_v28 = vpop.f32.mrb[45].mxu0 }
 0x2b3   : > { %v9142_v30 = vpop.f32.mrb[46].mxu0 }
 0x2b4   : > { %v6979_v31 = vpop.f32.mrb[47].mxu0 }
 0x2b5   : > { %v10733_v32 = vadd.f32 %v6979_v31, %v4169_v3 }
 0x2b7   : > { %v8247_v34 = vpack.c.bf16 %v10731_v27, %v10733_v32  ;;  %v7356_v37 = vadd.f32 %v10733_v32, %v7355_v33 }
 0x2b9   : > { %8278 = vst [vmem:[%s10598_s17 + $0x78] sm:$0xff] %v8247_v34   ;;  %v7357_v38 = vadd.f32 %v10731_v27, %v7356_v37 }
 0x2bb   : > { %v7358_v40 = vrot.slane %v7357_v38, 4 }
 0x2bd   : > { %v7359_v41 = vadd.f32 %v7358_v40, %v7357_v38 }
 0x2bf   : > { %v7360_v51 = vrot.slane %v7359_v41, 2 }
 0x2c1   : > { %v7361_v61 = vadd.f32 %v7360_v51, %v7359_v41 }
 0x2c3   : > { %v7362_v42 = vrot.slane %v7361_v61, 1 }
 0x2c5   : > { %v10740_v43 = vadd.f32 %v7362_v42, %v7361_v61 }
 0x2c7   : > { %v10743_v35 = vmul.f32 0.00390625, %v10740_v43 }
 0x2c9   : > { %v7365_v58 = vsub.f32 %v10587_v19, %v10743_v35  ;;  %v7366_v60 = vsub.f32 %v10591_v46, %v10743_v35  ;;  %v7367_v59 = vsub.f32 %v10589_v21, %v10743_v35  ;;  %v7368_v4 = vsub.f32 %v10607_v48, %v10743_v35 }
 0x2ca   : > { %v7369_v2 = vsub.f32 %v10605_v45, %v10743_v35  ;;  %v7370_v57 = vsub.f32 %v10610_v56, %v10743_v35  ;;  %v7371_v46 = vsub.f32 %v10623_v5, %v10743_v35  ;;  %v7372_v54 = vsub.f32 %v10620_v0, %v10743_v35 }
 0x2cb   : > { %v7397_v63 = vmul.f32 %v7365_v58, %v7365_v58  ;;  %v7398_v1 = vmul.f32 %v7366_v60, %v7366_v60  ;;  %v7399_v3 = vmul.f32 %v7367_v59, %v7367_v59  ;;  %v7400_v19 = vmul.f32 %v7368_v4, %v7368_v4 }
 0x2cc   : > { %v7401_v8 = vmul.f32 %v7369_v2, %v7369_v2  ;;  %v7402_v23 = vmul.f32 %v7370_v57, %v7370_v57  ;;  %v7373_v45 = vsub.f32 %v10629_v10, %v10743_v35  ;;  %v7403_v20 = vmul.f32 %v7371_v46, %v7371_v46 }
 0x2cd   : > { %v7429_v6 = vadd.f32 %v7398_v1, %v7397_v63  ;;  %v7374_v56 = vsub.f32 %v10635_v52, %v10743_v35  ;;  %v7404_v26 = vmul.f32 %v7372_v54, %v7372_v54  ;;  %v7375_v5 = vsub.f32 %v10632_v9, %v10743_v35 }
 0x2ce   : > { %v7405_v53 = vmul.f32 %v7373_v45, %v7373_v45  ;;  %v7376_v0 = vsub.f32 %v10643_v50, %v10743_v35  ;;  %v7377_v10 = vsub.f32 %v10641_v17, %v10743_v35  ;;  %v7378_v52 = vsub.f32 %v10646_v25, %v10743_v35 }
 0x2cf   : > { %v7430_v14 = vadd.f32 %v7429_v6, %v7399_v3  ;;  %v7406_v30 = vmul.f32 %v7374_v56, %v7374_v56  ;;  %v7407_v34 = vmul.f32 %v7375_v5, %v7375_v5  ;;  %v7379_v9 = vsub.f32 %v10661_v36, %v10743_v35 }
 0x2d0   : > { %v7408_v38 = vmul.f32 %v7376_v0, %v7376_v0  ;;  %v7409_v41 = vmul.f32 %v7377_v10, %v7377_v10  ;;  %v7380_v50 = vsub.f32 %v10657_v18, %v10743_v35  ;;  %v7410_v61 = vmul.f32 %v7378_v52, %v7378_v52 }
 0x2d1   : > { %v7431_v21 = vadd.f32 %v7430_v14, %v7400_v19  ;;  %v7381_v17 = vsub.f32 %v10667_v16, %v10743_v35  ;;  %v7411_v58 = vmul.f32 %v7379_v9, %v7379_v9  ;;  %v7382_v25 = vsub.f32 %v10673_v44, %v10743_v35 }
 0x2d2   : > { %v7412_v59 = vmul.f32 %v7380_v50, %v7380_v50  ;;  %v7383_v36 = vsub.f32 %v10670_v39, %v10743_v35  ;;  %v7384_v18 = vsub.f32 %v10682_v11, %v10743_v35  ;;  %v7385_v16 = vsub.f32 %v10680_v7, %v10743_v35 }
 0x2d3   : > { %v7432_v48 = vadd.f32 %v7431_v21, %v7401_v8  ;;  %v7413_v1 = vmul.f32 %v7381_v17, %v7381_v17  ;;  %v7414_v2 = vmul.f32 %v7382_v25, %v7382_v25  ;;  %v7386_v44 = vsub.f32 %v10684_v13, %v10743_v35 }
 0x2d4   : > { %v7415_v6 = vmul.f32 %v7383_v36, %v7383_v36  ;;  %v7416_v19 = vmul.f32 %v7384_v18, %v7384_v18  ;;  %v7387_v39 = vsub.f32 %v10697_v55, %v10743_v35  ;;  %v7417_v46 = vmul.f32 %v7385_v16, %v7385_v16 }
 0x2d5   : > { %v7433_v24 = vadd.f32 %v7432_v48, %v7402_v23  ;;  %v7388_v11 = vsub.f32 %v10695_v29, %v10743_v35  ;;  %v7418_v21 = vmul.f32 %v7386_v44, %v7386_v44  ;;  %v7389_v7 = vsub.f32 %v10704_v47, %v10743_v35 }
 0x2d6   : > { %v7419_v23 = vmul.f32 %v7387_v39, %v7387_v39  ;;  %v7390_v13 = vsub.f32 %v10709_v62, %v10743_v35  ;;  %v7391_v55 = vsub.f32 %v10706_v49, %v10743_v35  ;;  %v7392_v29 = vsub.f32 %v10718_v12, %v10743_v35 }
 0x2d7   : > { %v7434_v33 = vadd.f32 %v7433_v24, %v7403_v20  ;;  %v7420_v45 = vmul.f32 %v7388_v11, %v7388_v11  ;;  %v7421_v24 = vmul.f32 %v7389_v7, %v7389_v7  ;;  %v7393_v47 = vsub.f32 %v10716_v22, %v10743_v35 }
 0x2d8   : > { %v7423_v5 = vmul.f32 %v7391_v55, %v7391_v55  ;;  %v7394_v62 = vsub.f32 %v10720_v15, %v10743_v35  ;;  %v7395_v49 = vsub.f32 %v10733_v32, %v10743_v35  ;;  %v7396_v12 = vsub.f32 %v10731_v27, %v10743_v35 }
 0x2d9   : > { %v7435_v28 = vadd.f32 %v7434_v33, %v7404_v26  ;;  %v7422_v26 = vmul.f32 %v7390_v13, %v7390_v13 }
 0x2da   : > { %v7426_v10 = vmul.f32 %v7394_v62, %v7394_v62  ;;  %v7428_v52 = vmul.f32 %v7396_v12, %v7396_v12 }
 0x2db   : > { %v7436_v31 = vadd.f32 %v7435_v28, %v7405_v53  ;;  %v7424_v28 = vmul.f32 %v7392_v29, %v7392_v29 }
 0x2dd   : > { %v7437_v37 = vadd.f32 %v7436_v31, %v7406_v30  ;;  %v7425_v30 = vmul.f32 %v7393_v47, %v7393_v47 }
 0x2df   : > { %v7438_v40 = vadd.f32 %v7437_v37, %v7407_v34  ;;  %v7427_v37 = vmul.f32 %v7395_v49, %v7395_v49 }
 0x2e1   : > { %v7439_v51 = vadd.f32 %v7438_v40, %v7408_v38 }
 0x2e3   : > { %v7440_v42 = vadd.f32 %v7439_v51, %v7409_v41 }
 0x2e5   : > { %v7441_v60 = vadd.f32 %v7440_v42, %v7410_v61 }
 0x2e7   : > { %v7442_v63 = vadd.f32 %v7441_v60, %v7411_v58 }
 0x2e9   : > { %v7443_v4 = vadd.f32 %v7442_v63, %v7412_v59 }
 0x2eb   : > { %v7444_v3 = vadd.f32 %v7443_v4, %v7413_v1 }
 0x2ed   : > { %v7445_v57 = vadd.f32 %v7444_v3, %v7414_v2 }
 0x2ef   : > { %v7446_v14 = vadd.f32 %v7445_v57, %v7415_v6 }
 0x2f1   : > { %v7447_v8 = vadd.f32 %v7446_v14, %v7416_v19 }
 0x2f3   : > { %v7448_v54 = vadd.f32 %v7447_v8, %v7417_v46 }
 0x2f5   : > { %v7449_v48 = vadd.f32 %v7448_v54, %v7418_v21 }
 0x2f7   : > { %v7450_v20 = vadd.f32 %v7449_v48, %v7419_v23 }
 0x2f9   : > { %v7451_v56 = vadd.f32 %v7450_v20, %v7420_v45 }
 0x2fb   : > { %v7452_v33 = vadd.f32 %v7451_v56, %v7421_v24 }
 0x2fd   : > { %v7453_v53 = vadd.f32 %v7452_v33, %v7422_v26 }
 0x2ff   : > { %v7454_v0 = vadd.f32 %v7453_v53, %v7423_v5 }
 0x301   : > { %v7455_v31 = vadd.f32 %v7454_v0, %v7424_v28 }
 0x303   : > { %v7456_v34 = vadd.f32 %v7455_v31, %v7425_v30 }
 0x305   : > { %v7457_v22 = vadd.f32 %v7456_v34, %v7426_v10 }
 0x307   : > { %v7458_v38 = vadd.f32 %v7457_v22, %v7427_v37 }
 0x309   : > { %v7459_v40 = vadd.f32 %v7458_v38, %v7428_v52 }
 0x30b   : > { %v7460_v9 = vrot.slane %v7459_v40, 4 }
 0x30d   : > { %v7461_v15 = vadd.f32 %v7460_v9, %v7459_v40 }
 0x30f   : > { %v7462_v41 = vrot.slane %v7461_v15, 2 }
 0x311   : > { %v7463_v51 = vadd.f32 %v7462_v41, %v7461_v15 }
 0x313   : > { %v7464_v50 = vrot.slane %v7463_v51, 1 }
 0x315   : > { %v7465_v32 = vadd.f32 %v7464_v50, %v7463_v51 }
 0x317   : > { %v7467_v27 = vsel %vm578_vm0, %v10740_v43, %v7465_v32 }
 0x318   : > { %7468 = vst [vmem:[%s235_s23] sm:$0x3] %v7467_v27 }
 0x319 PF: > { %s16_s18 = sadd.s32 1, %s9847_s18  }
 0x31a   : > { %p13_p4 = scmp.ge.s32.totalorder %s16_s18, 6  }
 0x31c   :  { %15 = sbr.rel (!%p13_p4) target bundleno = 1 (0x1), region = 86 }

</bundles_post_ra>
